<compile_context>
chip_gen: v7x
topology: tpu7x:2x2x1
jax: 0.10.0
libtpu: 0.0.40
codegen_flags: <defaults>
</compile_context>

<pallas_src>
import functools

import jax
import jax.numpy as jnp
from jax.experimental import pallas as pl
from jax.experimental.pallas import tpu as pltpu


# ----------------------------- small helpers ------------------------------ #
def _cdiv(a, b):
    return (a + b - 1) // b


def _round_up(x, m):
    return _cdiv(x, m) * m


def _conv_out(h, k, s, p):
    return (h + 2 * p - k) // s + 1


# ------------------ fused matmul (+ BN shift + LeakyReLU) ------------------ #
def _conv_mm_kernel(x_ref, w_ref, s_ref, o_ref):
    # bf16 operands feed the MXU; accumulate + epilogue in f32; store bf16.
    y = jnp.dot(x_ref[...], w_ref[...], preferred_element_type=jnp.float32)
    y = y + s_ref[...]
    y = jnp.where(y >= 0.0, y, 0.01 * y)            # nn.LeakyReLU default slope
    o_ref[...] = y.astype(o_ref.dtype)


def fused_matmul_bn_lrelu(x, w, shift):
    """LeakyReLU(x @ w + shift).  x:(M,K) bf16, w:(K,N) bf16 (BN scale folded),
    shift:(1,N) f32.  Returns (M,N) bf16."""
    M, K = x.shape
    Kw, N = w.shape
    assert K == Kw and N % 128 == 0
    # Adaptive row tile: smallest 16-aligned tile covering M with cdiv(M,128)
    # blocks (removes the old pad-to-128 MXU waste for small M).
    gm = _cdiv(M, 128)
    tm = _round_up(_cdiv(M, gm), 16)
    Mp = tm * gm
    if Mp != M:
        x = jnp.pad(x, ((0, Mp - M), (0, 0)))
    tn = 128                                        # 128-wide N tile (v5e MXU friendly)

    out = pl.pallas_call(
        _conv_mm_kernel,
        out_shape=jax.ShapeDtypeStruct((Mp, N), jnp.bfloat16),
        grid=(gm, N // tn),
        in_specs=[
            pl.BlockSpec((tm, K), lambda i, j: (i, 0)),
            pl.BlockSpec((K, tn), lambda i, j: (0, j)),
            pl.BlockSpec((1, tn), lambda i, j: (0, j)),
        ],
        out_specs=pl.BlockSpec((tm, tn), lambda i, j: (i, j)),
        compiler_params=pltpu.CompilerParams(
            dimension_semantics=("parallel", "parallel")),
    )(x, w, shift)
    return out[:M] if Mp != M else out


# ------------------------------ 2x2 max pool ------------------------------- #
def _pool_kernel(a_ref, b_ref, o_ref, *, w2, c):
    m = jnp.maximum(a_ref[0, 0], b_ref[0, 0])       # (W, C): max over the H pair
    m = m[: 2 * w2].reshape(w2, 2, c)               # pair up W columns (floor mode)
    o_ref[0, 0] = jnp.max(m, axis=1)


def maxpool2x2(x):
    # nn.MaxPool2d(kernel_size=2): stride 2, floor mode.  x: (N, H, W, C) NHWC.
    N, H, W, C = x.shape
    H2, W2 = H // 2, W // 2
    kernel = functools.partial(_pool_kernel, w2=W2, c=C)
    return pl.pallas_call(
        kernel,
        out_shape=jax.ShapeDtypeStruct((N, H2, W2, C), x.dtype),
        grid=(N, H2),
        in_specs=[
            pl.BlockSpec((1, 1, W, C), lambda n, i: (n, 2 * i, 0, 0)),
            pl.BlockSpec((1, 1, W, C), lambda n, i: (n, 2 * i + 1, 0, 0)),
        ],
        out_specs=pl.BlockSpec((1, 1, W2, C), lambda n, i: (n, i, 0, 0)),
        compiler_params=pltpu.CompilerParams(
            dimension_semantics=("parallel", "parallel")),
    )(x, x)


# ----------------------------- conv via im2col ----------------------------- #
def im2col(x, k, stride, pad):
    # x: (N, H, W, C) bf16 -> patches (N*oh*ow, k*k*C); feature order (kh, kw, C).
    xp = jnp.pad(x, ((0, 0), (pad, pad), (pad, pad), (0, 0)))
    N, Hp, Wp, C = xp.shape
    oh = (Hp - k) // stride + 1
    ow = (Wp - k) // stride + 1
    cols = []
    for i in range(k):
        for j in range(k):
            cols.append(xp[:, i:i + (oh - 1) * stride + 1:stride,
                           j:j + (ow - 1) * stride + 1:stride, :])
    p = jnp.stack(cols, axis=3)                     # (N, oh, ow, k*k, C)
    return p.reshape(N * oh * ow, k * k * C), oh, ow


def conv_block(x, w_packed, shift, k, stride, pad):
    # w_packed: (round_up(k*k*Cin,128), Cout) bf16 with BN scale pre-folded.
    N = x.shape[0]
    patches, oh, ow = im2col(x, k, stride, pad)
    K = patches.shape[1]
    Kp = w_packed.shape[0]
    if Kp != K:                                     # only conv1 (K=25 -> 128)
        patches = jnp.pad(patches, ((0, 0), (0, Kp - K)))
    y = fused_matmul_bn_lrelu(patches, w_packed, shift)
    return y.reshape(N, oh, ow, w_packed.shape[1])


# -------------------------- fused 3-layer MLP head -------------------------- #
def _mlp_kernel(x_ref, w1_ref, s1_ref, w2_ref, s2_ref, w3_ref, s3_ref, o_ref):
    h = jnp.dot(x_ref[...], w1_ref[...], preferred_element_type=jnp.float32)
    h = h + s1_ref[...]
    h = jnp.where(h >= 0.0, h, 0.01 * h)            # linear1 + bn5 + LeakyReLU
    h = jnp.dot(h.astype(jnp.bfloat16), w2_ref[...],
                preferred_element_type=jnp.float32)
    h = h + s2_ref[...]
    h = jnp.where(h >= 0.0, h, 0.01 * h)            # linear2 + bn6 + LeakyReLU
    h = jnp.dot(h.astype(jnp.bfloat16), w3_ref[...],
                preferred_element_type=jnp.float32)
    h = h + s3_ref[...]
    o_ref[...] = 1.0 / (1.0 + jnp.exp(-h))          # linear3 + Sigmoid


def mlp_head(xf, p):
    M, K = xf.shape
    Mp = _round_up(M, 16)                           # real-batch tile, not 128
    xp = jnp.pad(xf, ((0, Mp - M), (0, 0)))
    nout = p["w3"].shape[1]
    out = pl.pallas_call(
        _mlp_kernel,
        out_shape=jax.ShapeDtypeStruct((Mp, nout), jnp.float32),
        grid=(1,),
        in_specs=[
            pl.BlockSpec((Mp, K), lambda i: (0, 0)),
            pl.BlockSpec(p["w1"].shape, lambda i: (0, 0)),
            pl.BlockSpec(p["s1"].shape, lambda i: (0, 0)),
            pl.BlockSpec(p["w2"].shape, lambda i: (0, 0)),
            pl.BlockSpec(p["s2"].shape, lambda i: (0, 0)),
            pl.BlockSpec(p["w3"].shape, lambda i: (0, 0)),
            pl.BlockSpec(p["s3"].shape, lambda i: (0, 0)),
        ],
        out_specs=pl.BlockSpec((Mp, nout), lambda i: (0, 0)),
    )(xp, p["w1"], p["s1"], p["w2"], p["s2"], p["w3"], p["s3"])
    return out[:M, :1]


# ----------------------------- model definition ---------------------------- #
C1, K1, S1, P1 = 128, 5, 3, 20
C2, K2, S2, P2 = 128, 5, 3, 15
C3, K3, S3, P3 = 128, 3, 2, 8
C4, K4, S4, P4 = 256, 3, 2, 3
L1, L2 = 512, 256
BN_EPS = 1e-5


def _linear_size(h, w):
    for (k, s, p) in ((K1, S1, P1), (K2, S2, P2), (K3, S3, P3), (K4, S4, P4)):
        h = _conv_out(h, k, s, p) // 2
        w = _conv_out(w, k, s, p) // 2
    return C4 * h * w, h, w


def _conv_param(key, cout, cin, k):
    kw_, kb = jax.random.split(key)
    fan_in = cin * k * k
    w = jax.random.normal(kw_, (cout, cin, k, k), jnp.float32) / jnp.sqrt(fan_in)
    b = 0.01 * jax.random.normal(kb, (cout,), jnp.float32)
    return w, b


def _linear_param(key, nout, nin):
    kw_, kb = jax.random.split(key)
    w = jax.random.normal(kw_, (nout, nin), jnp.float32) / jnp.sqrt(nin)
    b = 0.01 * jax.random.normal(kb, (nout,), jnp.float32)
    return w, b


def _bn_param(n):
    # PyTorch BatchNorm init: weight=1, bias=0, running_mean=0, running_var=1.
    return (jnp.ones((n,), jnp.float32), jnp.zeros((n,), jnp.float32),
            jnp.zeros((n,), jnp.float32), jnp.ones((n,), jnp.float32))


def init_params(key, in_h, in_w):
    keys = jax.random.split(key, 7)
    lin_size, _, _ = _linear_size(in_h, in_w)
    return {
        "conv1": _conv_param(keys[0], C1, 1, K1), "bn1": _bn_param(C1),
        "conv2": _conv_param(keys[1], C2, C1, K2), "bn2": _bn_param(C2),
        "conv3": _conv_param(keys[2], C3, C2, K3), "bn3": _bn_param(C3),
        "conv4": _conv_param(keys[3], C4, C3, K4), "bn4": _bn_param(C4),
        "linear1": _linear_param(keys[4], L1, lin_size), "bn5": _bn_param(L1),
        "linear2": _linear_param(keys[5], L2, L1), "bn6": _bn_param(L2),
        "linear3": _linear_param(keys[6], 1, L2),
    }


def _fold_bn(bn, bias, ):
    gamma, beta, mean, var = bn
    scale = gamma / jnp.sqrt(var + BN_EPS)
    shift = beta - mean * scale + bias * scale
    return scale, shift


def pack_params(params, in_h, in_w):
    """One-time repack into kernel-ready layouts (bf16, BN scale folded into
    weights, K padded to 128, linear1 columns permuted to NHWC flatten order)
    so the jitted forward issues no per-call weight relayouts."""
    packed = {}
    for idx, (ck, bk) in enumerate(
            (("conv1", "bn1"), ("conv2", "bn2"), ("conv3", "bn3"), ("conv4", "bn4"))):
        w, b = params[ck]
        cout, cin, kh, kw = w.shape
        scale, shift = _fold_bn(params[bk], b)
        wmat = jnp.transpose(w, (2, 3, 1, 0)).reshape(kh * kw * cin, cout)
        wmat = wmat * scale[None, :]                # fold BN scale into weights
        kdim = kh * kw * cin
        kpad = _round_up(kdim, 128)                 # lane-aligned contraction dim
        wmat = jnp.pad(wmat, ((0, kpad - kdim), (0, 0)))
        packed[f"c{idx + 1}_w"] = wmat.astype(jnp.bfloat16)
        packed[f"c{idx + 1}_s"] = shift.reshape(1, cout).astype(jnp.float32)

    lin_size, h4, w4 = _linear_size(in_h, in_w)
    # linear1: permute input columns from PyTorch NCHW-flatten order (c,h,w)
    # to this implementation's NHWC-flatten order (h,w,c).
    w1, b1 = params["linear1"]
    scale, shift = _fold_bn(params["bn5"], b1)
    perm = jnp.transpose(jnp.arange(lin_size).reshape(C4, h4, w4),
                         (1, 2, 0)).reshape(-1)
    packed["w1"] = ((w1 * scale[:, None])[:, perm].T).astype(jnp.bfloat16)
    packed["s1"] = shift.reshape(1, L1).astype(jnp.float32)

    w2, b2 = params["linear2"]
    scale, shift = _fold_bn(params["bn6"], b2)
    packed["w2"] = ((w2 * scale[:, None]).T).astype(jnp.bfloat16)
    packed["s2"] = shift.reshape(1, L2).astype(jnp.float32)

    w3, b3 = params["linear3"]
    nout_pad = 128                                  # pad output lanes 1 -> 128
    packed["w3"] = jnp.pad(w3.T, ((0, 0), (0, nout_pad - 1))).astype(jnp.bfloat16)
    packed["s3"] = jnp.pad(b3.reshape(1, 1),
                           ((0, 0), (0, nout_pad - 1))).astype(jnp.float32)
    return packed


@jax.jit
def forward(packed, x_nchw):
    # NCHW -> NHWC; activations kept in bf16, matmuls accumulate in f32.
    x = jnp.transpose(x_nchw, (0, 2, 3, 1)).astype(jnp.bfloat16)
    x = conv_block(x, packed["c1_w"], packed["c1_s"], K1, S1, P1)
    x = maxpool2x2(x)                               # dropout_conv: identity (eval)
    x = conv_block(x, packed["c2_w"], packed["c2_s"], K2, S2, P2)
    x = maxpool2x2(x)
    x = conv_block(x, packed["c3_w"], packed["c3_s"], K3, S3, P3)
    x = maxpool2x2(x)
    x = conv_block(x, packed["c4_w"], packed["c4_s"], K4, S4, P4)
    x = maxpool2x2(x)
    n, h, w, c = x.shape
    xf = x.reshape(n, h * w * c)                    # NHWC flatten (w1 pre-permuted)
    return mlp_head(xf, packed)                     # dropout_fc: identity (eval)


# --------------------------------- main ------------------------------------ #
if __name__ == "__main__":
    key = jax.random.PRNGKey(0)
    k_param, k_in = jax.random.split(key)

    # Small input consistent with the module: NCHW, single input channel.
    N, H, W = 2, 16, 16
    x = jax.random.normal(k_in, (N, 1, H, W), jnp.float32)

    params = init_params(k_param, H, W)
    packed = pack_params(params, H, W)

    out = forward(packed, x)
    out = jax.block_until_ready(out)

    assert out.shape == (N, 1), out.shape
    assert bool(jnp.all(jnp.isfinite(out)))
    assert bool(jnp.all((out >= 0.0) & (out <= 1.0)))
    print("KERNEL_OK")
</pallas_src>

<mosaic_0001>
module attributes {stable_mosaic.version = 11 : i64} {
  func.func @_conv_mm_kernel(%arg0: i32, %arg1: i32, %arg2: memref<112x128xbf16, #tpu.memory_space<vmem>>, %arg3: memref<128x128xbf16, #tpu.memory_space<vmem>>, %arg4: memref<1x128xf32, #tpu.memory_space<vmem>>, %arg5: memref<112x128xbf16, #tpu.memory_space<vmem>>) attributes {dimension_semantics = [#tpu.dimension_semantics<parallel>, #tpu.dimension_semantics<parallel>], iteration_bounds = array<i64: 6, 1>, scalar_prefetch = 0 : i64, scratch_operands = 0 : i64, tpu.core_type = #tpu.core_type<tc>, window_params = [{transform_indices = @transform_0, window_bounds = array<i64: 112, 128>}, {transform_indices = @transform_1, window_bounds = array<i64: 128, 128>}, {transform_indices = @transform_2, window_bounds = array<i64: 1, 128>}, {transform_indices = @transform_3, window_bounds = array<i64: 112, 128>}]} {
    %c0 = arith.constant 0 : index
    %c0_0 = arith.constant 0 : index
    %0 = vector.load %arg2[%c0, %c0_0] : memref<112x128xbf16, #tpu.memory_space<vmem>>, vector<112x128xbf16>
    %c0_1 = arith.constant 0 : index
    %c0_2 = arith.constant 0 : index
    %1 = vector.load %arg3[%c0_1, %c0_2] : memref<128x128xbf16, #tpu.memory_space<vmem>>, vector<128x128xbf16>
    %cst = arith.constant dense<0.000000e+00> : vector<112x128xf32>
    %2 = tpu.matmul %0, %1, %cst {dimension_numbers = #tpu.dot_dimension_numbers<[1], [0], [0], [1], [0, 0, 1, 1], [], []>} : vector<112x128xbf16>, vector<128x128xbf16>, vector<112x128xf32> -> vector<112x128xf32>
    %c0_3 = arith.constant 0 : index
    %c0_4 = arith.constant 0 : index
    %3 = vector.load %arg4[%c0_3, %c0_4] : memref<1x128xf32, #tpu.memory_space<vmem>>, vector<1x128xf32>
    %4 = vector.broadcast %3 : vector<1x128xf32> to vector<112x128xf32>
    %5 = arith.addf %2, %4 : vector<112x128xf32>
    %cst_5 = arith.constant 0.000000e+00 : f32
    %6 = vector.broadcast %cst_5 : f32 to vector<112x128xf32>
    %7 = arith.cmpf oge, %5, %6 : vector<112x128xf32>
    %cst_6 = arith.constant 0.00999999977 : f32
    %8 = vector.broadcast %cst_6 : f32 to vector<112x128xf32>
    %9 = arith.mulf %8, %5 : vector<112x128xf32>
    %10 = arith.select %7, %5, %9 : vector<112x128xi1>, vector<112x128xf32>
    %11 = arith.truncf %10 : vector<112x128xf32> to vector<112x128xbf16>
    %c0_7 = arith.constant 0 : index
    %c0_8 = arith.constant 0 : index
    %12 = vector.load %arg5[%c0_7, %c0_8] : memref<112x128xbf16, #tpu.memory_space<vmem>>, vector<112x128xbf16>
    tpu.vector_store %arg5[%c0_7, %c0_8], %11 {strides = array<i32>} : memref<112x128xbf16, #tpu.memory_space<vmem>>, vector<112x128xbf16>,
    return
  }
  func.func @transform_0(%arg0: i32, %arg1: i32) -> (i32, i32) {
    %c0_i32 = arith.constant 0 : i32
    %c0_i32_0 = arith.constant 0 : i32
    return %arg0, %c0_i32 : i32, i32
  }
  func.func @transform_1(%arg0: i32, %arg1: i32) -> (i32, i32) {
    %c0_i32 = arith.constant 0 : i32
    %c0_i32_0 = arith.constant 0 : i32
    return %c0_i32, %arg1 : i32, i32
  }
  func.func @transform_2(%arg0: i32, %arg1: i32) -> (i32, i32) {
    %c0_i32 = arith.constant 0 : i32
    %c0_i32_0 = arith.constant 0 : i32
    return %c0_i32, %arg1 : i32, i32
  }
  func.func @transform_3(%arg0: i32, %arg1: i32) -> (i32, i32) {
    %c0_i32 = arith.constant 0 : i32
    return %arg0, %arg1 : i32, i32
  }
}

module attributes {stable_mosaic.version = 11 : i64} {
  func.func @_pool_kernel(%arg0: i32, %arg1: i32, %arg2: memref<1x1x18x128xbf16, #tpu.memory_space<vmem>>, %arg3: memref<1x1x18x128xbf16, #tpu.memory_space<vmem>>, %arg4: memref<1x1x9x128xbf16, #tpu.memory_space<vmem>>) attributes {dimension_semantics = [#tpu.dimension_semantics<parallel>, #tpu.dimension_semantics<parallel>], iteration_bounds = array<i64: 2, 9>, scalar_prefetch = 0 : i64, scratch_operands = 0 : i64, tpu.core_type = #tpu.core_type<tc>, window_params = [{transform_indices = @transform_0, window_bounds = array<i64: 1, 1, 18, 128>}, {transform_indices = @transform_1, window_bounds = array<i64: 1, 1, 18, 128>}, {transform_indices = @transform_2, window_bounds = array<i64: 1, 1, 9, 128>}]} {
    %c0 = arith.constant 0 : index
    %c0_0 = arith.constant 0 : index
    %c0_1 = arith.constant 0 : index
    %c0_2 = arith.constant 0 : index
    %0 = vector.load %arg2[%c0, %c0_0, %c0_1, %c0_2] : memref<1x1x18x128xbf16, #tpu.memory_space<vmem>>, vector<1x1x18x128xbf16>
    %1 = vector.shape_cast %0 : vector<1x1x18x128xbf16> to vector<18x128xbf16>
    %c0_3 = arith.constant 0 : index
    %c0_4 = arith.constant 0 : index
    %c0_5 = arith.constant 0 : index
    %c0_6 = arith.constant 0 : index
    %2 = vector.load %arg3[%c0_3, %c0_4, %c0_5, %c0_6] : memref<1x1x18x128xbf16, #tpu.memory_space<vmem>>, vector<1x1x18x128xbf16>
    %3 = vector.shape_cast %2 : vector<1x1x18x128xbf16> to vector<18x128xbf16>
    %4 = arith.maximumf %1, %3 : vector<18x128xbf16>
    %5 = vector.shape_cast %4 : vector<18x128xbf16> to vector<9x2x128xbf16>
    %cst = arith.constant dense<0xFF80> : vector<9x128xbf16>
    %6 = vector.multi_reduction <maximumf>, %5, %cst [1] : vector<9x2x128xbf16> to vector<9x128xbf16>
    %c0_7 = arith.constant 0 : index
    %c0_8 = arith.constant 0 : index
    %c0_9 = arith.constant 0 : index
    %c0_10 = arith.constant 0 : index
    %7 = vector.load %arg4[%c0_7, %c0_8, %c0_9, %c0_10] : memref<1x1x9x128xbf16, #tpu.memory_space<vmem>>, vector<1x1x9x128xbf16>
    %8 = vector.shape_cast %7 : vector<1x1x9x128xbf16> to vector<9x128xbf16>
    %9 = vector.shape_cast %6 : vector<9x128xbf16> to vector<1x1x9x128xbf16>
    tpu.vector_store %arg4[%c0_7, %c0_8, %c0_9, %c0_10], %9 {strides = array<i32>} : memref<1x1x9x128xbf16, #tpu.memory_space<vmem>>, vector<1x1x9x128xbf16>,
    return
  }
  func.func @transform_0(%arg0: i32, %arg1: i32) -> (i32, i32, i32, i32) {
    %c2_i32 = arith.constant 2 : i32
    %0 = arith.muli %c2_i32, %arg1 : i32
    %c0_i32 = arith.constant 0 : i32
    %c0_i32_0 = arith.constant 0 : i32
    %c0_i32_1 = arith.constant 0 : i32
    return %arg0, %0, %c0_i32, %c0_i32_0 : i32, i32, i32, i32
  }
  func.func @transform_1(%arg0: i32, %arg1: i32) -> (i32, i32, i32, i32) {
    %c2_i32 = arith.constant 2 : i32
    %0 = arith.muli %c2_i32, %arg1 : i32
    %c1_i32 = arith.constant 1 : i32
    %1 = arith.addi %0, %c1_i32 : i32
    %c0_i32 = arith.constant 0 : i32
    %c0_i32_0 = arith.constant 0 : i32
    %c0_i32_1 = arith.constant 0 : i32
    return %arg0, %1, %c0_i32, %c0_i32_0 : i32, i32, i32, i32
  }
  func.func @transform_2(%arg0: i32, %arg1: i32) -> (i32, i32, i32, i32) {
    %c0_i32 = arith.constant 0 : i32
    %c0_i32_0 = arith.constant 0 : i32
    %c0_i32_1 = arith.constant 0 : i32
    return %arg0, %arg1, %c0_i32, %c0_i32_0 : i32, i32, i32, i32
  }
}

module attributes {stable_mosaic.version = 11 : i64} {
  func.func @_conv_mm_kernel(%arg0: i32, %arg1: i32, %arg2: memref<96x3200xbf16, #tpu.memory_space<vmem>>, %arg3: memref<3200x128xbf16, #tpu.memory_space<vmem>>, %arg4: memref<1x128xf32, #tpu.memory_space<vmem>>, %arg5: memref<96x128xbf16, #tpu.memory_space<vmem>>) attributes {dimension_semantics = [#tpu.dimension_semantics<parallel>, #tpu.dimension_semantics<parallel>], iteration_bounds = array<i64: 3, 1>, scalar_prefetch = 0 : i64, scratch_operands = 0 : i64, tpu.core_type = #tpu.core_type<tc>, window_params = [{transform_indices = @transform_0, window_bounds = array<i64: 96, 3200>}, {transform_indices = @transform_1, window_bounds = array<i64: 3200, 128>}, {transform_indices = @transform_2, window_bounds = array<i64: 1, 128>}, {transform_indices = @transform_3, window_bounds = array<i64: 96, 128>}]} {
    %c0 = arith.constant 0 : index
    %c0_0 = arith.constant 0 : index
    %0 = vector.load %arg2[%c0, %c0_0] : memref<96x3200xbf16, #tpu.memory_space<vmem>>, vector<96x3200xbf16>
    %c0_1 = arith.constant 0 : index
    %c0_2 = arith.constant 0 : index
    %1 = vector.load %arg3[%c0_1, %c0_2] : memref<3200x128xbf16, #tpu.memory_space<vmem>>, vector<3200x128xbf16>
    %cst = arith.constant dense<0.000000e+00> : vector<96x128xf32>
    %2 = tpu.matmul %0, %1, %cst {dimension_numbers = #tpu.dot_dimension_numbers<[1], [0], [0], [1], [0, 0, 1, 1], [], []>} : vector<96x3200xbf16>, vector<3200x128xbf16>, vector<96x128xf32> -> vector<96x128xf32>
    %c0_3 = arith.constant 0 : index
    %c0_4 = arith.constant 0 : index
    %3 = vector.load %arg4[%c0_3, %c0_4] : memref<1x128xf32, #tpu.memory_space<vmem>>, vector<1x128xf32>
    %4 = vector.broadcast %3 : vector<1x128xf32> to vector<96x128xf32>
    %5 = arith.addf %2, %4 : vector<96x128xf32>
    %cst_5 = arith.constant 0.000000e+00 : f32
    %6 = vector.broadcast %cst_5 : f32 to vector<96x128xf32>
    %7 = arith.cmpf oge, %5, %6 : vector<96x128xf32>
    %cst_6 = arith.constant 0.00999999977 : f32
    %8 = vector.broadcast %cst_6 : f32 to vector<96x128xf32>
    %9 = arith.mulf %8, %5 : vector<96x128xf32>
    %10 = arith.select %7, %5, %9 : vector<96x128xi1>, vector<96x128xf32>
    %11 = arith.truncf %10 : vector<96x128xf32> to vector<96x128xbf16>
    %c0_7 = arith.constant 0 : index
    %c0_8 = arith.constant 0 : index
    %12 = vector.load %arg5[%c0_7, %c0_8] : memref<96x128xbf16, #tpu.memory_space<vmem>>, vector<96x128xbf16>
    tpu.vector_store %arg5[%c0_7, %c0_8], %11 {strides = array<i32>} : memref<96x128xbf16, #tpu.memory_space<vmem>>, vector<96x128xbf16>,
    return
  }
  func.func @transform_0(%arg0: i32, %arg1: i32) -> (i32, i32) {
    %c0_i32 = arith.constant 0 : i32
    %c0_i32_0 = arith.constant 0 : i32
    return %arg0, %c0_i32 : i32, i32
  }
  func.func @transform_1(%arg0: i32, %arg1: i32) -> (i32, i32) {
    %c0_i32 = arith.constant 0 : i32
    %c0_i32_0 = arith.constant 0 : i32
    return %c0_i32, %arg1 : i32, i32
  }
  func.func @transform_2(%arg0: i32, %arg1: i32) -> (i32, i32) {
    %c0_i32 = arith.constant 0 : i32
    %c0_i32_0 = arith.constant 0 : i32
    return %c0_i32, %arg1 : i32, i32
  }
  func.func @transform_3(%arg0: i32, %arg1: i32) -> (i32, i32) {
    %c0_i32 = arith.constant 0 : i32
    return %arg0, %arg1 : i32, i32
  }
}

module attributes {stable_mosaic.version = 11 : i64} {
  func.func @_pool_kernel(%arg0: i32, %arg1: i32, %arg2: memref<1x1x12x128xbf16, #tpu.memory_space<vmem>>, %arg3: memref<1x1x12x128xbf16, #tpu.memory_space<vmem>>, %arg4: memref<1x1x6x128xbf16, #tpu.memory_space<vmem>>) attributes {dimension_semantics = [#tpu.dimension_semantics<parallel>, #tpu.dimension_semantics<parallel>], iteration_bounds = array<i64: 2, 6>, scalar_prefetch = 0 : i64, scratch_operands = 0 : i64, tpu.core_type = #tpu.core_type<tc>, window_params = [{transform_indices = @transform_0, window_bounds = array<i64: 1, 1, 12, 128>}, {transform_indices = @transform_1, window_bounds = array<i64: 1, 1, 12, 128>}, {transform_indices = @transform_2, window_bounds = array<i64: 1, 1, 6, 128>}]} {
    %c0 = arith.constant 0 : index
    %c0_0 = arith.constant 0 : index
    %c0_1 = arith.constant 0 : index
    %c0_2 = arith.constant 0 : index
    %0 = vector.load %arg2[%c0, %c0_0, %c0_1, %c0_2] : memref<1x1x12x128xbf16, #tpu.memory_space<vmem>>, vector<1x1x12x128xbf16>
    %1 = vector.shape_cast %0 : vector<1x1x12x128xbf16> to vector<12x128xbf16>
    %c0_3 = arith.constant 0 : index
    %c0_4 = arith.constant 0 : index
    %c0_5 = arith.constant 0 : index
    %c0_6 = arith.constant 0 : index
    %2 = vector.load %arg3[%c0_3, %c0_4, %c0_5, %c0_6] : memref<1x1x12x128xbf16, #tpu.memory_space<vmem>>, vector<1x1x12x128xbf16>
    %3 = vector.shape_cast %2 : vector<1x1x12x128xbf16> to vector<12x128xbf16>
    %4 = arith.maximumf %1, %3 : vector<12x128xbf16>
    %5 = vector.shape_cast %4 : vector<12x128xbf16> to vector<6x2x128xbf16>
    %cst = arith.constant dense<0xFF80> : vector<6x128xbf16>
    %6 = vector.multi_reduction <maximumf>, %5, %cst [1] : vector<6x2x128xbf16> to vector<6x128xbf16>
    %c0_7 = arith.constant 0 : index
    %c0_8 = arith.constant 0 : index
    %c0_9 = arith.constant 0 : index
    %c0_10 = arith.constant 0 : index
    %7 = vector.load %arg4[%c0_7, %c0_8, %c0_9, %c0_10] : memref<1x1x6x128xbf16, #tpu.memory_space<vmem>>, vector<1x1x6x128xbf16>
    %8 = vector.shape_cast %7 : vector<1x1x6x128xbf16> to vector<6x128xbf16>
    %9 = vector.shape_cast %6 : vector<6x128xbf16> to vector<1x1x6x128xbf16>
    tpu.vector_store %arg4[%c0_7, %c0_8, %c0_9, %c0_10], %9 {strides = array<i32>} : memref<1x1x6x128xbf16, #tpu.memory_space<vmem>>, vector<1x1x6x128xbf16>,
    return
  }
  func.func @transform_0(%arg0: i32, %arg1: i32) -> (i32, i32, i32, i32) {
    %c2_i32 = arith.constant 2 : i32
    %0 = arith.muli %c2_i32, %arg1 : i32
    %c0_i32 = arith.constant 0 : i32
    %c0_i32_0 = arith.constant 0 : i32
    %c0_i32_1 = arith.constant 0 : i32
    return %arg0, %0, %c0_i32, %c0_i32_0 : i32, i32, i32, i32
  }
  func.func @transform_1(%arg0: i32, %arg1: i32) -> (i32, i32, i32, i32) {
    %c2_i32 = arith.constant 2 : i32
    %0 = arith.muli %c2_i32, %arg1 : i32
    %c1_i32 = arith.constant 1 : i32
    %1 = arith.addi %0, %c1_i32 : i32
    %c0_i32 = arith.constant 0 : i32
    %c0_i32_0 = arith.constant 0 : i32
    %c0_i32_1 = arith.constant 0 : i32
    return %arg0, %1, %c0_i32, %c0_i32_0 : i32, i32, i32, i32
  }
  func.func @transform_2(%arg0: i32, %arg1: i32) -> (i32, i32, i32, i32) {
    %c0_i32 = arith.constant 0 : i32
    %c0_i32_0 = arith.constant 0 : i32
    %c0_i32_1 = arith.constant 0 : i32
    return %arg0, %arg1, %c0_i32, %c0_i32_0 : i32, i32, i32, i32
  }
}

module attributes {stable_mosaic.version = 11 : i64} {
  func.func @_conv_mm_kernel(%arg0: i32, %arg1: i32, %arg2: memref<112x1152xbf16, #tpu.memory_space<vmem>>, %arg3: memref<1152x128xbf16, #tpu.memory_space<vmem>>, %arg4: memref<1x128xf32, #tpu.memory_space<vmem>>, %arg5: memref<112x128xbf16, #tpu.memory_space<vmem>>) attributes {dimension_semantics = [#tpu.dimension_semantics<parallel>, #tpu.dimension_semantics<parallel>], iteration_bounds = array<i64: 2, 1>, scalar_prefetch = 0 : i64, scratch_operands = 0 : i64, tpu.core_type = #tpu.core_type<tc>, window_params = [{transform_indices = @transform_0, window_bounds = array<i64: 112, 1152>}, {transform_indices = @transform_1, window_bounds = array<i64: 1152, 128>}, {transform_indices = @transform_2, window_bounds = array<i64: 1, 128>}, {transform_indices = @transform_3, window_bounds = array<i64: 112, 128>}]} {
    %c0 = arith.constant 0 : index
    %c0_0 = arith.constant 0 : index
    %0 = vector.load %arg2[%c0, %c0_0] : memref<112x1152xbf16, #tpu.memory_space<vmem>>, vector<112x1152xbf16>
    %c0_1 = arith.constant 0 : index
    %c0_2 = arith.constant 0 : index
    %1 = vector.load %arg3[%c0_1, %c0_2] : memref<1152x128xbf16, #tpu.memory_space<vmem>>, vector<1152x128xbf16>
    %cst = arith.constant dense<0.000000e+00> : vector<112x128xf32>
    %2 = tpu.matmul %0, %1, %cst {dimension_numbers = #tpu.dot_dimension_numbers<[1], [0], [0], [1], [0, 0, 1, 1], [], []>} : vector<112x1152xbf16>, vector<1152x128xbf16>, vector<112x128xf32> -> vector<112x128xf32>
    %c0_3 = arith.constant 0 : index
    %c0_4 = arith.constant 0 : index
    %3 = vector.load %arg4[%c0_3, %c0_4] : memref<1x128xf32, #tpu.memory_space<vmem>>, vector<1x128xf32>
    %4 = vector.broadcast %3 : vector<1x128xf32> to vector<112x128xf32>
    %5 = arith.addf %2, %4 : vector<112x128xf32>
    %cst_5 = arith.constant 0.000000e+00 : f32
    %6 = vector.broadcast %cst_5 : f32 to vector<112x128xf32>
    %7 = arith.cmpf oge, %5, %6 : vector<112x128xf32>
    %cst_6 = arith.constant 0.00999999977 : f32
    %8 = vector.broadcast %cst_6 : f32 to vector<112x128xf32>
    %9 = arith.mulf %8, %5 : vector<112x128xf32>
    %10 = arith.select %7, %5, %9 : vector<112x128xi1>, vector<112x128xf32>
    %11 = arith.truncf %10 : vector<112x128xf32> to vector<112x128xbf16>
    %c0_7 = arith.constant 0 : index
    %c0_8 = arith.constant 0 : index
    %12 = vector.load %arg5[%c0_7, %c0_8] : memref<112x128xbf16, #tpu.memory_space<vmem>>, vector<112x128xbf16>
    tpu.vector_store %arg5[%c0_7, %c0_8], %11 {strides = array<i32>} : memref<112x128xbf16, #tpu.memory_space<vmem>>, vector<112x128xbf16>,
    return
  }
  func.func @transform_0(%arg0: i32, %arg1: i32) -> (i32, i32) {
    %c0_i32 = arith.constant 0 : i32
    %c0_i32_0 = arith.constant 0 : i32
    return %arg0, %c0_i32 : i32, i32
  }
  func.func @transform_1(%arg0: i32, %arg1: i32) -> (i32, i32) {
    %c0_i32 = arith.constant 0 : i32
    %c0_i32_0 = arith.constant 0 : i32
    return %c0_i32, %arg1 : i32, i32
  }
  func.func @transform_2(%arg0: i32, %arg1: i32) -> (i32, i32) {
    %c0_i32 = arith.constant 0 : i32
    %c0_i32_0 = arith.constant 0 : i32
    return %c0_i32, %arg1 : i32, i32
  }
  func.func @transform_3(%arg0: i32, %arg1: i32) -> (i32, i32) {
    %c0_i32 = arith.constant 0 : i32
    return %arg0, %arg1 : i32, i32
  }
}

module attributes {stable_mosaic.version = 11 : i64} {
  func.func @_pool_kernel(%arg0: i32, %arg1: i32, %arg2: memref<1x1x10x128xbf16, #tpu.memory_space<vmem>>, %arg3: memref<1x1x10x128xbf16, #tpu.memory_space<vmem>>, %arg4: memref<1x1x5x128xbf16, #tpu.memory_space<vmem>>) attributes {dimension_semantics = [#tpu.dimension_semantics<parallel>, #tpu.dimension_semantics<parallel>], iteration_bounds = array<i64: 2, 5>, scalar_prefetch = 0 : i64, scratch_operands = 0 : i64, tpu.core_type = #tpu.core_type<tc>, window_params = [{transform_indices = @transform_0, window_bounds = array<i64: 1, 1, 10, 128>}, {transform_indices = @transform_1, window_bounds = array<i64: 1, 1, 10, 128>}, {transform_indices = @transform_2, window_bounds = array<i64: 1, 1, 5, 128>}]} {
    %c0 = arith.constant 0 : index
    %c0_0 = arith.constant 0 : index
    %c0_1 = arith.constant 0 : index
    %c0_2 = arith.constant 0 : index
    %0 = vector.load %arg2[%c0, %c0_0, %c0_1, %c0_2] : memref<1x1x10x128xbf16, #tpu.memory_space<vmem>>, vector<1x1x10x128xbf16>
    %1 = vector.shape_cast %0 : vector<1x1x10x128xbf16> to vector<10x128xbf16>
    %c0_3 = arith.constant 0 : index
    %c0_4 = arith.constant 0 : index
    %c0_5 = arith.constant 0 : index
    %c0_6 = arith.constant 0 : index
    %2 = vector.load %arg3[%c0_3, %c0_4, %c0_5, %c0_6] : memref<1x1x10x128xbf16, #tpu.memory_space<vmem>>, vector<1x1x10x128xbf16>
    %3 = vector.shape_cast %2 : vector<1x1x10x128xbf16> to vector<10x128xbf16>
    %4 = arith.maximumf %1, %3 : vector<10x128xbf16>
    %5 = vector.shape_cast %4 : vector<10x128xbf16> to vector<5x2x128xbf16>
    %cst = arith.constant dense<0xFF80> : vector<5x128xbf16>
    %6 = vector.multi_reduction <maximumf>, %5, %cst [1] : vector<5x2x128xbf16> to vector<5x128xbf16>
    %c0_7 = arith.constant 0 : index
    %c0_8 = arith.constant 0 : index
    %c0_9 = arith.constant 0 : index
    %c0_10 = arith.constant 0 : index
    %7 = vector.load %arg4[%c0_7, %c0_8, %c0_9, %c0_10] : memref<1x1x5x128xbf16, #tpu.memory_space<vmem>>, vector<1x1x5x128xbf16>
    %8 = vector.shape_cast %7 : vector<1x1x5x128xbf16> to vector<5x128xbf16>
    %9 = vector.shape_cast %6 : vector<5x128xbf16> to vector<1x1x5x128xbf16>
    tpu.vector_store %arg4[%c0_7, %c0_8, %c0_9, %c0_10], %9 {strides = array<i32>} : memref<1x1x5x128xbf16, #tpu.memory_space<vmem>>, vector<1x1x5x128xbf16>,
    return
  }
  func.func @transform_0(%arg0: i32, %arg1: i32) -> (i32, i32, i32, i32) {
    %c2_i32 = arith.constant 2 : i32
    %0 = arith.muli %c2_i32, %arg1 : i32
    %c0_i32 = arith.constant 0 : i32
    %c0_i32_0 = arith.constant 0 : i32
    %c0_i32_1 = arith.constant 0 : i32
    return %arg0, %0, %c0_i32, %c0_i32_0 : i32, i32, i32, i32
  }
  func.func @transform_1(%arg0: i32, %arg1: i32) -> (i32, i32, i32, i32) {
    %c2_i32 = arith.constant 2 : i32
    %0 = arith.muli %c2_i32, %arg1 : i32
    %c1_i32 = arith.constant 1 : i32
    %1 = arith.addi %0, %c1_i32 : i32
    %c0_i32 = arith.constant 0 : i32
    %c0_i32_0 = arith.constant 0 : i32
    %c0_i32_1 = arith.constant 0 : i32
    return %arg0, %1, %c0_i32, %c0_i32_0 : i32, i32, i32, i32
  }
  func.func @transform_2(%arg0: i32, %arg1: i32) -> (i32, i32, i32, i32) {
    %c0_i32 = arith.constant 0 : i32
    %c0_i32_0 = arith.constant 0 : i32
    %c0_i32_1 = arith.constant 0 : i32
    return %arg0, %arg1, %c0_i32, %c0_i32_0 : i32, i32, i32, i32
  }
}

module attributes {stable_mosaic.version = 11 : i64} {
  func.func @_conv_mm_kernel(%arg0: i32, %arg1: i32, %arg2: memref<64x1152xbf16, #tpu.memory_space<vmem>>, %arg3: memref<1152x128xbf16, #tpu.memory_space<vmem>>, %arg4: memref<1x128xf32, #tpu.memory_space<vmem>>, %arg5: memref<64x128xbf16, #tpu.memory_space<vmem>>) attributes {dimension_semantics = [#tpu.dimension_semantics<parallel>, #tpu.dimension_semantics<parallel>], iteration_bounds = array<i64: 1, 2>, scalar_prefetch = 0 : i64, scratch_operands = 0 : i64, tpu.core_type = #tpu.core_type<tc>, window_params = [{transform_indices = @transform_0, window_bounds = array<i64: 64, 1152>}, {transform_indices = @transform_1, window_bounds = array<i64: 1152, 128>}, {transform_indices = @transform_2, window_bounds = array<i64: 1, 128>}, {transform_indices = @transform_3, window_bounds = array<i64: 64, 128>}]} {
    %c0 = arith.constant 0 : index
    %c0_0 = arith.constant 0 : index
    %0 = vector.load %arg2[%c0, %c0_0] : memref<64x1152xbf16, #tpu.memory_space<vmem>>, vector<64x1152xbf16>
    %c0_1 = arith.constant 0 : index
    %c0_2 = arith.constant 0 : index
    %1 = vector.load %arg3[%c0_1, %c0_2] : memref<1152x128xbf16, #tpu.memory_space<vmem>>, vector<1152x128xbf16>
    %cst = arith.constant dense<0.000000e+00> : vector<64x128xf32>
    %2 = tpu.matmul %0, %1, %cst {dimension_numbers = #tpu.dot_dimension_numbers<[1], [0], [0], [1], [0, 0, 1, 1], [], []>} : vector<64x1152xbf16>, vector<1152x128xbf16>, vector<64x128xf32> -> vector<64x128xf32>
    %c0_3 = arith.constant 0 : index
    %c0_4 = arith.constant 0 : index
    %3 = vector.load %arg4[%c0_3, %c0_4] : memref<1x128xf32, #tpu.memory_space<vmem>>, vector<1x128xf32>
    %4 = vector.broadcast %3 : vector<1x128xf32> to vector<64x128xf32>
    %5 = arith.addf %2, %4 : vector<64x128xf32>
    %cst_5 = arith.constant 0.000000e+00 : f32
    %6 = vector.broadcast %cst_5 : f32 to vector<64x128xf32>
    %7 = arith.cmpf oge, %5, %6 : vector<64x128xf32>
    %cst_6 = arith.constant 0.00999999977 : f32
    %8 = vector.broadcast %cst_6 : f32 to vector<64x128xf32>
    %9 = arith.mulf %8, %5 : vector<64x128xf32>
    %10 = arith.select %7, %5, %9 : vector<64x128xi1>, vector<64x128xf32>
    %11 = arith.truncf %10 : vector<64x128xf32> to vector<64x128xbf16>
    %c0_7 = arith.constant 0 : index
    %c0_8 = arith.constant 0 : index
    %12 = vector.load %arg5[%c0_7, %c0_8] : memref<64x128xbf16, #tpu.memory_space<vmem>>, vector<64x128xbf16>
    tpu.vector_store %arg5[%c0_7, %c0_8], %11 {strides = array<i32>} : memref<64x128xbf16, #tpu.memory_space<vmem>>, vector<64x128xbf16>,
    return
  }
  func.func @transform_0(%arg0: i32, %arg1: i32) -> (i32, i32) {
    %c0_i32 = arith.constant 0 : i32
    %c0_i32_0 = arith.constant 0 : i32
    return %arg0, %c0_i32 : i32, i32
  }
  func.func @transform_1(%arg0: i32, %arg1: i32) -> (i32, i32) {
    %c0_i32 = arith.constant 0 : i32
    %c0_i32_0 = arith.constant 0 : i32
    return %c0_i32, %arg1 : i32, i32
  }
  func.func @transform_2(%arg0: i32, %arg1: i32) -> (i32, i32) {
    %c0_i32 = arith.constant 0 : i32
    %c0_i32_0 = arith.constant 0 : i32
    return %c0_i32, %arg1 : i32, i32
  }
  func.func @transform_3(%arg0: i32, %arg1: i32) -> (i32, i32) {
    %c0_i32 = arith.constant 0 : i32
    return %arg0, %arg1 : i32, i32
  }
}

module attributes {stable_mosaic.version = 11 : i64} {
  func.func @_pool_kernel(%arg0: i32, %arg1: i32, %arg2: memref<1x1x5x256xbf16, #tpu.memory_space<vmem>>, %arg3: memref<1x1x5x256xbf16, #tpu.memory_space<vmem>>, %arg4: memref<1x1x2x256xbf16, #tpu.memory_space<vmem>>) attributes {dimension_semantics = [#tpu.dimension_semantics<parallel>, #tpu.dimension_semantics<parallel>], iteration_bounds = array<i64: 2, 2>, scalar_prefetch = 0 : i64, scratch_operands = 0 : i64, tpu.core_type = #tpu.core_type<tc>, window_params = [{transform_indices = @transform_0, window_bounds = array<i64: 1, 1, 5, 256>}, {transform_indices = @transform_1, window_bounds = array<i64: 1, 1, 5, 256>}, {transform_indices = @transform_2, window_bounds = array<i64: 1, 1, 2, 256>}]} {
    %c0 = arith.constant 0 : index
    %c0_0 = arith.constant 0 : index
    %c0_1 = arith.constant 0 : index
    %c0_2 = arith.constant 0 : index
    %0 = vector.load %arg2[%c0, %c0_0, %c0_1, %c0_2] : memref<1x1x5x256xbf16, #tpu.memory_space<vmem>>, vector<1x1x5x256xbf16>
    %1 = vector.shape_cast %0 : vector<1x1x5x256xbf16> to vector<5x256xbf16>
    %c0_3 = arith.constant 0 : index
    %c0_4 = arith.constant 0 : index
    %c0_5 = arith.constant 0 : index
    %c0_6 = arith.constant 0 : index
    %2 = vector.load %arg3[%c0_3, %c0_4, %c0_5, %c0_6] : memref<1x1x5x256xbf16, #tpu.memory_space<vmem>>, vector<1x1x5x256xbf16>
    %3 = vector.shape_cast %2 : vector<1x1x5x256xbf16> to vector<5x256xbf16>
    %4 = arith.maximumf %1, %3 : vector<5x256xbf16>
    %5 = vector.extract_strided_slice %4 {offsets = [0, 0], sizes = [4, 256], strides = [1, 1]} : vector<5x256xbf16> to vector<4x256xbf16>
    %6 = vector.shape_cast %5 : vector<4x256xbf16> to vector<2x2x256xbf16>
    %cst = arith.constant dense<0xFF80> : vector<2x256xbf16>
    %7 = vector.multi_reduction <maximumf>, %6, %cst [1] : vector<2x2x256xbf16> to vector<2x256xbf16>
    %c0_7 = arith.constant 0 : index
    %c0_8 = arith.constant 0 : index
    %c0_9 = arith.constant 0 : index
    %c0_10 = arith.constant 0 : index
    %8 = vector.load %arg4[%c0_7, %c0_8, %c0_9, %c0_10] : memref<1x1x2x256xbf16, #tpu.memory_space<vmem>>, vector<1x1x2x256xbf16>
    %9 = vector.shape_cast %8 : vector<1x1x2x256xbf16> to vector<2x256xbf16>
    %10 = vector.shape_cast %7 : vector<2x256xbf16> to vector<1x1x2x256xbf16>
    tpu.vector_store %arg4[%c0_7, %c0_8, %c0_9, %c0_10], %10 {strides = array<i32>} : memref<1x1x2x256xbf16, #tpu.memory_space<vmem>>, vector<1x1x2x256xbf16>,
    return
  }
  func.func @transform_0(%arg0: i32, %arg1: i32) -> (i32, i32, i32, i32) {
    %c2_i32 = arith.constant 2 : i32
    %0 = arith.muli %c2_i32, %arg1 : i32
    %c0_i32 = arith.constant 0 : i32
    %c0_i32_0 = arith.constant 0 : i32
    %c0_i32_1 = arith.constant 0 : i32
    return %arg0, %0, %c0_i32, %c0_i32_0 : i32, i32, i32, i32
  }
  func.func @transform_1(%arg0: i32, %arg1: i32) -> (i32, i32, i32, i32) {
    %c2_i32 = arith.constant 2 : i32
    %0 = arith.muli %c2_i32, %arg1 : i32
    %c1_i32 = arith.constant 1 : i32
    %1 = arith.addi %0, %c1_i32 : i32
    %c0_i32 = arith.constant 0 : i32
    %c0_i32_0 = arith.constant 0 : i32
    %c0_i32_1 = arith.constant 0 : i32
    return %arg0, %1, %c0_i32, %c0_i32_0 : i32, i32, i32, i32
  }
  func.func @transform_2(%arg0: i32, %arg1: i32) -> (i32, i32, i32, i32) {
    %c0_i32 = arith.constant 0 : i32
    %c0_i32_0 = arith.constant 0 : i32
    %c0_i32_1 = arith.constant 0 : i32
    return %arg0, %arg1, %c0_i32, %c0_i32_0 : i32, i32, i32, i32
  }
}

module attributes {stable_mosaic.version = 11 : i64} {
  func.func @_mlp_kernel(%arg0: i32, %arg1: memref<16x1024xbf16, #tpu.memory_space<vmem>>, %arg2: memref<1024x512xbf16, #tpu.memory_space<vmem>>, %arg3: memref<1x512xf32, #tpu.memory_space<vmem>>, %arg4: memref<512x256xbf16, #tpu.memory_space<vmem>>, %arg5: memref<1x256xf32, #tpu.memory_space<vmem>>, %arg6: memref<256x128xbf16, #tpu.memory_space<vmem>>, %arg7: memref<1x128xf32, #tpu.memory_space<vmem>>, %arg8: memref<16x128xf32, #tpu.memory_space<vmem>>) attributes {dimension_semantics = [#tpu.dimension_semantics<arbitrary>], iteration_bounds = array<i64: 1>, scalar_prefetch = 0 : i64, scratch_operands = 0 : i64, tpu.core_type = #tpu.core_type<tc>, window_params = [{pipeline_mode = #tpu.pipeline_mode<synchronous>, transform_indices = @transform_0, window_bounds = array<i64: 16, 1024>}, {pipeline_mode = #tpu.pipeline_mode<synchronous>, transform_indices = @transform_1, window_bounds = array<i64: 1024, 512>}, {pipeline_mode = #tpu.pipeline_mode<synchronous>, transform_indices = @transform_2, window_bounds = array<i64: 1, 512>}, {pipeline_mode = #tpu.pipeline_mode<synchronous>, transform_indices = @transform_3, window_bounds = array<i64: 512, 256>}, {pipeline_mode = #tpu.pipeline_mode<synchronous>, transform_indices = @transform_4, window_bounds = array<i64: 1, 256>}, {pipeline_mode = #tpu.pipeline_mode<synchronous>, transform_indices = @transform_5, window_bounds = array<i64: 256, 128>}, {pipeline_mode = #tpu.pipeline_mode<synchronous>, transform_indices = @transform_6, window_bounds = array<i64: 1, 128>}, {pipeline_mode = #tpu.pipeline_mode<synchronous>, transform_indices = @transform_7, window_bounds = array<i64: 16, 128>}]} {
    %c0 = arith.constant 0 : index
    %c0_0 = arith.constant 0 : index
    %0 = vector.load %arg1[%c0, %c0_0] : memref<16x1024xbf16, #tpu.memory_space<vmem>>, vector<16x1024xbf16>
    %c0_1 = arith.constant 0 : index
    %c0_2 = arith.constant 0 : index
    %1 = vector.load %arg2[%c0_1, %c0_2] : memref<1024x512xbf16, #tpu.memory_space<vmem>>, vector<1024x512xbf16>
    %cst = arith.constant dense<0.000000e+00> : vector<16x512xf32>
    %2 = tpu.matmul %0, %1, %cst {dimension_numbers = #tpu.dot_dimension_numbers<[1], [0], [0], [1], [0, 0, 1, 1], [], []>} : vector<16x1024xbf16>, vector<1024x512xbf16>, vector<16x512xf32> -> vector<16x512xf32>
    %c0_3 = arith.constant 0 : index
    %c0_4 = arith.constant 0 : index
    %3 = vector.load %arg3[%c0_3, %c0_4] : memref<1x512xf32, #tpu.memory_space<vmem>>, vector<1x512xf32>
    %4 = vector.broadcast %3 : vector<1x512xf32> to vector<16x512xf32>
    %5 = arith.addf %2, %4 : vector<16x512xf32>
    %cst_5 = arith.constant 0.000000e+00 : f32
    %6 = vector.broadcast %cst_5 : f32 to vector<16x512xf32>
    %7 = arith.cmpf oge, %5, %6 : vector<16x512xf32>
    %cst_6 = arith.constant 0.00999999977 : f32
    %8 = vector.broadcast %cst_6 : f32 to vector<16x512xf32>
    %9 = arith.mulf %8, %5 : vector<16x512xf32>
    %10 = arith.select %7, %5, %9 : vector<16x512xi1>, vector<16x512xf32>
    %11 = arith.truncf %10 : vector<16x512xf32> to vector<16x512xbf16>
    %c0_7 = arith.constant 0 : index
    %c0_8 = arith.constant 0 : index
    %12 = vector.load %arg4[%c0_7, %c0_8] : memref<512x256xbf16, #tpu.memory_space<vmem>>, vector<512x256xbf16>
    %cst_9 = arith.constant dense<0.000000e+00> : vector<16x256xf32>
    %13 = tpu.matmul %11, %12, %cst_9 {dimension_numbers = #tpu.dot_dimension_numbers<[1], [0], [0], [1], [0, 0, 1, 1], [], []>} : vector<16x512xbf16>, vector<512x256xbf16>, vector<16x256xf32> -> vector<16x256xf32>
    %c0_10 = arith.constant 0 : index
    %c0_11 = arith.constant 0 : index
    %14 = vector.load %arg5[%c0_10, %c0_11] : memref<1x256xf32, #tpu.memory_space<vmem>>, vector<1x256xf32>
    %15 = vector.broadcast %14 : vector<1x256xf32> to vector<16x256xf32>
    %16 = arith.addf %13, %15 : vector<16x256xf32>
    %cst_12 = arith.constant 0.000000e+00 : f32
    %17 = vector.broadcast %cst_12 : f32 to vector<16x256xf32>
    %18 = arith.cmpf oge, %16, %17 : vector<16x256xf32>
    %cst_13 = arith.constant 0.00999999977 : f32
    %19 = vector.broadcast %cst_13 : f32 to vector<16x256xf32>
    %20 = arith.mulf %19, %16 : vector<16x256xf32>
    %21 = arith.select %18, %16, %20 : vector<16x256xi1>, vector<16x256xf32>
    %22 = arith.truncf %21 : vector<16x256xf32> to vector<16x256xbf16>
    %c0_14 = arith.constant 0 : index
    %c0_15 = arith.constant 0 : index
    %23 = vector.load %arg6[%c0_14, %c0_15] : memref<256x128xbf16, #tpu.memory_space<vmem>>, vector<256x128xbf16>
    %cst_16 = arith.constant dense<0.000000e+00> : vector<16x128xf32>
    %24 = tpu.matmul %22, %23, %cst_16 {dimension_numbers = #tpu.dot_dimension_numbers<[1], [0], [0], [1], [0, 0, 1, 1], [], []>} : vector<16x256xbf16>, vector<256x128xbf16>, vector<16x128xf32> -> vector<16x128xf32>
    %c0_17 = arith.constant 0 : index
    %c0_18 = arith.constant 0 : index
    %25 = vector.load %arg7[%c0_17, %c0_18] : memref<1x128xf32, #tpu.memory_space<vmem>>, vector<1x128xf32>
    %26 = vector.broadcast %25 : vector<1x128xf32> to vector<16x128xf32>
    %27 = arith.addf %24, %26 : vector<16x128xf32>
    %cst_19 = arith.constant 0.000000e+00 : f32
    %28 = vector.broadcast %cst_19 : f32 to vector<16x128xf32>
    %29 = arith.subf %28, %27 : vector<16x128xf32>
    %30 = math.exp %29 : vector<16x128xf32>
    %cst_20 = arith.constant 1.000000e+00 : f32
    %31 = vector.broadcast %cst_20 : f32 to vector<16x128xf32>
    %32 = arith.addf %31, %30 : vector<16x128xf32>
    %cst_21 = arith.constant 1.000000e+00 : f32
    %33 = vector.broadcast %cst_21 : f32 to vector<16x128xf32>
    %34 = arith.divf %33, %32 : vector<16x128xf32>
    %c0_22 = arith.constant 0 : index
    %c0_23 = arith.constant 0 : index
    %35 = vector.load %arg8[%c0_22, %c0_23] : memref<16x128xf32, #tpu.memory_space<vmem>>, vector<16x128xf32>
    tpu.vector_store %arg8[%c0_22, %c0_23], %34 {strides = array<i32>} : memref<16x128xf32, #tpu.memory_space<vmem>>, vector<16x128xf32>,
    return
  }
  func.func @transform_0(%arg0: i32) -> (i32, i32) {
    %c0_i32 = arith.constant 0 : i32
    %c0_i32_0 = arith.constant 0 : i32
    %c0_i32_1 = arith.constant 0 : i32
    return %c0_i32, %c0_i32_0 : i32, i32
  }
  func.func @transform_1(%arg0: i32) -> (i32, i32) {
    %c0_i32 = arith.constant 0 : i32
    %c0_i32_0 = arith.constant 0 : i32
    %c0_i32_1 = arith.constant 0 : i32
    return %c0_i32, %c0_i32_0 : i32, i32
  }
  func.func @transform_2(%arg0: i32) -> (i32, i32) {
    %c0_i32 = arith.constant 0 : i32
    %c0_i32_0 = arith.constant 0 : i32
    %c0_i32_1 = arith.constant 0 : i32
    return %c0_i32, %c0_i32_0 : i32, i32
  }
  func.func @transform_3(%arg0: i32) -> (i32, i32) {
    %c0_i32 = arith.constant 0 : i32
    %c0_i32_0 = arith.constant 0 : i32
    %c0_i32_1 = arith.constant 0 : i32
    return %c0_i32, %c0_i32_0 : i32, i32
  }
  func.func @transform_4(%arg0: i32) -> (i32, i32) {
    %c0_i32 = arith.constant 0 : i32
    %c0_i32_0 = arith.constant 0 : i32
    %c0_i32_1 = arith.constant 0 : i32
    return %c0_i32, %c0_i32_0 : i32, i32
  }
  func.func @transform_5(%arg0: i32) -> (i32, i32) {
    %c0_i32 = arith.constant 0 : i32
    %c0_i32_0 = arith.constant 0 : i32
    %c0_i32_1 = arith.constant 0 : i32
    return %c0_i32, %c0_i32_0 : i32, i32
  }
  func.func @transform_6(%arg0: i32) -> (i32, i32) {
    %c0_i32 = arith.constant 0 : i32
    %c0_i32_0 = arith.constant 0 : i32
    %c0_i32_1 = arith.constant 0 : i32
    return %c0_i32, %c0_i32_0 : i32, i32
  }
  func.func @transform_7(%arg0: i32) -> (i32, i32) {
    %c0_i32 = arith.constant 0 : i32
    %c0_i32_0 = arith.constant 0 : i32
    %c0_i32_1 = arith.constant 0 : i32
    return %c0_i32, %c0_i32_0 : i32, i32
  }
}

</mosaic_0001>

<bundles_post_ra>
// kernel: forward.10
= control target key start
LH: loop header
LB: loop body
LE: loop exit
PB: predicated region body
PF: predicated region fallthrough
CT: control target
= control target key end

     0   :  { %s735_s9 = smov 0   ;;  %s737_s10 = smov 0   ;;  %s821_s0 = inlined_call_operand.vmem [shape: bf16[2,18,18,128], index: 0, kind: input, shape index: {}, may-alias: {0,1}]   ;;  %s822_s1 = inlined_call_operand.vmem [shape: bf16[2,18,18,128], index: 1, kind: input, shape index: {}, may-alias: {0,1}]   ;;  %s823_s2 = inlined_call_operand.vmem [shape: bf16[2,9,9,128], index: 2, kind: output, shape index: {}]  }
   0x1   :  { %s739_s11 = smov 0   ;;  %s741_s12 = smov 0  }
   0x2   :  { %s743_s13 = smov 0  }
   0x3 LB: > { %s21_s14 = sadd.s32 1, %s709_s11  ;;  %s24_s15 = sadd.s32 1, %s713_s12  ;;  %s717_s13 = sphi %s743_s13, %s12_s13   ;;  %s713_s12 = sphi %s741_s12, %s827_s12   ;;  %s709_s11 = sphi %s739_s11, %s826_s11   ;;  %s705_s10 = sphi %s737_s10, %s825_s10   ;;  %s701_s9 = sphi %s735_s9, %s824_s9  }
   0x4   : > { %p22_p0 = scmp.ge.s32.totalorder %s21_s14, 9  ;;  %p614_p1 = scmp.ge.s32.totalorder %s717_s13, 1 }
   0x5   : > { %p160_p2 = scmp.lt.s32.totalorder %s717_s13, 19 }
   0x6   : > { %s829_s14 = smov (%p22_p0, %s21_s14), 0  ;;  %s831_s15 = smov (!%p22_p0, %s24_s15), %s713_s12 }
   0x7   : > { %p161_p3 = pnand %p614_p1, %p160_p2  ;;  %p26_p4 = scmp.ge.s32.totalorder %s831_s15, 2 }
   0x8   : > { %s615_s16 = sshll.u32 (!%p161_p3), %s701_s9, 1  ;;  %p203_p5 = scmp.lt.s32.totalorder (!%p161_p3), %s705_s10, 1  ;;  %v719_v0 = vmov (!%p161_p3), 1966171168   ;;  %v251_v2 = vlaneseq (!%p161_p3)  ;;  %vm310_vm0 = vcmask (!%p161_p3), 1040384   ;;  %vm465_vm1 = vcmask (!%p161_p3), 1041409  }
   0x9   : > { %s833_s15 = smov (%p26_p4, %s831_s15), 0  ;;  %164 = sbr.rel (%p161_p3) target bundleno = 74 (0x4a), region = 28 }
   0xa   : > { %p205_p6 = scmp.lt.s32.totalorder (!%p161_p3), %s615_s16, 17  ;;  %s214_s17 = sadd.s32 (!%p161_p3), 1, %s615_s16  ;;  %v249_v1 = vunpack.c.l.s4 (!%p161_p3), %v719_v0  ;;  %v252_v4 = vshrl.u32 (!%p161_p3), %v251_v2, 7  ;;  %vm467_vm2 = vcmask (!%p161_p3), 1042434   ;;  %vm469_vm3 = vcmask (!%p161_p3), 1043459  }
   0xb   : > { %p217_p7 = scmp.lt.s32.totalorder (!%p161_p3), %s214_s17, 17  ;;  %p228_p8 = scmp.lt.s32.totalorder (!%p161_p3), %s701_s9, 8  ;;  %vm471_vm4 = vcmask (!%p161_p3), 1044484   ;;  %vm473_vm5 = vcmask (!%p161_p3), 1045509   ;;  %vm475_vm6 = vcmask (!%p161_p3), 1046534   ;;  %vm477_vm7 = vcmask (!%p161_p3), 1047559  }
   0xc   : > { %v250_v3 = vunpack.c.0.s8 (!%p161_p3), %v249_v1  ;;  %vm485_vm8 = vsmask.f32 (!%p161_p3), 256 }
   0xd   : > { %vm486_vm9 = vmand (!%p161_p3), %vm310_vm0, %vm485_vm8 }
   0xe   : > { %v253_v8 = vsub.s32 (!%p161_p3), %v250_v3, %v252_v4 }
  0x10   : > { %s835_s10 = smov (!%p203_p5, %s705_s10), 1  ;;  %s837_s16 = smov (!%p205_p6, %s615_s16), 17 }
  0x11   : > { %s635_s18 = smul.u32 54, %s835_s10  ;;  %s839_s17 = smov (!%p217_p7, %s214_s17), 17 }
  0x12   : > { %s634_s19 = smul.u32 3, %s837_s16  ;;  %s841_s9 = smov (!%p228_p8, %s701_s9), 8 }
  0x13   : > { %s636_s22 = smul.u32 3, %s839_s17  ;;  %s619_s4 = sshll.u32 %s841_s9, 1 }
  0x14   : > { %s209_s20 = sadd.s32 %s635_s18, %s634_s19  ;;  %s637_s3 = smul.u32 18, %s835_s10 }
  0x15   : > { %s616_s21 = sshll.u32 %s209_s20, 2  ;;  %s221_s26 = sadd.s32 %s636_s22, %s635_s18 }
  0x16   : > { %s211_s25 = scalar_lea.vmem %s821_s0, %s616_s21  ;;  %s618_s27 = sshll.u32 %s221_s26, 2 }
  0x17   : > { %v236_v5 = vld [vmem:[%s211_s25] sm:$0xf]  ;;  %v237_v6 = vld [vmem:[%s211_s25 + $0x4] sm:$0xf]  ;;  %s223_s30 = scalar_lea.vmem %s822_s1, %s618_s27  ;;  %v238_v7 = vld [vmem:[%s211_s25 + $0x8] sm:$0x1]  ;;  %s232_s5 = sadd.s32 %s637_s3, %s619_s4 }
  0x18   : > { %v239_v9 = vld [vmem:[%s223_s30] sm:$0xf]  ;;  %v240_v10 = vld [vmem:[%s223_s30 + $0x4] sm:$0xf]  ;;  %v241_v11 = vld [vmem:[%s223_s30 + $0x8] sm:$0x1] }
  0x19   : > { %v242_v12 = vmax.bf16 %v239_v9, %v236_v5  ;;  %v243_v13 = vmax.bf16 %v240_v10, %v237_v6  ;;  %v244_v14 = vmax.bf16 %v241_v11, %v238_v7  ;;  %s620_s6 = sshll.u32 %s232_s5, 2 }
  0x1a   : > { %s234_s9 = scalar_lea.vmem %s823_s2, %s620_s6 }
  0x1b   : > { %v254_v15 = vrot.slane %v242_v12, %v253_v8  ;;  %v278_v16 = vrot.slane %v243_v13, %v253_v8  ;;  %v302_v17 = vrot.slane %v244_v14, %v253_v8 }
  0x1d   : > { %v255_v18 = vcombine.high %v254_v15, %v254_v15  ;;  %v262_v19 = vrot.slane %v254_v15, %v253_v8  ;;  %v279_v20 = vcombine.high %v278_v16, %v278_v16  ;;  %v286_v21 = vrot.slane %v278_v16, %v253_v8 }
  0x1e   : > { %v309_v22 = vrot.slane %v302_v17, %v253_v8 }
  0x1f   : > { %v269_v23 = vrot.slane %v255_v18, %v253_v8  ;;  %v270_v24 = vcombine.high %v262_v19, %v262_v19  ;;  %v293_v25 = vrot.slane %v279_v20, %v253_v8  ;;  %v294_v26 = vcombine.high %v286_v21, %v286_v21 }
  0x20   : > { %v313_v27 = vsel %vm310_vm0, %v262_v19, 4286644096  ;;  %v365_v28 = vsel %vm310_vm0, %v286_v21, 4286644096  ;;  %v780_v29 = vsel %vm310_vm0, %v309_v22, 4286644096 }
  0x21   : > { %v271_v30 = vcombine.high %v269_v23, %v269_v23  ;;  %v295_v31 = vcombine.high %v293_v25, %v293_v25  ;;  %v315_v32 = vunpack.i.l.bf16 %v313_v27  ;;  %v316_v33 = vunpack.i.h.bf16 %v313_v27 }
  0x22   : > { %v326_v34 = vsel %vm310_vm0, %v269_v23, 4286644096  ;;  %v339_v35 = vsel %vm310_vm0, %v270_v24, 4286644096  ;;  %v367_v36 = vunpack.i.l.bf16 %v365_v28  ;;  %v368_v37 = vunpack.i.h.bf16 %v365_v28 }
  0x23   : > { %v317_v38 = vmax.f32 %v315_v32, %v316_v33  ;;  %v328_v39 = vunpack.i.l.bf16 %v326_v34  ;;  %v329_v40 = vunpack.i.h.bf16 %v326_v34  ;;  %v341_v41 = vunpack.i.l.bf16 %v339_v35 }
  0x24   : > { %v342_v42 = vunpack.i.h.bf16 %v339_v35  ;;  %v352_v43 = vsel %vm310_vm0, %v271_v30, 4286644096  ;;  %v369_v44 = vmax.f32 %v367_v36, %v368_v37  ;;  %v378_v45 = vsel %vm310_vm0, %v293_v25, 4286644096 }
  0x25   : > { %v318_v46 = vrot.slane %v317_v38, 4  ;;  %v330_v47 = vmax.f32 %v328_v39, %v329_v40  ;;  %v354_v48 = vunpack.i.l.bf16 %v352_v43  ;;  %v355_v49 = vunpack.i.h.bf16 %v352_v43 }
  0x26   : > { %v343_v50 = vmax.f32 %v341_v41, %v342_v42  ;;  %v370_v51 = vrot.slane %v369_v44, 4  ;;  %v380_v52 = vunpack.i.l.bf16 %v378_v45  ;;  %v381_v53 = vunpack.i.h.bf16 %v378_v45 }
  0x27   : > { %v319_v54 = vmax.f32 %v317_v38, %v318_v46  ;;  %v331_v55 = vrot.slane %v330_v47, 4  ;;  %v356_v56 = vmax.f32 %v354_v48, %v355_v49  ;;  %v391_v57 = vsel %vm310_vm0, %v294_v26, 4286644096 }
  0x28   : > { %v344_v58 = vrot.slane %v343_v50, 4  ;;  %v371_v59 = vmax.f32 %v369_v44, %v370_v51  ;;  %v382_v60 = vmax.f32 %v380_v52, %v381_v53  ;;  %v393_v61 = vunpack.i.l.bf16 %v391_v57 }
  0x29   : > { %v320_v62 = vrot.slane %v319_v54, 2  ;;  %v332_v63 = vmax.f32 %v330_v47, %v331_v55  ;;  %v357_v0 = vrot.slane %v356_v56, 4  ;;  %v394_v1 = vunpack.i.h.bf16 %v391_v57 }
  0x2a   : > { %v345_v2 = vmax.f32 %v343_v50, %v344_v58  ;;  %v372_v3 = vrot.slane %v371_v59, 2  ;;  %v383_v4 = vrot.slane %v382_v60, 4  ;;  %v404_v5 = vsel %vm310_vm0, %v295_v31, 4286644096 }
  0x2b   : > { %v321_v6 = vmax.f32 %v319_v54, %v320_v62  ;;  %v333_v7 = vrot.slane %v332_v63, 2  ;;  %v358_v8 = vmax.f32 %v356_v56, %v357_v0  ;;  %v395_v9 = vmax.f32 %v393_v61, %v394_v1 }
  0x2c   : > { %v346_v10 = vrot.slane %v345_v2, 2  ;;  %v373_v11 = vmax.f32 %v371_v59, %v372_v3  ;;  %v384_v12 = vmax.f32 %v382_v60, %v383_v4  ;;  %v406_v13 = vunpack.i.l.bf16 %v404_v5 }
  0x2d   : > { %v322_v14 = vrot.slane %v321_v6, 1  ;;  %v334_v15 = vmax.f32 %v332_v63, %v333_v7  ;;  %v359_v16 = vrot.slane %v358_v8, 2  ;;  %v396_v17 = vrot.slane %v395_v9, 4 }
  0x2e   : > { %v347_v18 = vmax.f32 %v345_v2, %v346_v10  ;;  %v374_v19 = vrot.slane %v373_v11, 1  ;;  %v385_v20 = vrot.slane %v384_v12, 2  ;;  %v407_v21 = vunpack.i.h.bf16 %v404_v5 }
  0x2f   : > { %v323_v22 = vmax.f32 %v321_v6, %v322_v14  ;;  %v335_v23 = vrot.slane %v334_v15, 1  ;;  %v360_v24 = vmax.f32 %v358_v8, %v359_v16  ;;  %v397_v25 = vmax.f32 %v395_v9, %v396_v17 }
  0x30   : > { %v348_v26 = vrot.slane %v347_v18, 1  ;;  %v375_v27 = vmax.f32 %v373_v11, %v374_v19  ;;  %v386_v28 = vmax.f32 %v384_v12, %v385_v20  ;;  %v408_v30 = vmax.f32 %v406_v13, %v407_v21 }
  0x31   : > { %v324_v31 = vpack.i.bf16 %v323_v22, %v323_v22  ;;  %v336_v32 = vmax.f32 %v334_v15, %v335_v23  ;;  %v361_v33 = vrot.slane %v360_v24, 1  ;;  %v398_v34 = vrot.slane %v397_v25, 2 }
  0x32   : > { %v349_v35 = vmax.f32 %v347_v18, %v348_v26  ;;  %v376_v36 = vpack.i.bf16 %v375_v27, %v375_v27  ;;  %v387_v37 = vrot.slane %v386_v28, 1  ;;  %v409_v38 = vrot.slane %v408_v30, 4 }
  0x33   : > { %v337_v39 = vpack.i.bf16 %v336_v32, %v336_v32  ;;  %v362_v40 = vmax.f32 %v360_v24, %v361_v33  ;;  %v399_v41 = vmax.f32 %v397_v25, %v398_v34  ;;  %v419_v42 = vunpack.i.l.bf16 %v780_v29  ;;  %v487_v24 = vld [vmem:[%s234_s9 + $0x4] sm:$0x1] }
  0x34   : > { %v350_v43 = vpack.i.bf16 %v349_v35, %v349_v35  ;;  %v388_v44 = vmax.f32 %v386_v28, %v387_v37  ;;  %v410_v45 = vmax.f32 %v408_v30, %v409_v38  ;;  %v420_v46 = vunpack.i.h.bf16 %v780_v29 }
  0x35   : > { %v363_v47 = vpack.i.bf16 %v362_v40, %v362_v40  ;;  %v400_v48 = vrot.slane %v399_v41, 1  ;;  %v621_v49 = vcombine.low %v324_v31, %v324_v31  ;;  %v622_v50 = vcombine.low %v337_v39, %v337_v39 }
  0x36   : > { %v389_v51 = vpack.i.bf16 %v388_v44, %v388_v44  ;;  %v411_v52 = vrot.slane %v410_v45, 2  ;;  %v421_v53 = vmax.f32 %v419_v42, %v420_v46  ;;  %v623_v54 = vcombine.low %v350_v43, %v350_v43 }
  0x37   : > { %v401_v55 = vmax.f32 %v399_v41, %v400_v48  ;;  %v624_v56 = vcombine.low %v363_v47, %v363_v47  ;;  %v625_v57 = vcombine.low %v376_v36, %v376_v36  ;;  %v456_v58 = vunpack.c.l.b16 %v621_v49 }
  0x38   : > { %v412_v59 = vmax.f32 %v410_v45, %v411_v52  ;;  %v422_v60 = vrot.slane %v421_v53, 4  ;;  %v626_v29 = vcombine.low %v389_v51, %v389_v51  ;;  %v457_v61 = vunpack.c.l.b16 %v622_v50 }
  0x39   : > { %v402_v62 = vpack.i.bf16 %v401_v55, %v401_v55  ;;  %v458_v63 = vunpack.c.l.b16 %v623_v54  ;;  %v459_v0 = vunpack.c.l.b16 %v624_v56  ;;  %v460_v1 = vunpack.c.l.b16 %v625_v57 }
  0x3a   : > { %v413_v2 = vrot.slane %v412_v59, 1  ;;  %v423_v3 = vmax.f32 %v421_v53, %v422_v60  ;;  %v461_v4 = vunpack.c.l.b16 %v626_v29  ;;  %v466_v5 = vsel %vm465_vm1, %v457_v61, %v456_v58 }
  0x3b   : > { %v627_v6 = vcombine.low %v402_v62, %v402_v62  ;;  %v468_v7 = vsel %vm467_vm2, %v458_v63, %v466_v5 }
  0x3c   : > { %v414_v8 = vmax.f32 %v412_v59, %v413_v2  ;;  %v424_v9 = vrot.slane %v423_v3, 2  ;;  %v470_v10 = vsel %vm469_vm3, %v459_v0, %v468_v7 }
  0x3d   : > { %v462_v11 = vunpack.c.l.b16 %v627_v6  ;;  %v472_v12 = vsel %vm471_vm4, %v460_v1, %v470_v10 }
  0x3e   : > { %v415_v13 = vpack.i.bf16 %v414_v8, %v414_v8  ;;  %v425_v14 = vmax.f32 %v423_v3, %v424_v9  ;;  %v474_v15 = vsel %vm473_vm5, %v461_v4, %v472_v12 }
  0x3f   : > { %v476_v18 = vsel %vm475_vm6, %v462_v11, %v474_v15 }
  0x40   : > { %v426_v16 = vrot.slane %v425_v14, 1  ;;  %v628_v17 = vcombine.low %v415_v13, %v415_v13 }
  0x42   : > { %v427_v19 = vmax.f32 %v425_v14, %v426_v16  ;;  %v463_v20 = vunpack.c.l.b16 %v628_v17 }
  0x44   : > { %v428_v21 = vpack.i.bf16 %v427_v19, %v427_v19  ;;  %v478_v22 = vsel %vm477_vm7, %v463_v20, %v476_v18 }
  0x45   : > { %v479_v23 = vpack.c.b16 %v478_v22, %v478_v22 }
  0x46   : > { %v633_v25 = vcombine.low %v428_v21, %v428_v21 }
  0x47   : > { %483 = vst [vmem:[%s234_s9] sm:$0xf] %v479_v23 }
  0x48   : > { %v488_v26 = vsel %vm486_vm9, %v633_v25, %v487_v24 }
  0x49   : > { %489 = vst [vmem:[%s234_s9 + $0x4] sm:$0x1] %v488_v26 }
  0x4a PF: > { %s12_s13 = sadd.s32 1, %s717_s13   ;;  %s824_s9 = smov %s709_s11 }
  0x4b   : > { %p9_p9 = scmp.ge.s32.totalorder %s12_s13, 20   ;;  %s825_s10 = smov %s713_s12 }
  0x4c   : > { %s826_s11 = smov %s829_s14  ;;  %s827_s12 = smov %s833_s15 }
  0x4d   :  { %11 = sbr.rel (!%p9_p9) target bundleno = 3 (0x3), region = 61 }

// kernel: forward.9
= control target key start
LH: loop header
LB: loop body
LE: loop exit
PB: predicated region body
PF: predicated region fallthrough
CT: control target
= control target key end

     0   :  { %8 = vsyncpa [#allocation3], 0  ;;  %s1201_s0 = inlined_call_operand.vmem [shape: bf16[672,128], index: 0, kind: input, shape index: {}]   ;;  %s1202_s1 = inlined_call_operand.hbm [shape: bf16[128,128], index: 1, kind: input, shape index: {}]   ;;  %s1203_s2 = inlined_call_operand.hbm [shape: f32[1,128], index: 2, kind: input, shape index: {}]   ;;  %s1204_s3 = inlined_call_operand.vmem [shape: bf16[672,128], index: 3, kind: output, shape index: {}]  }
   0x1   :  { %9 = vsyncpa [#allocation5], 0  ;;  %s1017_s12 = smov 0   ;;  %s1019_s13 = smov 0  }
   0x2   :  { %s1021_s14 = smov 0  }
   0x3 LB: > { %s666_s15 = sadd.s32 4294967295, %s989_s14   ;;  %s27_s16 = sadd.s32 1, %s985_s13  ;;  %s989_s14 = sphi %s1021_s14, %s15_s14   ;;  %s985_s13 = sphi %s1019_s13, %s1214_s13   ;;  %s981_s12 = sphi %s1017_s12, %s1213_s12  }
   0x4   : > { %p29_p0 = scmp.ge.s32.totalorder %s27_s16, 6  ;;  %p668_p1 = scmp.ge.s32.totalorder %s989_s14, 1 }
   0x5   : > { %p138_p2 = scmp.lt.s32.totalorder %s989_s14, 7  ;;  %p1042_p4 = scmp.eq.s32.totalorder %s666_s15, 0 }
   0x6   : > { %s1216_s16 = smov (%p29_p0, %s27_s16), 0  ;;  %s991_s19 = smov [#allocation2]  }
   0x7   : > { %p1038_p3 = pnand %p668_p1, %p138_p2  ;;  %s152_s20 = sshll.u32 %s991_s19, 4  ;;  %s153_s20 = int_to_ptr.vmem [resolvable:$true] %s152_s20 }
   0x8   : > { %s1209_s18 = scalar_select %p1042_p4, 1, 0 }
   0x9   : > { %s1208_s17 = scalar_select %p1038_p3, 1, 0 }
   0xa   : > { %p847_p5 = pneg %p1038_p3  ;;  %s992_s22 = smov [#allocation4]  }
   0xb   : > { %s168_s23 = sshll.u32 %s992_s22, 4  ;;  %s903_s26 = scalar_lea.hbm %s1202_s1, 1024  ;;  %s1054_s23 = int_to_ptr.vmem [resolvable:$true] %s168_s23 }
   0xc   : > { %p1050_p6 = pnand %p1042_p4, %p847_p5  ;;  %p904_p7 = scmp.ne.s32.totalorder %s1202_s1, %s903_s26 }
   0xd   : > { %p910_p11 = scmp.lt.u32.totalorder %s903_s26, %s1202_s1 }
   0xe   : > { %p905_p8 = pneg %p1050_p6 }
  0x10   : > { %p906_p9 = pnand %p905_p8, %p904_p7 }
  0x12   : > { %p907_p10 = pneg %p906_p9 }
  0x14   : > { %p912_p12 = pnand %p910_p11, %p907_p10 }
  0x16   : > { %915 = shalt.err (!%p912_p12)
}
  0x17   : > { %s916_s4 = scalar_lea.vmem %s153_s20, 1024  ;;  %p924_p2 = scmp.lt.s32.totalorder %s153_s20, %s153_s20 }
  0x18   : > { %p917_p13 = scmp.ne.s32.totalorder %s153_s20, %s916_s4  ;;  %p925_p5 = scmp.lt.s32.totalorder %s916_s4, %s916_s4 }
  0x1a   : > { %p919_p0 = pnand %p917_p13, %p905_p8  ;;  %p926_p4 = por %p925_p5, %p924_p2 }
  0x1c   : > { %p920_p1 = pneg %p919_p0 }
  0x1e   : > { %p927_p3 = pnand %p926_p4, %p920_p1 }
  0x20   : > { %930 = shalt.err (!%p927_p3)
}
  0x21   : > { %s993_s5 = smov 64   ;;  %s994_s6 = smov 4  }
  0x22   : > { %850 = dma.hbm_to_vmem [thread:$0]  (!%p1050_p6), %s1202_s1, 1024, %s153_s20, [#allocation3], %s993_s5, %s993_s5, %s994_s6  }
  0x23   : > { %s931_s11 = scalar_lea.hbm %s1203_s2, 16 }
  0x24   : > { %p932_p7 = scmp.ne.s32.totalorder %s1203_s2, %s931_s11  ;;  %p938_p9 = scmp.lt.u32.totalorder %s931_s11, %s1203_s2 }
  0x26   : > { %p934_p3 = pnand %p932_p7, %p905_p8 }
  0x28   : > { %p935_p4 = pneg %p934_p3 }
  0x2a   : > { %p940_p10 = pnand %p938_p9, %p935_p4 }
  0x2c   : > { %943 = shalt.err (!%p940_p10)
}
  0x2d   : > { %s944_s20 = scalar_lea.vmem %s1054_s23, 16  ;;  %s951_s25 = scalar_lea.vmem %s1054_s23, 32 }
  0x2e   : > { %p945_p11 = scmp.ne.s32.totalorder %s1054_s23, %s944_s20  ;;  %p952_p0 = scmp.lt.s32.totalorder %s1054_s23, %s1054_s23 }
  0x2f   : > { %p953_p1 = scmp.lt.s32.totalorder %s951_s25, %s944_s20 }
  0x30   : > { %p947_p12 = pnand %p945_p11, %p905_p8 }
  0x31   : > { %p954_p2 = por %p953_p1, %p952_p0 }
  0x32   : > { %p948_p13 = pneg %p947_p12 }
  0x34   : > { %p955_p5 = pnand %p954_p2, %p948_p13 }
  0x36   : > { %958 = shalt.err (!%p955_p5)
}
  0x37   : > { %853 = dma.hbm_to_vmem [thread:$0]  (!%p1050_p6), %s1203_s2, 16, %s1054_s23, [#allocation5]  }
  0x38   : > { %p1211_p7 = scmp.ne.s32.totalorder %s1208_s17, 0 }
  0x39   : > { %p1212_p8 = scmp.ne.s32.totalorder (!%p1211_p7), %s1209_s18, 0 }
  0x3a   : > { %190 = sbr.rel (%p1211_p7) target bundleno = 348 (0x15c), region = 32 }
  0x41   : > { %972 = dma.done.wait (%p1212_p8), [#allocation3], 1024  }
  0x42   : > { %974 = vsyncadd (%p1212_p8), [#allocation3], 4294966272 }
  0x43   : > { %976 = dma.done.wait (%p1212_p8), [#allocation5], 16  }
  0x44   : > { %978 = vsyncadd (%p1212_p8), [#allocation5], 4294967280  ;;  %s221_s21 = smul.u32 14, %s981_s12  ;;  %v995_v0 = vmov 0.0   ;;  %vm996_vm0 = vmmov 0   ;;  %v888_v1 = vld [vmem:[#allocation2] sm:$0xff]  }
  0x45   : > { %779 = vmatprep.subr.bf16.mxu0 %v995_v0  ;;  %823 = vmatprep.subr.bf16.mxu1 %v995_v0  ;;  %v889_v2 = vld [vmem:[#allocation2 + $0x8] sm:$0xff]   ;;  %v890_v3 = vld [vmem:[#allocation2 + $0x10] sm:$0xff]   ;;  %v891_v4 = vld [vmem:[#allocation2 + $0x18] sm:$0xff]  }
  0x46   : > { %795 = vmatprep.mubr.msk.bf16.mxu0 %vm996_vm0, %v995_v0  ;;  %811 = vmatprep.mubr.msk.bf16.mxu1 %vm996_vm0, %v995_v0  ;;  %p222_p6 = scmp.lt.s32.totalorder %s221_s21, 83  ;;  %v892_v5 = vld [vmem:[#allocation2 + $0x20] sm:$0xff]   ;;  %v893_v6 = vld [vmem:[#allocation2 + $0x28] sm:$0xff]   ;;  %v894_v7 = vld [vmem:[#allocation2 + $0x30] sm:$0xff]  }
  0x47   : > { %780 = vmatpush3.bf16.msra.mxu0 %v888_v1  ;;  %831 = vmatpush3.bf16.msra.mxu1 %v888_v1  ;;  %v895_v8 = vld [vmem:[#allocation2 + $0x38] sm:$0xff]   ;;  %v1162_v16 = vld [vmem:[#allocation4] ss:$0 sm:$0xff] }
  0x48   : > { %s1218_s21 = smov (!%p222_p6, %s221_s21), 83  ;;  %781 = vmatprep.subr.bf16.mxu0 %v995_v0  ;;  %824 = vmatprep.subr.bf16.mxu1 %v995_v0 }
  0x49   : > { %s675_s12 = sshll.u32 %s1218_s21, 2 }
  0x4a   : > { %s1133_s23 = scalar_lea.vmem %s1201_s0, %s675_s12  ;;  %s1173_s30 = scalar_lea.vmem %s1204_s3, %s675_s12 }
  0x4b   : > { %782 = vmatpush3.bf16.msra.mxu0 %v889_v2  ;;  %832 = vmatpush3.bf16.msra.mxu1 %v889_v2  ;;  %v896_v9 = vld [vmem:[%s1133_s23] sm:$0xff]   ;;  %v898_v11 = vld [vmem:[%s1133_s23 + $0x8] sm:$0xff]   ;;  %v900_v13 = vld [vmem:[%s1133_s23 + $0x10] sm:$0xff]  }
  0x4c   : > { %783 = vmatprep.subr.bf16.mxu0 %v995_v0  ;;  %825 = vmatprep.subr.bf16.mxu1 %v995_v0  ;;  %v897_v10 = vld [vmem:[%s1133_s23 + $0x20] sm:$0xff]   ;;  %v899_v12 = vld [vmem:[%s1133_s23 + $0x28] sm:$0xff]   ;;  %v901_v14 = vld [vmem:[%s1133_s23 + $0x30] sm:$0xff]  }
  0x4d   : > { %v902_v15 = vld [vmem:[%s1133_s23 + $0x18] sm:$0xff]  }
  0x4f   : > { %784 = vmatpush3.bf16.msra.mxu0 %v890_v3  ;;  %833 = vmatpush3.bf16.msra.mxu1 %v890_v3 }
  0x50   : > { %785 = vmatprep.subr.bf16.mxu0 %v995_v0  ;;  %826 = vmatprep.subr.bf16.mxu1 %v995_v0 }
  0x53   : > { %786 = vmatpush3.bf16.msra.mxu0 %v891_v4  ;;  %834 = vmatpush3.bf16.msra.mxu1 %v891_v4 }
  0x54   : > { %787 = vmatprep.subr.bf16.mxu0 %v995_v0  ;;  %827 = vmatprep.subr.bf16.mxu1 %v995_v0 }
  0x57   : > { %788 = vmatpush3.bf16.msra.mxu0 %v892_v5  ;;  %835 = vmatpush3.bf16.msra.mxu1 %v892_v5 }
  0x58   : > { %789 = vmatprep.subr.bf16.mxu0 %v995_v0  ;;  %828 = vmatprep.subr.bf16.mxu1 %v995_v0 }
  0x5b   : > { %790 = vmatpush3.bf16.msra.mxu0 %v893_v6  ;;  %836 = vmatpush3.bf16.msra.mxu1 %v893_v6 }
  0x5c   : > { %791 = vmatprep.subr.bf16.mxu0 %v995_v0  ;;  %829 = vmatprep.subr.bf16.mxu1 %v995_v0 }
  0x5f   : > { %792 = vmatpush3.bf16.msra.mxu0 %v894_v7  ;;  %837 = vmatpush3.bf16.msra.mxu1 %v894_v7 }
  0x60   : > { %793 = vmatprep.subr.bf16.mxu0 %v995_v0  ;;  %830 = vmatprep.subr.bf16.mxu1 %v995_v0 }
  0x63   : > { %794 = vmatpush3.bf16.msra.mxu0 %v895_v8  ;;  %838 = vmatpush3.bf16.msra.mxu1 %v895_v8 }
  0x66   : > { %796 = vmatmul.mubr.bf16.vlgmr.msra.gmra.mrb[0].mxu0 %v896_v9  ;;  %812 = vmatmul.mubr.bf16.vlgmr.msra.gmra.mrb[0].mxu1 %v897_v10 }
  0x67   : > { %799 = vmatprep.mubr.msk.bf16.mxu0 %vm996_vm0, %v995_v0  ;;  %815 = vmatprep.mubr.msk.bf16.mxu1 %vm996_vm0, %v995_v0 }
  0x6e   : > { %800 = vmatmul.mubr.bf16.gmra.mrb[4].mxu0 %v898_v11  ;;  %816 = vmatmul.mubr.bf16.gmra.mrb[4].mxu1 %v899_v12 }
  0x6f   : > { %803 = vmatprep.mubr.msk.bf16.mxu0 %vm996_vm0, %v995_v0  ;;  %819 = vmatprep.mubr.msk.bf16.mxu1 %vm996_vm0, %v995_v0 }
  0x76   : > { %804 = vmatmul.mubr.bf16.gmra.mrb[8].mxu0 %v900_v13  ;;  %820 = vmatmul.mubr.bf16.gmra.mrb[8].mxu1 %v901_v14 }
  0x77   : > { %807 = vmatprep.mubr.msk.bf16.mxu0 %vm996_vm0, %v995_v0 }
  0x7e   : > { %808 = vmatmul.mubr.bf16.gmra.mrb[12].mxu0 %v902_v15 }
 0x139   : > { %v398_v17 = vpop.f32.mrb[0].mxu0  ;;  %v430_v18 = vpop.f32.mrb[0].mxu1 }
 0x13a   : > { %v399_v19 = vadd.f32 %v1162_v16, %v398_v17  ;;  %v797_v20 = vpop.f32.mrb[1].mxu0  ;;  %v431_v21 = vadd.f32 %v1162_v16, %v430_v18  ;;  %v813_v22 = vpop.f32.mrb[1].mxu1 }
 0x13b   : > { %v401_v23 = vpop.f32.mrb[2].mxu0  ;;  %v433_v24 = vpop.f32.mrb[2].mxu1 }
 0x13c   : > { %v467_v25 = vmul.f32 0.01, %v399_v19  ;;  %v402_v26 = vadd.f32 %v1162_v16, %v401_v23  ;;  %v798_v27 = vpop.f32.mrb[3].mxu0  ;;  %vm461_vm1 = vcmp.ge.f32.partialorder %v431_v21, 0.0  ;;  %v814_v28 = vpop.f32.mrb[3].mxu1  ;;  %vm453_vm2 = vcmp.ge.f32.partialorder %v399_v19, 0.0 }
 0x13d   : > { %v475_v29 = vmul.f32 0.01, %v431_v21  ;;  %v434_v30 = vadd.f32 %v1162_v16, %v433_v24 }
 0x13e   : > { %vm454_vm3 = vcmp.ge.f32.partialorder %v402_v26, 0.0  ;;  %v468_v31 = vmul.f32 0.01, %v402_v26  ;;  %v481_v34 = vsel %vm453_vm2, %v399_v19, %v467_v25 }
 0x13f   : > { %v489_v32 = vsel %vm461_vm1, %v431_v21, %v475_v29  ;;  %vm462_vm4 = vcmp.ge.f32.partialorder %v434_v30, 0.0  ;;  %v476_v33 = vmul.f32 0.01, %v434_v30 }
 0x140   : > { %v482_v35 = vsel %vm454_vm3, %v402_v26, %v468_v31 }
 0x141   : > { %v726_v36 = vpack.c.bf16 %v482_v35, %v481_v34  ;;  %v490_v37 = vsel %vm462_vm4, %v434_v30, %v476_v33  ;;  %v406_v38 = vpop.f32.mrb[4].mxu0  ;;  %v438_v39 = vpop.f32.mrb[4].mxu1 }
 0x142   : > { %v746_v40 = vpack.c.bf16 %v490_v37, %v489_v32  ;;  %v407_v41 = vadd.f32 %v1162_v16, %v406_v38  ;;  %v801_v42 = vpop.f32.mrb[5].mxu0  ;;  %v439_v43 = vadd.f32 %v1162_v16, %v438_v39  ;;  %v817_v44 = vpop.f32.mrb[5].mxu1 }
 0x143   : > { %727 = vst [vmem:[%s1173_s30] sm:$0xff] %v726_v36   ;;  %v409_v45 = vpop.f32.mrb[6].mxu0  ;;  %v441_v46 = vpop.f32.mrb[6].mxu1 }
 0x144   : > { %761 = vst [vmem:[%s1173_s30 + $0x20] sm:$0xff] %v746_v40   ;;  %v469_v47 = vmul.f32 0.01, %v407_v41  ;;  %v410_v48 = vadd.f32 %v1162_v16, %v409_v45  ;;  %v802_v49 = vpop.f32.mrb[7].mxu0  ;;  %vm463_vm5 = vcmp.ge.f32.partialorder %v439_v43, 0.0  ;;  %v818_v50 = vpop.f32.mrb[7].mxu1  ;;  %v442_v52 = vadd.f32 %v1162_v16, %v441_v46 }
 0x145   : > { %vm455_vm6 = vcmp.ge.f32.partialorder %v407_v41, 0.0  ;;  %v477_v51 = vmul.f32 0.01, %v439_v43 }
 0x146   : > { %vm456_vm7 = vcmp.ge.f32.partialorder %v410_v48, 0.0  ;;  %v470_v53 = vmul.f32 0.01, %v410_v48  ;;  %vm464_vm8 = vcmp.ge.f32.partialorder %v442_v52, 0.0  ;;  %v478_v55 = vmul.f32 0.01, %v442_v52 }
 0x147   : > { %v491_v54 = vsel %vm463_vm5, %v439_v43, %v477_v51  ;;  %v483_v56 = vsel %vm455_vm6, %v407_v41, %v469_v47 }
 0x148   : > { %v484_v57 = vsel %vm456_vm7, %v410_v48, %v470_v53  ;;  %v492_v59 = vsel %vm464_vm8, %v442_v52, %v478_v55 }
 0x149   : > { %v731_v58 = vpack.c.bf16 %v484_v57, %v483_v56  ;;  %v414_v60 = vpop.f32.mrb[8].mxu0  ;;  %v446_v61 = vpop.f32.mrb[8].mxu1  ;;  %v751_v62 = vpack.c.bf16 %v492_v59, %v491_v54 }
 0x14a   : > { %v415_v63 = vadd.f32 %v1162_v16, %v414_v60  ;;  %v805_v0 = vpop.f32.mrb[9].mxu0  ;;  %v447_v1 = vadd.f32 %v1162_v16, %v446_v61  ;;  %v821_v2 = vpop.f32.mrb[9].mxu1 }
 0x14b   : > { %758 = vst [vmem:[%s1173_s30 + $0x8] sm:$0xff] %v731_v58   ;;  %v417_v3 = vpop.f32.mrb[10].mxu0  ;;  %v449_v4 = vpop.f32.mrb[10].mxu1  ;;  %762 = vst [vmem:[%s1173_s30 + $0x28] sm:$0xff] %v751_v62  }
 0x14c   : > { %v471_v5 = vmul.f32 0.01, %v415_v63  ;;  %v418_v6 = vadd.f32 %v1162_v16, %v417_v3  ;;  %v806_v7 = vpop.f32.mrb[11].mxu0  ;;  %vm465_vm9 = vcmp.ge.f32.partialorder %v447_v1, 0.0  ;;  %v822_v8 = vpop.f32.mrb[11].mxu1  ;;  %vm457_vm10 = vcmp.ge.f32.partialorder %v415_v63, 0.0 }
 0x14d   : > { %v479_v9 = vmul.f32 0.01, %v447_v1  ;;  %v450_v10 = vadd.f32 %v1162_v16, %v449_v4 }
 0x14e   : > { %vm458_vm11 = vcmp.ge.f32.partialorder %v418_v6, 0.0  ;;  %v472_v11 = vmul.f32 0.01, %v418_v6  ;;  %v485_v14 = vsel %vm457_vm10, %v415_v63, %v471_v5 }
 0x14f   : > { %v493_v12 = vsel %vm465_vm9, %v447_v1, %v479_v9  ;;  %vm466_vm12 = vcmp.ge.f32.partialorder %v450_v10, 0.0  ;;  %v480_v13 = vmul.f32 0.01, %v450_v10 }
 0x150   : > { %v486_v15 = vsel %vm458_vm11, %v418_v6, %v472_v11 }
 0x151   : > { %v736_v17 = vpack.c.bf16 %v486_v15, %v485_v14  ;;  %v494_v18 = vsel %vm466_vm12, %v450_v10, %v480_v13  ;;  %v422_v19 = vpop.f32.mrb[12].mxu0 }
 0x152   : > { %v756_v20 = vpack.c.bf16 %v494_v18, %v493_v12  ;;  %v423_v21 = vadd.f32 %v1162_v16, %v422_v19  ;;  %v809_v22 = vpop.f32.mrb[13].mxu0 }
 0x153   : > { %759 = vst [vmem:[%s1173_s30 + $0x10] sm:$0xff] %v736_v17   ;;  %v425_v23 = vpop.f32.mrb[14].mxu0 }
 0x154   : > { %763 = vst [vmem:[%s1173_s30 + $0x30] sm:$0xff] %v756_v20   ;;  %v473_v24 = vmul.f32 0.01, %v423_v21  ;;  %v426_v25 = vadd.f32 %v1162_v16, %v425_v23  ;;  %v810_v26 = vpop.f32.mrb[15].mxu0  ;;  %vm459_vm13 = vcmp.ge.f32.partialorder %v423_v21, 0.0 }
 0x156   : > { %vm460_vm14 = vcmp.ge.f32.partialorder %v426_v25, 0.0  ;;  %v474_v27 = vmul.f32 0.01, %v426_v25  ;;  %v487_v28 = vsel %vm459_vm13, %v423_v21, %v473_v24 }
 0x158   : > { %v488_v29 = vsel %vm460_vm14, %v426_v25, %v474_v27 }
 0x159   : > { %v741_v30 = vpack.c.bf16 %v488_v29, %v487_v28 }
 0x15b   : > { %760 = vst [vmem:[%s1173_s30 + $0x18] sm:$0xff] %v741_v30  }
 0x15c PF: > { %s15_s14 = sadd.s32 1, %s989_s14   ;;  %s1213_s12 = smov %s985_s13 }
 0x15d   : > { %p12_p3 = scmp.ge.s32.totalorder %s15_s14, 8   ;;  %s1214_s13 = smov %s1216_s16 }
 0x15f   :  { %14 = sbr.rel (!%p12_p3) target bundleno = 3 (0x3), region = 73 }
 0x166   :  { %593 = vsyncpa [#allocation3], 1 }
 0x167   :  { %595 = vsyncpa [#allocation3 + $0x1], 1 }
 0x168   :  { %596 = vsyncpa [#allocation5], 1 }

// kernel: forward.12
= control target key start
LH: loop header
LB: loop body
LE: loop exit
PB: predicated region body
PF: predicated region fallthrough
CT: control target
= control target key end

     0   :  { %s638_s9 = smov 0   ;;  %s640_s10 = smov 0   ;;  %s709_s0 = inlined_call_operand.vmem [shape: bf16[2,12,12,128], index: 0, kind: input, shape index: {}, may-alias: {0,1}]   ;;  %s710_s1 = inlined_call_operand.vmem [shape: bf16[2,12,12,128], index: 1, kind: input, shape index: {}, may-alias: {0,1}]   ;;  %s711_s2 = inlined_call_operand.vmem [shape: bf16[2,6,6,128], index: 2, kind: output, shape index: {}]  }
   0x1   :  { %s642_s11 = smov 0   ;;  %s644_s12 = smov 0  }
   0x2   :  { %s646_s13 = smov 0  }
   0x3 LB: > { %s21_s14 = sadd.s32 1, %s612_s11  ;;  %s24_s15 = sadd.s32 1, %s616_s12  ;;  %s620_s13 = sphi %s646_s13, %s12_s13   ;;  %s616_s12 = sphi %s644_s12, %s715_s12   ;;  %s612_s11 = sphi %s642_s11, %s714_s11   ;;  %s608_s10 = sphi %s640_s10, %s713_s10   ;;  %s604_s9 = sphi %s638_s9, %s712_s9  }
   0x4   : > { %p22_p0 = scmp.ge.s32.totalorder %s21_s14, 6  ;;  %p523_p1 = scmp.ge.s32.totalorder %s620_s13, 1 }
   0x5   : > { %p160_p2 = scmp.lt.s32.totalorder %s620_s13, 13 }
   0x6   : > { %s717_s14 = smov (%p22_p0, %s21_s14), 0  ;;  %s719_s15 = smov (!%p22_p0, %s24_s15), %s616_s12 }
   0x7   : > { %p161_p3 = pnand %p523_p1, %p160_p2  ;;  %p26_p4 = scmp.ge.s32.totalorder %s719_s15, 2 }
   0x8   : > { %s524_s16 = sshll.u32 (!%p161_p3), %s604_s9, 1  ;;  %p202_p5 = scmp.lt.s32.totalorder (!%p161_p3), %s608_s10, 1  ;;  %v622_v0 = vmov (!%p161_p3), 1966171168   ;;  %v245_v2 = vlaneseq (!%p161_p3)  ;;  %vm288_vm0 = vcmask (!%p161_p3), 1040384   ;;  %vm392_vm1 = vcmask (!%p161_p3), 1041409  }
   0x9   : > { %s721_s15 = smov (%p26_p4, %s719_s15), 0  ;;  %164 = sbr.rel (%p161_p3) target bundleno = 63 (0x3f), region = 28 }
   0xa   : > { %p204_p6 = scmp.lt.s32.totalorder (!%p161_p3), %s524_s16, 11  ;;  %s213_s17 = sadd.s32 (!%p161_p3), 1, %s524_s16  ;;  %v243_v1 = vunpack.c.l.s4 (!%p161_p3), %v622_v0  ;;  %v246_v4 = vshrl.u32 (!%p161_p3), %v245_v2, 7  ;;  %vm394_vm2 = vcmask (!%p161_p3), 1042434   ;;  %vm396_vm3 = vcmask (!%p161_p3), 1043459  }
   0xb   : > { %p216_p7 = scmp.lt.s32.totalorder (!%p161_p3), %s213_s17, 11  ;;  %p227_p8 = scmp.lt.s32.totalorder (!%p161_p3), %s604_s9, 5  ;;  %vm398_vm4 = vcmask (!%p161_p3), 1044484   ;;  %vm400_vm5 = vcmask (!%p161_p3), 1045509  }
   0xc   : > { %v244_v3 = vunpack.c.0.s8 (!%p161_p3), %v243_v1 }
   0xe   : > { %v247_v7 = vsub.s32 (!%p161_p3), %v244_v3, %v246_v4 }
  0x10   : > { %s723_s10 = smov (!%p202_p5, %s608_s10), 1  ;;  %s725_s16 = smov (!%p204_p6, %s524_s16), 11 }
  0x11   : > { %s539_s18 = smul.u32 24, %s723_s10  ;;  %s525_s19 = sshll.u32 %s725_s16, 1 }
  0x12   : > { %s727_s17 = smov (!%p216_p7, %s213_s17), 11  ;;  %s540_s3 = smul.u32 6, %s723_s10 }
  0x13   : > { %s208_s20 = sadd.s32 %s539_s18, %s525_s19  ;;  %s528_s25 = sshll.u32 %s727_s17, 1 }
  0x14   : > { %s526_s21 = sshll.u32 %s208_s20, 2  ;;  %s220_s26 = sadd.s32 %s539_s18, %s528_s25 }
  0x15   : > { %s210_s24 = scalar_lea.vmem %s709_s0, %s526_s21  ;;  %s529_s27 = sshll.u32 %s220_s26, 2 }
  0x16   : > { %v234_v5 = vld [vmem:[%s210_s24] sm:$0xf]  ;;  %v235_v6 = vld [vmem:[%s210_s24 + $0x4] sm:$0x3]  ;;  %s222_s30 = scalar_lea.vmem %s710_s1, %s529_s27  ;;  %s729_s9 = smov (!%p227_p8, %s604_s9), 5 }
  0x17   : > { %v236_v8 = vld [vmem:[%s222_s30] sm:$0xf]  ;;  %v237_v9 = vld [vmem:[%s222_s30 + $0x4] sm:$0x3]  ;;  %s230_s4 = sadd.s32 %s540_s3, %s729_s9 }
  0x18   : > { %v238_v10 = vmax.bf16 %v236_v8, %v234_v5  ;;  %v239_v11 = vmax.bf16 %v237_v9, %v235_v6  ;;  %s530_s5 = sshll.u32 %s230_s4, 2 }
  0x19   : > { %s232_s8 = scalar_lea.vmem %s711_s2, %s530_s5 }
  0x1a   : > { %v248_v12 = vrot.slane %v238_v10, %v247_v7  ;;  %v272_v13 = vrot.slane %v239_v11, %v247_v7 }
  0x1c   : > { %v249_v14 = vcombine.high %v248_v12, %v248_v12  ;;  %v256_v15 = vrot.slane %v248_v12, %v247_v7  ;;  %v273_v16 = vcombine.high %v272_v13, %v272_v13  ;;  %v280_v17 = vrot.slane %v272_v13, %v247_v7 }
  0x1e   : > { %v263_v18 = vrot.slane %v249_v14, %v247_v7  ;;  %v264_v19 = vcombine.high %v256_v15, %v256_v15  ;;  %v287_v20 = vrot.slane %v273_v16, %v247_v7  ;;  %v291_v21 = vsel %vm288_vm0, %v256_v15, 4286644096 }
  0x1f   : > { %v293_v22 = vunpack.i.l.bf16 %v291_v21  ;;  %v294_v23 = vunpack.i.h.bf16 %v291_v21  ;;  %v343_v24 = vsel %vm288_vm0, %v280_v17, 4286644096 }
  0x20   : > { %v265_v25 = vcombine.high %v263_v18, %v263_v18  ;;  %v304_v26 = vsel %vm288_vm0, %v263_v18, 4286644096  ;;  %v317_v27 = vsel %vm288_vm0, %v264_v19, 4286644096  ;;  %v345_v28 = vunpack.i.l.bf16 %v343_v24 }
  0x21   : > { %v295_v29 = vmax.f32 %v293_v22, %v294_v23  ;;  %v306_v30 = vunpack.i.l.bf16 %v304_v26  ;;  %v307_v31 = vunpack.i.h.bf16 %v304_v26  ;;  %v319_v32 = vunpack.i.l.bf16 %v317_v27 }
  0x22   : > { %v320_v33 = vunpack.i.h.bf16 %v317_v27  ;;  %v330_v34 = vsel %vm288_vm0, %v265_v25, 4286644096  ;;  %v346_v35 = vunpack.i.h.bf16 %v343_v24  ;;  %v356_v36 = vsel %vm288_vm0, %v287_v20, 4286644096 }
  0x23   : > { %v296_v37 = vrot.slane %v295_v29, 4  ;;  %v308_v38 = vmax.f32 %v306_v30, %v307_v31  ;;  %v332_v39 = vunpack.i.l.bf16 %v330_v34  ;;  %v333_v40 = vunpack.i.h.bf16 %v330_v34 }
  0x24   : > { %v321_v41 = vmax.f32 %v319_v32, %v320_v33  ;;  %v347_v42 = vmax.f32 %v345_v28, %v346_v35  ;;  %v358_v43 = vunpack.i.l.bf16 %v356_v36  ;;  %v359_v44 = vunpack.i.h.bf16 %v356_v36 }
  0x25   : > { %v297_v45 = vmax.f32 %v295_v29, %v296_v37  ;;  %v309_v46 = vrot.slane %v308_v38, 4  ;;  %v334_v47 = vmax.f32 %v332_v39, %v333_v40 }
  0x26   : > { %v322_v48 = vrot.slane %v321_v41, 4  ;;  %v348_v49 = vrot.slane %v347_v42, 4  ;;  %v360_v50 = vmax.f32 %v358_v43, %v359_v44 }
  0x27   : > { %v298_v51 = vrot.slane %v297_v45, 2  ;;  %v310_v52 = vmax.f32 %v308_v38, %v309_v46  ;;  %v335_v53 = vrot.slane %v334_v47, 4 }
  0x28   : > { %v323_v54 = vmax.f32 %v321_v41, %v322_v48  ;;  %v349_v55 = vmax.f32 %v347_v42, %v348_v49  ;;  %v361_v56 = vrot.slane %v360_v50, 4 }
  0x29   : > { %v299_v57 = vmax.f32 %v297_v45, %v298_v51  ;;  %v311_v58 = vrot.slane %v310_v52, 2  ;;  %v336_v59 = vmax.f32 %v334_v47, %v335_v53 }
  0x2a   : > { %v324_v60 = vrot.slane %v323_v54, 2  ;;  %v350_v61 = vrot.slane %v349_v55, 2  ;;  %v362_v62 = vmax.f32 %v360_v50, %v361_v56 }
  0x2b   : > { %v300_v63 = vrot.slane %v299_v57, 1  ;;  %v312_v0 = vmax.f32 %v310_v52, %v311_v58  ;;  %v337_v1 = vrot.slane %v336_v59, 2 }
  0x2c   : > { %v325_v2 = vmax.f32 %v323_v54, %v324_v60  ;;  %v351_v3 = vmax.f32 %v349_v55, %v350_v61  ;;  %v363_v4 = vrot.slane %v362_v62, 2 }
  0x2d   : > { %v301_v5 = vmax.f32 %v299_v57, %v300_v63  ;;  %v313_v6 = vrot.slane %v312_v0, 1  ;;  %v338_v7 = vmax.f32 %v336_v59, %v337_v1 }
  0x2e   : > { %v326_v8 = vrot.slane %v325_v2, 1  ;;  %v352_v9 = vrot.slane %v351_v3, 1  ;;  %v364_v10 = vmax.f32 %v362_v62, %v363_v4 }
  0x2f   : > { %v302_v11 = vpack.i.bf16 %v301_v5, %v301_v5  ;;  %v314_v12 = vmax.f32 %v312_v0, %v313_v6  ;;  %v339_v13 = vrot.slane %v338_v7, 1 }
  0x30   : > { %v327_v14 = vmax.f32 %v325_v2, %v326_v8  ;;  %v353_v15 = vmax.f32 %v351_v3, %v352_v9  ;;  %v365_v16 = vrot.slane %v364_v10, 1 }
  0x31   : > { %v315_v17 = vpack.i.bf16 %v314_v12, %v314_v12  ;;  %v340_v18 = vmax.f32 %v338_v7, %v339_v13  ;;  %v531_v19 = vcombine.low %v302_v11, %v302_v11 }
  0x32   : > { %v328_v20 = vpack.i.bf16 %v327_v14, %v327_v14  ;;  %v354_v21 = vpack.i.bf16 %v353_v15, %v353_v15  ;;  %v366_v22 = vmax.f32 %v364_v10, %v365_v16 }
  0x33   : > { %v341_v23 = vpack.i.bf16 %v340_v18, %v340_v18  ;;  %v532_v24 = vcombine.low %v315_v17, %v315_v17  ;;  %v386_v25 = vunpack.c.l.b16 %v531_v19 }
  0x34   : > { %v367_v26 = vpack.i.bf16 %v366_v22, %v366_v22  ;;  %v533_v27 = vcombine.low %v328_v20, %v328_v20  ;;  %v535_v28 = vcombine.low %v354_v21, %v354_v21 }
  0x35   : > { %v534_v29 = vcombine.low %v341_v23, %v341_v23  ;;  %v387_v30 = vunpack.c.l.b16 %v532_v24 }
  0x36   : > { %v536_v31 = vcombine.low %v367_v26, %v367_v26  ;;  %v388_v32 = vunpack.c.l.b16 %v533_v27  ;;  %v390_v33 = vunpack.c.l.b16 %v535_v28 }
  0x37   : > { %v389_v34 = vunpack.c.l.b16 %v534_v29  ;;  %v393_v35 = vsel %vm392_vm1, %v387_v30, %v386_v25 }
  0x38   : > { %v391_v36 = vunpack.c.l.b16 %v536_v31  ;;  %v395_v37 = vsel %vm394_vm2, %v388_v32, %v393_v35 }
  0x39   : > { %v397_v38 = vsel %vm396_vm3, %v389_v34, %v395_v37 }
  0x3a   : > { %v399_v39 = vsel %vm398_vm4, %v390_v33, %v397_v38 }
  0x3b   : > { %v401_v40 = vsel %vm400_vm5, %v391_v36, %v399_v39 }
  0x3c   : > { %v402_v41 = vpack.c.b16 %v401_v40, %v401_v40 }
  0x3e   : > { %404 = vst [vmem:[%s232_s8] sm:$0x7] %v402_v41 }
  0x3f PF: > { %s12_s13 = sadd.s32 1, %s620_s13   ;;  %s712_s9 = smov %s612_s11 }
  0x40   : > { %p9_p9 = scmp.ge.s32.totalorder %s12_s13, 14   ;;  %s713_s10 = smov %s616_s12 }
  0x41   : > { %s714_s11 = smov %s717_s14  ;;  %s715_s12 = smov %s721_s15 }
  0x42   :  { %11 = sbr.rel (!%p9_p9) target bundleno = 3 (0x3), region = 61 }

// kernel: forward.11
= control target key start
LH: loop header
LB: loop body
LE: loop exit
PB: predicated region body
PF: predicated region fallthrough
CT: control target
= control target key end

     0   :  { %s5593_s12 = smov 0   ;;  %s5595_s13 = smov 0   ;;  %s6613_s0 = inlined_call_operand.vmem [shape: bf16[288,3200], index: 0, kind: input, shape index: {}]   ;;  %s6614_s1 = inlined_call_operand.vmem [shape: bf16[3200,128], index: 1, kind: input, shape index: {}]   ;;  %s6615_s2 = inlined_call_operand.vmem [shape: f32[1,128], index: 2, kind: input, shape index: {}]   ;;  %s6616_s3 = inlined_call_operand.vmem [shape: bf16[288,128], index: 3, kind: output, shape index: {}]  }
   0x1   :  { %s5597_s14 = smov 0  }
   0x2 LB: > { %s25_s15 = sadd.s32 1, %s5567_s13  ;;  %p4005_p0 = scmp.ge.s32.totalorder %s5571_s14, 1  ;;  %s5571_s14 = sphi %s5597_s14, %s13_s14   ;;  %s5567_s13 = sphi %s5595_s13, %s6618_s13   ;;  %s5563_s12 = sphi %s5593_s12, %s6617_s12  }
   0x3   : > { %p27_p1 = scmp.ge.s32.totalorder %s25_s15, 3  ;;  %p170_p2 = scmp.lt.s32.totalorder %s5571_s14, 4 }
   0x5   : > { %s6620_s15 = smov (%p27_p1, %s25_s15), 0  ;;  %p171_p3 = pnand %p4005_p0, %p170_p2 }
   0x6   : > { %v5127_v0 = vld [vmem:[%s6614_s1 + $0x40] sm:$0xff] (!%p171_p3)   ;;  %v5131_v4 = vld [vmem:[%s6614_s1 + $0x48] sm:$0xff] (!%p171_p3)   ;;  %v5135_v8 = vld [vmem:[%s6614_s1 + $0x50] sm:$0xff] (!%p171_p3)   ;;  %s205_s21 = smul.u32 (!%p171_p3), 12, %s5563_s12 }
   0x7   : > { %174 = sbr.rel (%p171_p3) target bundleno = 560 (0x230), region = 32  ;;  %v5128_v1 = vld [vmem:[%s6614_s1 + $0xc0] sm:$0xff] (!%p171_p3)   ;;  %4420 = vmatprep.subr.bf16.mxu0 (!%p171_p3), %v5127_v0  ;;  %v5132_v5 = vld [vmem:[%s6614_s1 + $0xc8] sm:$0xff] (!%p171_p3)   ;;  %v5136_v9 = vld [vmem:[%s6614_s1 + $0xd0] sm:$0xff] (!%p171_p3)  }
   0x8   : > { %v5129_v2 = vld [vmem:[%s6614_s1] sm:$0xff] (!%p171_p3)   ;;  %4472 = vmatprep.subr.bf16.mxu1 (!%p171_p3), %v5128_v1  ;;  %v5133_v6 = vld [vmem:[%s6614_s1 + $0x8] sm:$0xff] (!%p171_p3)   ;;  %v5137_v10 = vld [vmem:[%s6614_s1 + $0x10] sm:$0xff] (!%p171_p3)   ;;  %p206_p4 = scmp.lt.s32.totalorder (!%p171_p3), %s205_s21, 35 }
   0x9   : > { %v5130_v3 = vld [vmem:[%s6614_s1 + $0x80] sm:$0xff] (!%p171_p3)   ;;  %4421 = vmatpush3.bf16.msra.mxu0 (!%p171_p3), %v5129_v2  ;;  %v5134_v7 = vld [vmem:[%s6614_s1 + $0x88] sm:$0xff] (!%p171_p3)   ;;  %v5138_v11 = vld [vmem:[%s6614_s1 + $0x90] sm:$0xff] (!%p171_p3)  }
   0xa   : > { %4473 = vmatpush3.bf16.msra.mxu1 (!%p171_p3), %v5130_v3  ;;  %4422 = vmatprep.subr.bf16.mxu0 (!%p171_p3), %v5131_v4  ;;  %v5139_v12 = vld [vmem:[%s6614_s1 + $0x58] sm:$0xff] (!%p171_p3)   ;;  %v5143_v16 = vld [vmem:[%s6614_s1 + $0x60] sm:$0xff] (!%p171_p3)   ;;  %v5147_v20 = vld [vmem:[%s6614_s1 + $0x68] sm:$0xff] (!%p171_p3)  }
   0xb   : > { %4474 = vmatprep.subr.bf16.mxu1 (!%p171_p3), %v5132_v5  ;;  %v5140_v13 = vld [vmem:[%s6614_s1 + $0xd8] sm:$0xff] (!%p171_p3)   ;;  %v5144_v17 = vld [vmem:[%s6614_s1 + $0xe0] sm:$0xff] (!%p171_p3)   ;;  %v5148_v21 = vld [vmem:[%s6614_s1 + $0xe8] sm:$0xff] (!%p171_p3)  }
   0xc   : > { %v5141_v14 = vld [vmem:[%s6614_s1 + $0x18] sm:$0xff] (!%p171_p3)   ;;  %v5145_v18 = vld [vmem:[%s6614_s1 + $0x20] sm:$0xff] (!%p171_p3)   ;;  %v5149_v22 = vld [vmem:[%s6614_s1 + $0x28] sm:$0xff] (!%p171_p3)  }
   0xd   : > { %4423 = vmatpush3.bf16.msra.mxu0 (!%p171_p3), %v5133_v6  ;;  %v5142_v15 = vld [vmem:[%s6614_s1 + $0x98] sm:$0xff] (!%p171_p3)   ;;  %v5146_v19 = vld [vmem:[%s6614_s1 + $0xa0] sm:$0xff] (!%p171_p3)   ;;  %v5150_v23 = vld [vmem:[%s6614_s1 + $0xa8] sm:$0xff] (!%p171_p3)  }
   0xe   : > { %4475 = vmatpush3.bf16.msra.mxu1 %v5134_v7  ;;  %4424 = vmatprep.subr.bf16.mxu0 %v5135_v8  ;;  %s6622_s21 = smov (!%p206_p4, %s205_s21), 35  ;;  %v5151_v24 = vld [vmem:[%s6614_s1 + $0x70] sm:$0xff]   ;;  %v5155_v28 = vld [vmem:[%s6614_s1 + $0x78] sm:$0xff]   ;;  %v5165_v36 = vld [vmem:[%s6614_s1 + $0x1c0] sm:$0xff]  }
   0xf   : > { %4476 = vmatprep.subr.bf16.mxu1 %v5136_v9  ;;  %v5152_v25 = vld [vmem:[%s6614_s1 + $0xf0] sm:$0xff]   ;;  %s5102_s23 = smul.u32 100, %s6622_s21  ;;  %v5156_v29 = vld [vmem:[%s6614_s1 + $0xf8] sm:$0xff]   ;;  %v5166_v37 = vld [vmem:[%s6614_s1 + $0x180] sm:$0xff]  }
  0x10   : > { %v5153_v26 = vld [vmem:[%s6614_s1 + $0x30] sm:$0xff]   ;;  %v5157_v30 = vld [vmem:[%s6614_s1 + $0x38] sm:$0xff]   ;;  %v5167_v38 = vld [vmem:[%s6614_s1 + $0x1c8] sm:$0xff]  }
  0x11   : > { %4425 = vmatpush3.bf16.msra.mxu0 %v5137_v10  ;;  %v5154_v27 = vld [vmem:[%s6614_s1 + $0xb0] sm:$0xff]   ;;  %s5710_s6 = scalar_lea.vmem %s6613_s0, %s5102_s23  ;;  %v5158_v31 = vld [vmem:[%s6614_s1 + $0xb8] sm:$0xff]   ;;  %v5172_v41 = vld [vmem:[%s6614_s1 + $0x188] sm:$0xff]  }
  0x12   : > { %4477 = vmatpush3.bf16.msra.mxu1 %v5138_v11  ;;  %4426 = vmatprep.subr.bf16.mxu0 %v5139_v12  ;;  %v5159_v32 = vld [vmem:[%s5710_s6] ss:$100 sps:$4 sm:$0xff]   ;;  %v5162_v34 = vld [vmem:[%s5710_s6 + $0x8] ss:$100 sps:$4 sm:$0xff]   ;;  %v5170_v40 = vld [vmem:[%s5710_s6 + $0xd4] ss:$100 sps:$4 sm:$0xff]  }
  0x13   : > { %4478 = vmatprep.subr.bf16.mxu1 %v5140_v13  ;;  %v5161_v33 = vld [vmem:[%s5710_s6 + $0x4] ss:$100 sps:$4 sm:$0xff]   ;;  %v5164_v35 = vld [vmem:[%s5710_s6 + $0xc] ss:$100 sps:$4 sm:$0xff]   ;;  %v5180_v49 = vld [vmem:[%s5710_s6 + $0x194] ss:$100 sps:$4 sm:$0xff]  }
  0x14   : > { %2780 = vmatprep.mubr.bf16.mxu0 %v5161_v33  ;;  %2861 = vmatprep.mubr.bf16.mxu1 %v5164_v35  ;;  %v5168_v39 = vld [vmem:[%s5710_s6 + $0xcc] ss:$100 sps:$4 sm:$0xff]   ;;  %v5175_v44 = vld [vmem:[%s6614_s1 + $0x140] sm:$0xff]   ;;  %v5186_v53 = vld [vmem:[%s5710_s6 + $0x198] ss:$100 sps:$4 sm:$0xff]  }
  0x15   : > { %4427 = vmatpush3.bf16.msra.mxu0 %v5141_v14  ;;  %v5173_v42 = vld [vmem:[%s5710_s6 + $0xc8] ss:$100 sps:$4 sm:$0xff]   ;;  %v5174_v43 = vld [vmem:[%s5710_s6 + $0xd0] ss:$100 sps:$4 sm:$0xff]   ;;  %v5176_v45 = vld [vmem:[%s6614_s1 + $0x100] sm:$0xff]  }
  0x16   : > { %4479 = vmatpush3.bf16.msra.mxu1 %v5142_v15  ;;  %4428 = vmatprep.subr.bf16.mxu0 %v5143_v16  ;;  %v5177_v46 = vld [vmem:[%s6614_s1 + $0x1d0] sm:$0xff]   ;;  %v5179_v48 = vld [vmem:[%s6614_s1 + $0x148] sm:$0xff]   ;;  %v5182_v50 = vld [vmem:[%s5710_s6 + $0x19c] ss:$100 sps:$4 sm:$0xff]  }
  0x17   : > { %4480 = vmatprep.subr.bf16.mxu1 %v5144_v17  ;;  %v5178_v47 = vld [vmem:[%s6614_s1 + $0x190] sm:$0xff]   ;;  %v5184_v51 = vld [vmem:[%s6614_s1 + $0x108] sm:$0xff]   ;;  %v5187_v54 = vld [vmem:[%s6614_s1 + $0x1d8] sm:$0xff]  }
  0x18   : > { %v5185_v52 = vld [vmem:[%s5710_s6 + $0x190] ss:$100 sps:$4 sm:$0xff]   ;;  %v5188_v55 = vld [vmem:[%s6614_s1 + $0x198] sm:$0xff]   ;;  %v5193_v59 = vld [vmem:[%s5710_s6 + $0x264] ss:$100 sps:$4 sm:$0xff]  }
  0x19   : > { %4429 = vmatpush3.bf16.msra.mxu0 %v5145_v18  ;;  %v5189_v56 = vld [vmem:[%s6614_s1 + $0x150] sm:$0xff]   ;;  %v5191_v58 = vld [vmem:[%s5710_s6 + $0x25c] ss:$100 sps:$4 sm:$0xff]   ;;  %v5201_v2 = vld [vmem:[%s6614_s1 + $0x1e8] sm:$0xff]  }
  0x1a   : > { %4481 = vmatpush3.bf16.msra.mxu1 %v5146_v19  ;;  %4430 = vmatprep.subr.bf16.mxu0 %v5147_v20  ;;  %v5190_v57 = vld [vmem:[%s6614_s1 + $0x110] sm:$0xff]   ;;  %v5195_v60 = vld [vmem:[%s5710_s6 + $0x258] ss:$100 sps:$4 sm:$0xff]   ;;  %v5196_v61 = vld [vmem:[%s5710_s6 + $0x260] ss:$100 sps:$4 sm:$0xff]  }
  0x1b   : > { %4482 = vmatprep.subr.bf16.mxu1 %v5148_v21  ;;  %v5197_v62 = vld [vmem:[%s6614_s1 + $0x1e0] sm:$0xff]   ;;  %v5199_v0 = vld [vmem:[%s6614_s1 + $0x158] sm:$0xff]   ;;  %v5204_v4 = vld [vmem:[%s5710_s6 + $0x32c] ss:$100 sps:$4 sm:$0xff]  }
  0x1c   : > { %v5198_v63 = vld [vmem:[%s6614_s1 + $0x1a0] sm:$0xff]   ;;  %v5200_v1 = vld [vmem:[%s6614_s1 + $0x118] sm:$0xff]   ;;  %v5206_v5 = vld [vmem:[%s6614_s1 + $0x1a8] sm:$0xff]  }
  0x1d   : > { %4431 = vmatpush3.bf16.msra.mxu0 %v5149_v22  ;;  %v5202_v3 = vld [vmem:[%s5710_s6 + $0x324] ss:$100 sps:$4 sm:$0xff]   ;;  %v5212_v11 = vld [vmem:[%s6614_s1 + $0x1f0] sm:$0xff]   ;;  %v5223_v20 = vld [vmem:[%s6614_s1 + $0x1f8] sm:$0xff]  }
  0x1e   : > { %4483 = vmatpush3.bf16.msra.mxu1 %v5150_v23  ;;  %4432 = vmatprep.subr.bf16.mxu0 %v5151_v24  ;;  %v5207_v6 = vld [vmem:[%s5710_s6 + $0x320] ss:$100 sps:$4 sm:$0xff]   ;;  %v5208_v7 = vld [vmem:[%s5710_s6 + $0x328] ss:$100 sps:$4 sm:$0xff]   ;;  %v5214_v13 = vld [vmem:[%s6614_s1 + $0x1b0] sm:$0xff]  }
  0x1f   : > { %4484 = vmatprep.subr.bf16.mxu1 %v5152_v25  ;;  %v5209_v8 = vld [vmem:[%s6614_s1 + $0x160] sm:$0xff]   ;;  %v5211_v10 = vld [vmem:[%s6614_s1 + $0x168] sm:$0xff]   ;;  %v5217_v15 = vld [vmem:[%s5710_s6 + $0x3f4] ss:$100 sps:$4 sm:$0xff]  }
  0x20   : > { %v5210_v9 = vld [vmem:[%s6614_s1 + $0x120] sm:$0xff]   ;;  %v5213_v12 = vld [vmem:[%s6614_s1 + $0x128] sm:$0xff]   ;;  %v5220_v17 = vld [vmem:[%s5710_s6 + $0x3f0] ss:$100 sps:$4 sm:$0xff]  }
  0x21   : > { %4433 = vmatpush3.bf16.msra.mxu0 %v5153_v26  ;;  %v5215_v14 = vld [vmem:[%s5710_s6 + $0x3ec] ss:$100 sps:$4 sm:$0xff]   ;;  %v5224_v21 = vld [vmem:[%s6614_s1 + $0x1b8] sm:$0xff]   ;;  %v5242_v35 = vld [vmem:[%s5710_s6 + $0xe0] ss:$100 sps:$4 sm:$0xff]  }
  0x22   : > { %4485 = vmatpush3.bf16.msra.mxu1 %v5154_v27  ;;  %4434 = vmatprep.subr.bf16.mxu0 %v5155_v28  ;;  %v5219_v16 = vld [vmem:[%s5710_s6 + $0x3e8] ss:$100 sps:$4 sm:$0xff]   ;;  %v5221_v18 = vld [vmem:[%s6614_s1 + $0x170] sm:$0xff]   ;;  %v5225_v22 = vld [vmem:[%s6614_s1 + $0x178] sm:$0xff]  }
  0x23   : > { %4486 = vmatprep.subr.bf16.mxu1 %v5156_v29  ;;  %v5222_v19 = vld [vmem:[%s6614_s1 + $0x130] sm:$0xff]   ;;  %v5226_v23 = vld [vmem:[%s6614_s1 + $0x138] sm:$0xff]   ;;  %v5233_v28 = vld [vmem:[%s6614_s1 + $0x2c0] sm:$0xff]  }
  0x24   : > { %v5227_v24 = vld [vmem:[%s5710_s6 + $0x10] ss:$100 sps:$4 sm:$0xff]   ;;  %v5230_v26 = vld [vmem:[%s5710_s6 + $0x18] ss:$100 sps:$4 sm:$0xff]   ;;  %v5234_v29 = vld [vmem:[%s6614_s1 + $0x280] sm:$0xff]  }
  0x25   : > { %4435 = vmatpush3.bf16.msra.mxu0 %v5157_v30  ;;  %v5229_v25 = vld [vmem:[%s5710_s6 + $0x14] ss:$100 sps:$4 sm:$0xff]   ;;  %v5232_v27 = vld [vmem:[%s5710_s6 + $0x1c] ss:$100 sps:$4 sm:$0xff]   ;;  %v5235_v30 = vld [vmem:[%s6614_s1 + $0x2c8] sm:$0xff]  }
  0x26   : > { %4487 = vmatpush3.bf16.msra.mxu1 %v5158_v31  ;;  %4524 = vmatprep.subr.bf16.mxu0 %v5175_v44  ;;  %v5236_v31 = vld [vmem:[%s5710_s6 + $0xdc] ss:$100 sps:$4 sm:$0xff]   ;;  %v5240_v33 = vld [vmem:[%s6614_s1 + $0x288] sm:$0xff]  }
  0x27   : > { %4576 = vmatprep.subr.bf16.mxu1 %v5165_v36  ;;  %v5243_v36 = vld [vmem:[%s6614_s1 + $0x240] sm:$0xff]  }
  0x28   : > { %2781 = vmatmul.mubr.bf16.vlgmr.msra.gmra.mrb[0].mxu0 %v5159_v32  ;;  %v5238_v32 = vld [vmem:[%s5710_s6 + $0xe4] ss:$100 sps:$4 sm:$0xff]  }
  0x29   : > { %2862 = vmatmul.mubr.bf16.vlgmr.msra.gmra.mrb[0].mxu1 %v5162_v34  ;;  %2788 = vmatprep.mubr.bf16.mxu0 %v5168_v39  ;;  %v5241_v34 = vld [vmem:[%s5710_s6 + $0xd8] ss:$100 sps:$4 sm:$0xff]   ;;  %v5246_v39 = vld [vmem:[%s6614_s1 + $0x290] sm:$0xff]   ;;  %v5253_v44 = vld [vmem:[%s5710_s6 + $0x1a0] ss:$100 sps:$4 sm:$0xff]  }
  0x2a   : > { %4577 = vmatpush3.bf16.msra.mxu1 %v5166_v37  ;;  %2869 = vmatprep.mubr.bf16.mxu1 %v5170_v40  ;;  %v5244_v37 = vld [vmem:[%s6614_s1 + $0x200] sm:$0xff]   ;;  %v5247_v40 = vld [vmem:[%s6614_s1 + $0x248] sm:$0xff]  }
  0x2b   : > { %4578 = vmatprep.subr.bf16.mxu1 %v5167_v38  ;;  %4525 = vmatpush3.bf16.msra.mxu0 %v5176_v45  ;;  %v5245_v38 = vld [vmem:[%s6614_s1 + $0x2d0] sm:$0xff]   ;;  %v5254_v45 = vld [vmem:[%s5710_s6 + $0x1a8] ss:$100 sps:$4 sm:$0xff]  }
  0x2c   : > { %4526 = vmatprep.subr.bf16.mxu0 %v5179_v48  ;;  %v5257_v48 = vld [vmem:[%s6614_s1 + $0x250] sm:$0xff]  }
  0x2e   : > { %4579 = vmatpush3.bf16.msra.mxu1 %v5172_v41  ;;  %v5248_v41 = vld [vmem:[%s5710_s6 + $0x1a4] ss:$100 sps:$4 sm:$0xff]  }
  0x2f   : > { %4580 = vmatprep.subr.bf16.mxu1 %v5177_v46  ;;  %4527 = vmatpush3.bf16.msra.mxu0 %v5184_v51  ;;  %v5255_v46 = vld [vmem:[%s6614_s1 + $0x2d8] sm:$0xff]  }
  0x30   : > { %2789 = vmatmul.mubr.bf16.gmra.mrb[4].mxu0 %v5173_v42  ;;  %4528 = vmatprep.subr.bf16.mxu0 %v5189_v56  ;;  %v5250_v42 = vld [vmem:[%s5710_s6 + $0x1ac] ss:$100 sps:$4 sm:$0xff]   ;;  %v5261_v51 = vld [vmem:[%s5710_s6 + $0x274] ss:$100 sps:$4 sm:$0xff]  }
  0x31   : > { %2870 = vmatmul.mubr.bf16.gmra.mrb[4].mxu1 %v5174_v43  ;;  %2796 = vmatprep.mubr.bf16.mxu0 %v5180_v49  ;;  %v5252_v43 = vld [vmem:[%s6614_s1 + $0x208] sm:$0xff]   ;;  %v5258_v49 = vld [vmem:[%s6614_s1 + $0x210] sm:$0xff]   ;;  %v5267_v56 = vld [vmem:[%s6614_s1 + $0x258] sm:$0xff]  }
  0x32   : > { %4581 = vmatpush3.bf16.msra.mxu1 %v5178_v47  ;;  %2877 = vmatprep.mubr.bf16.mxu1 %v5182_v50  ;;  %v5256_v47 = vld [vmem:[%s6614_s1 + $0x298] sm:$0xff]   ;;  %v5259_v50 = vld [vmem:[%s5710_s6 + $0x26c] ss:$100 sps:$4 sm:$0xff]  }
  0x33   : > { %4582 = vmatprep.subr.bf16.mxu1 %v5187_v54  ;;  %4529 = vmatpush3.bf16.msra.mxu0 %v5190_v57  ;;  %v5265_v54 = vld [vmem:[%s6614_s1 + $0x2e0] sm:$0xff]   ;;  %v5268_v57 = vld [vmem:[%s6614_s1 + $0x218] sm:$0xff]  }
  0x34   : > { %4530 = vmatprep.subr.bf16.mxu0 %v5199_v0  ;;  %v5277_v0 = vld [vmem:[%s6614_s1 + $0x260] sm:$0xff]  }
  0x36   : > { %4583 = vmatpush3.bf16.msra.mxu1 %v5188_v55  ;;  %v5266_v55 = vld [vmem:[%s6614_s1 + $0x2a0] sm:$0xff]  }
  0x37   : > { %4584 = vmatprep.subr.bf16.mxu1 %v5197_v62  ;;  %4531 = vmatpush3.bf16.msra.mxu0 %v5200_v1  ;;  %v5275_v62 = vld [vmem:[%s5710_s6 + $0x330] ss:$100 sps:$4 sm:$0xff]   ;;  %v5278_v1 = vld [vmem:[%s6614_s1 + $0x220] sm:$0xff]  }
  0x38   : > { %2797 = vmatmul.mubr.bf16.gmra.mrb[8].mxu0 %v5185_v52  ;;  %4532 = vmatprep.subr.bf16.mxu0 %v5209_v8  ;;  %v5263_v52 = vld [vmem:[%s5710_s6 + $0x268] ss:$100 sps:$4 sm:$0xff]   ;;  %v5287_v8 = vld [vmem:[%s5710_s6 + $0x3f8] ss:$100 sps:$4 sm:$0xff]  }
  0x39   : > { %2878 = vmatmul.mubr.bf16.gmra.mrb[8].mxu1 %v5186_v53  ;;  %2804 = vmatprep.mubr.bf16.mxu0 %v5191_v58  ;;  %v5264_v53 = vld [vmem:[%s5710_s6 + $0x270] ss:$100 sps:$4 sm:$0xff]   ;;  %v5269_v58 = vld [vmem:[%s6614_s1 + $0x2e8] sm:$0xff]  }
  0x3a   : > { %2885 = vmatprep.mubr.bf16.mxu1 %v5193_v59  ;;  %4585 = vmatpush3.bf16.msra.mxu1 %v5198_v63  ;;  %v5270_v59 = vld [vmem:[%s5710_s6 + $0x334] ss:$100 sps:$4 sm:$0xff]  }
  0x3b   : > { %4586 = vmatprep.subr.bf16.mxu1 %v5201_v2  ;;  %4533 = vmatpush3.bf16.msra.mxu0 %v5210_v9  ;;  %v5276_v63 = vld [vmem:[%s5710_s6 + $0x338] ss:$100 sps:$4 sm:$0xff]   ;;  %v5279_v2 = vld [vmem:[%s6614_s1 + $0x268] sm:$0xff]   ;;  %v5288_v9 = vld [vmem:[%s5710_s6 + $0x400] ss:$100 sps:$4 sm:$0xff]  }
  0x3c   : > { %4534 = vmatprep.subr.bf16.mxu0 %v5211_v10  ;;  %v5289_v10 = vld [vmem:[%s6614_s1 + $0x270] sm:$0xff]  }
  0x3e   : > { %4587 = vmatpush3.bf16.msra.mxu1 %v5206_v5  ;;  %v5282_v5 = vld [vmem:[%s6614_s1 + $0x2b0] sm:$0xff]  }
  0x3f   : > { %4588 = vmatprep.subr.bf16.mxu1 %v5212_v11  ;;  %4535 = vmatpush3.bf16.msra.mxu0 %v5213_v12  ;;  %v5290_v11 = vld [vmem:[%s6614_s1 + $0x230] sm:$0xff]   ;;  %v5291_v12 = vld [vmem:[%s6614_s1 + $0x2f8] sm:$0xff]  }
  0x40   : > { %2805 = vmatmul.mubr.bf16.gmra.mrb[12].mxu0 %v5195_v60  ;;  %4536 = vmatprep.subr.bf16.mxu0 %v5221_v18  ;;  %v5272_v60 = vld [vmem:[%s5710_s6 + $0x33c] ss:$100 sps:$4 sm:$0xff]   ;;  %v5298_v18 = vld [vmem:[%s5710_s6 + $0x28] ss:$100 sps:$4 sm:$0xff]  }
  0x41   : > { %2886 = vmatmul.mubr.bf16.gmra.mrb[12].mxu1 %v5196_v61  ;;  %2812 = vmatprep.mubr.bf16.mxu0 %v5202_v3  ;;  %v5274_v61 = vld [vmem:[%s6614_s1 + $0x2a8] sm:$0xff]   ;;  %v5280_v3 = vld [vmem:[%s6614_s1 + $0x2f0] sm:$0xff]  }
  0x42   : > { %2893 = vmatprep.mubr.bf16.mxu1 %v5204_v4  ;;  %4589 = vmatpush3.bf16.msra.mxu1 %v5214_v13  ;;  %v5281_v4 = vld [vmem:[%s6614_s1 + $0x228] sm:$0xff]   ;;  %v5292_v13 = vld [vmem:[%s6614_s1 + $0x2b8] sm:$0xff]  }
  0x43   : > { %4537 = vmatpush3.bf16.msra.mxu0 %v5222_v19  ;;  %4590 = vmatprep.subr.bf16.mxu1 %v5223_v20  ;;  %v5300_v19 = vld [vmem:[%s5710_s6 + $0x2c] ss:$100 sps:$4 sm:$0xff]   ;;  %v5301_v20 = vld [vmem:[%s6614_s1 + $0x3c0] sm:$0xff]  }
  0x44   : > { %4538 = vmatprep.subr.bf16.mxu0 %v5225_v22  ;;  %v5303_v22 = vld [vmem:[%s6614_s1 + $0x3c8] sm:$0xff]  }
  0x46   : > { %4591 = vmatpush3.bf16.msra.mxu1 %v5224_v21  ;;  %v5302_v21 = vld [vmem:[%s6614_s1 + $0x380] sm:$0xff]  }
  0x47   : > { %4539 = vmatpush3.bf16.msra.mxu0 %v5226_v23  ;;  %4680 = vmatprep.subr.bf16.mxu1 %v5233_v28  ;;  %v5304_v23 = vld [vmem:[%s5710_s6 + $0xec] ss:$100 sps:$4 sm:$0xff]   ;;  %v5311_v28 = vld [vmem:[%s6614_s1 + $0x340] sm:$0xff]  }
  0x48   : > { %2813 = vmatmul.mubr.bf16.gmra.mrb[16].mxu0 %v5207_v6  ;;  %4628 = vmatprep.subr.bf16.mxu0 %v5243_v36  ;;  %v5283_v6 = vld [vmem:[%s5710_s6 + $0x3fc] ss:$100 sps:$4 sm:$0xff]   ;;  %v5321_v36 = vld [vmem:[%s5710_s6 + $0x1b0] ss:$100 sps:$4 sm:$0xff]  }
  0x49   : > { %2894 = vmatmul.mubr.bf16.gmra.mrb[16].mxu1 %v5208_v7  ;;  %2820 = vmatprep.mubr.bf16.mxu0 %v5215_v14  ;;  %v5285_v7 = vld [vmem:[%s5710_s6 + $0x404] ss:$100 sps:$4 sm:$0xff]   ;;  %v5293_v14 = vld [vmem:[%s6614_s1 + $0x278] sm:$0xff]  }
  0x4a   : > { %2901 = vmatprep.mubr.bf16.mxu1 %v5217_v15  ;;  %v5294_v15 = vld [vmem:[%s6614_s1 + $0x238] sm:$0xff]  }
  0x50   : > { %2821 = vmatmul.mubr.bf16.gmra.mrb[20].mxu0 %v5219_v16  ;;  %v5295_v16 = vld [vmem:[%s5710_s6 + $0x20] ss:$100 sps:$4 sm:$0xff]  }
  0x51   : > { %2902 = vmatmul.mubr.bf16.gmra.mrb[20].mxu1 %v5220_v17  ;;  %2942 = vmatprep.mubr.bf16.mxu0 %v5229_v25  ;;  %v5297_v17 = vld [vmem:[%s5710_s6 + $0x24] ss:$100 sps:$4 sm:$0xff]  }
  0x52   : > { %3023 = vmatprep.mubr.bf16.mxu1 %v5232_v27  ;;  %v5308_v25 = vld [vmem:[%s6614_s1 + $0x388] sm:$0xff]   ;;  %v5310_v27 = vld [vmem:[%s5710_s6 + $0xf0] ss:$100 sps:$4 sm:$0xff]  }
  0x58   : > { %2943 = vmatmul.mubr.bf16.vlgmr.msra.gmra.mrb[24].mxu0 %v5227_v24  ;;  %v5306_v24 = vld [vmem:[%s5710_s6 + $0xf4] ss:$100 sps:$4 sm:$0xff]  }
  0x59   : > { %3024 = vmatmul.mubr.bf16.vlgmr.msra.gmra.mrb[24].mxu1 %v5230_v26  ;;  %2950 = vmatprep.mubr.bf16.mxu0 %v5236_v31  ;;  %v5309_v26 = vld [vmem:[%s5710_s6 + $0xe8] ss:$100 sps:$4 sm:$0xff]   ;;  %v5314_v31 = vld [vmem:[%s6614_s1 + $0x390] sm:$0xff]  }
  0x5a   : > { %4681 = vmatpush3.bf16.msra.mxu1 %v5234_v29  ;;  %3031 = vmatprep.mubr.bf16.mxu1 %v5238_v32  ;;  %v5312_v29 = vld [vmem:[%s6614_s1 + $0x300] sm:$0xff]   ;;  %v5315_v32 = vld [vmem:[%s6614_s1 + $0x348] sm:$0xff]  }
  0x5b   : > { %4682 = vmatprep.subr.bf16.mxu1 %v5235_v30  ;;  %4629 = vmatpush3.bf16.msra.mxu0 %v5244_v37  ;;  %v5313_v30 = vld [vmem:[%s6614_s1 + $0x3d0] sm:$0xff]   ;;  %v5322_v37 = vld [vmem:[%s5710_s6 + $0x1b8] ss:$100 sps:$4 sm:$0xff]  }
  0x5c   : > { %4630 = vmatprep.subr.bf16.mxu0 %v5247_v40  ;;  %v5325_v40 = vld [vmem:[%s6614_s1 + $0x350] sm:$0xff]  }
  0x5e   : > { %4683 = vmatpush3.bf16.msra.mxu1 %v5240_v33  ;;  %v5316_v33 = vld [vmem:[%s5710_s6 + $0x1b4] ss:$100 sps:$4 sm:$0xff]  }
  0x5f   : > { %4684 = vmatprep.subr.bf16.mxu1 %v5245_v38  ;;  %4631 = vmatpush3.bf16.msra.mxu0 %v5252_v43  ;;  %v5323_v38 = vld [vmem:[%s6614_s1 + $0x3d8] sm:$0xff]   ;;  %v5329_v43 = vld [vmem:[%s5710_s6 + $0x284] ss:$100 sps:$4 sm:$0xff]  }
  0x60   : > { %2951 = vmatmul.mubr.bf16.gmra.mrb[28].mxu0 %v5241_v34  ;;  %4632 = vmatprep.subr.bf16.mxu0 %v5257_v48  ;;  %v5318_v34 = vld [vmem:[%s5710_s6 + $0x1bc] ss:$100 sps:$4 sm:$0xff]  }
  0x61   : > { %3032 = vmatmul.mubr.bf16.gmra.mrb[28].mxu1 %v5242_v35  ;;  %2958 = vmatprep.mubr.bf16.mxu0 %v5248_v41  ;;  %v5320_v35 = vld [vmem:[%s6614_s1 + $0x308] sm:$0xff]   ;;  %v5326_v41 = vld [vmem:[%s6614_s1 + $0x310] sm:$0xff]   ;;  %v5335_v48 = vld [vmem:[%s6614_s1 + $0x358] sm:$0xff]  }
  0x62   : > { %4685 = vmatpush3.bf16.msra.mxu1 %v5246_v39  ;;  %3039 = vmatprep.mubr.bf16.mxu1 %v5250_v42  ;;  %v5324_v39 = vld [vmem:[%s6614_s1 + $0x398] sm:$0xff]  }
  0x63   : > { %4686 = vmatprep.subr.bf16.mxu1 %v5255_v46  ;;  %4633 = vmatpush3.bf16.msra.mxu0 %v5258_v49  ;;  %v5327_v42 = vld [vmem:[%s5710_s6 + $0x27c] ss:$100 sps:$4 sm:$0xff]  }
  0x64   : > { %4634 = vmatprep.subr.bf16.mxu0 %v5267_v56  ;;  %v5333_v46 = vld [vmem:[%s6614_s1 + $0x3e0] sm:$0xff]   ;;  %v5336_v49 = vld [vmem:[%s6614_s1 + $0x318] sm:$0xff]  }
  0x65   : > { %v5345_v56 = vld [vmem:[%s6614_s1 + $0x360] sm:$0xff]  }
  0x66   : > { %4687 = vmatpush3.bf16.msra.mxu1 %v5256_v47  ;;  %v5334_v47 = vld [vmem:[%s6614_s1 + $0x3a0] sm:$0xff]  }
  0x67   : > { %4688 = vmatprep.subr.bf16.mxu1 %v5265_v54  ;;  %4635 = vmatpush3.bf16.msra.mxu0 %v5268_v57  ;;  %v5343_v54 = vld [vmem:[%s5710_s6 + $0x340] ss:$100 sps:$4 sm:$0xff]  }
  0x68   : > { %2959 = vmatmul.mubr.bf16.gmra.mrb[32].mxu0 %v5253_v44  ;;  %4636 = vmatprep.subr.bf16.mxu0 %v5277_v0  ;;  %v5331_v44 = vld [vmem:[%s5710_s6 + $0x278] ss:$100 sps:$4 sm:$0xff]   ;;  %v5346_v57 = vld [vmem:[%s6614_s1 + $0x320] sm:$0xff]   ;;  %v5355_v0 = vld [vmem:[%s5710_s6 + $0x408] ss:$100 sps:$4 sm:$0xff]  }
  0x69   : > { %3040 = vmatmul.mubr.bf16.gmra.mrb[32].mxu1 %v5254_v45  ;;  %2966 = vmatprep.mubr.bf16.mxu0 %v5259_v50  ;;  %v5332_v45 = vld [vmem:[%s5710_s6 + $0x280] ss:$100 sps:$4 sm:$0xff]   ;;  %v5337_v50 = vld [vmem:[%s6614_s1 + $0x3e8] sm:$0xff]  }
  0x6a   : > { %3047 = vmatprep.mubr.bf16.mxu1 %v5261_v51  ;;  %4689 = vmatpush3.bf16.msra.mxu1 %v5266_v55  ;;  %v5338_v51 = vld [vmem:[%s5710_s6 + $0x344] ss:$100 sps:$4 sm:$0xff]  }
  0x6b   : > { %4690 = vmatprep.subr.bf16.mxu1 %v5269_v58  ;;  %4637 = vmatpush3.bf16.msra.mxu0 %v5278_v1  ;;  %v5344_v55 = vld [vmem:[%s5710_s6 + $0x348] ss:$100 sps:$4 sm:$0xff]   ;;  %v5356_v1 = vld [vmem:[%s5710_s6 + $0x410] ss:$100 sps:$4 sm:$0xff]  }
  0x6c   : > { %4638 = vmatprep.subr.bf16.mxu0 %v5279_v2  ;;  %v5347_v58 = vld [vmem:[%s6614_s1 + $0x368] sm:$0xff]   ;;  %v5357_v2 = vld [vmem:[%s6614_s1 + $0x370] sm:$0xff]  }
  0x6e   : > { %4691 = vmatpush3.bf16.msra.mxu1 %v5274_v61  ;;  %v5350_v61 = vld [vmem:[%s6614_s1 + $0x3b0] sm:$0xff]  }
  0x6f   : > { %4692 = vmatprep.subr.bf16.mxu1 %v5280_v3  ;;  %4639 = vmatpush3.bf16.msra.mxu0 %v5281_v4  ;;  %v5358_v3 = vld [vmem:[%s6614_s1 + $0x330] sm:$0xff]   ;;  %v5359_v4 = vld [vmem:[%s6614_s1 + $0x3f8] sm:$0xff]  }
  0x70   : > { %2967 = vmatmul.mubr.bf16.gmra.mrb[36].mxu0 %v5263_v52  ;;  %4640 = vmatprep.subr.bf16.mxu0 %v5289_v10  ;;  %v5340_v52 = vld [vmem:[%s5710_s6 + $0x34c] ss:$100 sps:$4 sm:$0xff]   ;;  %v5366_v10 = vld [vmem:[%s5710_s6 + $0x38] ss:$100 sps:$4 sm:$0xff]  }
  0x71   : > { %3048 = vmatmul.mubr.bf16.gmra.mrb[36].mxu1 %v5264_v53  ;;  %2974 = vmatprep.mubr.bf16.mxu0 %v5270_v59  ;;  %v5342_v53 = vld [vmem:[%s6614_s1 + $0x3a8] sm:$0xff]   ;;  %v5348_v59 = vld [vmem:[%s6614_s1 + $0x3f0] sm:$0xff]  }
  0x72   : > { %3055 = vmatprep.mubr.bf16.mxu1 %v5272_v60  ;;  %4693 = vmatpush3.bf16.msra.mxu1 %v5282_v5  ;;  %v5349_v60 = vld [vmem:[%s6614_s1 + $0x328] sm:$0xff]   ;;  %v5360_v5 = vld [vmem:[%s6614_s1 + $0x3b8] sm:$0xff]  }
  0x73   : > { %4641 = vmatpush3.bf16.msra.mxu0 %v5290_v11  ;;  %4694 = vmatprep.subr.bf16.mxu1 %v5291_v12  ;;  %v5368_v11 = vld [vmem:[%s5710_s6 + $0x3c] ss:$100 sps:$4 sm:$0xff]  }
  0x74   : > { %4642 = vmatprep.subr.bf16.mxu0 %v5293_v14  ;;  %v5369_v12 = vld [vmem:[%s6614_s1 + $0x4c0] sm:$0xff]   ;;  %v5371_v14 = vld [vmem:[%s6614_s1 + $0x4c8] sm:$0xff]  }
  0x76   : > { %4695 = vmatpush3.bf16.msra.mxu1 %v5292_v13  ;;  %v5370_v13 = vld [vmem:[%s6614_s1 + $0x480] sm:$0xff]  }
  0x77   : > { %4643 = vmatpush3.bf16.msra.mxu0 %v5294_v15  ;;  %4784 = vmatprep.subr.bf16.mxu1 %v5301_v20  ;;  %v5372_v15 = vld [vmem:[%s5710_s6 + $0xfc] ss:$100 sps:$4 sm:$0xff]  }
  0x78   : > { %2975 = vmatmul.mubr.bf16.gmra.mrb[40].mxu0 %v5275_v62  ;;  %4732 = vmatprep.subr.bf16.mxu0 %v5311_v28  ;;  %v5351_v62 = vld [vmem:[%s5710_s6 + $0x40c] ss:$100 sps:$4 sm:$0xff]   ;;  %v5379_v20 = vld [vmem:[%s6614_s1 + $0x440] sm:$0xff]  }
  0x79   : > { %3056 = vmatmul.mubr.bf16.gmra.mrb[40].mxu1 %v5276_v63  ;;  %2982 = vmatprep.mubr.bf16.mxu0 %v5283_v6  ;;  %v5353_v63 = vld [vmem:[%s5710_s6 + $0x414] ss:$100 sps:$4 sm:$0xff]   ;;  %v5389_v28 = vld [vmem:[%s5710_s6 + $0x1c0] ss:$100 sps:$4 sm:$0xff]  }
  0x7a   : > { %3063 = vmatprep.mubr.bf16.mxu1 %v5285_v7  ;;  %v5361_v6 = vld [vmem:[%s6614_s1 + $0x378] sm:$0xff]  }
  0x7b   : > { %v5362_v7 = vld [vmem:[%s6614_s1 + $0x338] sm:$0xff]  }
  0x80   : > { %2983 = vmatmul.mubr.bf16.gmra.mrb[44].mxu0 %v5287_v8  ;;  %v5363_v8 = vld [vmem:[%s5710_s6 + $0x30] ss:$100 sps:$4 sm:$0xff]  }
  0x81   : > { %3064 = vmatmul.mubr.bf16.gmra.mrb[44].mxu1 %v5288_v9  ;;  %3104 = vmatprep.mubr.bf16.mxu0 %v5297_v17  ;;  %v5365_v9 = vld [vmem:[%s5710_s6 + $0x34] ss:$100 sps:$4 sm:$0xff]   ;;  %v5376_v17 = vld [vmem:[%s6614_s1 + $0x488] sm:$0xff]  }
  0x82   : > { %3185 = vmatprep.mubr.bf16.mxu1 %v5300_v19  ;;  %v5378_v19 = vld [vmem:[%s5710_s6 + $0x100] ss:$100 sps:$4 sm:$0xff]  }
  0x88   : > { %3105 = vmatmul.mubr.bf16.vlgmr.msra.gmra.mrb[48].mxu0 %v5295_v16  ;;  %v5374_v16 = vld [vmem:[%s5710_s6 + $0x104] ss:$100 sps:$4 sm:$0xff]  }
  0x89   : > { %3186 = vmatmul.mubr.bf16.vlgmr.msra.gmra.mrb[48].mxu1 %v5298_v18  ;;  %3112 = vmatprep.mubr.bf16.mxu0 %v5304_v23  ;;  %v5377_v18 = vld [vmem:[%s5710_s6 + $0xf8] ss:$100 sps:$4 sm:$0xff]   ;;  %v5382_v23 = vld [vmem:[%s6614_s1 + $0x490] sm:$0xff]  }
  0x8a   : > { %4785 = vmatpush3.bf16.msra.mxu1 %v5302_v21  ;;  %3193 = vmatprep.mubr.bf16.mxu1 %v5306_v24  ;;  %v5380_v21 = vld [vmem:[%s6614_s1 + $0x400] sm:$0xff]   ;;  %v5383_v24 = vld [vmem:[%s6614_s1 + $0x448] sm:$0xff]  }
  0x8b   : > { %4786 = vmatprep.subr.bf16.mxu1 %v5303_v22  ;;  %4733 = vmatpush3.bf16.msra.mxu0 %v5312_v29  ;;  %v5381_v22 = vld [vmem:[%s6614_s1 + $0x4d0] sm:$0xff]   ;;  %v5390_v29 = vld [vmem:[%s5710_s6 + $0x1c8] ss:$100 sps:$4 sm:$0xff]  }
  0x8c   : > { %4734 = vmatprep.subr.bf16.mxu0 %v5315_v32  ;;  %v5393_v32 = vld [vmem:[%s6614_s1 + $0x450] sm:$0xff]  }
  0x8e   : > { %4787 = vmatpush3.bf16.msra.mxu1 %v5308_v25  ;;  %v5384_v25 = vld [vmem:[%s5710_s6 + $0x1c4] ss:$100 sps:$4 sm:$0xff]  }
  0x8f   : > { %4788 = vmatprep.subr.bf16.mxu1 %v5313_v30  ;;  %4735 = vmatpush3.bf16.msra.mxu0 %v5320_v35  ;;  %v5391_v30 = vld [vmem:[%s6614_s1 + $0x4d8] sm:$0xff]  }
  0x90   : > { %3113 = vmatmul.mubr.bf16.gmra.mrb[52].mxu0 %v5309_v26  ;;  %4736 = vmatprep.subr.bf16.mxu0 %v5325_v40  ;;  %v5386_v26 = vld [vmem:[%s5710_s6 + $0x1cc] ss:$100 sps:$4 sm:$0xff]   ;;  %v5397_v35 = vld [vmem:[%s5710_s6 + $0x294] ss:$100 sps:$4 sm:$0xff]  }
  0x91   : > { %3194 = vmatmul.mubr.bf16.gmra.mrb[52].mxu1 %v5310_v27  ;;  %3120 = vmatprep.mubr.bf16.mxu0 %v5316_v33  ;;  %v5388_v27 = vld [vmem:[%s6614_s1 + $0x408] sm:$0xff]   ;;  %v5394_v33 = vld [vmem:[%s6614_s1 + $0x410] sm:$0xff]   ;;  %v5403_v40 = vld [vmem:[%s6614_s1 + $0x458] sm:$0xff]  }
  0x92   : > { %4789 = vmatpush3.bf16.msra.mxu1 %v5314_v31  ;;  %3201 = vmatprep.mubr.bf16.mxu1 %v5318_v34  ;;  %v5392_v31 = vld [vmem:[%s6614_s1 + $0x498] sm:$0xff]   ;;  %v5395_v34 = vld [vmem:[%s5710_s6 + $0x28c] ss:$100 sps:$4 sm:$0xff]  }
  0x93   : > { %4790 = vmatprep.subr.bf16.mxu1 %v5323_v38  ;;  %4737 = vmatpush3.bf16.msra.mxu0 %v5326_v41  ;;  %v5401_v38 = vld [vmem:[%s6614_s1 + $0x4e0] sm:$0xff]   ;;  %v5404_v41 = vld [vmem:[%s6614_s1 + $0x418] sm:$0xff]  }
  0x94   : > { %4738 = vmatprep.subr.bf16.mxu0 %v5335_v48  ;;  %v5413_v48 = vld [vmem:[%s6614_s1 + $0x460] sm:$0xff]  }
  0x96   : > { %4791 = vmatpush3.bf16.msra.mxu1 %v5324_v39  ;;  %v5402_v39 = vld [vmem:[%s6614_s1 + $0x4a0] sm:$0xff]  }
  0x97   : > { %4792 = vmatprep.subr.bf16.mxu1 %v5333_v46  ;;  %4739 = vmatpush3.bf16.msra.mxu0 %v5336_v49  ;;  %v5411_v46 = vld [vmem:[%s5710_s6 + $0x350] ss:$100 sps:$4 sm:$0xff]   ;;  %v5414_v49 = vld [vmem:[%s6614_s1 + $0x420] sm:$0xff]  }
  0x98   : > { %3121 = vmatmul.mubr.bf16.gmra.mrb[56].mxu0 %v5321_v36  ;;  %4740 = vmatprep.subr.bf16.mxu0 %v5345_v56  ;;  %v5399_v36 = vld [vmem:[%s5710_s6 + $0x288] ss:$100 sps:$4 sm:$0xff]   ;;  %v5423_v56 = vld [vmem:[%s5710_s6 + $0x418] ss:$100 sps:$4 sm:$0xff]  }
  0x99   : > { %3202 = vmatmul.mubr.bf16.gmra.mrb[56].mxu1 %v5322_v37  ;;  %3128 = vmatprep.mubr.bf16.mxu0 %v5327_v42  ;;  %v5400_v37 = vld [vmem:[%s5710_s6 + $0x290] ss:$100 sps:$4 sm:$0xff]   ;;  %v5405_v42 = vld [vmem:[%s6614_s1 + $0x4e8] sm:$0xff]  }
  0x9a   : > { %3209 = vmatprep.mubr.bf16.mxu1 %v5329_v43  ;;  %4793 = vmatpush3.bf16.msra.mxu1 %v5334_v47  ;;  %v5406_v43 = vld [vmem:[%s5710_s6 + $0x354] ss:$100 sps:$4 sm:$0xff]  }
  0x9b   : > { %4794 = vmatprep.subr.bf16.mxu1 %v5337_v50  ;;  %4741 = vmatpush3.bf16.msra.mxu0 %v5346_v57  ;;  %v5412_v47 = vld [vmem:[%s5710_s6 + $0x358] ss:$100 sps:$4 sm:$0xff]   ;;  %v5415_v50 = vld [vmem:[%s6614_s1 + $0x468] sm:$0xff]   ;;  %v5424_v57 = vld [vmem:[%s5710_s6 + $0x420] ss:$100 sps:$4 sm:$0xff]  }
  0x9c   : > { %4742 = vmatprep.subr.bf16.mxu0 %v5347_v58  ;;  %v5425_v58 = vld [vmem:[%s6614_s1 + $0x470] sm:$0xff]  }
  0x9e   : > { %4795 = vmatpush3.bf16.msra.mxu1 %v5342_v53  ;;  %v5418_v53 = vld [vmem:[%s6614_s1 + $0x4b0] sm:$0xff]  }
  0x9f   : > { %4796 = vmatprep.subr.bf16.mxu1 %v5348_v59  ;;  %4743 = vmatpush3.bf16.msra.mxu0 %v5349_v60  ;;  %v5426_v59 = vld [vmem:[%s6614_s1 + $0x430] sm:$0xff]   ;;  %v5427_v60 = vld [vmem:[%s6614_s1 + $0x4f8] sm:$0xff]  }
  0xa0   : > { %3129 = vmatmul.mubr.bf16.gmra.mrb[60].mxu0 %v5331_v44  ;;  %4744 = vmatprep.subr.bf16.mxu0 %v5357_v2  ;;  %v5408_v44 = vld [vmem:[%s5710_s6 + $0x35c] ss:$100 sps:$4 sm:$0xff]   ;;  %v5434_v2 = vld [vmem:[%s5710_s6 + $0x48] ss:$100 sps:$4 sm:$0xff]  }
  0xa1   : > { %3210 = vmatmul.mubr.bf16.gmra.mrb[60].mxu1 %v5332_v45  ;;  %3136 = vmatprep.mubr.bf16.mxu0 %v5338_v51  ;;  %v5410_v45 = vld [vmem:[%s6614_s1 + $0x4a8] sm:$0xff]   ;;  %v5416_v51 = vld [vmem:[%s6614_s1 + $0x4f0] sm:$0xff]  }
  0xa2   : > { %3217 = vmatprep.mubr.bf16.mxu1 %v5340_v52  ;;  %4797 = vmatpush3.bf16.msra.mxu1 %v5350_v61  ;;  %v5417_v52 = vld [vmem:[%s6614_s1 + $0x428] sm:$0xff]   ;;  %v5428_v61 = vld [vmem:[%s6614_s1 + $0x4b8] sm:$0xff]  }
  0xa3   : > { %4745 = vmatpush3.bf16.msra.mxu0 %v5358_v3  ;;  %4798 = vmatprep.subr.bf16.mxu1 %v5359_v4  ;;  %v5436_v3 = vld [vmem:[%s5710_s6 + $0x4c] ss:$100 sps:$4 sm:$0xff]   ;;  %v5437_v4 = vld [vmem:[%s6614_s1 + $0x5c0] sm:$0xff]  }
  0xa4   : > { %4746 = vmatprep.subr.bf16.mxu0 %v5361_v6  ;;  %v5439_v6 = vld [vmem:[%s6614_s1 + $0x5c8] sm:$0xff]  }
  0xa6   : > { %4799 = vmatpush3.bf16.msra.mxu1 %v5360_v5  ;;  %v5438_v5 = vld [vmem:[%s6614_s1 + $0x580] sm:$0xff]  }
  0xa7   : > { %4747 = vmatpush3.bf16.msra.mxu0 %v5362_v7  ;;  %4888 = vmatprep.subr.bf16.mxu1 %v5369_v12  ;;  %v5440_v7 = vld [vmem:[%s5710_s6 + $0x10c] ss:$100 sps:$4 sm:$0xff]   ;;  %v5447_v12 = vld [vmem:[%s6614_s1 + $0x540] sm:$0xff]  }
  0xa8   : > { %3137 = vmatmul.mubr.bf16.gmra.mrb[64].mxu0 %v5343_v54  ;;  %4836 = vmatprep.subr.bf16.mxu0 %v5379_v20  ;;  %v5419_v54 = vld [vmem:[%s5710_s6 + $0x41c] ss:$100 sps:$4 sm:$0xff]   ;;  %v5457_v20 = vld [vmem:[%s5710_s6 + $0x1d0] ss:$100 sps:$4 sm:$0xff]  }
  0xa9   : > { %3218 = vmatmul.mubr.bf16.gmra.mrb[64].mxu1 %v5344_v55  ;;  %3144 = vmatprep.mubr.bf16.mxu0 %v5351_v62  ;;  %v5421_v55 = vld [vmem:[%s5710_s6 + $0x424] ss:$100 sps:$4 sm:$0xff]   ;;  %v5429_v62 = vld [vmem:[%s6614_s1 + $0x478] sm:$0xff]  }
  0xaa   : > { %3225 = vmatprep.mubr.bf16.mxu1 %v5353_v63  ;;  %v5430_v63 = vld [vmem:[%s6614_s1 + $0x438] sm:$0xff]  }
  0xb0   : > { %3145 = vmatmul.mubr.bf16.gmra.mrb[68].mxu0 %v5355_v0  ;;  %v5431_v0 = vld [vmem:[%s5710_s6 + $0x40] ss:$100 sps:$4 sm:$0xff]  }
  0xb1   : > { %3226 = vmatmul.mubr.bf16.gmra.mrb[68].mxu1 %v5356_v1  ;;  %3266 = vmatprep.mubr.bf16.mxu0 %v5365_v9  ;;  %v5433_v1 = vld [vmem:[%s5710_s6 + $0x44] ss:$100 sps:$4 sm:$0xff]  }
  0xb2   : > { %3347 = vmatprep.mubr.bf16.mxu1 %v5368_v11  ;;  %v5444_v9 = vld [vmem:[%s6614_s1 + $0x588] sm:$0xff]   ;;  %v5446_v11 = vld [vmem:[%s5710_s6 + $0x110] ss:$100 sps:$4 sm:$0xff]  }
  0xb8   : > { %3267 = vmatmul.mubr.bf16.vlgmr.msra.gmra.mrb[72].mxu0 %v5363_v8  ;;  %v5442_v8 = vld [vmem:[%s5710_s6 + $0x114] ss:$100 sps:$4 sm:$0xff]  }
  0xb9   : > { %3348 = vmatmul.mubr.bf16.vlgmr.msra.gmra.mrb[72].mxu1 %v5366_v10  ;;  %3274 = vmatprep.mubr.bf16.mxu0 %v5372_v15  ;;  %v5445_v10 = vld [vmem:[%s5710_s6 + $0x108] ss:$100 sps:$4 sm:$0xff]   ;;  %v5450_v15 = vld [vmem:[%s6614_s1 + $0x590] sm:$0xff]  }
  0xba   : > { %4889 = vmatpush3.bf16.msra.mxu1 %v5370_v13  ;;  %3355 = vmatprep.mubr.bf16.mxu1 %v5374_v16  ;;  %v5448_v13 = vld [vmem:[%s6614_s1 + $0x500] sm:$0xff]   ;;  %v5451_v16 = vld [vmem:[%s6614_s1 + $0x548] sm:$0xff]  }
  0xbb   : > { %4890 = vmatprep.subr.bf16.mxu1 %v5371_v14  ;;  %4837 = vmatpush3.bf16.msra.mxu0 %v5380_v21  ;;  %v5449_v14 = vld [vmem:[%s6614_s1 + $0x5d0] sm:$0xff]   ;;  %v5458_v21 = vld [vmem:[%s5710_s6 + $0x1d8] ss:$100 sps:$4 sm:$0xff]  }
  0xbc   : > { %4838 = vmatprep.subr.bf16.mxu0 %v5383_v24  ;;  %v5461_v24 = vld [vmem:[%s6614_s1 + $0x550] sm:$0xff]  }
  0xbe   : > { %4891 = vmatpush3.bf16.msra.mxu1 %v5376_v17  ;;  %v5452_v17 = vld [vmem:[%s5710_s6 + $0x1d4] ss:$100 sps:$4 sm:$0xff]  }
  0xbf   : > { %4892 = vmatprep.subr.bf16.mxu1 %v5381_v22  ;;  %4839 = vmatpush3.bf16.msra.mxu0 %v5388_v27  ;;  %v5459_v22 = vld [vmem:[%s6614_s1 + $0x5d8] sm:$0xff]  }
  0xc0   : > { %3275 = vmatmul.mubr.bf16.gmra.mrb[76].mxu0 %v5377_v18  ;;  %4840 = vmatprep.subr.bf16.mxu0 %v5393_v32  ;;  %v5454_v18 = vld [vmem:[%s5710_s6 + $0x1dc] ss:$100 sps:$4 sm:$0xff]  }
  0xc1   : > { %3356 = vmatmul.mubr.bf16.gmra.mrb[76].mxu1 %v5378_v19  ;;  %3282 = vmatprep.mubr.bf16.mxu0 %v5384_v25  ;;  %v5456_v19 = vld [vmem:[%s6614_s1 + $0x508] sm:$0xff]   ;;  %v6252_v25 = vld [vmem:[%s6615_s2] ss:$0 sm:$0xff]  ;;  %v5467_v32 = vld [vmem:[%s5710_s6 + $0x298] ss:$100 sps:$4 sm:$0xff]  }
  0xc2   : > { %4893 = vmatpush3.bf16.msra.mxu1 %v5382_v23  ;;  %3363 = vmatprep.mubr.bf16.mxu1 %v5386_v26  ;;  %v5460_v23 = vld [vmem:[%s6614_s1 + $0x598] sm:$0xff]   ;;  %v5462_v26 = vld [vmem:[%s6614_s1 + $0x510] sm:$0xff]  }
  0xc3   : > { %4894 = vmatprep.subr.bf16.mxu1 %v5391_v30  ;;  %4841 = vmatpush3.bf16.msra.mxu0 %v5394_v33 }
  0xc4   : > { %4842 = vmatprep.subr.bf16.mxu0 %v5403_v40  ;;  %v5469_v40 = vld [vmem:[%s6614_s1 + $0x5e0] sm:$0xff]  }
  0xc6   : > { %4895 = vmatpush3.bf16.msra.mxu1 %v5392_v31  ;;  %v5465_v31 = vld [vmem:[%s5710_s6 + $0x2a4] ss:$100 sps:$4 sm:$0xff]  }
  0xc7   : > { %4896 = vmatprep.subr.bf16.mxu1 %v5401_v38  ;;  %4843 = vmatpush3.bf16.msra.mxu0 %v5404_v41  ;;  %v5470_v41 = vld [vmem:[%s6614_s1 + $0x5a0] sm:$0xff]  }
  0xc8   : > { %3283 = vmatmul.mubr.bf16.gmra.mrb[80].mxu0 %v5389_v28  ;;  %4844 = vmatprep.subr.bf16.mxu0 %v5413_v48  ;;  %v5463_v28 = vld [vmem:[%s5710_s6 + $0x29c] ss:$100 sps:$4 sm:$0xff]  }
  0xc9   : > { %3364 = vmatmul.mubr.bf16.gmra.mrb[80].mxu1 %v5390_v29  ;;  %3290 = vmatprep.mubr.bf16.mxu0 %v5395_v34 }
  0xca   : > { %3371 = vmatprep.mubr.bf16.mxu1 %v5397_v35  ;;  %4897 = vmatpush3.bf16.msra.mxu1 %v5402_v39 }
  0xcb   : > { %4898 = vmatprep.subr.bf16.mxu1 %v5405_v42  ;;  %4845 = vmatpush3.bf16.msra.mxu0 %v5414_v49  ;;  %v5472_v49 = vld [vmem:[%s6614_s1 + $0x518] sm:$0xff]  }
  0xcc   : > { %4846 = vmatprep.subr.bf16.mxu0 %v5415_v50  ;;  %v5473_v50 = vld [vmem:[%s6614_s1 + $0x5e8] sm:$0xff]  }
  0xce   : > { %4899 = vmatpush3.bf16.msra.mxu1 %v5410_v45  ;;  %v5471_v45 = vld [vmem:[%s6614_s1 + $0x558] sm:$0xff]  }
  0xcf   : > { %4900 = vmatprep.subr.bf16.mxu1 %v5416_v51  ;;  %4847 = vmatpush3.bf16.msra.mxu0 %v5417_v52 }
  0xd0   : > { %3291 = vmatmul.mubr.bf16.gmra.mrb[84].mxu0 %v5399_v36  ;;  %4848 = vmatprep.subr.bf16.mxu0 %v5425_v58  ;;  %v5468_v36 = vld [vmem:[%s5710_s6 + $0x2a0] ss:$100 sps:$4 sm:$0xff]  }
  0xd1   : > { %3372 = vmatmul.mubr.bf16.gmra.mrb[84].mxu1 %v5400_v37  ;;  %3298 = vmatprep.mubr.bf16.mxu0 %v5406_v43 }
  0xd2   : > { %3379 = vmatprep.mubr.bf16.mxu1 %v5408_v44  ;;  %4901 = vmatpush3.bf16.msra.mxu1 %v5418_v53  ;;  %v5474_v53 = vld [vmem:[%s5710_s6 + $0x364] ss:$100 sps:$4 sm:$0xff]  }
  0xd3   : > { %4849 = vmatpush3.bf16.msra.mxu0 %v5426_v59  ;;  %4902 = vmatprep.subr.bf16.mxu1 %v5427_v60 }
  0xd4   : > { %4850 = vmatprep.subr.bf16.mxu0 %v5429_v62 }
  0xd6   : > { %4903 = vmatpush3.bf16.msra.mxu1 %v5428_v61 }
  0xd7   : > { %4851 = vmatpush3.bf16.msra.mxu0 %v5430_v63  ;;  %4992 = vmatprep.subr.bf16.mxu1 %v5437_v4 }
  0xd8   : > { %3299 = vmatmul.mubr.bf16.gmra.mrb[88].mxu0 %v5411_v46  ;;  %4940 = vmatprep.subr.bf16.mxu0 %v5447_v12 }
  0xd9   : > { %3380 = vmatmul.mubr.bf16.gmra.mrb[88].mxu1 %v5412_v47  ;;  %3306 = vmatprep.mubr.bf16.mxu0 %v5419_v54 }
  0xda   : > { %3387 = vmatprep.mubr.bf16.mxu1 %v5421_v55 }
  0xe0   : > { %3307 = vmatmul.mubr.bf16.gmra.mrb[92].mxu0 %v5423_v56  ;;  %v5476_v56 = vld [vmem:[%s5710_s6 + $0x36c] ss:$100 sps:$4 sm:$0xff]  }
  0xe1   : > { %3388 = vmatmul.mubr.bf16.gmra.mrb[92].mxu1 %v5424_v57  ;;  %3428 = vmatprep.mubr.bf16.mxu0 %v5433_v1  ;;  %v5478_v57 = vld [vmem:[%s6614_s1 + $0x5a8] sm:$0xff]  }
  0xe2   : > { %3509 = vmatprep.mubr.bf16.mxu1 %v5436_v3  ;;  %v5480_v1 = vld [vmem:[%s5710_s6 + $0x368] ss:$100 sps:$4 sm:$0xff]  }
  0xe8   : > { %3429 = vmatmul.mubr.bf16.vlgmr.msra.gmra.mrb[96].mxu0 %v5431_v0  ;;  %v5479_v0 = vld [vmem:[%s5710_s6 + $0x360] ss:$100 sps:$4 sm:$0xff]  }
  0xe9   : > { %3510 = vmatmul.mubr.bf16.vlgmr.msra.gmra.mrb[96].mxu1 %v5434_v2  ;;  %3436 = vmatprep.mubr.bf16.mxu0 %v5440_v7  ;;  %v5482_v7 = vld [vmem:[%s6614_s1 + $0x520] sm:$0xff]  }
  0xea   : > { %4993 = vmatpush3.bf16.msra.mxu1 %v5438_v5  ;;  %3517 = vmatprep.mubr.bf16.mxu1 %v5442_v8  ;;  %v5481_v5 = vld [vmem:[%s6614_s1 + $0x560] sm:$0xff]  }
  0xeb   : > { %4994 = vmatprep.subr.bf16.mxu1 %v5439_v6  ;;  %4941 = vmatpush3.bf16.msra.mxu0 %v5448_v13 }
  0xec   : > { %4942 = vmatprep.subr.bf16.mxu0 %v5451_v16 }
  0xee   : > { %4995 = vmatpush3.bf16.msra.mxu1 %v5444_v9 }
  0xef   : > { %4996 = vmatprep.subr.bf16.mxu1 %v5449_v14  ;;  %4943 = vmatpush3.bf16.msra.mxu0 %v5456_v19  ;;  %v5485_v14 = vld [vmem:[%s6614_s1 + $0x528] sm:$0xff]  }
  0xf0   : > { %3437 = vmatmul.mubr.bf16.gmra.mrb[100].mxu0 %v5445_v10  ;;  %4944 = vmatprep.subr.bf16.mxu0 %v5461_v24  ;;  %v5483_v10 = vld [vmem:[%s6614_s1 + $0x568] sm:$0xff]  }
  0xf1   : > { %3518 = vmatmul.mubr.bf16.gmra.mrb[100].mxu1 %v5446_v11  ;;  %3444 = vmatprep.mubr.bf16.mxu0 %v5452_v17  ;;  %v5484_v11 = vld [vmem:[%s6614_s1 + $0x5f0] sm:$0xff]  }
  0xf2   : > { %4997 = vmatpush3.bf16.msra.mxu1 %v5450_v15  ;;  %3525 = vmatprep.mubr.bf16.mxu1 %v5454_v18  ;;  %v5487_v24 = vld [vmem:[%s5710_s6 + $0x42c] ss:$100 sps:$4 sm:$0xff]  }
  0xf3   : > { %4998 = vmatprep.subr.bf16.mxu1 %v5459_v22  ;;  %4945 = vmatpush3.bf16.msra.mxu0 %v5462_v26 }
  0xf4   : > { %4946 = vmatprep.subr.bf16.mxu0 %v5471_v45  ;;  %v5497_v45 = vld [vmem:[%s6614_s1 + $0x578] sm:$0xff]  }
  0xf6   : > { %4999 = vmatpush3.bf16.msra.mxu1 %v5460_v23 }
  0xf7   : > { %5000 = vmatprep.subr.bf16.mxu1 %v5469_v40  ;;  %4947 = vmatpush3.bf16.msra.mxu0 %v5472_v49  ;;  %v5496_v40 = vld [vmem:[%s6614_s1 + $0x5b8] sm:$0xff]  }
  0xf8   : > { %3445 = vmatmul.mubr.bf16.gmra.mrb[104].mxu0 %v5457_v20  ;;  %4948 = vmatprep.subr.bf16.mxu0 %v5481_v5  ;;  %v5486_v20 = vld [vmem:[%s6614_s1 + $0x5b0] sm:$0xff]  }
  0xf9   : > { %3526 = vmatmul.mubr.bf16.gmra.mrb[104].mxu1 %v5458_v21  ;;  %3452 = vmatprep.mubr.bf16.mxu0 %v5463_v28 }
  0xfa   : > { %3533 = vmatprep.mubr.bf16.mxu1 %v5465_v31  ;;  %5001 = vmatpush3.bf16.msra.mxu1 %v5470_v41  ;;  %v5493_v31 = vld [vmem:[%s6614_s1 + $0x570] sm:$0xff]  }
  0xfb   : > { %v4436_v27 = vpop.f32.mrb[0].mxu0  ;;  %5002 = vmatprep.subr.bf16.mxu1 %v5473_v50  ;;  %4949 = vmatpush3.bf16.msra.mxu0 %v5482_v7 }
  0xfc   : > { %v4488_v29 = vpop.f32.mrb[0].mxu1  ;;  %v4437_v30 = vpop.f32.mrb[1].mxu0  ;;  %4950 = vmatprep.subr.bf16.mxu0 %v5483_v10 }
  0xfd   : > { %v4438_v33 = vadd.f32 %v4437_v30, %v4436_v27  ;;  %v4489_v34 = vpop.f32.mrb[1].mxu1  ;;  %v4439_v35 = vpop.f32.mrb[2].mxu0  ;;  %v5491_v30 = vld [vmem:[%s5710_s6 + $0x428] ss:$100 sps:$4 sm:$0xff]  }
  0xfe   : > { %v4490_v37 = vadd.f32 %v4489_v34, %v4488_v29  ;;  %v4491_v38 = vpop.f32.mrb[2].mxu1  ;;  %v4440_v39 = vpop.f32.mrb[3].mxu0  ;;  %5003 = vmatpush3.bf16.msra.mxu1 %v5478_v57  ;;  %v5489_v29 = vld [vmem:[%s5710_s6 + $0x434] ss:$100 sps:$4 sm:$0xff]  }
  0xff   : > { %v2783_v42 = vadd.f32 %v4438_v33, %v6252_v25  ;;  %v4441_v43 = vadd.f32 %v4440_v39, %v4439_v35  ;;  %v4492_v44 = vpop.f32.mrb[3].mxu1  ;;  %5004 = vmatprep.subr.bf16.mxu1 %v5484_v11  ;;  %4951 = vmatpush3.bf16.msra.mxu0 %v5485_v14  ;;  %v5492_v33 = vld [vmem:[%s5710_s6 + $0x430] ss:$100 sps:$4 sm:$0xff]   ;;  %v5511_v11 = vld [vmem:[%s5710_s6 + $0x118] ss:$100 sps:$4 sm:$0xff]  }
 0x100   : > { %v4493_v46 = vadd.f32 %v4492_v44, %v4491_v38  ;;  %3453 = vmatmul.mubr.bf16.gmra.mrb[108].mxu0 %v5467_v32  ;;  %4952 = vmatprep.subr.bf16.mxu0 %v5493_v31  ;;  %v5501_v57 = vld [vmem:[%s5710_s6 + $0x54] ss:$100 sps:$4 sm:$0xff]  }
 0x101   : > { %v6271_v47 = vadd.f32 %v4490_v37, %v2783_v42  ;;  %v2786_v48 = vadd.f32 %v4441_v43, %v6252_v25  ;;  %3534 = vmatmul.mubr.bf16.gmra.mrb[108].mxu1 %v5468_v36  ;;  %3460 = vmatprep.mubr.bf16.mxu0 %v5474_v53  ;;  %v5494_v36 = vld [vmem:[%s6614_s1 + $0x530] sm:$0xff]   ;;  %v5495_v37 = vld [vmem:[%s6614_s1 + $0x5f8] sm:$0xff]  }
 0x102   : > { %3541 = vmatprep.mubr.bf16.mxu1 %v5476_v56  ;;  %5005 = vmatpush3.bf16.msra.mxu1 %v5486_v20  ;;  %v5499_v56 = vld [vmem:[%s5710_s6 + $0x50] ss:$100 sps:$4 sm:$0xff]  }
 0x103   : > { %v6280_v51 = vadd.f32 %v4493_v46, %v2786_v48  ;;  %v4442_v52 = vpop.f32.mrb[4].mxu0  ;;  %4953 = vmatpush3.bf16.msra.mxu0 %v5494_v36  ;;  %5006 = vmatprep.subr.bf16.mxu1 %v5495_v37  ;;  %v5498_v48 = vld [vmem:[%s6614_s1 + $0x538] sm:$0xff]   ;;  %v5513_v20 = vld [vmem:[%s6614_s1 + $0x610] sm:$0xff]   ;;  %v5518_v36 = vld [vmem:[%s5710_s6 + $0x1e0] ss:$100 sps:$4 sm:$0xff]  }
 0x104   : > { %v4494_v54 = vpop.f32.mrb[4].mxu1  ;;  %v4443_v55 = vpop.f32.mrb[5].mxu0  ;;  %4954 = vmatprep.subr.bf16.mxu0 %v5497_v45  ;;  %v5519_v37 = vld [vmem:[%s5710_s6 + $0x1e8] ss:$100 sps:$4 sm:$0xff]  }
 0x105   : > { %v4444_v58 = vadd.f32 %v4443_v55, %v4442_v52  ;;  %v4495_v59 = vpop.f32.mrb[5].mxu1  ;;  %v4445_v60 = vpop.f32.mrb[6].mxu0 }
 0x106   : > { %v4496_v61 = vadd.f32 %v4495_v59, %v4494_v54  ;;  %v4497_v62 = vpop.f32.mrb[6].mxu1  ;;  %v4446_v63 = vpop.f32.mrb[7].mxu0  ;;  %5007 = vmatpush3.bf16.msra.mxu1 %v5496_v40  ;;  %v5502_v59 = vld [vmem:[%s5710_s6 + $0x58] ss:$100 sps:$4 sm:$0xff]  }
 0x107   : > { %v2791_v2 = vadd.f32 %v4444_v58, %v6252_v25  ;;  %v4447_v3 = vadd.f32 %v4446_v63, %v4445_v60  ;;  %v4498_v4 = vpop.f32.mrb[7].mxu1  ;;  %4955 = vmatpush3.bf16.msra.mxu0 %v5498_v48  ;;  %v5504_v60 = vld [vmem:[%s5710_s6 + $0x5c] ss:$100 sps:$4 sm:$0xff]  }
 0x108   : > { %v4499_v6 = vadd.f32 %v4498_v4, %v4497_v62  ;;  %3461 = vmatmul.mubr.bf16.gmra.mrb[112].mxu0 %v5479_v0  ;;  %v5505_v63 = vld [vmem:[%s6614_s1 + $0x600] sm:$0xff]   ;;  %v5506_v0 = vld [vmem:[%s6614_s1 + $0x608] sm:$0xff]  }
 0x109   : > { %v6296_v8 = vadd.f32 %v4496_v61, %v2791_v2  ;;  %v2794_v9 = vadd.f32 %v4447_v3, %v6252_v25  ;;  %3542 = vmatmul.mubr.bf16.gmra.mrb[112].mxu1 %v5480_v1  ;;  %3468 = vmatprep.mubr.bf16.mxu0 %v5487_v24  ;;  %v5507_v3 = vld [vmem:[%s5710_s6 + $0x11c] ss:$100 sps:$4 sm:$0xff]  }
 0x10a   : > { %3549 = vmatprep.mubr.bf16.mxu1 %v5489_v29  ;;  %5086 = vmatprep.subr.bf16.mxu1 %v5505_v63 }
 0x10b   : > { %v6305_v12 = vadd.f32 %v4499_v6, %v2794_v9  ;;  %v4448_v13 = vpop.f32.mrb[8].mxu0  ;;  %v5509_v6 = vld [vmem:[%s5710_s6 + $0x124] ss:$100 sps:$4 sm:$0xff]   ;;  %5058 = vmatprep.subr.bf16.mxu0 %v5505_v63 }
 0x10c   : > { %v4500_v15 = vpop.f32.mrb[8].mxu1  ;;  %v4449_v16 = vpop.f32.mrb[9].mxu0 }
 0x10d   : > { %v4450_v17 = vadd.f32 %v4449_v16, %v4448_v13  ;;  %v4501_v18 = vpop.f32.mrb[9].mxu1  ;;  %v4451_v19 = vpop.f32.mrb[10].mxu0  ;;  %v5512_v13 = vld [vmem:[%s5710_s6 + $0x120] ss:$100 sps:$4 sm:$0xff]  }
 0x10e   : > { %v4502_v21 = vadd.f32 %v4501_v18, %v4500_v15  ;;  %v4503_v22 = vpop.f32.mrb[10].mxu1  ;;  %v4452_v23 = vpop.f32.mrb[11].mxu0 }
 0x10f   : > { %v2799_v26 = vadd.f32 %v4450_v17, %v6252_v25  ;;  %v4453_v27 = vadd.f32 %v4452_v23, %v4451_v19  ;;  %v4504_v28 = vpop.f32.mrb[11].mxu1 }
 0x110   : > { %v4505_v32 = vadd.f32 %v4504_v28, %v4503_v22  ;;  %3469 = vmatmul.mubr.bf16.gmra.mrb[116].mxu0 %v5491_v30  ;;  %v5514_v22 = vld [vmem:[%s5710_s6 + $0x1e4] ss:$100 sps:$4 sm:$0xff]  }
 0x111   : > { %v6321_v34 = vadd.f32 %v4502_v21, %v2799_v26  ;;  %v2802_v35 = vadd.f32 %v4453_v27, %v6252_v25  ;;  %3550 = vmatmul.mubr.bf16.gmra.mrb[116].mxu1 %v5492_v33  ;;  %3590 = vmatprep.mubr.bf16.mxu0 %v5501_v57  ;;  %v5516_v26 = vld [vmem:[%s5710_s6 + $0x1ec] ss:$100 sps:$4 sm:$0xff]   ;;  %v5520_v27 = vld [vmem:[%s6614_s1 + $0x618] sm:$0xff]  }
 0x112   : > { %3671 = vmatprep.mubr.bf16.mxu1 %v5504_v60  ;;  %v5525_v60 = vld [vmem:[%s5710_s6 + $0x2a8] ss:$100 sps:$4 sm:$0xff]  }
 0x113   : > { %v6330_v38 = vadd.f32 %v4505_v32, %v2802_v35  ;;  %v4454_v39 = vpop.f32.mrb[12].mxu0 }
 0x114   : > { %v4506_v41 = vpop.f32.mrb[12].mxu1  ;;  %v4455_v42 = vpop.f32.mrb[13].mxu0 }
 0x115   : > { %v4456_v43 = vadd.f32 %v4455_v42, %v4454_v39  ;;  %v4507_v44 = vpop.f32.mrb[13].mxu1  ;;  %v4457_v46 = vpop.f32.mrb[14].mxu0  ;;  %v5521_v42 = vld [vmem:[%s5710_s6 + $0x2ac] ss:$100 sps:$4 sm:$0xff]  }
 0x116   : > { %v4508_v49 = vadd.f32 %v4507_v44, %v4506_v41  ;;  %v4509_v50 = vpop.f32.mrb[14].mxu1  ;;  %v4458_v52 = vpop.f32.mrb[15].mxu0 }
 0x117   : > { %v2807_v53 = vadd.f32 %v4456_v43, %v6252_v25  ;;  %v4459_v54 = vadd.f32 %v4458_v52, %v4457_v46  ;;  %v4510_v55 = vpop.f32.mrb[15].mxu1  ;;  %v5527_v46 = vld [vmem:[%s6614_s1 + $0x620] sm:$0xff]  }
 0x118   : > { %v4511_v58 = vadd.f32 %v4510_v55, %v4509_v50  ;;  %3591 = vmatmul.mubr.bf16.vlgmr.msra.gmra.mrb[120].mxu0 %v5499_v56 }
 0x119   : > { %v6346_v61 = vadd.f32 %v4508_v49, %v2807_v53  ;;  %v2810_v62 = vadd.f32 %v4459_v54, %v6252_v25  ;;  %3672 = vmatmul.mubr.bf16.vlgmr.msra.gmra.mrb[120].mxu1 %v5502_v59  ;;  %3598 = vmatprep.mubr.bf16.mxu0 %v5507_v3  ;;  %v5523_v49 = vld [vmem:[%s5710_s6 + $0x2b4] ss:$100 sps:$4 sm:$0xff]   ;;  %v5528_v53 = vld [vmem:[%s6614_s1 + $0x628] sm:$0xff]  }
 0x11a   : > { %5094 = vmatpush3.bf16.msra.mxu1 %v5505_v63  ;;  %3679 = vmatprep.mubr.bf16.mxu1 %v5509_v6  ;;  %v5529_v3 = vld [vmem:[%s5710_s6 + $0x374] ss:$100 sps:$4 sm:$0xff]  }
 0x11b   : > { %v6355_v1 = vadd.f32 %v4511_v58, %v2810_v62  ;;  %v4460_v2 = vpop.f32.mrb[16].mxu0  ;;  %5087 = vmatprep.subr.bf16.mxu1 %v5506_v0  ;;  %5059 = vmatpush3.bf16.msra.mxu0 %v5505_v63  ;;  %v5526_v62 = vld [vmem:[%s5710_s6 + $0x2b0] ss:$100 sps:$4 sm:$0xff]  }
 0x11c   : > { %v4512_v4 = vpop.f32.mrb[16].mxu1  ;;  %v4461_v5 = vpop.f32.mrb[17].mxu0  ;;  %5060 = vmatprep.subr.bf16.mxu0 %v5506_v0 }
 0x11d   : > { %v4462_v7 = vadd.f32 %v4461_v5, %v4460_v2  ;;  %v4513_v9 = vpop.f32.mrb[17].mxu1  ;;  %v4463_v10 = vpop.f32.mrb[18].mxu0 }
 0x11e   : > { %v4514_v14 = vadd.f32 %v4513_v9, %v4512_v4  ;;  %v4515_v15 = vpop.f32.mrb[18].mxu1  ;;  %v4464_v16 = vpop.f32.mrb[19].mxu0  ;;  %5095 = vmatpush3.bf16.msra.mxu1 %v5506_v0  ;;  %v5535_v4 = vld [vmem:[%s6614_s1 + $0x630] sm:$0xff]  }
 0x11f   : > { %v2815_v17 = vadd.f32 %v4462_v7, %v6252_v25  ;;  %v4465_v18 = vadd.f32 %v4464_v16, %v4463_v10  ;;  %v4516_v19 = vpop.f32.mrb[19].mxu1  ;;  %5088 = vmatprep.subr.bf16.mxu1 %v5513_v20  ;;  %5061 = vmatpush3.bf16.msra.mxu0 %v5506_v0  ;;  %v5531_v10 = vld [vmem:[%s5710_s6 + $0x37c] ss:$100 sps:$4 sm:$0xff]  }
 0x120   : > { %v4517_v21 = vadd.f32 %v4516_v19, %v4515_v15  ;;  %3599 = vmatmul.mubr.bf16.gmra.mrb[124].mxu0 %v5511_v11  ;;  %5062 = vmatprep.subr.bf16.mxu0 %v5513_v20 }
 0x121   : > { %v6366_v23 = vadd.f32 %v4514_v14, %v2815_v17  ;;  %v2818_v24 = vadd.f32 %v4465_v18, %v6252_v25  ;;  %3680 = vmatmul.mubr.bf16.gmra.mrb[124].mxu1 %v5512_v13  ;;  %3606 = vmatprep.mubr.bf16.mxu0 %v5514_v22  ;;  %v5542_v14 = vld [vmem:[%s6614_s1 + $0x638] sm:$0xff]  }
 0x122   : > { %3687 = vmatprep.mubr.bf16.mxu1 %v5516_v26  ;;  %5096 = vmatpush3.bf16.msra.mxu1 %v5513_v20 }
 0x123   : > { %v6373_v28 = vadd.f32 %v4517_v21, %v2818_v24  ;;  %v4466_v29 = vpop.f32.mrb[20].mxu0  ;;  %5089 = vmatprep.subr.bf16.mxu1 %v5520_v27  ;;  %5063 = vmatpush3.bf16.msra.mxu0 %v5513_v20 }
 0x124   : > { %v4518_v30 = vpop.f32.mrb[20].mxu1  ;;  %v4467_v31 = vpop.f32.mrb[21].mxu0  ;;  %5064 = vmatprep.subr.bf16.mxu0 %v5520_v27 }
 0x125   : > { %v4468_v32 = vadd.f32 %v4467_v31, %v4466_v29  ;;  %v4519_v33 = vpop.f32.mrb[21].mxu1  ;;  %v4469_v35 = vpop.f32.mrb[22].mxu0  ;;  %v5533_v29 = vld [vmem:[%s5710_s6 + $0x370] ss:$100 sps:$4 sm:$0xff]  }
 0x126   : > { %v4520_v39 = vadd.f32 %v4519_v33, %v4518_v30  ;;  %v4521_v40 = vpop.f32.mrb[22].mxu1  ;;  %v4470_v41 = vpop.f32.mrb[23].mxu0  ;;  %5097 = vmatpush3.bf16.msra.mxu1 %v5520_v27  ;;  %v5534_v30 = vld [vmem:[%s5710_s6 + $0x378] ss:$100 sps:$4 sm:$0xff]   ;;  %v5538_v33 = vld [vmem:[%s5710_s6 + $0x444] ss:$100 sps:$4 sm:$0xff]  }
 0x127   : > { %v2823_v43 = vadd.f32 %v4468_v32, %v6252_v25  ;;  %v4471_v44 = vadd.f32 %v4470_v41, %v4469_v35  ;;  %v4522_v45 = vpop.f32.mrb[23].mxu1  ;;  %5090 = vmatprep.subr.bf16.mxu1 %v5527_v46  ;;  %5065 = vmatpush3.bf16.msra.mxu0 %v5520_v27  ;;  %v5536_v32 = vld [vmem:[%s5710_s6 + $0x43c] ss:$100 sps:$4 sm:$0xff]  }
 0x128   : > { %v4523_v48 = vadd.f32 %v4522_v45, %v4521_v40  ;;  %3607 = vmatmul.mubr.bf16.gmra.mrb[128].mxu0 %v5518_v36  ;;  %5066 = vmatprep.subr.bf16.mxu0 %v5527_v46 }
 0x129   : > { %v6383_v50 = vadd.f32 %v4520_v39, %v2823_v43  ;;  %v2826_v52 = vadd.f32 %v4471_v44, %v6252_v25  ;;  %3688 = vmatmul.mubr.bf16.gmra.mrb[128].mxu1 %v5519_v37  ;;  %3614 = vmatprep.mubr.bf16.mxu0 %v5521_v42 }
 0x12a   : > { %3695 = vmatprep.mubr.bf16.mxu1 %v5523_v49  ;;  %5098 = vmatpush3.bf16.msra.mxu1 %v5527_v46 }
 0x12b   : > { %v6389_v54 = vadd.f32 %v4523_v48, %v2826_v52  ;;  %v4540_v55 = vpop.f32.mrb[24].mxu0  ;;  %5091 = vmatprep.subr.bf16.mxu1 %v5528_v53  ;;  %5067 = vmatpush3.bf16.msra.mxu0 %v5527_v46  ;;  %v5540_v52 = vld [vmem:[%s5710_s6 + $0x438] ss:$100 sps:$4 sm:$0xff]  }
 0x12c   : > { %v4592_v56 = vpop.f32.mrb[24].mxu1  ;;  %v4541_v57 = vpop.f32.mrb[25].mxu0  ;;  %5068 = vmatprep.subr.bf16.mxu0 %v5528_v53 }
 0x12d   : > { %v4542_v25 = vadd.f32 %v4541_v57, %v4540_v55  ;;  %v4593_v58 = vpop.f32.mrb[25].mxu1  ;;  %v4543_v59 = vpop.f32.mrb[26].mxu0  ;;  %v5544_v57 = vld [vmem:[%s5710_s6 + $0x1f0] ss:$100 sps:$4 sm:$0xff]  }
 0x12e   : > { %v4594_v63 = vadd.f32 %v4593_v58, %v4592_v56  ;;  %v4595_v0 = vpop.f32.mrb[26].mxu1  ;;  %v4544_v2 = vpop.f32.mrb[27].mxu0  ;;  %5099 = vmatpush3.bf16.msra.mxu1 %v5528_v53  ;;  %v5543_v56 = vld [vmem:[%s5710_s6 + $0x60] ss:$100 sps:$4 sm:$0xff]  }
 0x12f   : > { %v2945_v5 = vadd.f32 %v4542_v25, %v6271_v47  ;;  %v4545_v6 = vadd.f32 %v4544_v2, %v4543_v59  ;;  %v4596_v7 = vpop.f32.mrb[27].mxu1  ;;  %5092 = vmatprep.subr.bf16.mxu1 %v5535_v4  ;;  %5069 = vmatpush3.bf16.msra.mxu0 %v5528_v53  ;;  %v5541_v53 = vld [vmem:[%s5710_s6 + $0x440] ss:$100 sps:$4 sm:$0xff]  }
 0x130   : > { %v4597_v9 = vadd.f32 %v4596_v7, %v4595_v0  ;;  %3615 = vmatmul.mubr.bf16.gmra.mrb[132].mxu0 %v5525_v60  ;;  %5070 = vmatprep.subr.bf16.mxu0 %v5535_v4 }
 0x131   : > { %v6399_v11 = vadd.f32 %v4594_v63, %v2945_v5  ;;  %v2948_v13 = vadd.f32 %v4545_v6, %v6280_v51  ;;  %3696 = vmatmul.mubr.bf16.gmra.mrb[132].mxu1 %v5526_v62  ;;  %3622 = vmatprep.mubr.bf16.mxu0 %v5529_v3 }
 0x132   : > { %3703 = vmatprep.mubr.bf16.mxu1 %v5531_v10  ;;  %5100 = vmatpush3.bf16.msra.mxu1 %v5535_v4  ;;  %v5546_v10 = vld [vmem:[%s5710_s6 + $0x2b8] ss:$100 sps:$4 sm:$0xff]  }
 0x133   : > { %v6405_v15 = vadd.f32 %v4597_v9, %v2948_v13  ;;  %v4546_v47 = vpop.f32.mrb[28].mxu0  ;;  %5093 = vmatprep.subr.bf16.mxu1 %v5542_v14  ;;  %5071 = vmatpush3.bf16.msra.mxu0 %v5535_v4  ;;  %v5545_v9 = vld [vmem:[%s5710_s6 + $0x128] ss:$100 sps:$4 sm:$0xff]  }
 0x134   : > { %v4598_v16 = vpop.f32.mrb[28].mxu1  ;;  %v4547_v17 = vpop.f32.mrb[29].mxu0  ;;  %5072 = vmatprep.subr.bf16.mxu0 %v5542_v14 }
 0x135   : > { %v4548_v51 = vadd.f32 %v4547_v17, %v4546_v47  ;;  %v4599_v18 = vpop.f32.mrb[29].mxu1  ;;  %v4549_v19 = vpop.f32.mrb[30].mxu0 }
 0x136   : > { %v4600_v20 = vadd.f32 %v4599_v18, %v4598_v16  ;;  %v4601_v21 = vpop.f32.mrb[30].mxu1  ;;  %v4550_v22 = vpop.f32.mrb[31].mxu0  ;;  %5101 = vmatpush3.bf16.msra.mxu1 %v5542_v14 }
 0x137   : > { %v2953_v24 = vadd.f32 %v4548_v51, %v6296_v8  ;;  %v4551_v26 = vadd.f32 %v4550_v22, %v4549_v19  ;;  %v4602_v27 = vpop.f32.mrb[31].mxu1  ;;  %5073 = vmatpush3.bf16.msra.mxu0 %v5542_v14  ;;  %v5547_v14 = vld [vmem:[%s5710_s6 + $0x380] ss:$100 sps:$4 sm:$0xff]  }
 0x138   : > { %v4603_v31 = vadd.f32 %v4602_v27, %v4601_v21  ;;  %3623 = vmatmul.mubr.bf16.gmra.mrb[136].mxu0 %v5533_v29 }
 0x139   : > { %v6412_v35 = vadd.f32 %v4600_v20, %v2953_v24  ;;  %v2956_v36 = vadd.f32 %v4551_v26, %v6305_v12  ;;  %3704 = vmatmul.mubr.bf16.gmra.mrb[136].mxu1 %v5534_v30  ;;  %3630 = vmatprep.mubr.bf16.mxu0 %v5536_v32 }
 0x13a   : > { %3711 = vmatprep.mubr.bf16.mxu1 %v5538_v33 }
 0x13b   : > { %v6415_v37 = vadd.f32 %v4603_v31, %v2956_v36  ;;  %v4552_v8 = vpop.f32.mrb[32].mxu0 }
 0x13c   : > { %v4604_v39 = vpop.f32.mrb[32].mxu1  ;;  %v4553_v40 = vpop.f32.mrb[33].mxu0 }
 0x13d   : > { %v4554_v41 = vadd.f32 %v4553_v40, %v4552_v8  ;;  %v4605_v42 = vpop.f32.mrb[33].mxu1  ;;  %v4555_v43 = vpop.f32.mrb[34].mxu0 }
 0x13e   : > { %v4606_v12 = vadd.f32 %v4605_v42, %v4604_v39  ;;  %v4607_v44 = vpop.f32.mrb[34].mxu1  ;;  %v4556_v45 = vpop.f32.mrb[35].mxu0 }
 0x13f   : > { %v2961_v46 = vadd.f32 %v4554_v41, %v6321_v34  ;;  %v4557_v48 = vadd.f32 %v4556_v45, %v4555_v43  ;;  %v4608_v49 = vpop.f32.mrb[35].mxu1 }
 0x140   : > { %v4609_v55 = vadd.f32 %v4608_v49, %v4607_v44  ;;  %3631 = vmatmul.mubr.bf16.gmra.mrb[140].mxu0 %v5540_v52 }
 0x141   : > { %v6422_v25 = vadd.f32 %v4606_v12, %v2961_v46  ;;  %v2964_v58 = vadd.f32 %v4557_v48, %v6330_v38  ;;  %3712 = vmatmul.mubr.bf16.gmra.mrb[140].mxu1 %v5541_v53  ;;  %5074 = vmatprep.mubr.bf16.mxu0 %v5543_v56 }
 0x142   : > { %5078 = vmatprep.mubr.bf16.mxu1 %v5544_v57 }
 0x143   : > { %v6425_v59 = vadd.f32 %v4609_v55, %v2964_v58  ;;  %v4558_v60 = vpop.f32.mrb[36].mxu0 }
 0x144   : > { %v4610_v62 = vpop.f32.mrb[36].mxu1  ;;  %v4559_v34 = vpop.f32.mrb[37].mxu0 }
 0x145   : > { %v4560_v63 = vadd.f32 %v4559_v34, %v4558_v60  ;;  %v4611_v0 = vpop.f32.mrb[37].mxu1  ;;  %v4561_v2 = vpop.f32.mrb[38].mxu0 }
 0x146   : > { %v4612_v3 = vadd.f32 %v4611_v0, %v4610_v62  ;;  %v4613_v4 = vpop.f32.mrb[38].mxu1  ;;  %v4562_v5 = vpop.f32.mrb[39].mxu0 }
 0x147   : > { %v2969_v38 = vadd.f32 %v4560_v63, %v6346_v61  ;;  %v4563_v6 = vadd.f32 %v4562_v5, %v4561_v2  ;;  %v4614_v7 = vpop.f32.mrb[39].mxu1 }
 0x148   : > { %v4615_v13 = vadd.f32 %v4614_v7, %v4613_v4  ;;  %5075 = vmatmul.mubr.bf16.vlgmr.msra.gmra.mrb[144].mxu0 %v5545_v9 }
 0x149   : > { %v6431_v47 = vadd.f32 %v4612_v3, %v2969_v38  ;;  %v2972_v16 = vadd.f32 %v4563_v6, %v6355_v1  ;;  %5079 = vmatmul.mubr.bf16.vlgmr.msra.gmra.mrb[144].mxu1 %v5546_v10  ;;  %v5548_v1 = vld [vmem:[%s5710_s6 + $0x448] ss:$100 sps:$4 sm:$0xff]   ;;  %s4007_s6 = sshll.u32 %s6622_s21, 2 }
 0x14a   : > { %5082 = vmatprep.mubr.bf16.mxu1 %v5547_v14  ;;  %s6594_s21 = scalar_lea.vmem %s6616_s3, %s4007_s6 }
 0x14b   : > { %v6434_v17 = vadd.f32 %v4615_v13, %v2972_v16  ;;  %v4564_v51 = vpop.f32.mrb[40].mxu0 }
 0x14c   : > { %v4616_v18 = vpop.f32.mrb[40].mxu1  ;;  %v4565_v19 = vpop.f32.mrb[41].mxu0 }
 0x14d   : > { %v4566_v61 = vadd.f32 %v4565_v19, %v4564_v51  ;;  %v4617_v20 = vpop.f32.mrb[41].mxu1  ;;  %v4567_v21 = vpop.f32.mrb[42].mxu0 }
 0x14e   : > { %v4618_v22 = vadd.f32 %v4617_v20, %v4616_v18  ;;  %v4619_v24 = vpop.f32.mrb[42].mxu1  ;;  %v4568_v26 = vpop.f32.mrb[43].mxu0 }
 0x14f   : > { %v2977_v27 = vadd.f32 %v4566_v61, %v6366_v23  ;;  %v4569_v29 = vadd.f32 %v4568_v26, %v4567_v21  ;;  %v4620_v30 = vpop.f32.mrb[43].mxu1 }
 0x150   : > { %v4621_v31 = vadd.f32 %v4620_v30, %v4619_v24 }
 0x151   : > { %v6438_v32 = vadd.f32 %v4618_v22, %v2977_v27  ;;  %v2980_v33 = vadd.f32 %v4569_v29, %v6373_v28  ;;  %5083 = vmatmul.mubr.bf16.gmra.mrb[148].mxu1 %v5548_v1 }
 0x153   : > { %v6441_v36 = vadd.f32 %v4621_v31, %v2980_v33  ;;  %v4570_v8 = vpop.f32.mrb[44].mxu0 }
 0x154   : > { %v4622_v39 = vpop.f32.mrb[44].mxu1  ;;  %v4571_v40 = vpop.f32.mrb[45].mxu0 }
 0x155   : > { %v4572_v41 = vadd.f32 %v4571_v40, %v4570_v8  ;;  %v4623_v42 = vpop.f32.mrb[45].mxu1  ;;  %v4573_v43 = vpop.f32.mrb[46].mxu0 }
 0x156   : > { %v4624_v12 = vadd.f32 %v4623_v42, %v4622_v39  ;;  %v4625_v44 = vpop.f32.mrb[46].mxu1  ;;  %v4574_v23 = vpop.f32.mrb[47].mxu0 }
 0x157   : > { %v2985_v45 = vadd.f32 %v4572_v41, %v6383_v50  ;;  %v4575_v46 = vadd.f32 %v4574_v23, %v4573_v43  ;;  %v4626_v48 = vpop.f32.mrb[47].mxu1 }
 0x158   : > { %v4627_v49 = vadd.f32 %v4626_v48, %v4625_v44 }
 0x159   : > { %v6444_v52 = vadd.f32 %v4624_v12, %v2985_v45  ;;  %v2988_v28 = vadd.f32 %v4575_v46, %v6389_v54 }
 0x15b   : > { %v6447_v53 = vadd.f32 %v4627_v49, %v2988_v28  ;;  %v4644_v55 = vpop.f32.mrb[48].mxu0 }
 0x15c   : > { %v4696_v56 = vpop.f32.mrb[48].mxu1  ;;  %v4645_v57 = vpop.f32.mrb[49].mxu0 }
 0x15d   : > { %v4646_v58 = vadd.f32 %v4645_v57, %v4644_v55  ;;  %v4697_v60 = vpop.f32.mrb[49].mxu1  ;;  %v4647_v62 = vpop.f32.mrb[50].mxu0 }
 0x15e   : > { %v4698_v34 = vadd.f32 %v4697_v60, %v4696_v56  ;;  %v4699_v63 = vpop.f32.mrb[50].mxu1  ;;  %v4648_v0 = vpop.f32.mrb[51].mxu0 }
 0x15f   : > { %v3107_v50 = vadd.f32 %v4646_v58, %v6399_v11  ;;  %v4649_v2 = vadd.f32 %v4648_v0, %v4647_v62  ;;  %v4700_v3 = vpop.f32.mrb[51].mxu1 }
 0x160   : > { %v4701_v4 = vadd.f32 %v4700_v3, %v4699_v63 }
 0x161   : > { %v6450_v5 = vadd.f32 %v4698_v34, %v3107_v50  ;;  %v3110_v54 = vadd.f32 %v4649_v2, %v6405_v15 }
 0x163   : > { %v6453_v38 = vadd.f32 %v4701_v4, %v3110_v54  ;;  %v4650_v6 = vpop.f32.mrb[52].mxu0 }
 0x164   : > { %v4702_v7 = vpop.f32.mrb[52].mxu1  ;;  %v4651_v9 = vpop.f32.mrb[53].mxu0 }
 0x165   : > { %v4652_v10 = vadd.f32 %v4651_v9, %v4650_v6  ;;  %v4703_v13 = vpop.f32.mrb[53].mxu1  ;;  %v4653_v14 = vpop.f32.mrb[54].mxu0 }
 0x166   : > { %v4704_v16 = vadd.f32 %v4703_v13, %v4702_v7  ;;  %v4705_v51 = vpop.f32.mrb[54].mxu1  ;;  %v4654_v18 = vpop.f32.mrb[55].mxu0 }
 0x167   : > { %v3115_v11 = vadd.f32 %v4652_v10, %v6412_v35  ;;  %v4655_v19 = vadd.f32 %v4654_v18, %v4653_v14  ;;  %v4706_v61 = vpop.f32.mrb[55].mxu1 }
 0x168   : > { %v4707_v20 = vadd.f32 %v4706_v61, %v4705_v51 }
 0x169   : > { %v6456_v21 = vadd.f32 %v4704_v16, %v3115_v11  ;;  %v3118_v15 = vadd.f32 %v4655_v19, %v6415_v37 }
 0x16b   : > { %v6459_v22 = vadd.f32 %v4707_v20, %v3118_v15  ;;  %v4656_v24 = vpop.f32.mrb[56].mxu0 }
 0x16c   : > { %v4708_v26 = vpop.f32.mrb[56].mxu1  ;;  %v4657_v27 = vpop.f32.mrb[57].mxu0 }
 0x16d   : > { %v4658_v29 = vadd.f32 %v4657_v27, %v4656_v24  ;;  %v4709_v30 = vpop.f32.mrb[57].mxu1  ;;  %v4659_v1 = vpop.f32.mrb[58].mxu0 }
 0x16e   : > { %v4710_v31 = vadd.f32 %v4709_v30, %v4708_v26  ;;  %v4711_v33 = vpop.f32.mrb[58].mxu1  ;;  %v4660_v8 = vpop.f32.mrb[59].mxu0 }
 0x16f   : > { %v3123_v35 = vadd.f32 %v4658_v29, %v6422_v25  ;;  %v4661_v39 = vadd.f32 %v4660_v8, %v4659_v1  ;;  %v4712_v40 = vpop.f32.mrb[59].mxu1 }
 0x170   : > { %v4713_v41 = vadd.f32 %v4712_v40, %v4711_v33 }
 0x171   : > { %v6462_v42 = vadd.f32 %v4710_v31, %v3123_v35  ;;  %v3126_v37 = vadd.f32 %v4661_v39, %v6425_v59 }
 0x173   : > { %v6465_v43 = vadd.f32 %v4713_v41, %v3126_v37  ;;  %v4662_v12 = vpop.f32.mrb[60].mxu0 }
 0x174   : > { %v4714_v44 = vpop.f32.mrb[60].mxu1  ;;  %v4663_v23 = vpop.f32.mrb[61].mxu0 }
 0x175   : > { %v4664_v45 = vadd.f32 %v4663_v23, %v4662_v12  ;;  %v4715_v46 = vpop.f32.mrb[61].mxu1  ;;  %v4665_v48 = vpop.f32.mrb[62].mxu0 }
 0x176   : > { %v4716_v49 = vadd.f32 %v4715_v46, %v4714_v44  ;;  %v4717_v28 = vpop.f32.mrb[62].mxu1  ;;  %v4666_v55 = vpop.f32.mrb[63].mxu0 }
 0x177   : > { %v3131_v25 = vadd.f32 %v4664_v45, %v6431_v47  ;;  %v4667_v56 = vadd.f32 %v4666_v55, %v4665_v48  ;;  %v4718_v57 = vpop.f32.mrb[63].mxu1 }
 0x178   : > { %v4719_v58 = vadd.f32 %v4718_v57, %v4717_v28 }
 0x179   : > { %v6468_v60 = vadd.f32 %v4716_v49, %v3131_v25  ;;  %v3134_v59 = vadd.f32 %v4667_v56, %v6434_v17 }
 0x17b   : > { %v6471_v62 = vadd.f32 %v4719_v58, %v3134_v59  ;;  %v4668_v34 = vpop.f32.mrb[64].mxu0 }
 0x17c   : > { %v4720_v63 = vpop.f32.mrb[64].mxu1  ;;  %v4669_v0 = vpop.f32.mrb[65].mxu0 }
 0x17d   : > { %v4670_v50 = vadd.f32 %v4669_v0, %v4668_v34  ;;  %v4721_v2 = vpop.f32.mrb[65].mxu1  ;;  %v4671_v3 = vpop.f32.mrb[66].mxu0 }
 0x17e   : > { %v4722_v4 = vadd.f32 %v4721_v2, %v4720_v63  ;;  %v4723_v54 = vpop.f32.mrb[66].mxu1  ;;  %v4672_v6 = vpop.f32.mrb[67].mxu0 }
 0x17f   : > { %v3139_v47 = vadd.f32 %v4670_v50, %v6438_v32  ;;  %v4673_v7 = vadd.f32 %v4672_v6, %v4671_v3  ;;  %v4724_v9 = vpop.f32.mrb[67].mxu1 }
 0x180   : > { %v4725_v10 = vadd.f32 %v4724_v9, %v4723_v54 }
 0x181   : > { %v6474_v13 = vadd.f32 %v4722_v4, %v3139_v47  ;;  %v3142_v17 = vadd.f32 %v4673_v7, %v6441_v36 }
 0x183   : > { %v6477_v14 = vadd.f32 %v4725_v10, %v3142_v17  ;;  %v4674_v16 = vpop.f32.mrb[68].mxu0 }
 0x184   : > { %v4726_v51 = vpop.f32.mrb[68].mxu1  ;;  %v4675_v18 = vpop.f32.mrb[69].mxu0 }
 0x185   : > { %v4676_v11 = vadd.f32 %v4675_v18, %v4674_v16  ;;  %v4727_v19 = vpop.f32.mrb[69].mxu1  ;;  %v4677_v61 = vpop.f32.mrb[70].mxu0 }
 0x186   : > { %v4728_v20 = vadd.f32 %v4727_v19, %v4726_v51  ;;  %v4729_v15 = vpop.f32.mrb[70].mxu1  ;;  %v4678_v24 = vpop.f32.mrb[71].mxu0 }
 0x187   : > { %v3147_v32 = vadd.f32 %v4676_v11, %v6444_v52  ;;  %v4679_v26 = vadd.f32 %v4678_v24, %v4677_v61  ;;  %v4730_v27 = vpop.f32.mrb[71].mxu1 }
 0x188   : > { %v4731_v29 = vadd.f32 %v4730_v27, %v4729_v15 }
 0x189   : > { %v6480_v30 = vadd.f32 %v4728_v20, %v3147_v32  ;;  %v3150_v36 = vadd.f32 %v4679_v26, %v6447_v53 }
 0x18b   : > { %v6483_v1 = vadd.f32 %v4731_v29, %v3150_v36  ;;  %v4748_v31 = vpop.f32.mrb[72].mxu0 }
 0x18c   : > { %v4800_v33 = vpop.f32.mrb[72].mxu1  ;;  %v4749_v8 = vpop.f32.mrb[73].mxu0 }
 0x18d   : > { %v4750_v35 = vadd.f32 %v4749_v8, %v4748_v31  ;;  %v4801_v39 = vpop.f32.mrb[73].mxu1  ;;  %v4751_v40 = vpop.f32.mrb[74].mxu0 }
 0x18e   : > { %v4802_v41 = vadd.f32 %v4801_v39, %v4800_v33  ;;  %v4803_v37 = vpop.f32.mrb[74].mxu1  ;;  %v4752_v12 = vpop.f32.mrb[75].mxu0 }
 0x18f   : > { %v3269_v52 = vadd.f32 %v4750_v35, %v6450_v5  ;;  %v4753_v44 = vadd.f32 %v4752_v12, %v4751_v40  ;;  %v4804_v23 = vpop.f32.mrb[75].mxu1 }
 0x190   : > { %v4805_v45 = vadd.f32 %v4804_v23, %v4803_v37 }
 0x191   : > { %v6486_v46 = vadd.f32 %v4802_v41, %v3269_v52  ;;  %v3272_v53 = vadd.f32 %v4753_v44, %v6453_v38 }
 0x193   : > { %v6489_v48 = vadd.f32 %v4805_v45, %v3272_v53  ;;  %v4754_v49 = vpop.f32.mrb[76].mxu0 }
 0x194   : > { %v4806_v28 = vpop.f32.mrb[76].mxu1  ;;  %v4755_v55 = vpop.f32.mrb[77].mxu0 }
 0x195   : > { %v4756_v25 = vadd.f32 %v4755_v55, %v4754_v49  ;;  %v4807_v56 = vpop.f32.mrb[77].mxu1  ;;  %v4757_v57 = vpop.f32.mrb[78].mxu0 }
 0x196   : > { %v4808_v58 = vadd.f32 %v4807_v56, %v4806_v28  ;;  %v4809_v59 = vpop.f32.mrb[78].mxu1  ;;  %v4758_v34 = vpop.f32.mrb[79].mxu0 }
 0x197   : > { %v3277_v5 = vadd.f32 %v4756_v25, %v6456_v21  ;;  %v4759_v63 = vadd.f32 %v4758_v34, %v4757_v57  ;;  %v4810_v0 = vpop.f32.mrb[79].mxu1 }
 0x198   : > { %v4811_v50 = vadd.f32 %v4810_v0, %v4809_v59 }
 0x199   : > { %v6492_v2 = vadd.f32 %v4808_v58, %v3277_v5  ;;  %v3280_v38 = vadd.f32 %v4759_v63, %v6459_v22 }
 0x19b   : > { %v6495_v3 = vadd.f32 %v4811_v50, %v3280_v38  ;;  %v4760_v4 = vpop.f32.mrb[80].mxu0 }
 0x19c   : > { %v4812_v54 = vpop.f32.mrb[80].mxu1  ;;  %v4761_v6 = vpop.f32.mrb[81].mxu0 }
 0x19d   : > { %v4762_v47 = vadd.f32 %v4761_v6, %v4760_v4  ;;  %v4813_v7 = vpop.f32.mrb[81].mxu1  ;;  %v4763_v9 = vpop.f32.mrb[82].mxu0 }
 0x19e   : > { %v4814_v10 = vadd.f32 %v4813_v7, %v4812_v54  ;;  %v4815_v17 = vpop.f32.mrb[82].mxu1  ;;  %v4764_v16 = vpop.f32.mrb[83].mxu0 }
 0x19f   : > { %v3285_v21 = vadd.f32 %v4762_v47, %v6462_v42  ;;  %v4765_v51 = vadd.f32 %v4764_v16, %v4763_v9  ;;  %v4816_v18 = vpop.f32.mrb[83].mxu1 }
 0x1a0   : > { %v4817_v11 = vadd.f32 %v4816_v18, %v4815_v17 }
 0x1a1   : > { %v6498_v19 = vadd.f32 %v4814_v10, %v3285_v21  ;;  %v3288_v22 = vadd.f32 %v4765_v51, %v6465_v43 }
 0x1a3   : > { %v6501_v61 = vadd.f32 %v4817_v11, %v3288_v22  ;;  %v4766_v20 = vpop.f32.mrb[84].mxu0 }
 0x1a4   : > { %v4818_v15 = vpop.f32.mrb[84].mxu1  ;;  %v4767_v24 = vpop.f32.mrb[85].mxu0 }
 0x1a5   : > { %v4768_v32 = vadd.f32 %v4767_v24, %v4766_v20  ;;  %v4819_v26 = vpop.f32.mrb[85].mxu1  ;;  %v4769_v27 = vpop.f32.mrb[86].mxu0 }
 0x1a6   : > { %v4820_v29 = vadd.f32 %v4819_v26, %v4818_v15  ;;  %v4821_v36 = vpop.f32.mrb[86].mxu1  ;;  %v4770_v31 = vpop.f32.mrb[87].mxu0 }
 0x1a7   : > { %v3293_v42 = vadd.f32 %v4768_v32, %v6468_v60  ;;  %v4771_v33 = vadd.f32 %v4770_v31, %v4769_v27  ;;  %v4822_v8 = vpop.f32.mrb[87].mxu1 }
 0x1a8   : > { %v4823_v35 = vadd.f32 %v4822_v8, %v4821_v36 }
 0x1a9   : > { %v6504_v39 = vadd.f32 %v4820_v29, %v3293_v42  ;;  %v3296_v43 = vadd.f32 %v4771_v33, %v6471_v62 }
 0x1ab   : > { %v6507_v40 = vadd.f32 %v4823_v35, %v3296_v43  ;;  %v4772_v41 = vpop.f32.mrb[88].mxu0 }
 0x1ac   : > { %v4824_v37 = vpop.f32.mrb[88].mxu1  ;;  %v4773_v12 = vpop.f32.mrb[89].mxu0 }
 0x1ad   : > { %v4774_v52 = vadd.f32 %v4773_v12, %v4772_v41  ;;  %v4825_v44 = vpop.f32.mrb[89].mxu1  ;;  %v4775_v23 = vpop.f32.mrb[90].mxu0 }
 0x1ae   : > { %v4826_v45 = vadd.f32 %v4825_v44, %v4824_v37  ;;  %v4827_v53 = vpop.f32.mrb[90].mxu1  ;;  %v4776_v49 = vpop.f32.mrb[91].mxu0 }
 0x1af   : > { %v3301_v60 = vadd.f32 %v4774_v52, %v6474_v13  ;;  %v4777_v28 = vadd.f32 %v4776_v49, %v4775_v23  ;;  %v4828_v55 = vpop.f32.mrb[91].mxu1 }
 0x1b0   : > { %v4829_v25 = vadd.f32 %v4828_v55, %v4827_v53 }
 0x1b1   : > { %v6510_v56 = vadd.f32 %v4826_v45, %v3301_v60  ;;  %v3304_v62 = vadd.f32 %v4777_v28, %v6477_v14 }
 0x1b3   : > { %v6513_v57 = vadd.f32 %v4829_v25, %v3304_v62  ;;  %v4778_v58 = vpop.f32.mrb[92].mxu0 }
 0x1b4   : > { %v4830_v59 = vpop.f32.mrb[92].mxu1  ;;  %v4779_v34 = vpop.f32.mrb[93].mxu0 }
 0x1b5   : > { %v4780_v5 = vadd.f32 %v4779_v34, %v4778_v58  ;;  %v4831_v63 = vpop.f32.mrb[93].mxu1  ;;  %v4781_v0 = vpop.f32.mrb[94].mxu0 }
 0x1b6   : > { %v4832_v50 = vadd.f32 %v4831_v63, %v4830_v59  ;;  %v4833_v38 = vpop.f32.mrb[94].mxu1  ;;  %v4782_v4 = vpop.f32.mrb[95].mxu0 }
 0x1b7   : > { %v3309_v13 = vadd.f32 %v4780_v5, %v6480_v30  ;;  %v4783_v54 = vadd.f32 %v4782_v4, %v4781_v0  ;;  %v4834_v6 = vpop.f32.mrb[95].mxu1 }
 0x1b8   : > { %v4835_v47 = vadd.f32 %v4834_v6, %v4833_v38 }
 0x1b9   : > { %v6516_v7 = vadd.f32 %v4832_v50, %v3309_v13  ;;  %v3312_v14 = vadd.f32 %v4783_v54, %v6483_v1 }
 0x1bb   : > { %v6519_v9 = vadd.f32 %v4835_v47, %v3312_v14  ;;  %v4852_v10 = vpop.f32.mrb[96].mxu0 }
 0x1bc   : > { %v4904_v17 = vpop.f32.mrb[96].mxu1  ;;  %v4853_v16 = vpop.f32.mrb[97].mxu0 }
 0x1bd   : > { %v4854_v21 = vadd.f32 %v4853_v16, %v4852_v10  ;;  %v4905_v51 = vpop.f32.mrb[97].mxu1  ;;  %v4855_v18 = vpop.f32.mrb[98].mxu0 }
 0x1be   : > { %v4906_v11 = vadd.f32 %v4905_v51, %v4904_v17  ;;  %v4907_v22 = vpop.f32.mrb[98].mxu1  ;;  %v4856_v20 = vpop.f32.mrb[99].mxu0 }
 0x1bf   : > { %v3431_v30 = vadd.f32 %v4854_v21, %v6486_v46  ;;  %v4857_v15 = vadd.f32 %v4856_v20, %v4855_v18  ;;  %v4908_v24 = vpop.f32.mrb[99].mxu1 }
 0x1c0   : > { %v4909_v32 = vadd.f32 %v4908_v24, %v4907_v22 }
 0x1c1   : > { %v6522_v26 = vadd.f32 %v4906_v11, %v3431_v30  ;;  %v3434_v1 = vadd.f32 %v4857_v15, %v6489_v48 }
 0x1c3   : > { %v6525_v27 = vadd.f32 %v4909_v32, %v3434_v1  ;;  %v4858_v29 = vpop.f32.mrb[100].mxu0 }
 0x1c4   : > { %v4910_v36 = vpop.f32.mrb[100].mxu1  ;;  %v4859_v31 = vpop.f32.mrb[101].mxu0 }
 0x1c5   : > { %v4860_v42 = vadd.f32 %v4859_v31, %v4858_v29  ;;  %v4911_v33 = vpop.f32.mrb[101].mxu1  ;;  %v4861_v8 = vpop.f32.mrb[102].mxu0 }
 0x1c6   : > { %v4912_v35 = vadd.f32 %v4911_v33, %v4910_v36  ;;  %v4913_v43 = vpop.f32.mrb[102].mxu1  ;;  %v4862_v41 = vpop.f32.mrb[103].mxu0 }
 0x1c7   : > { %v3439_v46 = vadd.f32 %v4860_v42, %v6492_v2  ;;  %v4863_v37 = vadd.f32 %v4862_v41, %v4861_v8  ;;  %v4914_v12 = vpop.f32.mrb[103].mxu1 }
 0x1c8   : > { %v4915_v52 = vadd.f32 %v4914_v12, %v4913_v43 }
 0x1c9   : > { %v6528_v44 = vadd.f32 %v4912_v35, %v3439_v46  ;;  %v3442_v48 = vadd.f32 %v4863_v37, %v6495_v3 }
 0x1cb   : > { %v6531_v23 = vadd.f32 %v4915_v52, %v3442_v48  ;;  %v4864_v45 = vpop.f32.mrb[104].mxu0 }
 0x1cc   : > { %v4916_v53 = vpop.f32.mrb[104].mxu1  ;;  %v4865_v49 = vpop.f32.mrb[105].mxu0 }
 0x1cd   : > { %v4866_v60 = vadd.f32 %v4865_v49, %v4864_v45  ;;  %v4917_v28 = vpop.f32.mrb[105].mxu1  ;;  %v4867_v55 = vpop.f32.mrb[106].mxu0 }
 0x1ce   : > { %v4918_v25 = vadd.f32 %v4917_v28, %v4916_v53  ;;  %v4919_v62 = vpop.f32.mrb[106].mxu1  ;;  %v4868_v58 = vpop.f32.mrb[107].mxu0 }
 0x1cf   : > { %v3447_v2 = vadd.f32 %v4866_v60, %v6498_v19  ;;  %v4869_v59 = vadd.f32 %v4868_v58, %v4867_v55  ;;  %v4920_v34 = vpop.f32.mrb[107].mxu1 }
 0x1d0   : > { %v4921_v5 = vadd.f32 %v4920_v34, %v4919_v62 }
 0x1d1   : > { %v6534_v63 = vadd.f32 %v4918_v25, %v3447_v2  ;;  %v3450_v3 = vadd.f32 %v4869_v59, %v6501_v61 }
 0x1d3   : > { %v6537_v0 = vadd.f32 %v4921_v5, %v3450_v3  ;;  %v4870_v50 = vpop.f32.mrb[108].mxu0 }
 0x1d4   : > { %v4922_v38 = vpop.f32.mrb[108].mxu1  ;;  %v4871_v4 = vpop.f32.mrb[109].mxu0 }
 0x1d5   : > { %v4872_v13 = vadd.f32 %v4871_v4, %v4870_v50  ;;  %v4923_v54 = vpop.f32.mrb[109].mxu1  ;;  %v4873_v6 = vpop.f32.mrb[110].mxu0 }
 0x1d6   : > { %v4924_v47 = vadd.f32 %v4923_v54, %v4922_v38  ;;  %v4925_v14 = vpop.f32.mrb[110].mxu1  ;;  %v4874_v10 = vpop.f32.mrb[111].mxu0 }
 0x1d7   : > { %v3455_v19 = vadd.f32 %v4872_v13, %v6504_v39  ;;  %v4875_v17 = vadd.f32 %v4874_v10, %v4873_v6  ;;  %v4926_v16 = vpop.f32.mrb[111].mxu1 }
 0x1d8   : > { %v4927_v21 = vadd.f32 %v4926_v16, %v4925_v14 }
 0x1d9   : > { %v6540_v51 = vadd.f32 %v4924_v47, %v3455_v19  ;;  %v3458_v61 = vadd.f32 %v4875_v17, %v6507_v40 }
 0x1db   : > { %v6543_v18 = vadd.f32 %v4927_v21, %v3458_v61  ;;  %v4876_v11 = vpop.f32.mrb[112].mxu0 }
 0x1dc   : > { %v4928_v22 = vpop.f32.mrb[112].mxu1  ;;  %v4877_v20 = vpop.f32.mrb[113].mxu0 }
 0x1dd   : > { %v4878_v30 = vadd.f32 %v4877_v20, %v4876_v11  ;;  %v4929_v15 = vpop.f32.mrb[113].mxu1  ;;  %v4879_v24 = vpop.f32.mrb[114].mxu0 }
 0x1de   : > { %v4930_v32 = vadd.f32 %v4929_v15, %v4928_v22  ;;  %v4931_v1 = vpop.f32.mrb[114].mxu1  ;;  %v4880_v29 = vpop.f32.mrb[115].mxu0 }
 0x1df   : > { %v3463_v39 = vadd.f32 %v4878_v30, %v6510_v56  ;;  %v4881_v36 = vadd.f32 %v4880_v29, %v4879_v24  ;;  %v4932_v31 = vpop.f32.mrb[115].mxu1 }
 0x1e0   : > { %v4933_v42 = vadd.f32 %v4932_v31, %v4931_v1 }
 0x1e1   : > { %v6546_v33 = vadd.f32 %v4930_v32, %v3463_v39  ;;  %v3466_v40 = vadd.f32 %v4881_v36, %v6513_v57 }
 0x1e3   : > { %v6549_v8 = vadd.f32 %v4933_v42, %v3466_v40  ;;  %v4882_v35 = vpop.f32.mrb[116].mxu0 }
 0x1e4   : > { %v4934_v43 = vpop.f32.mrb[116].mxu1  ;;  %v4883_v41 = vpop.f32.mrb[117].mxu0 }
 0x1e5   : > { %v4884_v46 = vadd.f32 %v4883_v41, %v4882_v35  ;;  %v4935_v37 = vpop.f32.mrb[117].mxu1  ;;  %v4885_v12 = vpop.f32.mrb[118].mxu0 }
 0x1e6   : > { %v4936_v52 = vadd.f32 %v4935_v37, %v4934_v43  ;;  %v4937_v48 = vpop.f32.mrb[118].mxu1  ;;  %v4886_v45 = vpop.f32.mrb[119].mxu0 }
 0x1e7   : > { %v3471_v56 = vadd.f32 %v4884_v46, %v6516_v7  ;;  %v4887_v53 = vadd.f32 %v4886_v45, %v4885_v12  ;;  %v4938_v49 = vpop.f32.mrb[119].mxu1 }
 0x1e8   : > { %v4939_v60 = vadd.f32 %v4938_v49, %v4937_v48 }
 0x1e9   : > { %v6552_v28 = vadd.f32 %v4936_v52, %v3471_v56  ;;  %v3474_v57 = vadd.f32 %v4887_v53, %v6519_v9 }
 0x1eb   : > { %v6555_v55 = vadd.f32 %v4939_v60, %v3474_v57  ;;  %v4956_v25 = vpop.f32.mrb[120].mxu0 }
 0x1ec   : > { %v5008_v62 = vpop.f32.mrb[120].mxu1  ;;  %v4957_v58 = vpop.f32.mrb[121].mxu0 }
 0x1ed   : > { %v5009_v2 = vpop.f32.mrb[121].mxu1  ;;  %v4958_v59 = vadd.f32 %v4957_v58, %v4956_v25  ;;  %v4959_v5 = vpop.f32.mrb[122].mxu0 }
 0x1ee   : > { %v5010_v34 = vadd.f32 %v5009_v2, %v5008_v62  ;;  %v5011_v3 = vpop.f32.mrb[122].mxu1  ;;  %v4960_v50 = vpop.f32.mrb[123].mxu0 }
 0x1ef   : > { %v5012_v38 = vpop.f32.mrb[123].mxu1  ;;  %v3593_v7 = vadd.f32 %v4958_v59, %v6522_v26  ;;  %v4961_v4 = vadd.f32 %v4960_v50, %v4959_v5 }
 0x1f0   : > { %v5013_v13 = vadd.f32 %v5012_v38, %v5011_v3 }
 0x1f1   : > { %v3596_v54 = vadd.f32 %v4961_v4, %v6525_v27  ;;  %v6559_v6 = vadd.f32 %v5010_v34, %v3593_v7 }
 0x1f3   : > { %v4962_v9 = vpop.f32.mrb[124].mxu0  ;;  %v6561_v14 = vadd.f32 %v5013_v13, %v3596_v54 }
 0x1f4   : > { %v5014_v47 = vpop.f32.mrb[124].mxu1  ;;  %v4963_v10 = vpop.f32.mrb[125].mxu0 }
 0x1f5   : > { %v5015_v19 = vpop.f32.mrb[125].mxu1  ;;  %v4964_v17 = vadd.f32 %v4963_v10, %v4962_v9  ;;  %v4965_v21 = vpop.f32.mrb[126].mxu0 }
 0x1f6   : > { %v5016_v16 = vadd.f32 %v5015_v19, %v5014_v47  ;;  %v5017_v61 = vpop.f32.mrb[126].mxu1  ;;  %v4966_v11 = vpop.f32.mrb[127].mxu0 }
 0x1f7   : > { %v5018_v22 = vpop.f32.mrb[127].mxu1  ;;  %v3601_v26 = vadd.f32 %v4964_v17, %v6528_v44  ;;  %v4967_v20 = vadd.f32 %v4966_v11, %v4965_v21 }
 0x1f8   : > { %v5019_v30 = vadd.f32 %v5018_v22, %v5017_v61 }
 0x1f9   : > { %v3604_v27 = vadd.f32 %v4967_v20, %v6531_v23  ;;  %v6565_v15 = vadd.f32 %v5016_v16, %v3601_v26 }
 0x1fb   : > { %v4968_v24 = vpop.f32.mrb[128].mxu0  ;;  %v6567_v1 = vadd.f32 %v5019_v30, %v3604_v27 }
 0x1fc   : > { %v5020_v32 = vpop.f32.mrb[128].mxu1  ;;  %v4969_v29 = vpop.f32.mrb[129].mxu0 }
 0x1fd   : > { %v5021_v39 = vpop.f32.mrb[129].mxu1  ;;  %v4970_v36 = vadd.f32 %v4969_v29, %v4968_v24  ;;  %v4971_v42 = vpop.f32.mrb[130].mxu0 }
 0x1fe   : > { %v5022_v31 = vadd.f32 %v5021_v39, %v5020_v32  ;;  %v5023_v40 = vpop.f32.mrb[130].mxu1  ;;  %v4972_v35 = vpop.f32.mrb[131].mxu0 }
 0x1ff   : > { %v5024_v43 = vpop.f32.mrb[131].mxu1  ;;  %v3609_v44 = vadd.f32 %v4970_v36, %v6534_v63  ;;  %v4973_v41 = vadd.f32 %v4972_v35, %v4971_v42 }
 0x200   : > { %v5025_v46 = vadd.f32 %v5024_v43, %v5023_v40 }
 0x201   : > { %v3612_v23 = vadd.f32 %v4973_v41, %v6537_v0  ;;  %v3690_v37 = vadd.f32 %v5022_v31, %v3609_v44 }
 0x203   : > { %v4974_v12 = vpop.f32.mrb[132].mxu0  ;;  %v6571_v48 = vadd.f32 %v5025_v46, %v3612_v23 }
 0x204   : > { %v5026_v52 = vpop.f32.mrb[132].mxu1  ;;  %v4975_v45 = vpop.f32.mrb[133].mxu0 }
 0x205   : > { %v5027_v56 = vpop.f32.mrb[133].mxu1  ;;  %v4976_v53 = vadd.f32 %v4975_v45, %v4974_v12  ;;  %v4977_v60 = vpop.f32.mrb[134].mxu0 }
 0x206   : > { %v5028_v49 = vadd.f32 %v5027_v56, %v5026_v52  ;;  %v5029_v57 = vpop.f32.mrb[134].mxu1  ;;  %v4978_v25 = vpop.f32.mrb[135].mxu0 }
 0x207   : > { %v5030_v62 = vpop.f32.mrb[135].mxu1  ;;  %v3617_v58 = vadd.f32 %v4976_v53, %v6540_v51  ;;  %v4979_v63 = vadd.f32 %v4978_v25, %v4977_v60 }
 0x208   : > { %v5031_v2 = vadd.f32 %v5030_v62, %v5029_v57 }
 0x209   : > { %v3620_v59 = vadd.f32 %v4979_v63, %v6543_v18  ;;  %v3698_v0 = vadd.f32 %v5028_v49, %v3617_v58 }
 0x20b   : > { %v4980_v34 = vpop.f32.mrb[136].mxu0  ;;  %v3701_v3 = vadd.f32 %v5031_v2, %v3620_v59 }
 0x20c   : > { %v5032_v5 = vpop.f32.mrb[136].mxu1  ;;  %v4981_v50 = vpop.f32.mrb[137].mxu0 }
 0x20d   : > { %v5033_v38 = vpop.f32.mrb[137].mxu1  ;;  %v4982_v7 = vadd.f32 %v4981_v50, %v4980_v34  ;;  %v4983_v13 = vpop.f32.mrb[138].mxu0 }
 0x20e   : > { %v5034_v4 = vadd.f32 %v5033_v38, %v5032_v5  ;;  %v5035_v54 = vpop.f32.mrb[138].mxu1  ;;  %v4984_v9 = vpop.f32.mrb[139].mxu0 }
 0x20f   : > { %v5036_v47 = vpop.f32.mrb[139].mxu1  ;;  %v3625_v10 = vadd.f32 %v4982_v7, %v6546_v33  ;;  %v4985_v19 = vadd.f32 %v4984_v9, %v4983_v13 }
 0x210   : > { %v5037_v51 = vadd.f32 %v5036_v47, %v5035_v54 }
 0x211   : > { %v3628_v17 = vadd.f32 %v4985_v19, %v6549_v8  ;;  %v6577_v16 = vadd.f32 %v5034_v4, %v3625_v10 }
 0x213   : > { %v4986_v18 = vpop.f32.mrb[140].mxu0  ;;  %v6579_v61 = vadd.f32 %v5037_v51, %v3628_v17 }
 0x214   : > { %v5038_v21 = vpop.f32.mrb[140].mxu1  ;;  %v4987_v11 = vpop.f32.mrb[141].mxu0 }
 0x215   : > { %v5039_v22 = vpop.f32.mrb[141].mxu1  ;;  %v4988_v26 = vadd.f32 %v4987_v11, %v4986_v18  ;;  %v4989_v30 = vpop.f32.mrb[142].mxu0 }
 0x216   : > { %v5040_v20 = vadd.f32 %v5039_v22, %v5038_v21  ;;  %v5041_v27 = vpop.f32.mrb[142].mxu1  ;;  %v4990_v24 = vpop.f32.mrb[143].mxu0 }
 0x217   : > { %v5042_v32 = vpop.f32.mrb[143].mxu1  ;;  %v3633_v33 = vadd.f32 %v4988_v26, %v6552_v28  ;;  %v4991_v29 = vadd.f32 %v4990_v24, %v4989_v30 }
 0x218   : > { %v5043_v39 = vadd.f32 %v5042_v32, %v5041_v27 }
 0x219   : > { %v3636_v8 = vadd.f32 %v4991_v29, %v6555_v55  ;;  %v3714_v36 = vadd.f32 %v5040_v20, %v3633_v33 }
 0x21b   : > { %v5076_v31 = vpop.f32.mrb[144].mxu0  ;;  %v3717_v40 = vadd.f32 %v5043_v39, %v3636_v8 }
 0x21c   : > { %v5080_v42 = vpop.f32.mrb[144].mxu1  ;;  %v3763_v35 = vadd.f32 %v5076_v31, %v6565_v15  ;;  %v3754_v44 = vpop.f32.mrb[145].mxu0 }
 0x21d   : > { %v3779_v43 = vadd.f32 %v5080_v42, %v3698_v0  ;;  %v3770_v41 = vpop.f32.mrb[145].mxu1  ;;  %v3755_v46 = vadd.f32 %v3754_v44, %v6559_v6  ;;  %v5077_v12 = vpop.f32.mrb[146].mxu0 }
 0x21e   : > { %v3771_v23 = vadd.f32 %v3770_v41, %v3690_v37  ;;  %v5081_v52 = vpop.f32.mrb[146].mxu1  ;;  %vm3803_vm0 = vcmp.ge.f32.partialorder %v3763_v35, 0.0  ;;  %v3815_v28 = vmul.f32 0.01, %v3763_v35  ;;  %v3766_v53 = vadd.f32 %v5077_v12, %v6567_v1  ;;  %v3757_v49 = vpop.f32.mrb[147].mxu0 }
 0x21f   : > { %vm3807_vm1 = vcmp.ge.f32.partialorder %v3779_v43, 0.0  ;;  %v3819_v45 = vmul.f32 0.01, %v3779_v43  ;;  %vm3801_vm2 = vcmp.ge.f32.partialorder %v3755_v46, 0.0  ;;  %v3813_v55 = vmul.f32 0.01, %v3755_v46 }
 0x220   : > { %vm3805_vm3 = vcmp.ge.f32.partialorder %v3771_v23, 0.0  ;;  %v3817_v56 = vmul.f32 0.01, %v3771_v23  ;;  %v3782_v15 = vadd.f32 %v5081_v52, %v3701_v3  ;;  %v3773_v60 = vpop.f32.mrb[147].mxu1  ;;  %v3827_v57 = vsel %vm3803_vm0, %v3763_v35, %v3815_v28 }
 0x221   : > { %v3831_v25 = vsel %vm3807_vm1, %v3779_v43, %v3819_v45  ;;  %v3758_v6 = vadd.f32 %v3757_v49, %v6561_v14  ;;  %v3774_v37 = vadd.f32 %v3773_v60, %v6571_v48  ;;  %vm3804_vm4 = vcmp.ge.f32.partialorder %v3766_v53, 0.0 }
 0x222   : > { %v3816_v62 = vmul.f32 0.01, %v3766_v53  ;;  %vm3808_vm5 = vcmp.ge.f32.partialorder %v3782_v15, 0.0  ;;  %v3820_v58 = vmul.f32 0.01, %v3782_v15  ;;  %v3825_v1 = vsel %vm3801_vm2, %v3755_v46, %v3813_v55 }
 0x223   : > { %vm3802_vm6 = vcmp.ge.f32.partialorder %v3758_v6, 0.0  ;;  %v3814_v63 = vmul.f32 0.01, %v3758_v6  ;;  %vm3806_vm7 = vcmp.ge.f32.partialorder %v3774_v37, 0.0  ;;  %v3818_v2 = vmul.f32 0.01, %v3774_v37 }
 0x224   : > { %v3829_v59 = vsel %vm3805_vm3, %v3771_v23, %v3817_v56  ;;  %v3828_v14 = vsel %vm3804_vm4, %v3766_v53, %v3816_v62  ;;  %v3832_v48 = vsel %vm3808_vm5, %v3782_v15, %v3820_v58  ;;  %v5084_v0 = vpop.f32.mrb[148].mxu1 }
 0x225   : > { %v4393_v34 = vpack.c.bf16 %v3828_v14, %v3827_v57  ;;  %v4403_v5 = vpack.c.bf16 %v3832_v48, %v3831_v25  ;;  %v3826_v3 = vsel %vm3802_vm6, %v3758_v6, %v3814_v63  ;;  %v3830_v50 = vsel %vm3806_vm7, %v3774_v37, %v3818_v2  ;;  %v3786_v38 = vpop.f32.mrb[149].mxu1 }
 0x226   : > { %v4388_v7 = vpack.c.bf16 %v3826_v3, %v3825_v1  ;;  %v4398_v4 = vpack.c.bf16 %v3830_v50, %v3829_v59  ;;  %v3795_v13 = vadd.f32 %v5084_v0, %v3714_v36  ;;  %v3787_v54 = vadd.f32 %v3786_v38, %v6577_v16  ;;  %v5085_v9 = vpop.f32.mrb[150].mxu1 }
 0x227   : > { %4415 = vst [vmem:[%s6594_s21 + $0x8] sm:$0xff] %v4393_v34   ;;  %4417 = vst [vmem:[%s6594_s21 + $0x18] sm:$0xff] %v4403_v5   ;;  %v3798_v47 = vadd.f32 %v5085_v9, %v3717_v40  ;;  %v3789_v10 = vpop.f32.mrb[151].mxu1 }
 0x228   : > { %4389 = vst [vmem:[%s6594_s21] sm:$0xff] %v4388_v7   ;;  %4416 = vst [vmem:[%s6594_s21 + $0x10] sm:$0xff] %v4398_v4   ;;  %vm3811_vm8 = vcmp.ge.f32.partialorder %v3795_v13, 0.0  ;;  %v3823_v19 = vmul.f32 0.01, %v3795_v13  ;;  %v3821_v51 = vmul.f32 0.01, %v3787_v54  ;;  %v3790_v18 = vadd.f32 %v3789_v10, %v6579_v61 }
 0x229   : > { %vm3812_vm9 = vcmp.ge.f32.partialorder %v3798_v47, 0.0  ;;  %v3824_v17 = vmul.f32 0.01, %v3798_v47  ;;  %vm3809_vm10 = vcmp.ge.f32.partialorder %v3787_v54, 0.0 }
 0x22a   : > { %v3835_v21 = vsel %vm3811_vm8, %v3795_v13, %v3823_v19  ;;  %vm3810_vm11 = vcmp.ge.f32.partialorder %v3790_v18, 0.0  ;;  %v3822_v16 = vmul.f32 0.01, %v3790_v18  ;;  %v3833_v26 = vsel %vm3809_vm10, %v3787_v54, %v3821_v51 }
 0x22b   : > { %v3836_v11 = vsel %vm3812_vm9, %v3798_v47, %v3824_v17 }
 0x22c   : > { %v4413_v22 = vpack.c.bf16 %v3836_v11, %v3835_v21  ;;  %v3834_v20 = vsel %vm3810_vm11, %v3790_v18, %v3822_v16 }
 0x22d   : > { %v4408_v30 = vpack.c.bf16 %v3834_v20, %v3833_v26 }
 0x22e   : > { %4419 = vst [vmem:[%s6594_s21 + $0x28] sm:$0xff] %v4413_v22  }
 0x22f   : > { %4418 = vst [vmem:[%s6594_s21 + $0x20] sm:$0xff] %v4408_v30  }
 0x230 PF: > { %s13_s14 = sadd.s32 1, %s5571_s14   ;;  %s6617_s12 = smov %s5567_s13 }
 0x231   : > { %p10_p5 = scmp.ge.s32.totalorder %s13_s14, 5   ;;  %s6618_s13 = smov %s6620_s15 }
 0x233   :  { %12 = sbr.rel (!%p10_p5) target bundleno = 2 (0x2), region = 68 }

// kernel: forward.13
= control target key start
LH: loop header
LB: loop body
LE: loop exit
PB: predicated region body
PF: predicated region fallthrough
CT: control target
= control target key end

     0   :  { %s2622_s12 = smov 0   ;;  %s2624_s13 = smov 0   ;;  %s3056_s0 = inlined_call_operand.vmem [shape: bf16[224,1152], index: 0, kind: input, shape index: {}]   ;;  %s3057_s1 = inlined_call_operand.vmem [shape: bf16[1152,128], index: 1, kind: input, shape index: {}]   ;;  %s3058_s2 = inlined_call_operand.vmem [shape: f32[1,128], index: 2, kind: input, shape index: {}]   ;;  %s3059_s3 = inlined_call_operand.vmem [shape: bf16[224,128], index: 3, kind: output, shape index: {}]  }
   0x1   :  { %s2626_s14 = smov 0  }
   0x2 LB: > { %s25_s15 = sadd.s32 1, %s2594_s13  ;;  %p1869_p0 = scmp.ge.s32.totalorder %s2598_s14, 1  ;;  %s2598_s14 = sphi %s2626_s14, %s13_s14   ;;  %s2594_s13 = sphi %s2624_s13, %s3061_s13   ;;  %s2590_s12 = sphi %s2622_s12, %s3060_s12  }
   0x3   : > { %p27_p1 = scmp.ge.s32.totalorder %s25_s15, 2  ;;  %p170_p2 = scmp.lt.s32.totalorder %s2598_s14, 3 }
   0x5   : > { %s3063_s15 = smov (%p27_p1, %s25_s15), 0  ;;  %p171_p3 = pnand %p1869_p0, %p170_p2 }
   0x6   : > { %v2413_v0 = vld [vmem:[%s3057_s1 + $0x40] sm:$0xff] (!%p171_p3)   ;;  %s205_s18 = smul.u32 (!%p171_p3), 14, %s2590_s12  ;;  %v2415_v2 = vld [vmem:[%s3057_s1 + $0x48] sm:$0xff] (!%p171_p3)   ;;  %v2417_v4 = vld [vmem:[%s3057_s1 + $0x50] sm:$0xff] (!%p171_p3)   ;;  %vm2601_vm0 = vmmov (!%p171_p3), 0  }
   0x7   : > { %174 = sbr.rel (%p171_p3) target bundleno = 402 (0x192), region = 32  ;;  %v2414_v1 = vld [vmem:[%s3057_s1] sm:$0xff] (!%p171_p3)   ;;  %2370 = vmatprep.subr.bf16.mxu1 (!%p171_p3), %v2413_v0  ;;  %2079 = vmatprep.subr.bf16.mxu0 (!%p171_p3), %v2413_v0  ;;  %v2416_v3 = vld [vmem:[%s3057_s1 + $0x8] sm:$0xff] (!%p171_p3)   ;;  %v2418_v5 = vld [vmem:[%s3057_s1 + $0x10] sm:$0xff] (!%p171_p3)  }
   0x8   : > { %p206_p4 = scmp.lt.s32.totalorder (!%p171_p3), %s205_s18, 27  ;;  %2378 = vmatpush3.bf16.msra.mxu1 (!%p171_p3), %v2414_v1  ;;  %2080 = vmatpush3.bf16.msra.mxu0 (!%p171_p3), %v2414_v1  ;;  %v2419_v6 = vld [vmem:[%s3057_s1 + $0x58] sm:$0xff] (!%p171_p3)   ;;  %v2421_v8 = vld [vmem:[%s3057_s1 + $0x60] sm:$0xff] (!%p171_p3)   ;;  %v2423_v10 = vld [vmem:[%s3057_s1 + $0x68] sm:$0xff] (!%p171_p3)  }
   0x9   : > { %2371 = vmatprep.subr.bf16.mxu1 (!%p171_p3), %v2415_v2  ;;  %2081 = vmatprep.subr.bf16.mxu0 (!%p171_p3), %v2415_v2  ;;  %v2420_v7 = vld [vmem:[%s3057_s1 + $0x18] sm:$0xff] (!%p171_p3)   ;;  %v2422_v9 = vld [vmem:[%s3057_s1 + $0x20] sm:$0xff] (!%p171_p3)   ;;  %v2424_v12 = vld [vmem:[%s3057_s1 + $0x28] sm:$0xff] (!%p171_p3)  }
   0xa   : > { %v2425_v14 = vld [vmem:[%s3057_s1 + $0x70] sm:$0xff] (!%p171_p3)   ;;  %v2427_v16 = vld [vmem:[%s3057_s1 + $0x78] sm:$0xff] (!%p171_p3)   ;;  %v2432_v18 = vld [vmem:[%s3057_s1 + $0xc0] sm:$0xff] (!%p171_p3)  }
   0xb   : > { %v2426_v15 = vld [vmem:[%s3057_s1 + $0x30] sm:$0xff] (!%p171_p3)   ;;  %v2428_v17 = vld [vmem:[%s3057_s1 + $0x38] sm:$0xff] (!%p171_p3)   ;;  %v2437_v21 = vld [vmem:[%s3057_s1 + $0x140] sm:$0xff] (!%p171_p3)  }
   0xc   : > { %2379 = vmatpush3.bf16.msra.mxu1 (!%p171_p3), %v2416_v3  ;;  %2082 = vmatpush3.bf16.msra.mxu0 (!%p171_p3), %v2416_v3  ;;  %v2436_v22 = vld [vmem:[%s3057_s1 + $0x80] sm:$0xff] (!%p171_p3)   ;;  %v2439_v24 = vld [vmem:[%s3057_s1 + $0xc8] sm:$0xff] (!%p171_p3)   ;;  %v2443_v30 = vld [vmem:[%s3057_s1 + $0xd0] sm:$0xff] (!%p171_p3)  }
   0xd   : > { %2372 = vmatprep.subr.bf16.mxu1 (!%p171_p3), %v2417_v4  ;;  %2083 = vmatprep.subr.bf16.mxu0 (!%p171_p3), %v2417_v4  ;;  %v2438_v23 = vld [vmem:[%s3057_s1 + $0x100] sm:$0xff] (!%p171_p3)   ;;  %v2441_v25 = vld [vmem:[%s3057_s1 + $0x148] sm:$0xff] (!%p171_p3)   ;;  %v2448_v31 = vld [vmem:[%s3057_s1 + $0x150] sm:$0xff] (!%p171_p3)  }
   0xe   : > { %s3065_s18 = smov (!%p206_p4, %s205_s18), 27  ;;  %v2440_v27 = vld [vmem:[%s3057_s1 + $0x88] sm:$0xff]   ;;  %v2446_v32 = vld [vmem:[%s3057_s1 + $0x90] sm:$0xff]   ;;  %v2450_v36 = vld [vmem:[%s3057_s1 + $0xd8] sm:$0xff]  }
   0xf   : > { %s2386_s4 = smul.u32 36, %s3065_s18  ;;  %v2442_v29 = vld [vmem:[%s3057_s1 + $0x108] sm:$0xff]   ;;  %v2449_v35 = vld [vmem:[%s3057_s1 + $0x110] sm:$0xff]   ;;  %v2455_v37 = vld [vmem:[%s3057_s1 + $0x158] sm:$0xff]   ;;  %s1871_s6 = sshll.u32 %s3065_s18, 2 }
  0x10   : > { %2380 = vmatpush3.bf16.msra.mxu1 %v2418_v5  ;;  %2084 = vmatpush3.bf16.msra.mxu0 %v2418_v5  ;;  %v2453_v38 = vld [vmem:[%s3057_s1 + $0x98] sm:$0xff]   ;;  %v2457_v41 = vld [vmem:[%s3057_s1 + $0xe0] sm:$0xff]   ;;  %v2464_v48 = vld [vmem:[%s3057_s1 + $0xe8] sm:$0xff]   ;;  %s3026_s9 = scalar_lea.vmem %s3059_s3, %s1871_s6 }
  0x11   : > { %2373 = vmatprep.subr.bf16.mxu1 %v2419_v6  ;;  %2085 = vmatprep.subr.bf16.mxu0 %v2419_v6  ;;  %s2673_s11 = scalar_lea.vmem %s3056_s0, %s2386_s4  ;;  %v2456_v39 = vld [vmem:[%s3057_s1 + $0x118] sm:$0xff]   ;;  %v2462_v42 = vld [vmem:[%s3057_s1 + $0x160] sm:$0xff]   ;;  %v2469_v49 = vld [vmem:[%s3057_s1 + $0x168] sm:$0xff]   ;;  %v2600_v6 = vmov 0.0  }
  0x12   : > { %v2431_v11 = vld [vmem:[%s2673_s11 + $0x124] ss:$36 sps:$4 sm:$0xff]   ;;  %v2444_v26 = vld [vmem:[%s2673_s11 + $0x4c] ss:$36 sps:$4 sm:$0xff]   ;;  %v2458_v40 = vld [vmem:[%s2673_s11 + $0x94] ss:$36 sps:$4 sm:$0xff]  }
  0x13   : > { %v2435_v13 = vld [vmem:[%s2673_s11 + $0x4] ss:$36 sps:$4 sm:$0xff]   ;;  %1268 = vmatprep.mubr.bf16.mxu1 %v2431_v11  ;;  %v2451_v28 = vld [vmem:[%s2673_s11 + $0x16c] ss:$36 sps:$4 sm:$0xff]   ;;  %v2465_v43 = vld [vmem:[%s2673_s11 + $0x1b4] ss:$36 sps:$4 sm:$0xff]  }
  0x14   : > { %2381 = vmatpush3.bf16.msra.mxu1 %v2420_v7  ;;  %2086 = vmatpush3.bf16.msra.mxu0 %v2420_v7  ;;  %v2429_v19 = vld [vmem:[%s2673_s11 + $0x120] ss:$36 sps:$4 sm:$0xff]   ;;  %v2447_v33 = vld [vmem:[%s2673_s11 + $0x48] ss:$36 sps:$4 sm:$0xff]   ;;  %v2461_v45 = vld [vmem:[%s2673_s11 + $0x90] ss:$36 sps:$4 sm:$0xff]  }
  0x15   : > { %2374 = vmatprep.subr.bf16.mxu1 %v2421_v8  ;;  %2087 = vmatprep.subr.bf16.mxu0 %v2421_v8  ;;  %v2433_v20 = vld [vmem:[%s2673_s11] ss:$36 sps:$4 sm:$0xff]   ;;  %v2454_v34 = vld [vmem:[%s2673_s11 + $0x168] ss:$36 sps:$4 sm:$0xff]   ;;  %v2468_v47 = vld [vmem:[%s2673_s11 + $0x1b0] ss:$36 sps:$4 sm:$0xff]  }
  0x16   : > { %1236 = vmatprep.mubr.bf16.mxu0 %v2435_v13  ;;  %v2460_v44 = vld [vmem:[%s3057_s1 + $0xa0] sm:$0xff]   ;;  %v2467_v50 = vld [vmem:[%s3057_s1 + $0xa8] sm:$0xff]   ;;  %v2471_v53 = vld [vmem:[%s3057_s1 + $0xf0] sm:$0xff]  }
  0x17   : > { %v2463_v46 = vld [vmem:[%s3057_s1 + $0x120] sm:$0xff]   ;;  %v2470_v52 = vld [vmem:[%s3057_s1 + $0x128] sm:$0xff]   ;;  %v2476_v54 = vld [vmem:[%s3057_s1 + $0x170] sm:$0xff]  }
  0x18   : > { %2382 = vmatpush3.bf16.msra.mxu1 %v2422_v9  ;;  %2088 = vmatpush3.bf16.msra.mxu0 %v2422_v9  ;;  %v2472_v51 = vld [vmem:[%s2673_s11 + $0xdc] ss:$36 sps:$4 sm:$0xff]   ;;  %v2474_v55 = vld [vmem:[%s3057_s1 + $0xb0] sm:$0xff]   ;;  %v2481_v0 = vld [vmem:[%s2673_s11 + $0x8] ss:$36 sps:$4 sm:$0xff]  }
  0x19   : > { %2375 = vmatprep.subr.bf16.mxu1 %v2423_v10  ;;  %2089 = vmatprep.subr.bf16.mxu0 %v2423_v10  ;;  %v2475_v56 = vld [vmem:[%s2673_s11 + $0xd8] ss:$36 sps:$4 sm:$0xff]   ;;  %v2477_v57 = vld [vmem:[%s3057_s1 + $0x130] sm:$0xff]   ;;  %v2485_v63 = vld [vmem:[%s3057_s1 + $0x1c0] sm:$0xff]  }
  0x1a   : > { %v2478_v58 = vld [vmem:[%s3057_s1 + $0xf8] sm:$0xff]   ;;  %v2483_v61 = vld [vmem:[%s2673_s11 + $0xc] ss:$36 sps:$4 sm:$0xff]   ;;  %v2489_v3 = vld [vmem:[%s3057_s1 + $0x180] sm:$0xff]  }
  0x1b   : > { %v2480_v59 = vld [vmem:[%s3057_s1 + $0x178] sm:$0xff]   ;;  %v2486_v1 = vld [vmem:[%s2673_s11 + $0x10] ss:$36 sps:$4 sm:$0xff]   ;;  %v2490_v4 = vld [vmem:[%s3057_s1 + $0x200] sm:$0xff]  }
  0x1c   : > { %2383 = vmatpush3.bf16.msra.mxu1 %v2424_v12  ;;  %2090 = vmatpush3.bf16.msra.mxu0 %v2424_v12  ;;  %v2479_v60 = vld [vmem:[%s3057_s1 + $0xb8] sm:$0xff]   ;;  %v2493_v7 = vld [vmem:[%s3057_s1 + $0x1c8] sm:$0xff]   ;;  %v2494_v10 = vld [vmem:[%s2673_s11 + $0x50] ss:$36 sps:$4 sm:$0xff]  }
  0x1d   : > { %2376 = vmatprep.subr.bf16.mxu1 %v2425_v14  ;;  %2091 = vmatprep.subr.bf16.mxu0 %v2425_v14  ;;  %v2484_v62 = vld [vmem:[%s3057_s1 + $0x138] sm:$0xff]   ;;  %v2495_v8 = vld [vmem:[%s3057_s1 + $0x188] sm:$0xff]   ;;  %v2500_v12 = vld [vmem:[%s3057_s1 + $0x1d0] sm:$0xff]  }
  0x1e   : > { %v2488_v2 = vld [vmem:[%s2673_s11 + $0x14] ss:$36 sps:$4 sm:$0xff]   ;;  %v2496_v9 = vld [vmem:[%s2673_s11 + $0x5c] ss:$36 sps:$4 sm:$0xff]   ;;  %v2499_v11 = vld [vmem:[%s3057_s1 + $0x208] sm:$0xff]  }
  0x1f   : > { %v2491_v5 = vld [vmem:[%s2673_s11 + $0x54] ss:$36 sps:$4 sm:$0xff]   ;;  %v2501_v14 = vld [vmem:[%s2673_s11 + $0x9c] ss:$36 sps:$4 sm:$0xff]  }
  0x20   : > { %2384 = vmatpush3.bf16.msra.mxu1 %v2426_v15  ;;  %2092 = vmatpush3.bf16.msra.mxu0 %v2426_v15  ;;  %v2498_v13 = vld [vmem:[%s2673_s11 + $0x58] ss:$36 sps:$4 sm:$0xff]   ;;  %v2503_v15 = vld [vmem:[%s3057_s1 + $0x190] sm:$0xff]  }
  0x21   : > { %2377 = vmatprep.subr.bf16.mxu1 %v2427_v16  ;;  %2093 = vmatprep.subr.bf16.mxu0 %v2427_v16  ;;  %v2505_v16 = vld [vmem:[%s2673_s11 + $0xa4] ss:$36 sps:$4 sm:$0xff]  }
  0x24   : > { %2385 = vmatpush3.bf16.msra.mxu1 %v2428_v17  ;;  %2094 = vmatpush3.bf16.msra.mxu0 %v2428_v17  ;;  %v2508_v17 = vld [vmem:[%s3057_s1 + $0x210] sm:$0xff]  }
  0x25   : > { %2137 = vmatprep.subr.bf16.mxu1 %v2432_v18  ;;  %2195 = vmatprep.subr.bf16.mxu0 %v2437_v21  ;;  %v2509_v18 = vld [vmem:[%s3057_s1 + $0x1d8] sm:$0xff]   ;;  %v2507_v21 = vld [vmem:[%s2673_s11 + $0xa0] ss:$36 sps:$4 sm:$0xff]  }
  0x27   : > { %1269 = vmatmul.mubr.bf16.vlgmr.msra.gmra.mrb[0].mxu1 %v2429_v19  ;;  %1237 = vmatmul.mubr.bf16.vlgmr.msra.gmra.mrb[0].mxu0 %v2433_v20  ;;  %v2510_v19 = vld [vmem:[%s3057_s1 + $0x198] sm:$0xff]  }
  0x28   : > { %2138 = vmatpush3.bf16.msra.mxu1 %v2436_v22  ;;  %2196 = vmatpush3.bf16.msra.mxu0 %v2438_v23  ;;  %v2504_v20 = vld [vmem:[%s2673_s11 + $0x98] ss:$36 sps:$4 sm:$0xff]   ;;  %v2511_v22 = vld [vmem:[%s2673_s11 + $0xe4] ss:$36 sps:$4 sm:$0xff]   ;;  %v2514_v23 = vld [vmem:[%s2673_s11 + $0xec] ss:$36 sps:$4 sm:$0xff]  }
  0x29   : > { %2139 = vmatprep.subr.bf16.mxu1 %v2439_v24  ;;  %2197 = vmatprep.subr.bf16.mxu0 %v2441_v25  ;;  %v2517_v24 = vld [vmem:[%s3057_s1 + $0x218] sm:$0xff]   ;;  %v2518_v25 = vld [vmem:[%s3057_s1 + $0x1e0] sm:$0xff]  }
  0x2a   : > { %1244 = vmatprep.mubr.bf16.mxu0 %v2444_v26  ;;  %1276 = vmatprep.mubr.bf16.mxu1 %v2451_v28  ;;  %v2519_v26 = vld [vmem:[%s3057_s1 + $0x1a0] sm:$0xff]   ;;  %v2516_v28 = vld [vmem:[%s2673_s11 + $0xe8] ss:$36 sps:$4 sm:$0xff]  }
  0x2c   : > { %2140 = vmatpush3.bf16.msra.mxu1 %v2440_v27  ;;  %2198 = vmatpush3.bf16.msra.mxu0 %v2442_v29  ;;  %v2513_v27 = vld [vmem:[%s2673_s11 + $0xe0] ss:$36 sps:$4 sm:$0xff]   ;;  %v2520_v29 = vld [vmem:[%s2673_s11 + $0x12c] ss:$36 sps:$4 sm:$0xff]  }
  0x2d   : > { %2141 = vmatprep.subr.bf16.mxu1 %v2443_v30  ;;  %2199 = vmatprep.subr.bf16.mxu0 %v2448_v31  ;;  %v2523_v30 = vld [vmem:[%s2673_s11 + $0x134] ss:$36 sps:$4 sm:$0xff]   ;;  %v2526_v31 = vld [vmem:[%s3057_s1 + $0x220] sm:$0xff]  }
  0x2f   : > { %1245 = vmatmul.mubr.bf16.gmra.mrb[4].mxu0 %v2447_v33  ;;  %1277 = vmatmul.mubr.bf16.gmra.mrb[4].mxu1 %v2454_v34  ;;  %v2528_v33 = vld [vmem:[%s3057_s1 + $0x1a8] sm:$0xff]  }
  0x30   : > { %2142 = vmatpush3.bf16.msra.mxu1 %v2446_v32  ;;  %2200 = vmatpush3.bf16.msra.mxu0 %v2449_v35  ;;  %v2527_v32 = vld [vmem:[%s3057_s1 + $0x1e8] sm:$0xff]  }
  0x31   : > { %2143 = vmatprep.subr.bf16.mxu1 %v2450_v36  ;;  %2201 = vmatprep.subr.bf16.mxu0 %v2455_v37  ;;  %v2534_v34 = vld [vmem:[%s3057_s1 + $0x228] sm:$0xff]   ;;  %v2525_v36 = vld [vmem:[%s2673_s11 + $0x130] ss:$36 sps:$4 sm:$0xff]  }
  0x32   : > { %1252 = vmatprep.mubr.bf16.mxu0 %v2458_v40  ;;  %1284 = vmatprep.mubr.bf16.mxu1 %v2465_v43  ;;  %v2522_v35 = vld [vmem:[%s2673_s11 + $0x128] ss:$36 sps:$4 sm:$0xff]   ;;  %v2536_v37 = vld [vmem:[%s3057_s1 + $0x1f0] sm:$0xff]   ;;  %v2532_v40 = vld [vmem:[%s2673_s11 + $0x17c] ss:$36 sps:$4 sm:$0xff]  }
  0x33   : > { %v2546_v43 = vld [vmem:[%s3057_s1 + $0x1b8] sm:$0xff]  }
  0x34   : > { %2144 = vmatpush3.bf16.msra.mxu1 %v2453_v38  ;;  %2202 = vmatpush3.bf16.msra.mxu0 %v2456_v39  ;;  %v2537_v38 = vld [vmem:[%s3057_s1 + $0x1b0] sm:$0xff]  }
  0x35   : > { %2145 = vmatprep.subr.bf16.mxu1 %v2457_v41  ;;  %2203 = vmatprep.subr.bf16.mxu0 %v2462_v42  ;;  %v2529_v39 = vld [vmem:[%s2673_s11 + $0x174] ss:$36 sps:$4 sm:$0xff]  }
  0x36   : > { %v2541_v41 = vld [vmem:[%s3057_s1 + $0x230] sm:$0xff]   ;;  %v2544_v42 = vld [vmem:[%s3057_s1 + $0x1f8] sm:$0xff]  }
  0x37   : > { %1253 = vmatmul.mubr.bf16.gmra.mrb[8].mxu0 %v2461_v45  ;;  %1285 = vmatmul.mubr.bf16.gmra.mrb[8].mxu1 %v2468_v47  ;;  %v2550_v45 = vld [vmem:[%s3057_s1 + $0x238] sm:$0xff]  }
  0x38   : > { %2146 = vmatpush3.bf16.msra.mxu1 %v2460_v44  ;;  %2204 = vmatpush3.bf16.msra.mxu0 %v2463_v46  ;;  %v2531_v44 = vld [vmem:[%s2673_s11 + $0x170] ss:$36 sps:$4 sm:$0xff]   ;;  %v2535_v46 = vld [vmem:[%s2673_s11 + $0x178] ss:$36 sps:$4 sm:$0xff]  }
  0x39   : > { %2147 = vmatprep.subr.bf16.mxu1 %v2464_v48  ;;  %2205 = vmatprep.subr.bf16.mxu0 %v2469_v49  ;;  %v2538_v47 = vld [vmem:[%s2673_s11 + $0x1bc] ss:$36 sps:$4 sm:$0xff]   ;;  %v2542_v48 = vld [vmem:[%s2673_s11 + $0x1c4] ss:$36 sps:$4 sm:$0xff]  }
  0x3a   : > { %1260 = vmatprep.mubr.bf16.mxu0 %v2472_v51  ;;  %1325 = vmatprep.mubr.bf16.mxu1 %v2483_v61  ;;  %v2540_v49 = vld [vmem:[%s2673_s11 + $0x1b8] ss:$36 sps:$4 sm:$0xff]   ;;  %v2562_v61 = vld [vmem:[%s2673_s11 + $0xf0] ss:$36 sps:$4 sm:$0xff]  }
  0x3b   : > { %v2549_v51 = vld [vmem:[%s2673_s11 + $0x1c] ss:$36 sps:$4 sm:$0xff]  }
  0x3c   : > { %2148 = vmatpush3.bf16.msra.mxu1 %v2467_v50  ;;  %2206 = vmatpush3.bf16.msra.mxu0 %v2470_v52  ;;  %v2545_v50 = vld [vmem:[%s2673_s11 + $0x1c0] ss:$36 sps:$4 sm:$0xff]   ;;  %v2547_v52 = vld [vmem:[%s2673_s11 + $0x18] ss:$36 sps:$4 sm:$0xff]  }
  0x3d   : > { %2149 = vmatprep.subr.bf16.mxu1 %v2471_v53  ;;  %2207 = vmatprep.subr.bf16.mxu0 %v2476_v54  ;;  %v2551_v53 = vld [vmem:[%s2673_s11 + $0x20] ss:$36 sps:$4 sm:$0xff]  }
  0x3e   : > { %v2552_v54 = vld [vmem:[%s2673_s11 + $0x64] ss:$36 sps:$4 sm:$0xff]  }
  0x3f   : > { %1261 = vmatmul.mubr.bf16.gmra.mrb[12].mxu0 %v2475_v56  ;;  %v2555_v56 = vld [vmem:[%s2673_s11 + $0x68] ss:$36 sps:$4 sm:$0xff]  }
  0x40   : > { %2150 = vmatpush3.bf16.msra.mxu1 %v2474_v55  ;;  %2208 = vmatpush3.bf16.msra.mxu0 %v2477_v57  ;;  %v2554_v55 = vld [vmem:[%s2673_s11 + $0x60] ss:$36 sps:$4 sm:$0xff]   ;;  %v2556_v57 = vld [vmem:[%s2673_s11 + $0xac] ss:$36 sps:$4 sm:$0xff]  }
  0x41   : > { %2151 = vmatprep.subr.bf16.mxu1 %v2478_v58  ;;  %2209 = vmatprep.subr.bf16.mxu0 %v2480_v59  ;;  %v2558_v58 = vld [vmem:[%s2673_s11 + $0xa8] ss:$36 sps:$4 sm:$0xff]   ;;  %v2559_v59 = vld [vmem:[%s2673_s11 + $0xb0] ss:$36 sps:$4 sm:$0xff]  }
  0x42   : > { %1414 = vmatprep.mubr.bf16.mxu0 %v2488_v2  ;;  %v2568_v2 = vld [vmem:[%s2673_s11 + $0x184] ss:$36 sps:$4 sm:$0xff]  }
  0x44   : > { %2152 = vmatpush3.bf16.msra.mxu1 %v2479_v60  ;;  %2210 = vmatpush3.bf16.msra.mxu0 %v2484_v62  ;;  %v2560_v60 = vld [vmem:[%s2673_s11 + $0xf4] ss:$36 sps:$4 sm:$0xff]  }
  0x45   : > { %2253 = vmatprep.subr.bf16.mxu1 %v2485_v63  ;;  %2326 = vmatprep.subr.bf16.mxu0 %v2600_v6  ;;  %v2563_v62 = vld [vmem:[%s2673_s11 + $0xf8] ss:$36 sps:$4 sm:$0xff]  }
  0x46   : > { %v2564_v63 = vld [vmem:[%s2673_s11 + $0x13c] ss:$36 sps:$4 sm:$0xff]  }
  0x47   : > { %1326 = vmatmul.mubr.bf16.vlgmr.msra.gmra.mrb[12].mxu1 %v2481_v0  ;;  %1415 = vmatmul.mubr.bf16.vlgmr.msra.gmra.mrb[16].mxu0 %v2486_v1  ;;  %v2566_v0 = vld [vmem:[%s2673_s11 + $0x138] ss:$36 sps:$4 sm:$0xff]   ;;  %v2567_v1 = vld [vmem:[%s2673_s11 + $0x140] ss:$36 sps:$4 sm:$0xff]  }
  0x48   : > { %2254 = vmatpush3.bf16.msra.mxu1 %v2489_v3  ;;  %2327 = vmatpush3.bf16.msra.mxu0 %v2490_v4  ;;  %v2570_v3 = vld [vmem:[%s2673_s11 + $0x180] ss:$36 sps:$4 sm:$0xff]   ;;  %v2571_v4 = vld [vmem:[%s2673_s11 + $0x188] ss:$36 sps:$4 sm:$0xff]  }
  0x49   : > { %1333 = vmatprep.mubr.bf16.mxu1 %v2491_v5  ;;  %2255 = vmatprep.subr.bf16.mxu1 %v2493_v7  ;;  %v2572_v5 = vld [vmem:[%s2673_s11 + $0x1cc] ss:$36 sps:$4 sm:$0xff]  }
  0x4a   : > { %1422 = vmatprep.mubr.bf16.mxu0 %v2496_v9  ;;  %2328 = vmatprep.subr.bf16.mxu0 %v2600_v6  ;;  %v2574_v7 = vld [vmem:[%s2673_s11 + $0x1c8] ss:$36 sps:$4 sm:$0xff]  }
  0x4c   : > { %2256 = vmatpush3.bf16.msra.mxu1 %v2495_v8  ;;  %2329 = vmatpush3.bf16.msra.mxu0 %v2499_v11  ;;  %v2575_v8 = vld [vmem:[%s2673_s11 + $0x1d0] ss:$36 sps:$4 sm:$0xff]  }
  0x4d   : > { %2257 = vmatprep.subr.bf16.mxu1 %v2500_v12  ;;  %2330 = vmatprep.subr.bf16.mxu0 %v2600_v6 }
  0x4f   : > { %1334 = vmatmul.mubr.bf16.gmra.mrb[16].mxu1 %v2494_v10  ;;  %1423 = vmatmul.mubr.bf16.gmra.mrb[20].mxu0 %v2498_v13 }
  0x50   : > { %1341 = vmatprep.mubr.bf16.mxu1 %v2501_v14  ;;  %2258 = vmatpush3.bf16.msra.mxu1 %v2503_v15 }
  0x51   : > { %1430 = vmatprep.mubr.bf16.mxu0 %v2505_v16  ;;  %2331 = vmatpush3.bf16.msra.mxu0 %v2508_v17 }
  0x52   : > { %2259 = vmatprep.subr.bf16.mxu1 %v2509_v18  ;;  %2332 = vmatprep.subr.bf16.mxu0 %v2600_v6 }
  0x54   : > { %2260 = vmatpush3.bf16.msra.mxu1 %v2510_v19 }
  0x55   : > { %2333 = vmatpush3.bf16.msra.mxu0 %v2517_v24  ;;  %2261 = vmatprep.subr.bf16.mxu1 %v2518_v25 }
  0x56   : > { %2334 = vmatprep.subr.bf16.mxu0 %v2600_v6 }
  0x57   : > { %1342 = vmatmul.mubr.bf16.gmra.mrb[20].mxu1 %v2504_v20  ;;  %1431 = vmatmul.mubr.bf16.gmra.mrb[24].mxu0 %v2507_v21 }
  0x58   : > { %1349 = vmatprep.mubr.bf16.mxu1 %v2511_v22  ;;  %1438 = vmatprep.mubr.bf16.mxu0 %v2514_v23 }
  0x59   : > { %2262 = vmatpush3.bf16.msra.mxu1 %v2519_v26  ;;  %2335 = vmatpush3.bf16.msra.mxu0 %v2526_v31 }
  0x5a   : > { %2263 = vmatprep.subr.bf16.mxu1 %v2527_v32  ;;  %2336 = vmatprep.subr.bf16.mxu0 %v2600_v6 }
  0x5d   : > { %2264 = vmatpush3.bf16.msra.mxu1 %v2528_v33  ;;  %2337 = vmatpush3.bf16.msra.mxu0 %v2534_v34 }
  0x5e   : > { %2338 = vmatprep.subr.bf16.mxu0 %v2600_v6  ;;  %2265 = vmatprep.subr.bf16.mxu1 %v2536_v37 }
  0x5f   : > { %1350 = vmatmul.mubr.bf16.gmra.mrb[24].mxu1 %v2513_v27  ;;  %1439 = vmatmul.mubr.bf16.gmra.mrb[28].mxu0 %v2516_v28 }
  0x60   : > { %1357 = vmatprep.mubr.bf16.mxu1 %v2520_v29  ;;  %1446 = vmatprep.mubr.bf16.mxu0 %v2523_v30 }
  0x61   : > { %2266 = vmatpush3.bf16.msra.mxu1 %v2537_v38  ;;  %2339 = vmatpush3.bf16.msra.mxu0 %v2541_v41 }
  0x62   : > { %2267 = vmatprep.subr.bf16.mxu1 %v2544_v42  ;;  %2340 = vmatprep.subr.bf16.mxu0 %v2600_v6 }
  0x65   : > { %2268 = vmatpush3.bf16.msra.mxu1 %v2546_v43  ;;  %2341 = vmatpush3.bf16.msra.mxu0 %v2550_v45 }
  0x67   : > { %1358 = vmatmul.mubr.bf16.gmra.mrb[28].mxu1 %v2522_v35  ;;  %1447 = vmatmul.mubr.bf16.gmra.mrb[32].mxu0 %v2525_v36 }
  0x68   : > { %1365 = vmatprep.mubr.bf16.mxu1 %v2529_v39  ;;  %1454 = vmatprep.mubr.bf16.mxu0 %v2532_v40 }
  0x6f   : > { %1366 = vmatmul.mubr.bf16.gmra.mrb[32].mxu1 %v2531_v44  ;;  %1455 = vmatmul.mubr.bf16.gmra.mrb[36].mxu0 %v2535_v46 }
  0x70   : > { %1373 = vmatprep.mubr.bf16.mxu1 %v2538_v47  ;;  %1462 = vmatprep.mubr.bf16.mxu0 %v2542_v48 }
  0x77   : > { %1374 = vmatmul.mubr.bf16.gmra.mrb[36].mxu1 %v2540_v49  ;;  %1463 = vmatmul.mubr.bf16.gmra.mrb[40].mxu0 %v2545_v50 }
  0x78   : > { %1503 = vmatprep.mubr.bf16.mxu1 %v2549_v51  ;;  %2342 = vmatprep.mubr.msk.bf16.mxu0 %vm2601_vm0, %v2600_v6 }
  0x7f   : > { %1504 = vmatmul.mubr.bf16.vlgmr.msra.gmra.mrb[40].mxu1 %v2547_v52  ;;  %2343 = vmatmul.mubr.bf16.vlgmr.msra.gmra.mrb[44].mxu0 %v2551_v53  ;;  %v2968_v52 = vld [vmem:[%s3058_s2] ss:$0 sm:$0xff] }
  0x80   : > { %1511 = vmatprep.mubr.bf16.mxu1 %v2552_v54  ;;  %2346 = vmatprep.mubr.msk.bf16.mxu0 %vm2601_vm0, %v2600_v6 }
  0x87   : > { %1512 = vmatmul.mubr.bf16.gmra.mrb[44].mxu1 %v2554_v55  ;;  %2347 = vmatmul.mubr.bf16.gmra.mrb[48].mxu0 %v2555_v56 }
  0x88   : > { %1519 = vmatprep.mubr.bf16.mxu1 %v2556_v57  ;;  %2350 = vmatprep.mubr.msk.bf16.mxu0 %vm2601_vm0, %v2600_v6 }
  0x8f   : > { %1520 = vmatmul.mubr.bf16.gmra.mrb[48].mxu1 %v2558_v58  ;;  %2351 = vmatmul.mubr.bf16.gmra.mrb[52].mxu0 %v2559_v59 }
  0x90   : > { %1527 = vmatprep.mubr.bf16.mxu1 %v2560_v60  ;;  %2354 = vmatprep.mubr.msk.bf16.mxu0 %vm2601_vm0, %v2600_v6 }
  0x97   : > { %1528 = vmatmul.mubr.bf16.gmra.mrb[52].mxu1 %v2562_v61  ;;  %2355 = vmatmul.mubr.bf16.gmra.mrb[56].mxu0 %v2563_v62 }
  0x98   : > { %1535 = vmatprep.mubr.bf16.mxu1 %v2564_v63  ;;  %2358 = vmatprep.mubr.msk.bf16.mxu0 %vm2601_vm0, %v2600_v6 }
  0x9f   : > { %1536 = vmatmul.mubr.bf16.gmra.mrb[56].mxu1 %v2566_v0  ;;  %2359 = vmatmul.mubr.bf16.gmra.mrb[60].mxu0 %v2567_v1 }
  0xa0   : > { %1543 = vmatprep.mubr.bf16.mxu1 %v2568_v2  ;;  %2362 = vmatprep.mubr.msk.bf16.mxu0 %vm2601_vm0, %v2600_v6 }
  0xa7   : > { %1544 = vmatmul.mubr.bf16.gmra.mrb[60].mxu1 %v2570_v3  ;;  %2363 = vmatmul.mubr.bf16.gmra.mrb[64].mxu0 %v2571_v4 }
  0xa8   : > { %1551 = vmatprep.mubr.bf16.mxu1 %v2572_v5  ;;  %2366 = vmatprep.mubr.msk.bf16.mxu0 %vm2601_vm0, %v2600_v6 }
  0xaf   : > { %1552 = vmatmul.mubr.bf16.gmra.mrb[64].mxu1 %v2574_v7  ;;  %2367 = vmatmul.mubr.bf16.gmra.mrb[68].mxu0 %v2575_v8 }
  0xfa   : > { %v2119_v9 = vpop.f32.mrb[0].mxu1  ;;  %v2095_v10 = vpop.f32.mrb[0].mxu0 }
  0xfb   : > { %v2120_v11 = vpop.f32.mrb[1].mxu1  ;;  %v2096_v12 = vpop.f32.mrb[1].mxu0 }
  0xfc   : > { %v2949_v13 = vadd.f32 %v2120_v11, %v2119_v9  ;;  %v2122_v14 = vpop.f32.mrb[2].mxu1  ;;  %v2097_v15 = vadd.f32 %v2096_v12, %v2095_v10  ;;  %v2098_v16 = vpop.f32.mrb[2].mxu0 }
  0xfd   : > { %v2123_v17 = vpop.f32.mrb[3].mxu1  ;;  %v2099_v18 = vpop.f32.mrb[3].mxu0 }
  0xfe   : > { %v2951_v19 = vadd.f32 %v2123_v17, %v2122_v14  ;;  %v2100_v20 = vadd.f32 %v2099_v18, %v2098_v16  ;;  %v1239_v55 = vadd.f32 %v2097_v15, %v2968_v52 }
 0x100   : > { %v1242_v62 = vadd.f32 %v2100_v20, %v2968_v52 }
 0x102   : > { %v2101_v21 = vpop.f32.mrb[4].mxu0  ;;  %v2125_v6 = vpop.f32.mrb[4].mxu1 }
 0x103   : > { %v2102_v22 = vpop.f32.mrb[5].mxu0  ;;  %v2126_v23 = vpop.f32.mrb[5].mxu1 }
 0x104   : > { %v2103_v24 = vadd.f32 %v2102_v22, %v2101_v21  ;;  %v2104_v25 = vpop.f32.mrb[6].mxu0  ;;  %v2953_v26 = vadd.f32 %v2126_v23, %v2125_v6  ;;  %v2128_v27 = vpop.f32.mrb[6].mxu1 }
 0x105   : > { %v2105_v28 = vpop.f32.mrb[7].mxu0  ;;  %v2129_v29 = vpop.f32.mrb[7].mxu1 }
 0x106   : > { %v2106_v30 = vadd.f32 %v2105_v28, %v2104_v25  ;;  %v2955_v31 = vadd.f32 %v2129_v29, %v2128_v27  ;;  %v1247_v10 = vadd.f32 %v2103_v24, %v2968_v52 }
 0x108   : > { %v1250_v18 = vadd.f32 %v2106_v30, %v2968_v52 }
 0x10a   : > { %v2107_v32 = vpop.f32.mrb[8].mxu0  ;;  %v2131_v33 = vpop.f32.mrb[8].mxu1 }
 0x10b   : > { %v2108_v34 = vpop.f32.mrb[9].mxu0  ;;  %v2132_v35 = vpop.f32.mrb[9].mxu1 }
 0x10c   : > { %v2109_v36 = vadd.f32 %v2108_v34, %v2107_v32  ;;  %v2110_v37 = vpop.f32.mrb[10].mxu0  ;;  %v2957_v38 = vadd.f32 %v2132_v35, %v2131_v33  ;;  %v2134_v39 = vpop.f32.mrb[10].mxu1 }
 0x10d   : > { %v2111_v40 = vpop.f32.mrb[11].mxu0  ;;  %v2135_v41 = vpop.f32.mrb[11].mxu1 }
 0x10e   : > { %v2112_v42 = vadd.f32 %v2111_v40, %v2110_v37  ;;  %v2959_v43 = vadd.f32 %v2135_v41, %v2134_v39  ;;  %v1255_v32 = vadd.f32 %v2109_v36, %v2968_v52 }
 0x110   : > { %v1258_v40 = vadd.f32 %v2112_v42, %v2968_v52 }
 0x112   : > { %v2113_v44 = vpop.f32.mrb[12].mxu0 }
 0x113   : > { %v2114_v45 = vpop.f32.mrb[13].mxu0 }
 0x114   : > { %v2961_v46 = vadd.f32 %v2114_v45, %v2113_v44  ;;  %v2116_v47 = vpop.f32.mrb[14].mxu0 }
 0x115   : > { %v2117_v48 = vpop.f32.mrb[15].mxu0 }
 0x116   : > { %v2963_v49 = vadd.f32 %v2117_v48, %v2116_v47 }
 0x11a   : > { %v2153_v50 = vpop.f32.mrb[12].mxu1  ;;  %v2211_v51 = vpop.f32.mrb[16].mxu0 }
 0x11b   : > { %v2154_v53 = vpop.f32.mrb[13].mxu1  ;;  %v2212_v54 = vpop.f32.mrb[17].mxu0 }
 0x11c   : > { %v2155_v56 = vadd.f32 %v2154_v53, %v2153_v50  ;;  %v2156_v57 = vpop.f32.mrb[14].mxu1  ;;  %v2213_v58 = vadd.f32 %v2212_v54, %v2211_v51  ;;  %v2214_v59 = vpop.f32.mrb[18].mxu0 }
 0x11d   : > { %v2157_v60 = vpop.f32.mrb[15].mxu1  ;;  %v2215_v61 = vpop.f32.mrb[19].mxu0 }
 0x11e   : > { %v1328_v63 = vadd.f32 %v2155_v56, %v1239_v55  ;;  %v2158_v0 = vadd.f32 %v2157_v60, %v2156_v57  ;;  %v2216_v1 = vadd.f32 %v2215_v61, %v2214_v59  ;;  %v1263_v55 = vadd.f32 %v2961_v46, %v2968_v52 }
 0x11f   : > { %v1266_v61 = vadd.f32 %v2963_v49, %v2968_v52 }
 0x120   : > { %v1331_v2 = vadd.f32 %v2158_v0, %v1242_v62  ;;  %v2972_v3 = vadd.f32 %v2213_v58, %v1328_v63 }
 0x122   : > { %v2974_v4 = vadd.f32 %v2216_v1, %v1331_v2  ;;  %v2159_v5 = vpop.f32.mrb[16].mxu1  ;;  %v2217_v7 = vpop.f32.mrb[20].mxu0 }
 0x123   : > { %v2160_v8 = vpop.f32.mrb[17].mxu1  ;;  %v2218_v9 = vpop.f32.mrb[21].mxu0 }
 0x124   : > { %v2161_v11 = vadd.f32 %v2160_v8, %v2159_v5  ;;  %v2162_v12 = vpop.f32.mrb[18].mxu1  ;;  %v2219_v14 = vadd.f32 %v2218_v9, %v2217_v7  ;;  %v2220_v15 = vpop.f32.mrb[22].mxu0 }
 0x125   : > { %v2163_v16 = vpop.f32.mrb[19].mxu1  ;;  %v2221_v17 = vpop.f32.mrb[23].mxu0 }
 0x126   : > { %v1336_v20 = vadd.f32 %v2161_v11, %v1247_v10  ;;  %v2164_v21 = vadd.f32 %v2163_v16, %v2162_v12  ;;  %v2222_v6 = vadd.f32 %v2221_v17, %v2220_v15  ;;  %v1271_v10 = vadd.f32 %v2949_v13, %v2968_v52 }
 0x127   : > { %v1274_v17 = vadd.f32 %v2951_v19, %v2968_v52 }
 0x128   : > { %v1339_v22 = vadd.f32 %v2164_v21, %v1250_v18  ;;  %v2978_v23 = vadd.f32 %v2219_v14, %v1336_v20 }
 0x12a   : > { %v2980_v25 = vadd.f32 %v2222_v6, %v1339_v22  ;;  %v2165_v27 = vpop.f32.mrb[20].mxu1  ;;  %v2223_v28 = vpop.f32.mrb[24].mxu0 }
 0x12b   : > { %v2166_v29 = vpop.f32.mrb[21].mxu1  ;;  %v2224_v24 = vpop.f32.mrb[25].mxu0 }
 0x12c   : > { %v2167_v33 = vadd.f32 %v2166_v29, %v2165_v27  ;;  %v2168_v34 = vpop.f32.mrb[22].mxu1  ;;  %v2225_v35 = vadd.f32 %v2224_v24, %v2223_v28  ;;  %v2226_v37 = vpop.f32.mrb[26].mxu0 }
 0x12d   : > { %v2169_v39 = vpop.f32.mrb[23].mxu1  ;;  %v2227_v30 = vpop.f32.mrb[27].mxu0 }
 0x12e   : > { %v1344_v41 = vadd.f32 %v2167_v33, %v1255_v32  ;;  %v2170_v44 = vadd.f32 %v2169_v39, %v2168_v34  ;;  %v2228_v45 = vadd.f32 %v2227_v30, %v2226_v37  ;;  %v1279_v32 = vadd.f32 %v2953_v26, %v2968_v52 }
 0x12f   : > { %v1282_v30 = vadd.f32 %v2955_v31, %v2968_v52 }
 0x130   : > { %v1347_v47 = vadd.f32 %v2170_v44, %v1258_v40  ;;  %v2984_v48 = vadd.f32 %v2225_v35, %v1344_v41 }
 0x132   : > { %v2986_v50 = vadd.f32 %v2228_v45, %v1347_v47  ;;  %v2171_v51 = vpop.f32.mrb[24].mxu1  ;;  %v2229_v53 = vpop.f32.mrb[28].mxu0 }
 0x133   : > { %v2172_v54 = vpop.f32.mrb[25].mxu1  ;;  %v2230_v36 = vpop.f32.mrb[29].mxu0 }
 0x134   : > { %v2173_v56 = vadd.f32 %v2172_v54, %v2171_v51  ;;  %v2174_v57 = vpop.f32.mrb[26].mxu1  ;;  %v2231_v58 = vadd.f32 %v2230_v36, %v2229_v53  ;;  %v2232_v59 = vpop.f32.mrb[30].mxu0 }
 0x135   : > { %v2175_v42 = vpop.f32.mrb[27].mxu1  ;;  %v2233_v60 = vpop.f32.mrb[31].mxu0 }
 0x136   : > { %v1352_v62 = vadd.f32 %v2173_v56, %v1263_v55  ;;  %v2176_v63 = vadd.f32 %v2175_v42, %v2174_v57  ;;  %v2234_v0 = vadd.f32 %v2233_v60, %v2232_v59  ;;  %v1287_v55 = vadd.f32 %v2957_v38, %v2968_v52 }
 0x137   : > { %v1290_v60 = vadd.f32 %v2959_v43, %v2968_v52 }
 0x138   : > { %v1355_v1 = vadd.f32 %v2176_v63, %v1266_v61  ;;  %v2992_v2 = vadd.f32 %v2231_v58, %v1352_v62 }
 0x13a   : > { %v2994_v5 = vadd.f32 %v2234_v0, %v1355_v1  ;;  %v2177_v7 = vpop.f32.mrb[28].mxu1  ;;  %v2235_v8 = vpop.f32.mrb[32].mxu0 }
 0x13b   : > { %v2178_v46 = vpop.f32.mrb[29].mxu1  ;;  %v2236_v9 = vpop.f32.mrb[33].mxu0 }
 0x13c   : > { %v2179_v11 = vadd.f32 %v2178_v46, %v2177_v7  ;;  %v2180_v12 = vpop.f32.mrb[30].mxu1  ;;  %v2237_v14 = vadd.f32 %v2236_v9, %v2235_v8  ;;  %v2238_v15 = vpop.f32.mrb[34].mxu0 }
 0x13d   : > { %v2181_v49 = vpop.f32.mrb[31].mxu1  ;;  %v2239_v16 = vpop.f32.mrb[35].mxu0 }
 0x13e   : > { %v1360_v18 = vadd.f32 %v2179_v11, %v1271_v10  ;;  %v2182_v20 = vadd.f32 %v2181_v49, %v2180_v12  ;;  %v2240_v21 = vadd.f32 %v2239_v16, %v2238_v15 }
 0x140   : > { %v1363_v6 = vadd.f32 %v2182_v20, %v1274_v17  ;;  %v3000_v22 = vadd.f32 %v2237_v14, %v1360_v18 }
 0x142   : > { %v3002_v27 = vadd.f32 %v2240_v21, %v1363_v6  ;;  %v2183_v28 = vpop.f32.mrb[32].mxu1  ;;  %v2241_v29 = vpop.f32.mrb[36].mxu0 }
 0x143   : > { %v2184_v13 = vpop.f32.mrb[33].mxu1  ;;  %v2242_v24 = vpop.f32.mrb[37].mxu0 }
 0x144   : > { %v2185_v33 = vadd.f32 %v2184_v13, %v2183_v28  ;;  %v2186_v34 = vpop.f32.mrb[34].mxu1  ;;  %v2243_v35 = vadd.f32 %v2242_v24, %v2241_v29  ;;  %v2244_v37 = vpop.f32.mrb[38].mxu0 }
 0x145   : > { %v2187_v19 = vpop.f32.mrb[35].mxu1  ;;  %v2245_v39 = vpop.f32.mrb[39].mxu0 }
 0x146   : > { %v1368_v40 = vadd.f32 %v2185_v33, %v1279_v32  ;;  %v2188_v41 = vadd.f32 %v2187_v19, %v2186_v34  ;;  %v2246_v44 = vadd.f32 %v2245_v39, %v2244_v37 }
 0x148   : > { %v1371_v45 = vadd.f32 %v2188_v41, %v1282_v30  ;;  %v3008_v47 = vadd.f32 %v2243_v35, %v1368_v40 }
 0x14a   : > { %v3010_v51 = vadd.f32 %v2246_v44, %v1371_v45  ;;  %v2189_v53 = vpop.f32.mrb[36].mxu1  ;;  %v2247_v54 = vpop.f32.mrb[40].mxu0 }
 0x14b   : > { %v2190_v26 = vpop.f32.mrb[37].mxu1  ;;  %v2248_v36 = vpop.f32.mrb[41].mxu0 }
 0x14c   : > { %v2191_v56 = vadd.f32 %v2190_v26, %v2189_v53  ;;  %v2192_v57 = vpop.f32.mrb[38].mxu1  ;;  %v2249_v58 = vadd.f32 %v2248_v36, %v2247_v54  ;;  %v2250_v59 = vpop.f32.mrb[42].mxu0 }
 0x14d   : > { %v2193_v31 = vpop.f32.mrb[39].mxu1  ;;  %v2251_v42 = vpop.f32.mrb[43].mxu0 }
 0x14e   : > { %v1376_v61 = vadd.f32 %v2191_v56, %v1287_v55  ;;  %v2194_v62 = vadd.f32 %v2193_v31, %v2192_v57  ;;  %v2252_v63 = vadd.f32 %v2251_v42, %v2250_v59 }
 0x150   : > { %v1379_v0 = vadd.f32 %v2194_v62, %v1290_v60  ;;  %v3016_v1 = vadd.f32 %v2249_v58, %v1376_v61 }
 0x152   : > { %v3018_v7 = vadd.f32 %v2252_v63, %v1379_v0  ;;  %v2269_v8 = vpop.f32.mrb[40].mxu1  ;;  %v1594_v46 = vpop.f32.mrb[44].mxu0 }
 0x153   : > { %v2270_v38 = vpop.f32.mrb[41].mxu1  ;;  %v2344_v9 = vpop.f32.mrb[45].mxu0 }
 0x154   : > { %v2271_v10 = vadd.f32 %v2270_v38, %v2269_v8  ;;  %v2272_v11 = vpop.f32.mrb[42].mxu1  ;;  %v1597_v12 = vpop.f32.mrb[46].mxu0 }
 0x155   : > { %v2273_v14 = vpop.f32.mrb[43].mxu1  ;;  %v2345_v15 = vpop.f32.mrb[47].mxu0 }
 0x156   : > { %v2274_v49 = vadd.f32 %v2273_v14, %v2272_v11  ;;  %v1506_v43 = vadd.f32 %v2271_v10, %v2972_v3 }
 0x158   : > { %v1595_v52 = vadd.f32 %v1594_v46, %v1506_v43  ;;  %v1509_v16 = vadd.f32 %v2274_v49, %v2974_v4 }
 0x15a   : > { %v1663_v17 = vmul.f32 0.01, %v1595_v52  ;;  %v1598_v18 = vadd.f32 %v1597_v12, %v1509_v16  ;;  %v2275_v20 = vpop.f32.mrb[44].mxu1  ;;  %v1602_v21 = vpop.f32.mrb[48].mxu0  ;;  %vm1649_vm1 = vcmp.ge.f32.partialorder %v1595_v52, 0.0 }
 0x15b   : > { %v2276_v6 = vpop.f32.mrb[45].mxu1  ;;  %v2348_v28 = vpop.f32.mrb[49].mxu0 }
 0x15c   : > { %vm1650_vm2 = vcmp.ge.f32.partialorder %v1598_v18, 0.0  ;;  %v1664_v29 = vmul.f32 0.01, %v1598_v18  ;;  %v2277_v13 = vadd.f32 %v2276_v6, %v2275_v20  ;;  %v2278_v24 = vpop.f32.mrb[46].mxu1  ;;  %v1605_v32 = vpop.f32.mrb[50].mxu0  ;;  %v1677_v35 = vsel %vm1649_vm1, %v1595_v52, %v1663_v17 }
 0x15d   : > { %v2279_v33 = vpop.f32.mrb[47].mxu1  ;;  %v2349_v34 = vpop.f32.mrb[51].mxu0 }
 0x15e   : > { %v1678_v3 = vsel %vm1650_vm2, %v1598_v18, %v1664_v29  ;;  %v2280_v4 = vadd.f32 %v2279_v33, %v2278_v24  ;;  %v1514_v37 = vadd.f32 %v2277_v13, %v2978_v23 }
 0x15f   : > { %v2041_v19 = vpack.c.bf16 %v1678_v3, %v1677_v35 }
 0x160   : > { %v1603_v39 = vadd.f32 %v1602_v21, %v1514_v37  ;;  %v1517_v30 = vadd.f32 %v2280_v4, %v2980_v25 }
 0x161   : > { %2042 = vst [vmem:[%s3026_s9] sm:$0xff] %v2041_v19  }
 0x162   : > { %v1665_v40 = vmul.f32 0.01, %v1603_v39  ;;  %v1606_v41 = vadd.f32 %v1605_v32, %v1517_v30  ;;  %v2281_v44 = vpop.f32.mrb[48].mxu1  ;;  %v1610_v45 = vpop.f32.mrb[52].mxu0  ;;  %vm1651_vm3 = vcmp.ge.f32.partialorder %v1603_v39, 0.0 }
 0x163   : > { %v2282_v53 = vpop.f32.mrb[49].mxu1  ;;  %v2352_v54 = vpop.f32.mrb[53].mxu0 }
 0x164   : > { %vm1652_vm4 = vcmp.ge.f32.partialorder %v1606_v41, 0.0  ;;  %v1666_v26 = vmul.f32 0.01, %v1606_v41  ;;  %v2283_v36 = vadd.f32 %v2282_v53, %v2281_v44  ;;  %v2284_v55 = vpop.f32.mrb[50].mxu1  ;;  %v1613_v56 = vpop.f32.mrb[54].mxu0  ;;  %v1679_v58 = vsel %vm1651_vm3, %v1603_v39, %v1665_v40 }
 0x165   : > { %v2285_v57 = vpop.f32.mrb[51].mxu1  ;;  %v2353_v23 = vpop.f32.mrb[55].mxu0 }
 0x166   : > { %v1680_v59 = vsel %vm1652_vm4, %v1606_v41, %v1666_v26  ;;  %v2286_v31 = vadd.f32 %v2285_v57, %v2284_v55  ;;  %v1522_v25 = vadd.f32 %v2283_v36, %v2984_v48 }
 0x167   : > { %v2046_v42 = vpack.c.bf16 %v1680_v59, %v1679_v58 }
 0x168   : > { %v1611_v60 = vadd.f32 %v1610_v45, %v1522_v25  ;;  %v1525_v61 = vadd.f32 %v2286_v31, %v2986_v50 }
 0x169   : > { %2073 = vst [vmem:[%s3026_s9 + $0x8] sm:$0xff] %v2046_v42  }
 0x16a   : > { %v1667_v62 = vmul.f32 0.01, %v1611_v60  ;;  %v1614_v63 = vadd.f32 %v1613_v56, %v1525_v61  ;;  %v2287_v0 = vpop.f32.mrb[52].mxu1  ;;  %v1618_v8 = vpop.f32.mrb[56].mxu0  ;;  %vm1653_vm5 = vcmp.ge.f32.partialorder %v1611_v60, 0.0 }
 0x16b   : > { %v2288_v46 = vpop.f32.mrb[53].mxu1  ;;  %v2356_v38 = vpop.f32.mrb[57].mxu0 }
 0x16c   : > { %vm1654_vm6 = vcmp.ge.f32.partialorder %v1614_v63, 0.0  ;;  %v1668_v9 = vmul.f32 0.01, %v1614_v63  ;;  %v2289_v10 = vadd.f32 %v2288_v46, %v2287_v0  ;;  %v2290_v11 = vpop.f32.mrb[54].mxu1  ;;  %v1621_v12 = vpop.f32.mrb[58].mxu0  ;;  %v1681_v15 = vsel %vm1653_vm5, %v1611_v60, %v1667_v62 }
 0x16d   : > { %v2291_v14 = vpop.f32.mrb[55].mxu1  ;;  %v2357_v48 = vpop.f32.mrb[59].mxu0 }
 0x16e   : > { %v1682_v49 = vsel %vm1654_vm6, %v1614_v63, %v1668_v9  ;;  %v2292_v43 = vadd.f32 %v2291_v14, %v2290_v11  ;;  %v1530_v50 = vadd.f32 %v2289_v10, %v2992_v2 }
 0x16f   : > { %v2051_v52 = vpack.c.bf16 %v1682_v49, %v1681_v15 }
 0x170   : > { %v1619_v16 = vadd.f32 %v1618_v8, %v1530_v50  ;;  %v1533_v17 = vadd.f32 %v2292_v43, %v2994_v5 }
 0x171   : > { %2074 = vst [vmem:[%s3026_s9 + $0x10] sm:$0xff] %v2051_v52  }
 0x172   : > { %v1669_v18 = vmul.f32 0.01, %v1619_v16  ;;  %v1622_v20 = vadd.f32 %v1621_v12, %v1533_v17  ;;  %v2293_v21 = vpop.f32.mrb[56].mxu1  ;;  %v1626_v6 = vpop.f32.mrb[60].mxu0  ;;  %vm1655_vm7 = vcmp.ge.f32.partialorder %v1619_v16, 0.0 }
 0x173   : > { %v2294_v28 = vpop.f32.mrb[57].mxu1  ;;  %v2360_v29 = vpop.f32.mrb[61].mxu0 }
 0x174   : > { %vm1656_vm8 = vcmp.ge.f32.partialorder %v1622_v20, 0.0  ;;  %v1670_v13 = vmul.f32 0.01, %v1622_v20  ;;  %v2295_v24 = vadd.f32 %v2294_v28, %v2293_v21  ;;  %v2296_v32 = vpop.f32.mrb[58].mxu1  ;;  %v1629_v33 = vpop.f32.mrb[62].mxu0  ;;  %v1683_v35 = vsel %vm1655_vm7, %v1619_v16, %v1669_v18 }
 0x175   : > { %v2297_v34 = vpop.f32.mrb[59].mxu1  ;;  %v2361_v2 = vpop.f32.mrb[63].mxu0 }
 0x176   : > { %v1684_v3 = vsel %vm1656_vm8, %v1622_v20, %v1670_v13  ;;  %v2298_v4 = vadd.f32 %v2297_v34, %v2296_v32  ;;  %v1538_v5 = vadd.f32 %v2295_v24, %v3000_v22 }
 0x177   : > { %v2056_v37 = vpack.c.bf16 %v1684_v3, %v1683_v35 }
 0x178   : > { %v1627_v19 = vadd.f32 %v1626_v6, %v1538_v5  ;;  %v1541_v39 = vadd.f32 %v2298_v4, %v3002_v27 }
 0x179   : > { %2075 = vst [vmem:[%s3026_s9 + $0x18] sm:$0xff] %v2056_v37  }
 0x17a   : > { %v1671_v30 = vmul.f32 0.01, %v1627_v19  ;;  %v1630_v40 = vadd.f32 %v1629_v33, %v1541_v39  ;;  %v2299_v41 = vpop.f32.mrb[60].mxu1  ;;  %v1634_v44 = vpop.f32.mrb[64].mxu0  ;;  %vm1657_vm9 = vcmp.ge.f32.partialorder %v1627_v19, 0.0 }
 0x17b   : > { %v2300_v45 = vpop.f32.mrb[61].mxu1  ;;  %v2364_v53 = vpop.f32.mrb[65].mxu0 }
 0x17c   : > { %vm1658_vm10 = vcmp.ge.f32.partialorder %v1630_v40, 0.0  ;;  %v1672_v54 = vmul.f32 0.01, %v1630_v40  ;;  %v2301_v26 = vadd.f32 %v2300_v45, %v2299_v41  ;;  %v2302_v36 = vpop.f32.mrb[62].mxu1  ;;  %v1637_v55 = vpop.f32.mrb[66].mxu0  ;;  %v1685_v57 = vsel %vm1657_vm9, %v1627_v19, %v1671_v30 }
 0x17d   : > { %v2303_v56 = vpop.f32.mrb[63].mxu1  ;;  %v2365_v22 = vpop.f32.mrb[67].mxu0 }
 0x17e   : > { %v1686_v23 = vsel %vm1658_vm10, %v1630_v40, %v1672_v54  ;;  %v2304_v58 = vadd.f32 %v2303_v56, %v2302_v36  ;;  %v1546_v27 = vadd.f32 %v2301_v26, %v3008_v47 }
 0x17f   : > { %v2061_v59 = vpack.c.bf16 %v1686_v23, %v1685_v57 }
 0x180   : > { %v1635_v31 = vadd.f32 %v1634_v44, %v1546_v27  ;;  %v1549_v25 = vadd.f32 %v2304_v58, %v3010_v51 }
 0x181   : > { %2076 = vst [vmem:[%s3026_s9 + $0x20] sm:$0xff] %v2061_v59  }
 0x182   : > { %v1673_v42 = vmul.f32 0.01, %v1635_v31  ;;  %v1638_v60 = vadd.f32 %v1637_v55, %v1549_v25  ;;  %v2305_v61 = vpop.f32.mrb[64].mxu1  ;;  %v1642_v62 = vpop.f32.mrb[68].mxu0  ;;  %vm1659_vm11 = vcmp.ge.f32.partialorder %v1635_v31, 0.0 }
 0x183   : > { %v2306_v63 = vpop.f32.mrb[65].mxu1  ;;  %v2368_v0 = vpop.f32.mrb[69].mxu0 }
 0x184   : > { %vm1660_vm12 = vcmp.ge.f32.partialorder %v1638_v60, 0.0  ;;  %v1674_v8 = vmul.f32 0.01, %v1638_v60  ;;  %v2307_v46 = vadd.f32 %v2306_v63, %v2305_v61  ;;  %v2308_v38 = vpop.f32.mrb[66].mxu1  ;;  %v1645_v9 = vpop.f32.mrb[70].mxu0  ;;  %v1687_v11 = vsel %vm1659_vm11, %v1635_v31, %v1673_v42 }
 0x185   : > { %v2309_v10 = vpop.f32.mrb[67].mxu1  ;;  %v2369_v47 = vpop.f32.mrb[71].mxu0 }
 0x186   : > { %v1688_v12 = vsel %vm1660_vm12, %v1638_v60, %v1674_v8  ;;  %v2310_v51 = vadd.f32 %v2309_v10, %v2308_v38  ;;  %v1554_v14 = vadd.f32 %v2307_v46, %v3016_v1 }
 0x187   : > { %v2066_v48 = vpack.c.bf16 %v1688_v12, %v1687_v11 }
 0x188   : > { %v1643_v15 = vadd.f32 %v1642_v62, %v1554_v14  ;;  %v1557_v49 = vadd.f32 %v2310_v51, %v3018_v7 }
 0x189   : > { %2077 = vst [vmem:[%s3026_s9 + $0x28] sm:$0xff] %v2066_v48  }
 0x18a   : > { %v1675_v43 = vmul.f32 0.01, %v1643_v15  ;;  %v1646_v50 = vadd.f32 %v1645_v9, %v1557_v49  ;;  %vm1661_vm13 = vcmp.ge.f32.partialorder %v1643_v15, 0.0 }
 0x18c   : > { %vm1662_vm14 = vcmp.ge.f32.partialorder %v1646_v50, 0.0  ;;  %v1676_v52 = vmul.f32 0.01, %v1646_v50  ;;  %v1689_v16 = vsel %vm1661_vm13, %v1643_v15, %v1675_v43 }
 0x18e   : > { %v1690_v17 = vsel %vm1662_vm14, %v1646_v50, %v1676_v52 }
 0x18f   : > { %v2071_v18 = vpack.c.bf16 %v1690_v17, %v1689_v16 }
 0x191   : > { %2078 = vst [vmem:[%s3026_s9 + $0x30] sm:$0xff] %v2071_v18  }
 0x192 PF: > { %s13_s14 = sadd.s32 1, %s2598_s14   ;;  %s3060_s12 = smov %s2594_s13 }
 0x193   : > { %p10_p5 = scmp.ge.s32.totalorder %s13_s14, 4   ;;  %s3061_s13 = smov %s3063_s15 }
 0x195   :  { %12 = sbr.rel (!%p10_p5) target bundleno = 2 (0x2), region = 68 }

// kernel: forward.14
= control target key start
LH: loop header
LB: loop body
LE: loop exit
PB: predicated region body
PF: predicated region fallthrough
CT: control target
= control target key end

     0   :  { %s615_s9 = smov 0   ;;  %s617_s10 = smov 0   ;;  %s683_s0 = inlined_call_operand.vmem [shape: bf16[2,10,10,128], index: 0, kind: input, shape index: {}, may-alias: {0,1}]   ;;  %s684_s1 = inlined_call_operand.vmem [shape: bf16[2,10,10,128], index: 1, kind: input, shape index: {}, may-alias: {0,1}]   ;;  %s685_s2 = inlined_call_operand.vmem [shape: bf16[2,5,5,128], index: 2, kind: output, shape index: {}]  }
   0x1   :  { %s619_s11 = smov 0   ;;  %s621_s12 = smov 0  }
   0x2   :  { %s623_s13 = smov 0  }
   0x3 LB: > { %s21_s14 = sadd.s32 1, %s589_s11  ;;  %s24_s15 = sadd.s32 1, %s593_s12  ;;  %s597_s13 = sphi %s623_s13, %s12_s13   ;;  %s593_s12 = sphi %s621_s12, %s689_s12   ;;  %s589_s11 = sphi %s619_s11, %s688_s11   ;;  %s585_s10 = sphi %s617_s10, %s687_s10   ;;  %s581_s9 = sphi %s615_s9, %s686_s9  }
   0x4   : > { %p22_p0 = scmp.ge.s32.totalorder %s21_s14, 5  ;;  %p501_p1 = scmp.ge.s32.totalorder %s597_s13, 1 }
   0x5   : > { %p160_p2 = scmp.lt.s32.totalorder %s597_s13, 11 }
   0x6   : > { %s691_s14 = smov (%p22_p0, %s21_s14), 0  ;;  %s693_s15 = smov (!%p22_p0, %s24_s15), %s593_s12 }
   0x7   : > { %p161_p3 = pnand %p501_p1, %p160_p2  ;;  %p26_p4 = scmp.ge.s32.totalorder %s693_s15, 2 }
   0x8   : > { %s502_s16 = sshll.u32 (!%p161_p3), %s581_s9, 1  ;;  %p202_p5 = scmp.lt.s32.totalorder (!%p161_p3), %s585_s10, 1  ;;  %v599_v0 = vmov (!%p161_p3), 1966171168   ;;  %v245_v2 = vlaneseq (!%p161_p3)  ;;  %vm280_vm0 = vcmask (!%p161_p3), 1040384   ;;  %vm367_vm1 = vcmask (!%p161_p3), 1041409  }
   0x9   : > { %s695_s15 = smov (%p26_p4, %s693_s15), 0  ;;  %164 = sbr.rel (%p161_p3) target bundleno = 63 (0x3f), region = 28 }
   0xa   : > { %p204_p6 = scmp.lt.s32.totalorder (!%p161_p3), %s502_s16, 9  ;;  %s213_s17 = sadd.s32 (!%p161_p3), 1, %s502_s16  ;;  %v243_v1 = vunpack.c.l.s4 (!%p161_p3), %v599_v0  ;;  %v246_v4 = vshrl.u32 (!%p161_p3), %v245_v2, 7  ;;  %vm369_vm2 = vcmask (!%p161_p3), 1042434   ;;  %vm371_vm3 = vcmask (!%p161_p3), 1043459  }
   0xb   : > { %p216_p7 = scmp.lt.s32.totalorder (!%p161_p3), %s213_s17, 9  ;;  %p227_p8 = scmp.lt.s32.totalorder (!%p161_p3), %s581_s9, 4  ;;  %vm373_vm4 = vcmask (!%p161_p3), 1044484   ;;  %vm377_vm5 = vcmask (!%p161_p3), 1042432   ;;  %vm378_vm6 = vsmask.f32 (!%p161_p3), 2304 }
   0xc   : > { %v244_v3 = vunpack.c.0.s8 (!%p161_p3), %v243_v1  ;;  %vm379_vm7 = vmand (!%p161_p3), %vm377_vm5, %vm378_vm6 }
   0xe   : > { %v247_v7 = vsub.s32 (!%p161_p3), %v244_v3, %v246_v4 }
  0x10   : > { %s697_s10 = smov (!%p202_p5, %s585_s10), 1  ;;  %s699_s16 = smov (!%p204_p6, %s502_s16), 9 }
  0x11   : > { %s516_s18 = smul.u32 20, %s697_s10  ;;  %s503_s19 = sshll.u32 %s699_s16, 1 }
  0x12   : > { %s701_s17 = smov (!%p216_p7, %s213_s17), 9  ;;  %s517_s3 = smul.u32 5, %s697_s10 }
  0x13   : > { %s208_s20 = sadd.s32 %s516_s18, %s503_s19  ;;  %s506_s25 = sshll.u32 %s701_s17, 1 }
  0x14   : > { %s504_s21 = sshll.u32 %s208_s20, 2  ;;  %s220_s26 = sadd.s32 %s516_s18, %s506_s25 }
  0x15   : > { %s210_s24 = scalar_lea.vmem %s683_s0, %s504_s21  ;;  %s507_s27 = sshll.u32 %s220_s26, 2 }
  0x16   : > { %v234_v5 = vld [vmem:[%s210_s24] sm:$0xf]  ;;  %v235_v6 = vld [vmem:[%s210_s24 + $0x4] sm:$0x1]  ;;  %s222_s30 = scalar_lea.vmem %s684_s1, %s507_s27  ;;  %s703_s9 = smov (!%p227_p8, %s581_s9), 4 }
  0x17   : > { %v236_v8 = vld [vmem:[%s222_s30] sm:$0xf]  ;;  %v237_v9 = vld [vmem:[%s222_s30 + $0x4] sm:$0x1]  ;;  %s230_s4 = sadd.s32 %s517_s3, %s703_s9 }
  0x18   : > { %v238_v10 = vmax.bf16 %v236_v8, %v234_v5  ;;  %v239_v11 = vmax.bf16 %v237_v9, %v235_v6  ;;  %s508_s5 = sshll.u32 %s230_s4, 2 }
  0x19   : > { %s232_s8 = scalar_lea.vmem %s685_s2, %s508_s5 }
  0x1a   : > { %v248_v12 = vrot.slane %v238_v10, %v247_v7  ;;  %v272_v13 = vrot.slane %v239_v11, %v247_v7 }
  0x1c   : > { %v249_v14 = vcombine.high %v248_v12, %v248_v12  ;;  %v256_v15 = vrot.slane %v248_v12, %v247_v7  ;;  %v279_v16 = vrot.slane %v272_v13, %v247_v7 }
  0x1e   : > { %v263_v17 = vrot.slane %v249_v14, %v247_v7  ;;  %v264_v18 = vcombine.high %v256_v15, %v256_v15  ;;  %v283_v19 = vsel %vm280_vm0, %v256_v15, 4286644096  ;;  %v335_v20 = vsel %vm280_vm0, %v279_v16, 4286644096 }
  0x1f   : > { %v285_v21 = vunpack.i.l.bf16 %v283_v19  ;;  %v286_v22 = vunpack.i.h.bf16 %v283_v19  ;;  %v337_v23 = vunpack.i.l.bf16 %v335_v20  ;;  %v338_v24 = vunpack.i.h.bf16 %v335_v20 }
  0x20   : > { %v265_v25 = vcombine.high %v263_v17, %v263_v17  ;;  %v296_v26 = vsel %vm280_vm0, %v263_v17, 4286644096  ;;  %v309_v27 = vsel %vm280_vm0, %v264_v18, 4286644096 }
  0x21   : > { %v287_v28 = vmax.f32 %v285_v21, %v286_v22  ;;  %v298_v29 = vunpack.i.l.bf16 %v296_v26  ;;  %v299_v30 = vunpack.i.h.bf16 %v296_v26  ;;  %v311_v31 = vunpack.i.l.bf16 %v309_v27 }
  0x22   : > { %v312_v32 = vunpack.i.h.bf16 %v309_v27  ;;  %v322_v33 = vsel %vm280_vm0, %v265_v25, 4286644096  ;;  %v339_v34 = vmax.f32 %v337_v23, %v338_v24  ;;  %v380_v25 = vld [vmem:[%s232_s8] sm:$0x7] }
  0x23   : > { %v288_v35 = vrot.slane %v287_v28, 4  ;;  %v300_v36 = vmax.f32 %v298_v29, %v299_v30  ;;  %v324_v37 = vunpack.i.l.bf16 %v322_v33  ;;  %v325_v38 = vunpack.i.h.bf16 %v322_v33 }
  0x24   : > { %v313_v39 = vmax.f32 %v311_v31, %v312_v32  ;;  %v340_v40 = vrot.slane %v339_v34, 4 }
  0x25   : > { %v289_v41 = vmax.f32 %v287_v28, %v288_v35  ;;  %v301_v42 = vrot.slane %v300_v36, 4  ;;  %v326_v43 = vmax.f32 %v324_v37, %v325_v38 }
  0x26   : > { %v314_v44 = vrot.slane %v313_v39, 4  ;;  %v341_v45 = vmax.f32 %v339_v34, %v340_v40 }
  0x27   : > { %v290_v46 = vrot.slane %v289_v41, 2  ;;  %v302_v47 = vmax.f32 %v300_v36, %v301_v42  ;;  %v327_v48 = vrot.slane %v326_v43, 4 }
  0x28   : > { %v315_v49 = vmax.f32 %v313_v39, %v314_v44  ;;  %v342_v50 = vrot.slane %v341_v45, 2 }
  0x29   : > { %v291_v51 = vmax.f32 %v289_v41, %v290_v46  ;;  %v303_v52 = vrot.slane %v302_v47, 2  ;;  %v328_v53 = vmax.f32 %v326_v43, %v327_v48 }
  0x2a   : > { %v316_v54 = vrot.slane %v315_v49, 2  ;;  %v343_v55 = vmax.f32 %v341_v45, %v342_v50 }
  0x2b   : > { %v292_v56 = vrot.slane %v291_v51, 1  ;;  %v304_v57 = vmax.f32 %v302_v47, %v303_v52  ;;  %v329_v58 = vrot.slane %v328_v53, 2 }
  0x2c   : > { %v317_v59 = vmax.f32 %v315_v49, %v316_v54  ;;  %v344_v60 = vrot.slane %v343_v55, 1 }
  0x2d   : > { %v293_v61 = vmax.f32 %v291_v51, %v292_v56  ;;  %v305_v62 = vrot.slane %v304_v57, 1  ;;  %v330_v63 = vmax.f32 %v328_v53, %v329_v58 }
  0x2e   : > { %v318_v0 = vrot.slane %v317_v59, 1  ;;  %v345_v1 = vmax.f32 %v343_v55, %v344_v60 }
  0x2f   : > { %v294_v2 = vpack.i.bf16 %v293_v61, %v293_v61  ;;  %v306_v3 = vmax.f32 %v304_v57, %v305_v62  ;;  %v331_v4 = vrot.slane %v330_v63, 1 }
  0x30   : > { %v319_v5 = vmax.f32 %v317_v59, %v318_v0  ;;  %v346_v6 = vpack.i.bf16 %v345_v1, %v345_v1 }
  0x31   : > { %v307_v7 = vpack.i.bf16 %v306_v3, %v306_v3  ;;  %v332_v8 = vmax.f32 %v330_v63, %v331_v4  ;;  %v509_v9 = vcombine.low %v294_v2, %v294_v2 }
  0x32   : > { %v320_v10 = vpack.i.bf16 %v319_v5, %v319_v5  ;;  %v513_v11 = vcombine.low %v346_v6, %v346_v6 }
  0x33   : > { %v333_v12 = vpack.i.bf16 %v332_v8, %v332_v8  ;;  %v510_v13 = vcombine.low %v307_v7, %v307_v7  ;;  %v362_v14 = vunpack.c.l.b16 %v509_v9 }
  0x34   : > { %v511_v15 = vcombine.low %v320_v10, %v320_v10  ;;  %v366_v19 = vunpack.c.l.b16 %v513_v11 }
  0x35   : > { %v512_v16 = vcombine.low %v333_v12, %v333_v12  ;;  %v363_v17 = vunpack.c.l.b16 %v510_v13 }
  0x36   : > { %v364_v18 = vunpack.c.l.b16 %v511_v15 }
  0x37   : > { %v365_v20 = vunpack.c.l.b16 %v512_v16  ;;  %v368_v21 = vsel %vm367_vm1, %v363_v17, %v362_v14 }
  0x38   : > { %v370_v22 = vsel %vm369_vm2, %v364_v18, %v368_v21 }
  0x39   : > { %v372_v23 = vsel %vm371_vm3, %v365_v20, %v370_v22 }
  0x3a   : > { %v374_v24 = vsel %vm373_vm4, %v366_v19, %v372_v23 }
  0x3b   : > { %v375_v26 = vpack.c.b16 %v374_v24, %v374_v24 }
  0x3d   : > { %v381_v27 = vsel %vm379_vm7, %v375_v26, %v380_v25 }
  0x3e   : > { %382 = vst [vmem:[%s232_s8] sm:$0x7] %v381_v27 }
  0x3f PF: > { %s12_s13 = sadd.s32 1, %s597_s13   ;;  %s686_s9 = smov %s589_s11 }
  0x40   : > { %p9_p9 = scmp.ge.s32.totalorder %s12_s13, 12   ;;  %s687_s10 = smov %s593_s12 }
  0x41   : > { %s688_s11 = smov %s691_s14  ;;  %s689_s12 = smov %s695_s15 }
  0x42   :  { %11 = sbr.rel (!%p9_p9) target bundleno = 3 (0x3), region = 61 }

// kernel: forward.15
= control target key start
LH: loop header
LB: loop body
LE: loop exit
PB: predicated region body
PF: predicated region fallthrough
CT: control target
= control target key end

     0   :  { %s2797_s12 = smov 0   ;;  %s2799_s13 = smov 0   ;;  %s3358_s0 = inlined_call_operand.vmem [shape: bf16[64,1152], index: 0, kind: input, shape index: {}]   ;;  %s3359_s1 = inlined_call_operand.vmem [shape: bf16[1152,256], index: 1, kind: input, shape index: {}]   ;;  %s3360_s2 = inlined_call_operand.vmem [shape: f32[1,256], index: 2, kind: input, shape index: {}]   ;;  %s3361_s3 = inlined_call_operand.vmem [shape: bf16[64,256], index: 3, kind: output, shape index: {}]  }
   0x1   :  { %s2801_s14 = smov 0   ;;  %s2803_s15 = smov 0  }
   0x2   :  { %s2805_s16 = smov 0  }
   0x3 LB: > { %s22_s17 = sadd.s32 1, %s2771_s15  ;;  %s2199_s18 = sadd.s32 4294967295, %s2775_s16   ;;  %s2775_s16 = sphi %s2805_s16, %s13_s16   ;;  %s2771_s15 = sphi %s2803_s15, %s3366_s15   ;;  %s2767_s14 = sphi %s2801_s14, %s3365_s14   ;;  %s2763_s13 = sphi %s2799_s13, %s3364_s13   ;;  %s2759_s12 = sphi %s2797_s12, %s3363_s12  }
   0x4   : > { %p23_p0 = scmp.ge.s32.totalorder %s22_s17, 2  ;;  %p65_p1 = scmp.ne.s32.totalorder %s2763_s13, %s2759_s12 }
   0x5   : > { %p66_p2 = scmp.eq.s32.totalorder %s2775_s16, 0  ;;  %p123_p4 = scmp.eq.s32.totalorder %s2199_s18, 1 }
   0x6   : > { %s3368_s17 = smov (%p23_p0, %s22_s17), 0  ;;  %s58_s20 = sadd.s32 1, %s2763_s13 }
   0x7   : > { %p67_p3 = por %p66_p2, %p65_p1  ;;  %s55_s19 = ssub.s32 %s2771_s15, %s3368_s17 }
   0x8   : > { %p56_p5 = scmp.eq.s32.totalorder %s55_s19, 0  ;;  %p2832_p6 = por %p123_p4, %p65_p1 }
   0x9   : > { %p2203_p7 = scmp.ge.s32.totalorder %s2775_s16, 2 }
   0xa   : > { %s2837_s22 = scalar_select %p56_p5, %s2763_s13, %s58_s20  }
   0xb   : > { %155 = sbr.rel (%p2203_p7) target bundleno = 118 (0x76), region = 20 }
  0x12   : > { %158 = sbr.rel (!%p67_p3) target bundleno = 118 (0x76), region = 24  ;;  %s160_s23 = sand.u32 (%p67_p3), 1, %s2763_s13  }
  0x13   : > { %s2204_s24 = sshll.u32 (%p67_p3), %s2771_s15, 2  ;;  %s2571_s25 = smul.u32 (%p67_p3), 576, %s160_s23 }
  0x14   : > { %s2845_s28 = scalar_lea.vmem (%p67_p3), %s3359_s1, %s2204_s24 }
  0x15   : > { %v180_v0 = vld [vmem:[%s2845_s28] sm:$0xf] (%p67_p3)  ;;  %v182_v1 = vld [vmem:[%s2845_s28 + $0x8] sm:$0xf] (%p67_p3)  ;;  %v184_v2 = vld [vmem:[%s2845_s28 + $0x10] sm:$0xf] (%p67_p3) }
  0x16   : > { %v186_v3 = vld [vmem:[%s2845_s28 + $0x18] sm:$0xf] (%p67_p3)  ;;  %v188_v4 = vld [vmem:[%s2845_s28 + $0x20] sm:$0xf] (%p67_p3)  ;;  %s2852_s29 = scalar_lea.vmem (%p67_p3), [#allocation2], %s2571_s25 }
  0x17   : > { %181 = vst [vmem:[%s2852_s29] sm:$0xf] (%p67_p3), %v180_v0  ;;  %183 = vst [vmem:[%s2852_s29 + $0x4] sm:$0xf] (%p67_p3), %v182_v1  ;;  %v190_v5 = vld [vmem:[%s2845_s28 + $0x28] sm:$0xf] (%p67_p3) }
  0x18   : > { %185 = vst [vmem:[%s2852_s29 + $0x8] sm:$0xf] (%p67_p3), %v184_v2  ;;  %187 = vst [vmem:[%s2852_s29 + $0xc] sm:$0xf] (%p67_p3), %v186_v3  ;;  %v192_v6 = vld [vmem:[%s2845_s28 + $0x30] sm:$0xf] (%p67_p3) }
  0x19   : > { %189 = vst [vmem:[%s2852_s29 + $0x10] sm:$0xf] %v188_v4  ;;  %v194_v7 = vld [vmem:[%s2845_s28 + $0x38] sm:$0xf]  ;;  %191 = vst [vmem:[%s2852_s29 + $0x14] sm:$0xf] %v190_v5 }
  0x1a   : > { %193 = vst [vmem:[%s2852_s29 + $0x18] sm:$0xf] %v192_v6  ;;  %195 = vst [vmem:[%s2852_s29 + $0x1c] sm:$0xf] %v194_v7  ;;  %v196_v8 = vld [vmem:[%s2845_s28 + $0x40] sm:$0xf] }
  0x1b   : > { %v198_v9 = vld [vmem:[%s2845_s28 + $0x48] sm:$0xf]  ;;  %v200_v10 = vld [vmem:[%s2845_s28 + $0x50] sm:$0xf]  ;;  %197 = vst [vmem:[%s2852_s29 + $0x20] sm:$0xf] %v196_v8 }
  0x1c   : > { %199 = vst [vmem:[%s2852_s29 + $0x24] sm:$0xf] %v198_v9  ;;  %201 = vst [vmem:[%s2852_s29 + $0x28] sm:$0xf] %v200_v10  ;;  %v202_v11 = vld [vmem:[%s2845_s28 + $0x58] sm:$0xf] }
  0x1d   : > { %v204_v12 = vld [vmem:[%s2845_s28 + $0x60] sm:$0xf]  ;;  %v206_v13 = vld [vmem:[%s2845_s28 + $0x68] sm:$0xf]  ;;  %203 = vst [vmem:[%s2852_s29 + $0x2c] sm:$0xf] %v202_v11 }
  0x1e   : > { %205 = vst [vmem:[%s2852_s29 + $0x30] sm:$0xf] %v204_v12  ;;  %207 = vst [vmem:[%s2852_s29 + $0x34] sm:$0xf] %v206_v13  ;;  %v208_v14 = vld [vmem:[%s2845_s28 + $0x70] sm:$0xf] }
  0x1f   : > { %v210_v15 = vld [vmem:[%s2845_s28 + $0x78] sm:$0xf]  ;;  %v212_v16 = vld [vmem:[%s2845_s28 + $0x80] sm:$0xf]  ;;  %209 = vst [vmem:[%s2852_s29 + $0x38] sm:$0xf] %v208_v14 }
  0x20   : > { %211 = vst [vmem:[%s2852_s29 + $0x3c] sm:$0xf] %v210_v15  ;;  %213 = vst [vmem:[%s2852_s29 + $0x40] sm:$0xf] %v212_v16  ;;  %v214_v17 = vld [vmem:[%s2845_s28 + $0x88] sm:$0xf] }
  0x21   : > { %v216_v18 = vld [vmem:[%s2845_s28 + $0x90] sm:$0xf]  ;;  %v218_v19 = vld [vmem:[%s2845_s28 + $0x98] sm:$0xf]  ;;  %215 = vst [vmem:[%s2852_s29 + $0x44] sm:$0xf] %v214_v17 }
  0x22   : > { %217 = vst [vmem:[%s2852_s29 + $0x48] sm:$0xf] %v216_v18  ;;  %219 = vst [vmem:[%s2852_s29 + $0x4c] sm:$0xf] %v218_v19  ;;  %v220_v20 = vld [vmem:[%s2845_s28 + $0xa0] sm:$0xf] }
  0x23   : > { %v222_v21 = vld [vmem:[%s2845_s28 + $0xa8] sm:$0xf]  ;;  %v224_v22 = vld [vmem:[%s2845_s28 + $0xb0] sm:$0xf]  ;;  %221 = vst [vmem:[%s2852_s29 + $0x50] sm:$0xf] %v220_v20 }
  0x24   : > { %223 = vst [vmem:[%s2852_s29 + $0x54] sm:$0xf] %v222_v21  ;;  %225 = vst [vmem:[%s2852_s29 + $0x58] sm:$0xf] %v224_v22  ;;  %v226_v23 = vld [vmem:[%s2845_s28 + $0xb8] sm:$0xf] }
  0x25   : > { %v228_v24 = vld [vmem:[%s2845_s28 + $0xc0] sm:$0xf]  ;;  %v230_v25 = vld [vmem:[%s2845_s28 + $0xc8] sm:$0xf]  ;;  %227 = vst [vmem:[%s2852_s29 + $0x5c] sm:$0xf] %v226_v23 }
  0x26   : > { %229 = vst [vmem:[%s2852_s29 + $0x60] sm:$0xf] %v228_v24  ;;  %231 = vst [vmem:[%s2852_s29 + $0x64] sm:$0xf] %v230_v25  ;;  %v232_v26 = vld [vmem:[%s2845_s28 + $0xd0] sm:$0xf] }
  0x27   : > { %v234_v27 = vld [vmem:[%s2845_s28 + $0xd8] sm:$0xf]  ;;  %v236_v28 = vld [vmem:[%s2845_s28 + $0xe0] sm:$0xf]  ;;  %233 = vst [vmem:[%s2852_s29 + $0x68] sm:$0xf] %v232_v26 }
  0x28   : > { %235 = vst [vmem:[%s2852_s29 + $0x6c] sm:$0xf] %v234_v27  ;;  %237 = vst [vmem:[%s2852_s29 + $0x70] sm:$0xf] %v236_v28  ;;  %v238_v29 = vld [vmem:[%s2845_s28 + $0xe8] sm:$0xf] }
  0x29   : > { %v240_v30 = vld [vmem:[%s2845_s28 + $0xf0] sm:$0xf]  ;;  %v242_v31 = vld [vmem:[%s2845_s28 + $0xf8] sm:$0xf]  ;;  %239 = vst [vmem:[%s2852_s29 + $0x74] sm:$0xf] %v238_v29 }
  0x2a   : > { %241 = vst [vmem:[%s2852_s29 + $0x78] sm:$0xf] %v240_v30  ;;  %243 = vst [vmem:[%s2852_s29 + $0x7c] sm:$0xf] %v242_v31  ;;  %v244_v32 = vld [vmem:[%s2845_s28 + $0x100] sm:$0xf] }
  0x2b   : > { %v246_v33 = vld [vmem:[%s2845_s28 + $0x108] sm:$0xf]  ;;  %v248_v34 = vld [vmem:[%s2845_s28 + $0x110] sm:$0xf]  ;;  %245 = vst [vmem:[%s2852_s29 + $0x80] sm:$0xf] %v244_v32 }
  0x2c   : > { %247 = vst [vmem:[%s2852_s29 + $0x84] sm:$0xf] %v246_v33  ;;  %249 = vst [vmem:[%s2852_s29 + $0x88] sm:$0xf] %v248_v34  ;;  %v250_v35 = vld [vmem:[%s2845_s28 + $0x118] sm:$0xf] }
  0x2d   : > { %v252_v36 = vld [vmem:[%s2845_s28 + $0x120] sm:$0xf]  ;;  %v254_v37 = vld [vmem:[%s2845_s28 + $0x128] sm:$0xf]  ;;  %251 = vst [vmem:[%s2852_s29 + $0x8c] sm:$0xf] %v250_v35 }
  0x2e   : > { %253 = vst [vmem:[%s2852_s29 + $0x90] sm:$0xf] %v252_v36  ;;  %255 = vst [vmem:[%s2852_s29 + $0x94] sm:$0xf] %v254_v37  ;;  %v256_v38 = vld [vmem:[%s2845_s28 + $0x130] sm:$0xf] }
  0x2f   : > { %v258_v39 = vld [vmem:[%s2845_s28 + $0x138] sm:$0xf]  ;;  %v260_v40 = vld [vmem:[%s2845_s28 + $0x140] sm:$0xf]  ;;  %257 = vst [vmem:[%s2852_s29 + $0x98] sm:$0xf] %v256_v38 }
  0x30   : > { %259 = vst [vmem:[%s2852_s29 + $0x9c] sm:$0xf] %v258_v39  ;;  %261 = vst [vmem:[%s2852_s29 + $0xa0] sm:$0xf] %v260_v40  ;;  %v262_v41 = vld [vmem:[%s2845_s28 + $0x148] sm:$0xf] }
  0x31   : > { %v264_v42 = vld [vmem:[%s2845_s28 + $0x150] sm:$0xf]  ;;  %v266_v43 = vld [vmem:[%s2845_s28 + $0x158] sm:$0xf]  ;;  %263 = vst [vmem:[%s2852_s29 + $0xa4] sm:$0xf] %v262_v41 }
  0x32   : > { %265 = vst [vmem:[%s2852_s29 + $0xa8] sm:$0xf] %v264_v42  ;;  %267 = vst [vmem:[%s2852_s29 + $0xac] sm:$0xf] %v266_v43  ;;  %v268_v44 = vld [vmem:[%s2845_s28 + $0x160] sm:$0xf] }
  0x33   : > { %v270_v45 = vld [vmem:[%s2845_s28 + $0x168] sm:$0xf]  ;;  %v272_v46 = vld [vmem:[%s2845_s28 + $0x170] sm:$0xf]  ;;  %269 = vst [vmem:[%s2852_s29 + $0xb0] sm:$0xf] %v268_v44 }
  0x34   : > { %271 = vst [vmem:[%s2852_s29 + $0xb4] sm:$0xf] %v270_v45  ;;  %273 = vst [vmem:[%s2852_s29 + $0xb8] sm:$0xf] %v272_v46  ;;  %v274_v47 = vld [vmem:[%s2845_s28 + $0x178] sm:$0xf] }
  0x35   : > { %v276_v48 = vld [vmem:[%s2845_s28 + $0x180] sm:$0xf]  ;;  %v278_v49 = vld [vmem:[%s2845_s28 + $0x188] sm:$0xf]  ;;  %275 = vst [vmem:[%s2852_s29 + $0xbc] sm:$0xf] %v274_v47 }
  0x36   : > { %277 = vst [vmem:[%s2852_s29 + $0xc0] sm:$0xf] %v276_v48  ;;  %279 = vst [vmem:[%s2852_s29 + $0xc4] sm:$0xf] %v278_v49  ;;  %v280_v50 = vld [vmem:[%s2845_s28 + $0x190] sm:$0xf] }
  0x37   : > { %v282_v51 = vld [vmem:[%s2845_s28 + $0x198] sm:$0xf]  ;;  %v284_v52 = vld [vmem:[%s2845_s28 + $0x1a0] sm:$0xf]  ;;  %281 = vst [vmem:[%s2852_s29 + $0xc8] sm:$0xf] %v280_v50 }
  0x38   : > { %283 = vst [vmem:[%s2852_s29 + $0xcc] sm:$0xf] %v282_v51  ;;  %285 = vst [vmem:[%s2852_s29 + $0xd0] sm:$0xf] %v284_v52  ;;  %v286_v53 = vld [vmem:[%s2845_s28 + $0x1a8] sm:$0xf] }
  0x39   : > { %v288_v54 = vld [vmem:[%s2845_s28 + $0x1b0] sm:$0xf]  ;;  %v290_v55 = vld [vmem:[%s2845_s28 + $0x1b8] sm:$0xf]  ;;  %287 = vst [vmem:[%s2852_s29 + $0xd4] sm:$0xf] %v286_v53 }
  0x3a   : > { %289 = vst [vmem:[%s2852_s29 + $0xd8] sm:$0xf] %v288_v54  ;;  %291 = vst [vmem:[%s2852_s29 + $0xdc] sm:$0xf] %v290_v55  ;;  %v292_v56 = vld [vmem:[%s2845_s28 + $0x1c0] sm:$0xf] }
  0x3b   : > { %v294_v57 = vld [vmem:[%s2845_s28 + $0x1c8] sm:$0xf]  ;;  %v296_v58 = vld [vmem:[%s2845_s28 + $0x1d0] sm:$0xf]  ;;  %293 = vst [vmem:[%s2852_s29 + $0xe0] sm:$0xf] %v292_v56 }
  0x3c   : > { %295 = vst [vmem:[%s2852_s29 + $0xe4] sm:$0xf] %v294_v57  ;;  %297 = vst [vmem:[%s2852_s29 + $0xe8] sm:$0xf] %v296_v58  ;;  %v298_v59 = vld [vmem:[%s2845_s28 + $0x1d8] sm:$0xf] }
  0x3d   : > { %v300_v60 = vld [vmem:[%s2845_s28 + $0x1e0] sm:$0xf]  ;;  %v302_v61 = vld [vmem:[%s2845_s28 + $0x1e8] sm:$0xf]  ;;  %299 = vst [vmem:[%s2852_s29 + $0xec] sm:$0xf] %v298_v59 }
  0x3e   : > { %301 = vst [vmem:[%s2852_s29 + $0xf0] sm:$0xf] %v300_v60  ;;  %303 = vst [vmem:[%s2852_s29 + $0xf4] sm:$0xf] %v302_v61  ;;  %v304_v62 = vld [vmem:[%s2845_s28 + $0x1f0] sm:$0xf] }
  0x3f   : > { %v306_v63 = vld [vmem:[%s2845_s28 + $0x1f8] sm:$0xf]  ;;  %v308_v0 = vld [vmem:[%s2845_s28 + $0x200] sm:$0xf]  ;;  %305 = vst [vmem:[%s2852_s29 + $0xf8] sm:$0xf] %v304_v62 }
  0x40   : > { %307 = vst [vmem:[%s2852_s29 + $0xfc] sm:$0xf] %v306_v63  ;;  %309 = vst [vmem:[%s2852_s29 + $0x100] sm:$0xf] %v308_v0  ;;  %v310_v1 = vld [vmem:[%s2845_s28 + $0x208] sm:$0xf] }
  0x41   : > { %v312_v2 = vld [vmem:[%s2845_s28 + $0x210] sm:$0xf]  ;;  %v314_v3 = vld [vmem:[%s2845_s28 + $0x218] sm:$0xf]  ;;  %311 = vst [vmem:[%s2852_s29 + $0x104] sm:$0xf] %v310_v1 }
  0x42   : > { %313 = vst [vmem:[%s2852_s29 + $0x108] sm:$0xf] %v312_v2  ;;  %315 = vst [vmem:[%s2852_s29 + $0x10c] sm:$0xf] %v314_v3  ;;  %v316_v4 = vld [vmem:[%s2845_s28 + $0x220] sm:$0xf] }
  0x43   : > { %v318_v5 = vld [vmem:[%s2845_s28 + $0x228] sm:$0xf]  ;;  %v320_v6 = vld [vmem:[%s2845_s28 + $0x230] sm:$0xf]  ;;  %317 = vst [vmem:[%s2852_s29 + $0x110] sm:$0xf] %v316_v4 }
  0x44   : > { %319 = vst [vmem:[%s2852_s29 + $0x114] sm:$0xf] %v318_v5  ;;  %321 = vst [vmem:[%s2852_s29 + $0x118] sm:$0xf] %v320_v6  ;;  %v322_v7 = vld [vmem:[%s2845_s28 + $0x238] sm:$0xf] }
  0x45   : > { %v324_v8 = vld [vmem:[%s2845_s28 + $0x240] sm:$0xf]  ;;  %v326_v9 = vld [vmem:[%s2845_s28 + $0x248] sm:$0xf]  ;;  %323 = vst [vmem:[%s2852_s29 + $0x11c] sm:$0xf] %v322_v7 }
  0x46   : > { %325 = vst [vmem:[%s2852_s29 + $0x120] sm:$0xf] %v324_v8  ;;  %327 = vst [vmem:[%s2852_s29 + $0x124] sm:$0xf] %v326_v9  ;;  %v328_v10 = vld [vmem:[%s2845_s28 + $0x250] sm:$0xf] }
  0x47   : > { %v330_v11 = vld [vmem:[%s2845_s28 + $0x258] sm:$0xf]  ;;  %v332_v12 = vld [vmem:[%s2845_s28 + $0x260] sm:$0xf]  ;;  %329 = vst [vmem:[%s2852_s29 + $0x128] sm:$0xf] %v328_v10 }
  0x48   : > { %331 = vst [vmem:[%s2852_s29 + $0x12c] sm:$0xf] %v330_v11  ;;  %333 = vst [vmem:[%s2852_s29 + $0x130] sm:$0xf] %v332_v12  ;;  %v334_v13 = vld [vmem:[%s2845_s28 + $0x268] sm:$0xf] }
  0x49   : > { %v336_v14 = vld [vmem:[%s2845_s28 + $0x270] sm:$0xf]  ;;  %v338_v15 = vld [vmem:[%s2845_s28 + $0x278] sm:$0xf]  ;;  %335 = vst [vmem:[%s2852_s29 + $0x134] sm:$0xf] %v334_v13 }
  0x4a   : > { %337 = vst [vmem:[%s2852_s29 + $0x138] sm:$0xf] %v336_v14  ;;  %339 = vst [vmem:[%s2852_s29 + $0x13c] sm:$0xf] %v338_v15  ;;  %v340_v16 = vld [vmem:[%s2845_s28 + $0x280] sm:$0xf] }
  0x4b   : > { %v342_v17 = vld [vmem:[%s2845_s28 + $0x288] sm:$0xf]  ;;  %v344_v18 = vld [vmem:[%s2845_s28 + $0x290] sm:$0xf]  ;;  %341 = vst [vmem:[%s2852_s29 + $0x140] sm:$0xf] %v340_v16 }
  0x4c   : > { %343 = vst [vmem:[%s2852_s29 + $0x144] sm:$0xf] %v342_v17  ;;  %345 = vst [vmem:[%s2852_s29 + $0x148] sm:$0xf] %v344_v18  ;;  %v346_v19 = vld [vmem:[%s2845_s28 + $0x298] sm:$0xf] }
  0x4d   : > { %v348_v20 = vld [vmem:[%s2845_s28 + $0x2a0] sm:$0xf]  ;;  %v350_v21 = vld [vmem:[%s2845_s28 + $0x2a8] sm:$0xf]  ;;  %347 = vst [vmem:[%s2852_s29 + $0x14c] sm:$0xf] %v346_v19 }
  0x4e   : > { %349 = vst [vmem:[%s2852_s29 + $0x150] sm:$0xf] %v348_v20  ;;  %351 = vst [vmem:[%s2852_s29 + $0x154] sm:$0xf] %v350_v21  ;;  %v352_v22 = vld [vmem:[%s2845_s28 + $0x2b0] sm:$0xf] }
  0x4f   : > { %v354_v23 = vld [vmem:[%s2845_s28 + $0x2b8] sm:$0xf]  ;;  %v356_v24 = vld [vmem:[%s2845_s28 + $0x2c0] sm:$0xf]  ;;  %353 = vst [vmem:[%s2852_s29 + $0x158] sm:$0xf] %v352_v22 }
  0x50   : > { %355 = vst [vmem:[%s2852_s29 + $0x15c] sm:$0xf] %v354_v23  ;;  %357 = vst [vmem:[%s2852_s29 + $0x160] sm:$0xf] %v356_v24  ;;  %v358_v25 = vld [vmem:[%s2845_s28 + $0x2c8] sm:$0xf] }
  0x51   : > { %v360_v26 = vld [vmem:[%s2845_s28 + $0x2d0] sm:$0xf]  ;;  %v362_v27 = vld [vmem:[%s2845_s28 + $0x2d8] sm:$0xf]  ;;  %359 = vst [vmem:[%s2852_s29 + $0x164] sm:$0xf] %v358_v25 }
  0x52   : > { %361 = vst [vmem:[%s2852_s29 + $0x168] sm:$0xf] %v360_v26  ;;  %363 = vst [vmem:[%s2852_s29 + $0x16c] sm:$0xf] %v362_v27  ;;  %v364_v28 = vld [vmem:[%s2845_s28 + $0x2e0] sm:$0xf] }
  0x53   : > { %v366_v29 = vld [vmem:[%s2845_s28 + $0x2e8] sm:$0xf]  ;;  %v368_v30 = vld [vmem:[%s2845_s28 + $0x2f0] sm:$0xf]  ;;  %365 = vst [vmem:[%s2852_s29 + $0x170] sm:$0xf] %v364_v28 }
  0x54   : > { %367 = vst [vmem:[%s2852_s29 + $0x174] sm:$0xf] %v366_v29  ;;  %369 = vst [vmem:[%s2852_s29 + $0x178] sm:$0xf] %v368_v30  ;;  %v370_v31 = vld [vmem:[%s2845_s28 + $0x2f8] sm:$0xf] }
  0x55   : > { %v372_v32 = vld [vmem:[%s2845_s28 + $0x300] sm:$0xf]  ;;  %v374_v33 = vld [vmem:[%s2845_s28 + $0x308] sm:$0xf]  ;;  %371 = vst [vmem:[%s2852_s29 + $0x17c] sm:$0xf] %v370_v31 }
  0x56   : > { %373 = vst [vmem:[%s2852_s29 + $0x180] sm:$0xf] %v372_v32  ;;  %375 = vst [vmem:[%s2852_s29 + $0x184] sm:$0xf] %v374_v33  ;;  %v376_v34 = vld [vmem:[%s2845_s28 + $0x310] sm:$0xf] }
  0x57   : > { %v378_v35 = vld [vmem:[%s2845_s28 + $0x318] sm:$0xf]  ;;  %v380_v36 = vld [vmem:[%s2845_s28 + $0x320] sm:$0xf]  ;;  %377 = vst [vmem:[%s2852_s29 + $0x188] sm:$0xf] %v376_v34 }
  0x58   : > { %379 = vst [vmem:[%s2852_s29 + $0x18c] sm:$0xf] %v378_v35  ;;  %381 = vst [vmem:[%s2852_s29 + $0x190] sm:$0xf] %v380_v36  ;;  %v382_v37 = vld [vmem:[%s2845_s28 + $0x328] sm:$0xf] }
  0x59   : > { %v384_v38 = vld [vmem:[%s2845_s28 + $0x330] sm:$0xf]  ;;  %v386_v39 = vld [vmem:[%s2845_s28 + $0x338] sm:$0xf]  ;;  %383 = vst [vmem:[%s2852_s29 + $0x194] sm:$0xf] %v382_v37 }
  0x5a   : > { %385 = vst [vmem:[%s2852_s29 + $0x198] sm:$0xf] %v384_v38  ;;  %387 = vst [vmem:[%s2852_s29 + $0x19c] sm:$0xf] %v386_v39  ;;  %v388_v40 = vld [vmem:[%s2845_s28 + $0x340] sm:$0xf] }
  0x5b   : > { %v390_v41 = vld [vmem:[%s2845_s28 + $0x348] sm:$0xf]  ;;  %v392_v42 = vld [vmem:[%s2845_s28 + $0x350] sm:$0xf]  ;;  %389 = vst [vmem:[%s2852_s29 + $0x1a0] sm:$0xf] %v388_v40 }
  0x5c   : > { %391 = vst [vmem:[%s2852_s29 + $0x1a4] sm:$0xf] %v390_v41  ;;  %393 = vst [vmem:[%s2852_s29 + $0x1a8] sm:$0xf] %v392_v42  ;;  %v394_v43 = vld [vmem:[%s2845_s28 + $0x358] sm:$0xf] }
  0x5d   : > { %v396_v44 = vld [vmem:[%s2845_s28 + $0x360] sm:$0xf]  ;;  %v398_v45 = vld [vmem:[%s2845_s28 + $0x368] sm:$0xf]  ;;  %395 = vst [vmem:[%s2852_s29 + $0x1ac] sm:$0xf] %v394_v43 }
  0x5e   : > { %397 = vst [vmem:[%s2852_s29 + $0x1b0] sm:$0xf] %v396_v44  ;;  %399 = vst [vmem:[%s2852_s29 + $0x1b4] sm:$0xf] %v398_v45  ;;  %v400_v46 = vld [vmem:[%s2845_s28 + $0x370] sm:$0xf] }
  0x5f   : > { %v402_v47 = vld [vmem:[%s2845_s28 + $0x378] sm:$0xf]  ;;  %v404_v48 = vld [vmem:[%s2845_s28 + $0x380] sm:$0xf]  ;;  %401 = vst [vmem:[%s2852_s29 + $0x1b8] sm:$0xf] %v400_v46 }
  0x60   : > { %403 = vst [vmem:[%s2852_s29 + $0x1bc] sm:$0xf] %v402_v47  ;;  %405 = vst [vmem:[%s2852_s29 + $0x1c0] sm:$0xf] %v404_v48  ;;  %v406_v49 = vld [vmem:[%s2845_s28 + $0x388] sm:$0xf] }
  0x61   : > { %v408_v50 = vld [vmem:[%s2845_s28 + $0x390] sm:$0xf]  ;;  %v410_v51 = vld [vmem:[%s2845_s28 + $0x398] sm:$0xf]  ;;  %407 = vst [vmem:[%s2852_s29 + $0x1c4] sm:$0xf] %v406_v49 }
  0x62   : > { %409 = vst [vmem:[%s2852_s29 + $0x1c8] sm:$0xf] %v408_v50  ;;  %411 = vst [vmem:[%s2852_s29 + $0x1cc] sm:$0xf] %v410_v51  ;;  %v412_v52 = vld [vmem:[%s2845_s28 + $0x3a0] sm:$0xf] }
  0x63   : > { %v414_v53 = vld [vmem:[%s2845_s28 + $0x3a8] sm:$0xf]  ;;  %v416_v54 = vld [vmem:[%s2845_s28 + $0x3b0] sm:$0xf]  ;;  %413 = vst [vmem:[%s2852_s29 + $0x1d0] sm:$0xf] %v412_v52 }
  0x64   : > { %415 = vst [vmem:[%s2852_s29 + $0x1d4] sm:$0xf] %v414_v53  ;;  %417 = vst [vmem:[%s2852_s29 + $0x1d8] sm:$0xf] %v416_v54  ;;  %v418_v55 = vld [vmem:[%s2845_s28 + $0x3b8] sm:$0xf] }
  0x65   : > { %v420_v56 = vld [vmem:[%s2845_s28 + $0x3c0] sm:$0xf]  ;;  %v422_v57 = vld [vmem:[%s2845_s28 + $0x3c8] sm:$0xf]  ;;  %419 = vst [vmem:[%s2852_s29 + $0x1dc] sm:$0xf] %v418_v55 }
  0x66   : > { %421 = vst [vmem:[%s2852_s29 + $0x1e0] sm:$0xf] %v420_v56  ;;  %423 = vst [vmem:[%s2852_s29 + $0x1e4] sm:$0xf] %v422_v57  ;;  %v424_v58 = vld [vmem:[%s2845_s28 + $0x3d0] sm:$0xf] }
  0x67   : > { %v426_v59 = vld [vmem:[%s2845_s28 + $0x3d8] sm:$0xf]  ;;  %v428_v60 = vld [vmem:[%s2845_s28 + $0x3e0] sm:$0xf]  ;;  %425 = vst [vmem:[%s2852_s29 + $0x1e8] sm:$0xf] %v424_v58 }
  0x68   : > { %427 = vst [vmem:[%s2852_s29 + $0x1ec] sm:$0xf] %v426_v59  ;;  %429 = vst [vmem:[%s2852_s29 + $0x1f0] sm:$0xf] %v428_v60  ;;  %v430_v61 = vld [vmem:[%s2845_s28 + $0x3e8] sm:$0xf] }
  0x69   : > { %v432_v62 = vld [vmem:[%s2845_s28 + $0x3f0] sm:$0xf]  ;;  %v434_v63 = vld [vmem:[%s2845_s28 + $0x3f8] sm:$0xf]  ;;  %431 = vst [vmem:[%s2852_s29 + $0x1f4] sm:$0xf] %v430_v61 }
  0x6a   : > { %433 = vst [vmem:[%s2852_s29 + $0x1f8] sm:$0xf] %v432_v62  ;;  %435 = vst [vmem:[%s2852_s29 + $0x1fc] sm:$0xf] %v434_v63  ;;  %v436_v0 = vld [vmem:[%s2845_s28 + $0x400] sm:$0xf] }
  0x6b   : > { %v438_v1 = vld [vmem:[%s2845_s28 + $0x408] sm:$0xf]  ;;  %v440_v2 = vld [vmem:[%s2845_s28 + $0x410] sm:$0xf]  ;;  %437 = vst [vmem:[%s2852_s29 + $0x200] sm:$0xf] %v436_v0 }
  0x6c   : > { %439 = vst [vmem:[%s2852_s29 + $0x204] sm:$0xf] %v438_v1  ;;  %441 = vst [vmem:[%s2852_s29 + $0x208] sm:$0xf] %v440_v2  ;;  %v442_v3 = vld [vmem:[%s2845_s28 + $0x418] sm:$0xf] }
  0x6d   : > { %v444_v4 = vld [vmem:[%s2845_s28 + $0x420] sm:$0xf]  ;;  %v446_v5 = vld [vmem:[%s2845_s28 + $0x428] sm:$0xf]  ;;  %443 = vst [vmem:[%s2852_s29 + $0x20c] sm:$0xf] %v442_v3 }
  0x6e   : > { %445 = vst [vmem:[%s2852_s29 + $0x210] sm:$0xf] %v444_v4  ;;  %447 = vst [vmem:[%s2852_s29 + $0x214] sm:$0xf] %v446_v5  ;;  %v448_v6 = vld [vmem:[%s2845_s28 + $0x430] sm:$0xf] }
  0x6f   : > { %v450_v7 = vld [vmem:[%s2845_s28 + $0x438] sm:$0xf]  ;;  %v452_v8 = vld [vmem:[%s2845_s28 + $0x440] sm:$0xf]  ;;  %449 = vst [vmem:[%s2852_s29 + $0x218] sm:$0xf] %v448_v6 }
  0x70   : > { %451 = vst [vmem:[%s2852_s29 + $0x21c] sm:$0xf] %v450_v7  ;;  %453 = vst [vmem:[%s2852_s29 + $0x220] sm:$0xf] %v452_v8  ;;  %v454_v9 = vld [vmem:[%s2845_s28 + $0x448] sm:$0xf] }
  0x71   : > { %v456_v10 = vld [vmem:[%s2845_s28 + $0x450] sm:$0xf]  ;;  %v458_v11 = vld [vmem:[%s2845_s28 + $0x458] sm:$0xf]  ;;  %455 = vst [vmem:[%s2852_s29 + $0x224] sm:$0xf] %v454_v9 }
  0x72   : > { %457 = vst [vmem:[%s2852_s29 + $0x228] sm:$0xf] %v456_v10  ;;  %459 = vst [vmem:[%s2852_s29 + $0x22c] sm:$0xf] %v458_v11  ;;  %v460_v12 = vld [vmem:[%s2845_s28 + $0x460] sm:$0xf] }
  0x73   : > { %v462_v13 = vld [vmem:[%s2845_s28 + $0x468] sm:$0xf]  ;;  %v464_v14 = vld [vmem:[%s2845_s28 + $0x470] sm:$0xf]  ;;  %461 = vst [vmem:[%s2852_s29 + $0x230] sm:$0xf] %v460_v12 }
  0x74   : > { %463 = vst [vmem:[%s2852_s29 + $0x234] sm:$0xf] %v462_v13  ;;  %465 = vst [vmem:[%s2852_s29 + $0x238] sm:$0xf] %v464_v14  ;;  %v466_v15 = vld [vmem:[%s2845_s28 + $0x478] sm:$0xf] }
  0x75   : > { %467 = vst [vmem:[%s2852_s29 + $0x23c] sm:$0xf] %v466_v15 }
  0x76 PF: > { %p2205_p8 = scmp.ge.s32.totalorder %s2775_s16, 1  ;;  %p783_p9 = scmp.lt.s32.totalorder %s2775_s16, 3 }
  0x78   : > { %p784_p10 = pnand %p2205_p8, %p783_p9 }
  0x79   : > { %s790_s30 = sand.u32 (!%p784_p10), 1, %s2759_s12   ;;  %v2647_v16 = vld [vmem:[%s3358_s0 + $0x4] ss:$36 sps:$4 sm:$0xff] (!%p784_p10)   ;;  %v2650_v17 = vld [vmem:[%s3358_s0 + $0xc] ss:$36 sps:$4 sm:$0xff] (!%p784_p10)   ;;  %p828_p11 = scmp.lt.s32.totalorder (!%p784_p10), %s2767_s14, 1 }
  0x7a   : > { %787 = sbr.rel (%p784_p10) target bundleno = 460 (0x1cc), region = 69  ;;  %1672 = vmatprep.mubr.bf16.mxu0 (!%p784_p10), %v2647_v16  ;;  %1737 = vmatprep.mubr.bf16.mxu1 (!%p784_p10), %v2650_v17  ;;  %v2645_v48 = vld [vmem:[%s3358_s0] ss:$36 sps:$4 sm:$0xff] (!%p784_p10)   ;;  %v2648_v50 = vld [vmem:[%s3358_s0 + $0x8] ss:$36 sps:$4 sm:$0xff] (!%p784_p10)   ;;  %s2206_s19 = sshll.u32 (!%p784_p10), %s790_s30, 5 }
  0x7b   : > { %s2572_s4 = smul.u32 (!%p784_p10), 576, %s790_s30  ;;  %v2659_v52 = vld [vmem:[%s3358_s0 + $0x4c] ss:$36 sps:$4 sm:$0xff] (!%p784_p10)   ;;  %v2661_v61 = vld [vmem:[%s3358_s0 + $0x54] ss:$36 sps:$4 sm:$0xff] (!%p784_p10)   ;;  %s820_s12 = scalar_lea.vmem (!%p784_p10), [#allocation3], %s2206_s19 }
  0x7c   : > { %v2663_v62 = vld [vmem:[%s3358_s0 + $0x48] ss:$36 sps:$4 sm:$0xff] (!%p784_p10)   ;;  %v2664_v63 = vld [vmem:[%s3358_s0 + $0x50] ss:$36 sps:$4 sm:$0xff] (!%p784_p10)   ;;  %v2675_v9 = vld [vmem:[%s3358_s0 + $0x9c] ss:$36 sps:$4 sm:$0xff] (!%p784_p10)  }
  0x7d   : > { %s3148_s9 = scalar_lea.vmem (!%p784_p10), [#allocation2], %s2572_s4  ;;  %v2673_v8 = vld [vmem:[%s3358_s0 + $0x94] ss:$36 sps:$4 sm:$0xff] (!%p784_p10)  }
  0x7e   : > { %v2613_v18 = vld [vmem:[%s3148_s9 + $0x40] sm:$0xff] (!%p784_p10)   ;;  %v2617_v22 = vld [vmem:[%s3148_s9 + $0x48] sm:$0xff] (!%p784_p10)   ;;  %v2621_v26 = vld [vmem:[%s3148_s9 + $0x50] sm:$0xff] (!%p784_p10)  }
  0x7f   : > { %v2614_v19 = vld [vmem:[%s3148_s9 + $0xc0] sm:$0xff] (!%p784_p10)   ;;  %2359 = vmatprep.subr.bf16.mxu0 (!%p784_p10), %v2613_v18  ;;  %v2618_v23 = vld [vmem:[%s3148_s9 + $0xc8] sm:$0xff] (!%p784_p10)   ;;  %v2622_v27 = vld [vmem:[%s3148_s9 + $0xd0] sm:$0xff] (!%p784_p10)  }
  0x80   : > { %v2615_v20 = vld [vmem:[%s3148_s9] sm:$0xff] (!%p784_p10)   ;;  %2399 = vmatprep.subr.bf16.mxu1 (!%p784_p10), %v2614_v19  ;;  %v2619_v24 = vld [vmem:[%s3148_s9 + $0x8] sm:$0xff] (!%p784_p10)   ;;  %v2623_v28 = vld [vmem:[%s3148_s9 + $0x10] sm:$0xff] (!%p784_p10)  }
  0x81   : > { %v2616_v21 = vld [vmem:[%s3148_s9 + $0x80] sm:$0xff]   ;;  %2360 = vmatpush3.bf16.msra.mxu0 %v2615_v20  ;;  %v2620_v25 = vld [vmem:[%s3148_s9 + $0x88] sm:$0xff]   ;;  %v2624_v29 = vld [vmem:[%s3148_s9 + $0x90] sm:$0xff]   ;;  %s2325_s30 = sshll.u32 (%p2832_p6), %s2767_s14, 2 }
  0x82   : > { %2400 = vmatpush3.bf16.msra.mxu1 %v2616_v21  ;;  %2361 = vmatprep.subr.bf16.mxu0 %v2617_v22  ;;  %v2625_v30 = vld [vmem:[%s3148_s9 + $0x58] sm:$0xff]   ;;  %v2629_v34 = vld [vmem:[%s3148_s9 + $0x60] sm:$0xff]   ;;  %v2633_v38 = vld [vmem:[%s3148_s9 + $0x68] sm:$0xff]   ;;  %s2040_s24 = scalar_lea.vmem (%p2832_p6), %s3361_s3, %s2325_s30 }
  0x83   : > { %2401 = vmatprep.subr.bf16.mxu1 %v2618_v23  ;;  %v2626_v31 = vld [vmem:[%s3148_s9 + $0xd8] sm:$0xff]   ;;  %v2630_v35 = vld [vmem:[%s3148_s9 + $0xe0] sm:$0xff]   ;;  %v2634_v39 = vld [vmem:[%s3148_s9 + $0xe8] sm:$0xff]  }
  0x84   : > { %v2627_v32 = vld [vmem:[%s3148_s9 + $0x18] sm:$0xff]   ;;  %v2631_v36 = vld [vmem:[%s3148_s9 + $0x20] sm:$0xff]   ;;  %v2635_v40 = vld [vmem:[%s3148_s9 + $0x28] sm:$0xff]  }
  0x85   : > { %2362 = vmatpush3.bf16.msra.mxu0 %v2619_v24  ;;  %v2628_v33 = vld [vmem:[%s3148_s9 + $0x98] sm:$0xff]   ;;  %v2632_v37 = vld [vmem:[%s3148_s9 + $0xa0] sm:$0xff]   ;;  %v2636_v41 = vld [vmem:[%s3148_s9 + $0xa8] sm:$0xff]  }
  0x86   : > { %2402 = vmatpush3.bf16.msra.mxu1 %v2620_v25  ;;  %2363 = vmatprep.subr.bf16.mxu0 %v2621_v26  ;;  %v2637_v42 = vld [vmem:[%s3148_s9 + $0x70] sm:$0xff]   ;;  %v2641_v46 = vld [vmem:[%s3148_s9 + $0x78] sm:$0xff]   ;;  %v2651_v53 = vld [vmem:[%s3148_s9 + $0x140] sm:$0xff]  }
  0x87   : > { %2403 = vmatprep.subr.bf16.mxu1 %v2622_v27  ;;  %v2638_v43 = vld [vmem:[%s3148_s9 + $0xf0] sm:$0xff]   ;;  %v2642_v47 = vld [vmem:[%s3148_s9 + $0xf8] sm:$0xff]   ;;  %v2652_v54 = vld [vmem:[%s3148_s9 + $0x1c0] sm:$0xff]  }
  0x88   : > { %v2639_v44 = vld [vmem:[%s3148_s9 + $0x30] sm:$0xff]   ;;  %v2643_v49 = vld [vmem:[%s3148_s9 + $0x38] sm:$0xff]   ;;  %v2653_v55 = vld [vmem:[%s3148_s9 + $0x100] sm:$0xff]  }
  0x89   : > { %2364 = vmatpush3.bf16.msra.mxu0 %v2623_v28  ;;  %v2640_v45 = vld [vmem:[%s3148_s9 + $0xb0] sm:$0xff]   ;;  %v2644_v51 = vld [vmem:[%s3148_s9 + $0xb8] sm:$0xff]   ;;  %v2654_v56 = vld [vmem:[%s3148_s9 + $0x180] sm:$0xff]  }
  0x8a   : > { %2404 = vmatpush3.bf16.msra.mxu1 %v2624_v29  ;;  %2365 = vmatprep.subr.bf16.mxu0 %v2625_v30  ;;  %v2655_v57 = vld [vmem:[%s3148_s9 + $0x148] sm:$0xff]   ;;  %v2665_v0 = vld [vmem:[%s3148_s9 + $0x150] sm:$0xff]   ;;  %v2669_v4 = vld [vmem:[%s3148_s9 + $0x158] sm:$0xff]  }
  0x8b   : > { %2405 = vmatprep.subr.bf16.mxu1 %v2626_v31  ;;  %v2656_v58 = vld [vmem:[%s3148_s9 + $0x1c8] sm:$0xff]   ;;  %v2666_v1 = vld [vmem:[%s3148_s9 + $0x1d0] sm:$0xff]   ;;  %v2670_v5 = vld [vmem:[%s3148_s9 + $0x1d8] sm:$0xff]  }
  0x8c   : > { %v2657_v59 = vld [vmem:[%s3148_s9 + $0x108] sm:$0xff]   ;;  %v2667_v2 = vld [vmem:[%s3148_s9 + $0x110] sm:$0xff]   ;;  %v2671_v6 = vld [vmem:[%s3148_s9 + $0x118] sm:$0xff]  }
  0x8d   : > { %2366 = vmatpush3.bf16.msra.mxu0 %v2627_v32  ;;  %v2658_v60 = vld [vmem:[%s3148_s9 + $0x188] sm:$0xff]   ;;  %v2668_v3 = vld [vmem:[%s3148_s9 + $0x190] sm:$0xff]   ;;  %v2672_v7 = vld [vmem:[%s3148_s9 + $0x198] sm:$0xff]  }
  0x8e   : > { %2406 = vmatpush3.bf16.msra.mxu1 %v2628_v33  ;;  %2367 = vmatprep.subr.bf16.mxu0 %v2629_v34  ;;  %v2677_v10 = vld [vmem:[%s3358_s0 + $0x90] ss:$36 sps:$4 sm:$0xff]   ;;  %v2678_v11 = vld [vmem:[%s3358_s0 + $0x98] ss:$36 sps:$4 sm:$0xff]   ;;  %v2679_v12 = vld [vmem:[%s3148_s9 + $0x160] sm:$0xff]  }
  0x8f   : > { %2407 = vmatprep.subr.bf16.mxu1 %v2630_v35  ;;  %v2680_v13 = vld [vmem:[%s3148_s9 + $0x1e0] sm:$0xff]   ;;  %v2683_v16 = vld [vmem:[%s3148_s9 + $0x168] sm:$0xff]   ;;  %v2691_v22 = vld [vmem:[%s3358_s0 + $0xd8] ss:$36 sps:$4 sm:$0xff]  }
  0x90   : > { %v2681_v14 = vld [vmem:[%s3148_s9 + $0x120] sm:$0xff]   ;;  %v2684_v17 = vld [vmem:[%s3148_s9 + $0x1e8] sm:$0xff]   ;;  %v2693_v24 = vld [vmem:[%s3148_s9 + $0x170] sm:$0xff]  }
  0x91   : > { %2368 = vmatpush3.bf16.msra.mxu0 %v2631_v36  ;;  %v2682_v15 = vld [vmem:[%s3148_s9 + $0x1a0] sm:$0xff]   ;;  %v2685_v18 = vld [vmem:[%s3148_s9 + $0x128] sm:$0xff]   ;;  %v2694_v25 = vld [vmem:[%s3148_s9 + $0x1f0] sm:$0xff]  }
  0x92   : > { %2408 = vmatpush3.bf16.msra.mxu1 %v2632_v37  ;;  %2369 = vmatprep.subr.bf16.mxu0 %v2633_v38  ;;  %v2686_v19 = vld [vmem:[%s3148_s9 + $0x1a8] sm:$0xff]   ;;  %v2687_v20 = vld [vmem:[%s3358_s0 + $0xdc] ss:$36 sps:$4 sm:$0xff]   ;;  %v2695_v26 = vld [vmem:[%s3148_s9 + $0x130] sm:$0xff]  }
  0x93   : > { %2409 = vmatprep.subr.bf16.mxu1 %v2634_v39  ;;  %v2689_v21 = vld [vmem:[%s3358_s0 + $0xe4] ss:$36 sps:$4 sm:$0xff]   ;;  %v2696_v27 = vld [vmem:[%s3148_s9 + $0x1b0] sm:$0xff]   ;;  %v2697_v28 = vld [vmem:[%s3148_s9 + $0x178] sm:$0xff]  }
  0x94   : > { %v2692_v23 = vld [vmem:[%s3358_s0 + $0xe0] ss:$36 sps:$4 sm:$0xff]   ;;  %v2698_v29 = vld [vmem:[%s3148_s9 + $0x1f8] sm:$0xff]   ;;  %v2701_v32 = vld [vmem:[%s3358_s0 + $0x10] ss:$36 sps:$4 sm:$0xff]  }
  0x95   : > { %2370 = vmatpush3.bf16.msra.mxu0 %v2635_v40  ;;  %v2699_v30 = vld [vmem:[%s3148_s9 + $0x138] sm:$0xff]   ;;  %v2707_v36 = vld [vmem:[%s3148_s9 + $0x200] sm:$0xff]   ;;  %v2708_v37 = vld [vmem:[%s3148_s9 + $0x208] sm:$0xff]  }
  0x96   : > { %2410 = vmatpush3.bf16.msra.mxu1 %v2636_v41  ;;  %2371 = vmatprep.subr.bf16.mxu0 %v2637_v42  ;;  %v2700_v31 = vld [vmem:[%s3148_s9 + $0x1b8] sm:$0xff]   ;;  %v2711_v39 = vld [vmem:[%s3358_s0 + $0x64] ss:$36 sps:$4 sm:$0xff]   ;;  %v2715_v42 = vld [vmem:[%s3148_s9 + $0x210] sm:$0xff]  }
  0x97   : > { %2411 = vmatprep.subr.bf16.mxu1 %v2638_v43  ;;  %v2703_v33 = vld [vmem:[%s3358_s0 + $0x14] ss:$36 sps:$4 sm:$0xff]   ;;  %v2706_v35 = vld [vmem:[%s3358_s0 + $0x1c] ss:$36 sps:$4 sm:$0xff]   ;;  %v2717_v43 = vld [vmem:[%s3358_s0 + $0xa4] ss:$36 sps:$4 sm:$0xff]  }
  0x98   : > { %v2704_v34 = vld [vmem:[%s3358_s0 + $0x18] ss:$36 sps:$4 sm:$0xff]   ;;  %v2714_v41 = vld [vmem:[%s3358_s0 + $0x60] ss:$36 sps:$4 sm:$0xff]  }
  0x99   : > { %2372 = vmatpush3.bf16.msra.mxu0 %v2639_v44  ;;  %v2709_v38 = vld [vmem:[%s3358_s0 + $0x5c] ss:$36 sps:$4 sm:$0xff]   ;;  %v2719_v44 = vld [vmem:[%s3358_s0 + $0xac] ss:$36 sps:$4 sm:$0xff]  }
  0x9a   : > { %2412 = vmatpush3.bf16.msra.mxu1 %v2640_v45  ;;  %2373 = vmatprep.subr.bf16.mxu0 %v2641_v46  ;;  %v2713_v40 = vld [vmem:[%s3358_s0 + $0x58] ss:$36 sps:$4 sm:$0xff]   ;;  %v2721_v46 = vld [vmem:[%s3358_s0 + $0xa0] ss:$36 sps:$4 sm:$0xff]  }
  0x9b   : > { %2413 = vmatprep.subr.bf16.mxu1 %v2642_v47  ;;  %v2716_v45 = vld [vmem:[%s3148_s9 + $0x218] sm:$0xff]   ;;  %v2722_v47 = vld [vmem:[%s3358_s0 + $0xa8] ss:$36 sps:$4 sm:$0xff]  }
  0x9d   : > { %2374 = vmatpush3.bf16.msra.mxu0 %v2643_v49  ;;  %v2725_v49 = vld [vmem:[%s3358_s0 + $0xec] ss:$36 sps:$4 sm:$0xff]  }
  0x9e   : > { %2414 = vmatpush3.bf16.msra.mxu1 %v2644_v51  ;;  %2439 = vmatprep.subr.bf16.mxu0 %v2651_v53  ;;  %v2724_v51 = vld [vmem:[%s3148_s9 + $0x228] sm:$0xff]   ;;  %v2731_v53 = vld [vmem:[%s3148_s9 + $0x230] sm:$0xff]  }
  0x9f   : > { %2479 = vmatprep.subr.bf16.mxu1 %v2652_v54  ;;  %v2730_v54 = vld [vmem:[%s3358_s0 + $0xf0] ss:$36 sps:$4 sm:$0xff]  }
  0xa0   : > { %1673 = vmatmul.mubr.bf16.vlgmr.msra.gmra.mrb[0].mxu0 %v2645_v48  ;;  %v2723_v48 = vld [vmem:[%s3148_s9 + $0x220] sm:$0xff]  }
  0xa1   : > { %1738 = vmatmul.mubr.bf16.vlgmr.msra.gmra.mrb[0].mxu1 %v2648_v50  ;;  %2440 = vmatpush3.bf16.msra.mxu0 %v2653_v55  ;;  %v2727_v50 = vld [vmem:[%s3358_s0 + $0xf4] ss:$36 sps:$4 sm:$0xff]   ;;  %v2733_v55 = vld [vmem:[%s3358_s0 + $0x20] ss:$36 sps:$4 sm:$0xff]  }
  0xa2   : > { %2480 = vmatpush3.bf16.msra.mxu1 %v2654_v56  ;;  %1680 = vmatprep.mubr.bf16.mxu0 %v2659_v52  ;;  %v2729_v52 = vld [vmem:[%s3358_s0 + $0xe8] ss:$36 sps:$4 sm:$0xff]   ;;  %v2734_v56 = vld [vmem:[%s3358_s0 + $0xb0] ss:$36 sps:$4 sm:$0xff]  }
  0xa3   : > { %2441 = vmatprep.subr.bf16.mxu0 %v2655_v57  ;;  %2481 = vmatprep.subr.bf16.mxu1 %v2656_v58  ;;  %v2732_v57 = vld [vmem:[%s3148_s9 + $0x238] sm:$0xff]   ;;  %v2735_v58 = vld [vmem:[%s3358_s0 + $0x68] ss:$36 sps:$4 sm:$0xff]   ;;  %s829_s9 = scalar_select %p828_p11, %s2767_s14, 1 }
  0xa4   : > { %1745 = vmatprep.mubr.bf16.mxu1 %v2661_v61 }
  0xa5   : > { %2442 = vmatpush3.bf16.msra.mxu0 %v2657_v59  ;;  %v2736_v59 = vld [vmem:[%s3358_s0 + $0xf8] ss:$36 sps:$4 sm:$0xff]   ;;  %s830_s18 = scalar_lea.vmem %s3360_s2, %s829_s9 }
  0xa6   : > { %2482 = vmatpush3.bf16.msra.mxu1 %v2658_v60  ;;  %2443 = vmatprep.subr.bf16.mxu0 %v2665_v0 }
  0xa7   : > { %2483 = vmatprep.subr.bf16.mxu1 %v2666_v1 }
  0xa8   : > { %1681 = vmatmul.mubr.bf16.gmra.mrb[4].mxu0 %v2663_v62  ;;  %v2207_v62 = vld [vmem:[%s830_s18] ss:$0 sm:$0xff] }
  0xa9   : > { %1746 = vmatmul.mubr.bf16.gmra.mrb[4].mxu1 %v2664_v63  ;;  %2444 = vmatpush3.bf16.msra.mxu0 %v2667_v2 }
  0xaa   : > { %2484 = vmatpush3.bf16.msra.mxu1 %v2668_v3  ;;  %2445 = vmatprep.subr.bf16.mxu0 %v2669_v4 }
  0xab   : > { %2485 = vmatprep.subr.bf16.mxu1 %v2670_v5  ;;  %1688 = vmatprep.mubr.bf16.mxu0 %v2673_v8 }
  0xac   : > { %1753 = vmatprep.mubr.bf16.mxu1 %v2675_v9 }
  0xad   : > { %2446 = vmatpush3.bf16.msra.mxu0 %v2671_v6 }
  0xae   : > { %2486 = vmatpush3.bf16.msra.mxu1 %v2672_v7  ;;  %2447 = vmatprep.subr.bf16.mxu0 %v2679_v12 }
  0xaf   : > { %2487 = vmatprep.subr.bf16.mxu1 %v2680_v13 }
  0xb0   : > { %1689 = vmatmul.mubr.bf16.gmra.mrb[8].mxu0 %v2677_v10 }
  0xb1   : > { %1754 = vmatmul.mubr.bf16.gmra.mrb[8].mxu1 %v2678_v11  ;;  %2448 = vmatpush3.bf16.msra.mxu0 %v2681_v14 }
  0xb2   : > { %2488 = vmatpush3.bf16.msra.mxu1 %v2682_v15  ;;  %2449 = vmatprep.subr.bf16.mxu0 %v2683_v16 }
  0xb3   : > { %2489 = vmatprep.subr.bf16.mxu1 %v2684_v17  ;;  %1696 = vmatprep.mubr.bf16.mxu0 %v2687_v20 }
  0xb4   : > { %1761 = vmatprep.mubr.bf16.mxu1 %v2689_v21 }
  0xb5   : > { %2450 = vmatpush3.bf16.msra.mxu0 %v2685_v18 }
  0xb6   : > { %2490 = vmatpush3.bf16.msra.mxu1 %v2686_v19  ;;  %2451 = vmatprep.subr.bf16.mxu0 %v2693_v24 }
  0xb7   : > { %2491 = vmatprep.subr.bf16.mxu1 %v2694_v25 }
  0xb8   : > { %1697 = vmatmul.mubr.bf16.gmra.mrb[12].mxu0 %v2691_v22 }
  0xb9   : > { %1762 = vmatmul.mubr.bf16.gmra.mrb[12].mxu1 %v2692_v23  ;;  %2452 = vmatpush3.bf16.msra.mxu0 %v2695_v26 }
  0xba   : > { %2492 = vmatpush3.bf16.msra.mxu1 %v2696_v27  ;;  %2453 = vmatprep.subr.bf16.mxu0 %v2697_v28 }
  0xbb   : > { %2493 = vmatprep.subr.bf16.mxu1 %v2698_v29  ;;  %1802 = vmatprep.mubr.bf16.mxu0 %v2703_v33 }
  0xbc   : > { %1867 = vmatprep.mubr.bf16.mxu1 %v2706_v35 }
  0xbd   : > { %2454 = vmatpush3.bf16.msra.mxu0 %v2699_v30 }
  0xbe   : > { %2494 = vmatpush3.bf16.msra.mxu1 %v2700_v31  ;;  %2531 = vmatprep.subr.bf16.mxu0 %v2707_v36 }
  0xbf   : > { %2555 = vmatprep.subr.bf16.mxu1 %v2707_v36 }
  0xc0   : > { %1803 = vmatmul.mubr.bf16.vlgmr.msra.gmra.mrb[16].mxu0 %v2701_v32 }
  0xc1   : > { %1868 = vmatmul.mubr.bf16.vlgmr.msra.gmra.mrb[16].mxu1 %v2704_v34  ;;  %2532 = vmatpush3.bf16.msra.mxu0 %v2707_v36 }
  0xc2   : > { %2563 = vmatpush3.bf16.msra.mxu1 %v2707_v36  ;;  %2533 = vmatprep.subr.bf16.mxu0 %v2708_v37 }
  0xc3   : > { %2556 = vmatprep.subr.bf16.mxu1 %v2708_v37  ;;  %1810 = vmatprep.mubr.bf16.mxu0 %v2709_v38 }
  0xc4   : > { %1875 = vmatprep.mubr.bf16.mxu1 %v2711_v39 }
  0xc5   : > { %2534 = vmatpush3.bf16.msra.mxu0 %v2708_v37 }
  0xc6   : > { %2564 = vmatpush3.bf16.msra.mxu1 %v2708_v37  ;;  %2535 = vmatprep.subr.bf16.mxu0 %v2715_v42 }
  0xc7   : > { %2557 = vmatprep.subr.bf16.mxu1 %v2715_v42 }
  0xc8   : > { %1811 = vmatmul.mubr.bf16.gmra.mrb[20].mxu0 %v2713_v40 }
  0xc9   : > { %1876 = vmatmul.mubr.bf16.gmra.mrb[20].mxu1 %v2714_v41  ;;  %1818 = vmatprep.mubr.bf16.mxu0 %v2717_v43 }
  0xca   : > { %2536 = vmatpush3.bf16.msra.mxu0 %v2715_v42  ;;  %1883 = vmatprep.mubr.bf16.mxu1 %v2719_v44 }
  0xcb   : > { %2565 = vmatpush3.bf16.msra.mxu1 %v2715_v42  ;;  %2537 = vmatprep.subr.bf16.mxu0 %v2716_v45 }
  0xcc   : > { %2558 = vmatprep.subr.bf16.mxu1 %v2716_v45 }
  0xce   : > { %2538 = vmatpush3.bf16.msra.mxu0 %v2716_v45 }
  0xcf   : > { %2566 = vmatpush3.bf16.msra.mxu1 %v2716_v45  ;;  %2539 = vmatprep.subr.bf16.mxu0 %v2723_v48 }
  0xd0   : > { %1819 = vmatmul.mubr.bf16.gmra.mrb[24].mxu0 %v2721_v46  ;;  %2559 = vmatprep.subr.bf16.mxu1 %v2723_v48 }
  0xd1   : > { %1884 = vmatmul.mubr.bf16.gmra.mrb[24].mxu1 %v2722_v47  ;;  %1826 = vmatprep.mubr.bf16.mxu0 %v2725_v49 }
  0xd2   : > { %2540 = vmatpush3.bf16.msra.mxu0 %v2723_v48  ;;  %1891 = vmatprep.mubr.bf16.mxu1 %v2727_v50 }
  0xd3   : > { %2567 = vmatpush3.bf16.msra.mxu1 %v2723_v48  ;;  %2541 = vmatprep.subr.bf16.mxu0 %v2724_v51 }
  0xd4   : > { %2560 = vmatprep.subr.bf16.mxu1 %v2724_v51 }
  0xd6   : > { %2542 = vmatpush3.bf16.msra.mxu0 %v2724_v51 }
  0xd7   : > { %2568 = vmatpush3.bf16.msra.mxu1 %v2724_v51  ;;  %2543 = vmatprep.subr.bf16.mxu0 %v2731_v53 }
  0xd8   : > { %1827 = vmatmul.mubr.bf16.gmra.mrb[28].mxu0 %v2729_v52  ;;  %2561 = vmatprep.subr.bf16.mxu1 %v2731_v53 }
  0xd9   : > { %1892 = vmatmul.mubr.bf16.gmra.mrb[28].mxu1 %v2730_v54  ;;  %2547 = vmatprep.mubr.bf16.mxu0 %v2733_v55 }
  0xda   : > { %2544 = vmatpush3.bf16.msra.mxu0 %v2731_v53  ;;  %2551 = vmatprep.mubr.bf16.mxu1 %v2734_v56 }
  0xdb   : > { %2569 = vmatpush3.bf16.msra.mxu1 %v2731_v53  ;;  %2545 = vmatprep.subr.bf16.mxu0 %v2732_v57 }
  0xdc   : > { %2562 = vmatprep.subr.bf16.mxu1 %v2732_v57 }
  0xde   : > { %2546 = vmatpush3.bf16.msra.mxu0 %v2732_v57 }
  0xdf   : > { %2570 = vmatpush3.bf16.msra.mxu1 %v2732_v57 }
  0xe1   : > { %2548 = vmatmul.mubr.bf16.vlgmr.msra.gmra.mrb[32].mxu0 %v2735_v58 }
  0xe2   : > { %2552 = vmatmul.mubr.bf16.vlgmr.msra.gmra.mrb[32].mxu1 %v2736_v59 }
 0x173   : > { %v2375_v60 = vpop.f32.mrb[0].mxu0 }
 0x174   : > { %v2415_v61 = vpop.f32.mrb[0].mxu1  ;;  %v2376_v63 = vpop.f32.mrb[1].mxu0 }
 0x175   : > { %v2377_v0 = vadd.f32 %v2376_v63, %v2375_v60  ;;  %v2416_v1 = vpop.f32.mrb[1].mxu1  ;;  %v2378_v2 = vpop.f32.mrb[2].mxu0 }
 0x176   : > { %v2417_v3 = vadd.f32 %v2416_v1, %v2415_v61  ;;  %v2418_v4 = vpop.f32.mrb[2].mxu1  ;;  %v2379_v5 = vpop.f32.mrb[3].mxu0 }
 0x177   : > { %v1675_v6 = vadd.f32 %v2377_v0, %v2207_v62  ;;  %v2380_v7 = vadd.f32 %v2379_v5, %v2378_v2  ;;  %v2419_v8 = vpop.f32.mrb[3].mxu1 }
 0x178   : > { %v2420_v9 = vadd.f32 %v2419_v8, %v2418_v4 }
 0x179   : > { %v1740_v10 = vadd.f32 %v2417_v3, %v1675_v6  ;;  %v1678_v11 = vadd.f32 %v2380_v7, %v2207_v62 }
 0x17b   : > { %v1743_v12 = vadd.f32 %v2420_v9, %v1678_v11  ;;  %v2381_v13 = vpop.f32.mrb[4].mxu0 }
 0x17c   : > { %v2421_v14 = vpop.f32.mrb[4].mxu1  ;;  %v2382_v15 = vpop.f32.mrb[5].mxu0 }
 0x17d   : > { %v2383_v16 = vadd.f32 %v2382_v15, %v2381_v13  ;;  %v2422_v17 = vpop.f32.mrb[5].mxu1  ;;  %v2384_v18 = vpop.f32.mrb[6].mxu0 }
 0x17e   : > { %v2423_v19 = vadd.f32 %v2422_v17, %v2421_v14  ;;  %v2424_v20 = vpop.f32.mrb[6].mxu1  ;;  %v2385_v21 = vpop.f32.mrb[7].mxu0 }
 0x17f   : > { %v1683_v22 = vadd.f32 %v2383_v16, %v2207_v62  ;;  %v2386_v23 = vadd.f32 %v2385_v21, %v2384_v18  ;;  %v2425_v24 = vpop.f32.mrb[7].mxu1 }
 0x180   : > { %v2426_v25 = vadd.f32 %v2425_v24, %v2424_v20 }
 0x181   : > { %v1748_v26 = vadd.f32 %v2423_v19, %v1683_v22  ;;  %v1686_v27 = vadd.f32 %v2386_v23, %v2207_v62 }
 0x183   : > { %v1751_v28 = vadd.f32 %v2426_v25, %v1686_v27  ;;  %v2387_v29 = vpop.f32.mrb[8].mxu0 }
 0x184   : > { %v2427_v30 = vpop.f32.mrb[8].mxu1  ;;  %v2388_v31 = vpop.f32.mrb[9].mxu0 }
 0x185   : > { %v2389_v32 = vadd.f32 %v2388_v31, %v2387_v29  ;;  %v2428_v33 = vpop.f32.mrb[9].mxu1  ;;  %v2390_v34 = vpop.f32.mrb[10].mxu0 }
 0x186   : > { %v2429_v35 = vadd.f32 %v2428_v33, %v2427_v30  ;;  %v2430_v36 = vpop.f32.mrb[10].mxu1  ;;  %v2391_v37 = vpop.f32.mrb[11].mxu0 }
 0x187   : > { %v1691_v38 = vadd.f32 %v2389_v32, %v2207_v62  ;;  %v2392_v39 = vadd.f32 %v2391_v37, %v2390_v34  ;;  %v2431_v40 = vpop.f32.mrb[11].mxu1 }
 0x188   : > { %v2432_v41 = vadd.f32 %v2431_v40, %v2430_v36 }
 0x189   : > { %v1756_v42 = vadd.f32 %v2429_v35, %v1691_v38  ;;  %v1694_v43 = vadd.f32 %v2392_v39, %v2207_v62 }
 0x18b   : > { %v1759_v44 = vadd.f32 %v2432_v41, %v1694_v43  ;;  %v2393_v45 = vpop.f32.mrb[12].mxu0 }
 0x18c   : > { %v2433_v46 = vpop.f32.mrb[12].mxu1  ;;  %v2394_v47 = vpop.f32.mrb[13].mxu0 }
 0x18d   : > { %v2434_v48 = vpop.f32.mrb[13].mxu1  ;;  %v2395_v49 = vadd.f32 %v2394_v47, %v2393_v45  ;;  %v2396_v51 = vpop.f32.mrb[14].mxu0 }
 0x18e   : > { %v2435_v50 = vadd.f32 %v2434_v48, %v2433_v46  ;;  %v2436_v52 = vpop.f32.mrb[14].mxu1  ;;  %v2397_v53 = vpop.f32.mrb[15].mxu0 }
 0x18f   : > { %v2437_v54 = vpop.f32.mrb[15].mxu1  ;;  %v1699_v55 = vadd.f32 %v2395_v49, %v2207_v62  ;;  %v2398_v56 = vadd.f32 %v2397_v53, %v2396_v51 }
 0x190   : > { %v2438_v57 = vadd.f32 %v2437_v54, %v2436_v52 }
 0x191   : > { %v1764_v58 = vadd.f32 %v2435_v50, %v1699_v55  ;;  %v1702_v59 = vadd.f32 %v2398_v56, %v2207_v62 }
 0x193   : > { %v1767_v60 = vadd.f32 %v2438_v57, %v1702_v59  ;;  %v2455_v61 = vpop.f32.mrb[16].mxu0 }
 0x194   : > { %v2456_v63 = vpop.f32.mrb[17].mxu0  ;;  %v2495_v0 = vpop.f32.mrb[16].mxu1 }
 0x195   : > { %v2457_v1 = vadd.f32 %v2456_v63, %v2455_v61  ;;  %v2458_v2 = vpop.f32.mrb[18].mxu0  ;;  %v2496_v3 = vpop.f32.mrb[17].mxu1 }
 0x196   : > { %v2459_v4 = vpop.f32.mrb[19].mxu0  ;;  %v2497_v6 = vadd.f32 %v2496_v3, %v2495_v0  ;;  %v2498_v7 = vpop.f32.mrb[18].mxu1 }
 0x197   : > { %v1805_v5 = vadd.f32 %v2457_v1, %v1740_v10  ;;  %v2460_v8 = vadd.f32 %v2459_v4, %v2458_v2  ;;  %v2499_v9 = vpop.f32.mrb[19].mxu1 }
 0x198   : > { %v2500_v13 = vadd.f32 %v2499_v9, %v2498_v7 }
 0x199   : > { %v1808_v11 = vadd.f32 %v2460_v8, %v1743_v12  ;;  %v1870_v14 = vadd.f32 %v2497_v6, %v1805_v5 }
 0x19b   : > { %v2461_v15 = vpop.f32.mrb[20].mxu0  ;;  %v3329_v16 = vadd.f32 %v2500_v13, %v1808_v11 }
 0x19c   : > { %v2462_v62 = vpop.f32.mrb[21].mxu0  ;;  %v2501_v17 = vpop.f32.mrb[20].mxu1 }
 0x19d   : > { %v2463_v18 = vadd.f32 %v2462_v62, %v2461_v15  ;;  %v2464_v19 = vpop.f32.mrb[22].mxu0  ;;  %v2502_v20 = vpop.f32.mrb[21].mxu1 }
 0x19e   : > { %v2465_v21 = vpop.f32.mrb[23].mxu0  ;;  %v2503_v23 = vadd.f32 %v2502_v20, %v2501_v17  ;;  %v2504_v24 = vpop.f32.mrb[22].mxu1 }
 0x19f   : > { %v1813_v22 = vadd.f32 %v2463_v18, %v1748_v26  ;;  %v2466_v10 = vadd.f32 %v2465_v21, %v2464_v19  ;;  %v2505_v25 = vpop.f32.mrb[23].mxu1 }
 0x1a0   : > { %v2506_v29 = vadd.f32 %v2505_v25, %v2504_v24 }
 0x1a1   : > { %v1816_v27 = vadd.f32 %v2466_v10, %v1751_v28  ;;  %v1878_v30 = vadd.f32 %v2503_v23, %v1813_v22 }
 0x1a3   : > { %v2467_v12 = vpop.f32.mrb[24].mxu0  ;;  %v1881_v31 = vadd.f32 %v2506_v29, %v1816_v27 }
 0x1a4   : > { %v2468_v32 = vpop.f32.mrb[25].mxu0  ;;  %v2507_v33 = vpop.f32.mrb[24].mxu1 }
 0x1a5   : > { %v2469_v34 = vadd.f32 %v2468_v32, %v2467_v12  ;;  %v2470_v35 = vpop.f32.mrb[26].mxu0  ;;  %v2508_v36 = vpop.f32.mrb[25].mxu1 }
 0x1a6   : > { %v2471_v37 = vpop.f32.mrb[27].mxu0  ;;  %v2509_v39 = vadd.f32 %v2508_v36, %v2507_v33  ;;  %v2510_v40 = vpop.f32.mrb[26].mxu1 }
 0x1a7   : > { %v1821_v38 = vadd.f32 %v2469_v34, %v1756_v42  ;;  %v2472_v41 = vadd.f32 %v2471_v37, %v2470_v35  ;;  %v2511_v26 = vpop.f32.mrb[27].mxu1 }
 0x1a8   : > { %v2512_v45 = vadd.f32 %v2511_v26, %v2510_v40 }
 0x1a9   : > { %v1824_v43 = vadd.f32 %v2472_v41, %v1759_v44  ;;  %v1886_v46 = vadd.f32 %v2509_v39, %v1821_v38 }
 0x1ab   : > { %v2473_v47 = vpop.f32.mrb[28].mxu0  ;;  %v1889_v28 = vadd.f32 %v2512_v45, %v1824_v43 }
 0x1ac   : > { %v2474_v48 = vpop.f32.mrb[29].mxu0  ;;  %v2513_v49 = vpop.f32.mrb[28].mxu1 }
 0x1ad   : > { %v2475_v50 = vadd.f32 %v2474_v48, %v2473_v47  ;;  %v2476_v51 = vpop.f32.mrb[30].mxu0  ;;  %v2514_v52 = vpop.f32.mrb[29].mxu1 }
 0x1ae   : > { %v2477_v53 = vpop.f32.mrb[31].mxu0  ;;  %v2515_v55 = vadd.f32 %v2514_v52, %v2513_v49  ;;  %v2516_v56 = vpop.f32.mrb[30].mxu1 }
 0x1af   : > { %v1829_v54 = vadd.f32 %v2475_v50, %v1764_v58  ;;  %v2478_v57 = vadd.f32 %v2477_v53, %v2476_v51  ;;  %v2517_v42 = vpop.f32.mrb[31].mxu1 }
 0x1b0   : > { %v2518_v61 = vadd.f32 %v2517_v42, %v2516_v56 }
 0x1b1   : > { %v1832_v59 = vadd.f32 %v2478_v57, %v1767_v60  ;;  %v1894_v63 = vadd.f32 %v2515_v55, %v1829_v54 }
 0x1b3   : > { %v1897_v0 = vadd.f32 %v2518_v61, %v1832_v59 }
 0x1b4   : > { %v2549_v44 = vpop.f32.mrb[32].mxu0 }
 0x1b5   : > { %v1943_v1 = vadd.f32 %v2549_v44, %v1878_v30  ;;  %v2553_v2 = vpop.f32.mrb[32].mxu1  ;;  %v1934_v3 = vpop.f32.mrb[33].mxu0 }
 0x1b6   : > { %v1959_v4 = vadd.f32 %v2553_v2, %v1894_v63  ;;  %v1935_v5 = vadd.f32 %v1934_v3, %v1870_v14  ;;  %v1950_v6 = vpop.f32.mrb[33].mxu1  ;;  %v2550_v7 = vpop.f32.mrb[34].mxu0 }
 0x1b7   : > { %v1975_v8 = vmul.f32 0.01, %v1943_v1  ;;  %v1951_v9 = vadd.f32 %v1950_v6, %v1886_v46  ;;  %v1946_v58 = vadd.f32 %v2550_v7, %v1881_v31  ;;  %v2554_v11 = vpop.f32.mrb[34].mxu1  ;;  %v1937_v13 = vpop.f32.mrb[35].mxu0  ;;  %vm1967_vm0 = vcmp.ge.f32.partialorder %v1943_v1, 0.0 }
 0x1b8   : > { %vm1971_vm1 = vcmp.ge.f32.partialorder %v1959_v4, 0.0  ;;  %v1979_v60 = vmul.f32 0.01, %v1959_v4  ;;  %v1953_v15 = vpop.f32.mrb[35].mxu1  ;;  %vm1965_vm3 = vcmp.ge.f32.partialorder %v1935_v5, 0.0  ;;  %v1962_v18 = vadd.f32 %v2554_v11, %v1897_v0 }
 0x1b9   : > { %vm1968_vm2 = vcmp.ge.f32.partialorder %v1946_v58, 0.0  ;;  %v1973_v62 = vmul.f32 0.01, %v1935_v5  ;;  %v1976_v17 = vmul.f32 0.01, %v1946_v58  ;;  %v1983_v19 = vsel %vm1967_vm0, %v1943_v1, %v1975_v8 }
 0x1ba   : > { %vm1969_vm4 = vcmp.ge.f32.partialorder %v1951_v9, 0.0  ;;  %v1938_v14 = vadd.f32 %v1937_v13, %v3329_v16  ;;  %v1954_v20 = vadd.f32 %v1953_v15, %v1889_v28  ;;  %v1977_v21 = vmul.f32 0.01, %v1951_v9 }
 0x1bb   : > { %v1984_v22 = vsel %vm1968_vm2, %v1946_v58, %v1976_v17  ;;  %vm1972_vm5 = vcmp.ge.f32.partialorder %v1962_v18, 0.0  ;;  %v1980_v23 = vmul.f32 0.01, %v1962_v18  ;;  %v1987_v25 = vsel %vm1971_vm1, %v1959_v4, %v1979_v60 }
 0x1bc   : > { %v2344_v24 = vpack.c.bf16 %v1984_v22, %v1983_v19  ;;  %vm1966_vm6 = vcmp.ge.f32.partialorder %v1938_v14, 0.0  ;;  %v1974_v10 = vmul.f32 0.01, %v1938_v14  ;;  %vm1970_vm7 = vcmp.ge.f32.partialorder %v1954_v20, 0.0  ;;  %2035 = sbr.rel (!%p2832_p6) target bundleno = 460 (0x1cc), region = 77 }
 0x1bd   : > { %v1988_v27 = vsel %vm1972_vm5, %v1962_v18, %v1980_v23  ;;  %v1978_v29 = vmul.f32 0.01, %v1954_v20  ;;  %v1981_v30 = vsel %vm1965_vm3, %v1935_v5, %v1973_v62  ;;  %v1985_v16 = vsel %vm1969_vm4, %v1951_v9, %v1977_v21 }
 0x1be   : > { %2356 = vst [vmem:[%s820_s12 + $0x8] sm:$0xff] %v2344_v24   ;;  %v2354_v12 = vpack.c.bf16 %v1988_v27, %v1987_v25  ;;  %v1982_v31 = vsel %vm1966_vm6, %v1938_v14, %v1974_v10 }
 0x1bf   : > { %v2339_v32 = vpack.c.bf16 %v1982_v31, %v1981_v30  ;;  %v1986_v33 = vsel %vm1970_vm7, %v1954_v20, %v1978_v29 }
 0x1c0   : > { %2358 = vst [vmem:[%s820_s12 + $0x18] sm:$0xff] %v2354_v12   ;;  %v2349_v34 = vpack.c.bf16 %v1986_v33, %v1985_v16 }
 0x1c1   : > { %2340 = vst [vmem:[%s820_s12] sm:$0xff] %v2339_v32  }
 0x1c2   : > { %2357 = vst [vmem:[%s820_s12 + $0x10] sm:$0xff] %v2349_v34  }
 0x1c5   : > { %v2060_v37 = vld [vmem:[%s820_s12 + $0x8] sm:$0xf]  ;;  %v2062_v38 = vld [vmem:[%s820_s12 + $0xc] sm:$0xf] }
 0x1c6   : > { %2061 = vst [vmem:[%s2040_s24 + $0x10] sm:$0xf] %v2060_v37  ;;  %2063 = vst [vmem:[%s2040_s24 + $0x18] sm:$0xf] %v2062_v38 }
 0x1c7   : > { %v2068_v41 = vld [vmem:[%s820_s12 + $0x18] sm:$0xf]  ;;  %v2070_v26 = vld [vmem:[%s820_s12 + $0x1c] sm:$0xf] }
 0x1c8   : > { %v2056_v35 = vld [vmem:[%s820_s12] sm:$0xf]  ;;  %v2058_v36 = vld [vmem:[%s820_s12 + $0x4] sm:$0xf]  ;;  %2069 = vst [vmem:[%s2040_s24 + $0x30] sm:$0xf] %v2068_v41 }
 0x1c9   : > { %v2064_v39 = vld [vmem:[%s820_s12 + $0x10] sm:$0xf]  ;;  %2057 = vst [vmem:[%s2040_s24] sm:$0xf] %v2056_v35  ;;  %2059 = vst [vmem:[%s2040_s24 + $0x8] sm:$0xf] %v2058_v36 }
 0x1ca   : > { %2065 = vst [vmem:[%s2040_s24 + $0x20] sm:$0xf] %v2064_v39  ;;  %v2066_v40 = vld [vmem:[%s820_s12 + $0x14] sm:$0xf]  ;;  %2071 = vst [vmem:[%s2040_s24 + $0x38] sm:$0xf] %v2070_v26 }
 0x1cb   : > { %2067 = vst [vmem:[%s2040_s24 + $0x28] sm:$0xf] %v2066_v40 }
 0x1cc PF: > { %s13_s16 = sadd.s32 1, %s2775_s16   ;;  %s3363_s12 = smov %s2763_s13 }
 0x1cd   : > { %p10_p12 = scmp.ge.s32.totalorder %s13_s16, 4   ;;  %s3364_s13 = smov %s2837_s22 }
 0x1ce   : > { %s3365_s14 = smov %s2771_s15  ;;  %s3366_s15 = smov %s3368_s17 }
 0x1cf   :  { %12 = sbr.rel (!%p10_p12) target bundleno = 3 (0x3), region = 155 }

// kernel: forward.16
= control target key start
LH: loop header
LB: loop body
LE: loop exit
PB: predicated region body
PF: predicated region fallthrough
CT: control target
= control target key end

     0   :  { %s676_s9 = smov 0   ;;  %s678_s10 = smov 0   ;;  %s759_s0 = inlined_call_operand.vmem [shape: bf16[2,5,5,256], index: 0, kind: input, shape index: {}, may-alias: {0,1}]   ;;  %s760_s1 = inlined_call_operand.vmem [shape: bf16[2,5,5,256], index: 1, kind: input, shape index: {}, may-alias: {0,1}]   ;;  %s761_s2 = inlined_call_operand.vmem [shape: bf16[2,2,2,256], index: 2, kind: output, shape index: {}]  }
   0x1   :  { %s680_s11 = smov 0   ;;  %s682_s12 = smov 0  }
   0x2   :  { %s684_s13 = smov 0  }
   0x3 LB: > { %s21_s14 = sadd.s32 1, %s649_s11  ;;  %s24_s15 = sadd.s32 1, %s653_s12  ;;  %s657_s13 = sphi %s684_s13, %s12_s13   ;;  %s653_s12 = sphi %s682_s12, %s765_s12   ;;  %s649_s11 = sphi %s680_s11, %s764_s11   ;;  %s645_s10 = sphi %s678_s10, %s763_s10   ;;  %s641_s9 = sphi %s676_s9, %s762_s9  }
   0x4   : > { %p22_p0 = scmp.ge.s32.totalorder %s21_s14, 2  ;;  %p564_p1 = scmp.ge.s32.totalorder %s657_s13, 1 }
   0x5   : > { %p160_p2 = scmp.lt.s32.totalorder %s657_s13, 5 }
   0x6   : > { %s767_s14 = smov (%p22_p0, %s21_s14), 0  ;;  %s769_s15 = smov (!%p22_p0, %s24_s15), %s653_s12 }
   0x7   : > { %p161_p3 = pnand %p564_p1, %p160_p2  ;;  %p26_p4 = scmp.ge.s32.totalorder %s769_s15, 2 }
   0x8   : > { %s565_s16 = sshll.u32 (!%p161_p3), %s641_s9, 1  ;;  %p202_p5 = scmp.lt.s32.totalorder (!%p161_p3), %s645_s10, 1  ;;  %v659_v0 = vmov (!%p161_p3), 1966171168   ;;  %v241_v2 = vlaneseq (!%p161_p3)  ;;  %vm304_vm0 = vcmask (!%p161_p3), 1040384   ;;  %vm425_vm1 = vcmask (!%p161_p3), 1041409  }
   0x9   : > { %s771_s15 = smov (%p26_p4, %s769_s15), 0  ;;  %164 = sbr.rel (%p161_p3) target bundleno = 77 (0x4d), region = 28 }
   0xa   : > { %p204_p6 = scmp.lt.s32.totalorder (!%p161_p3), %s565_s16, 4  ;;  %s213_s17 = sadd.s32 (!%p161_p3), 1, %s565_s16  ;;  %v239_v1 = vunpack.c.l.s4 (!%p161_p3), %v659_v0  ;;  %v715_v4 = vshrl.u32 (!%p161_p3), %v241_v2, 7  ;;  %v660_v60 = vmov (!%p161_p3), 1935823168  }
   0xb   : > { %p216_p7 = scmp.lt.s32.totalorder (!%p161_p3), %s213_s17, 4  ;;  %v393_v61 = vunpack.c.l.s4 (!%p161_p3), %v660_v60  ;;  %p227_p8 = scmp.lt.s32.totalorder (!%p161_p3), %s641_s9, 1 }
   0xc   : > { %v240_v3 = vunpack.c.0.s8 (!%p161_p3), %v239_v1 }
   0xe   : > { %v721_v6 = vsub.s32 (!%p161_p3), %v240_v3, %v715_v4 }
  0x10   : > { %s773_s10 = smov (!%p202_p5, %s645_s10), 1  ;;  %s775_s16 = smov (!%p204_p6, %s565_s16), 4 }
  0x11   : > { %s576_s18 = smul.u32 10, %s773_s10  ;;  %s566_s19 = sshll.u32 %s775_s16, 1 }
  0x12   : > { %s777_s17 = smov (!%p216_p7, %s213_s17), 4  ;;  %s779_s9 = smov (!%p227_p8, %s641_s9), 1 }
  0x13   : > { %s208_s20 = sadd.s32 %s576_s18, %s566_s19  ;;  %s569_s25 = sshll.u32 %s777_s17, 1 }
  0x14   : > { %s567_s21 = sshll.u32 %s208_s20, 2  ;;  %s220_s26 = sadd.s32 %s576_s18, %s569_s25 }
  0x15   : > { %s210_s24 = scalar_lea.vmem %s759_s0, %s567_s21  ;;  %s570_s27 = sshll.u32 %s220_s26, 2 }
  0x16   : > { %v234_v5 = vld [vmem:[%s210_s24] sm:$0x77]  ;;  %s222_s30 = scalar_lea.vmem %s760_s1, %s570_s27  ;;  %s571_s3 = sshll.u32 %s779_s9, 1 }
  0x17   : > { %v235_v7 = vld [vmem:[%s222_s30] sm:$0x77]  ;;  %s572_s4 = sshll.u32 %s773_s10, 2 }
  0x18   : > { %v236_v8 = vmax.bf16 %v235_v7, %v234_v5  ;;  %v394_v5 = vunpack.c.0.s8 %v393_v61  ;;  %s231_s5 = sadd.s32 %s572_s4, %s571_s3 }
  0x19   : > { %s232_s8 = scalar_lea.vmem %s761_s2, %s231_s5 }
  0x1a   : > { %v244_v9 = vrot.slane %v236_v8, %v721_v6 }
  0x1c   : > { %v245_v10 = vcombine.high %v244_v9, %v244_v9  ;;  %v252_v11 = vrot.slane %v244_v9, %v721_v6 }
  0x1e   : > { %v259_v12 = vrot.slane %v245_v10, %v721_v6  ;;  %v266_v13 = vrot.slane %v252_v11, %v721_v6  ;;  %v397_v11 = vsub.s32 %v394_v5, %v715_v4 }
  0x20   : > { %v267_v14 = vcombine.high %v266_v13, %v266_v13  ;;  %v274_v15 = vrot.slane %v266_v13, %v721_v6  ;;  %v288_v16 = vrot.slane %v259_v12, %v721_v6 }
  0x22   : > { %v281_v17 = vrot.slane %v267_v14, %v721_v6  ;;  %v289_v18 = vcombine.high %v288_v16, %v288_v16  ;;  %v296_v19 = vrot.slane %v288_v16, %v721_v6  ;;  %v307_v20 = vsel %vm304_vm0, %v274_v15, 4286644096 }
  0x23   : > { %v309_v21 = vunpack.i.l.bf16 %v307_v20  ;;  %v310_v22 = vunpack.i.h.bf16 %v307_v20 }
  0x24   : > { %v303_v23 = vrot.slane %v289_v18, %v721_v6  ;;  %v320_v24 = vsel %vm304_vm0, %v281_v17, 4286644096  ;;  %v333_v25 = vsel %vm304_vm0, %v296_v19, 4286644096 }
  0x25   : > { %v311_v26 = vmax.f32 %v309_v21, %v310_v22  ;;  %v322_v27 = vunpack.i.l.bf16 %v320_v24  ;;  %v323_v28 = vunpack.i.h.bf16 %v320_v24  ;;  %v335_v29 = vunpack.i.l.bf16 %v333_v25 }
  0x26   : > { %v336_v30 = vunpack.i.h.bf16 %v333_v25  ;;  %v346_v31 = vsel %vm304_vm0, %v303_v23, 4286644096 }
  0x27   : > { %v312_v32 = vrot.slane %v311_v26, 4  ;;  %v324_v33 = vmax.f32 %v322_v27, %v323_v28  ;;  %v348_v34 = vunpack.i.l.bf16 %v346_v31  ;;  %v349_v35 = vunpack.i.h.bf16 %v346_v31 }
  0x28   : > { %v337_v36 = vmax.f32 %v335_v29, %v336_v30 }
  0x29   : > { %v313_v37 = vmax.f32 %v311_v26, %v312_v32  ;;  %v325_v38 = vrot.slane %v324_v33, 4  ;;  %v350_v39 = vmax.f32 %v348_v34, %v349_v35 }
  0x2a   : > { %v338_v40 = vrot.slane %v337_v36, 4 }
  0x2b   : > { %v314_v41 = vrot.slane %v313_v37, 2  ;;  %v326_v42 = vmax.f32 %v324_v33, %v325_v38  ;;  %v351_v43 = vrot.slane %v350_v39, 4 }
  0x2c   : > { %v339_v44 = vmax.f32 %v337_v36, %v338_v40 }
  0x2d   : > { %v315_v45 = vmax.f32 %v313_v37, %v314_v41  ;;  %v327_v46 = vrot.slane %v326_v42, 2  ;;  %v352_v47 = vmax.f32 %v350_v39, %v351_v43 }
  0x2e   : > { %v340_v48 = vrot.slane %v339_v44, 2 }
  0x2f   : > { %v316_v49 = vrot.slane %v315_v45, 1  ;;  %v328_v50 = vmax.f32 %v326_v42, %v327_v46  ;;  %v353_v51 = vrot.slane %v352_v47, 2 }
  0x30   : > { %v341_v52 = vmax.f32 %v339_v44, %v340_v48 }
  0x31   : > { %v317_v53 = vmax.f32 %v315_v45, %v316_v49  ;;  %v329_v54 = vrot.slane %v328_v50, 1  ;;  %v354_v55 = vmax.f32 %v352_v47, %v353_v51 }
  0x32   : > { %v342_v56 = vrot.slane %v341_v52, 1 }
  0x33   : > { %v318_v57 = vpack.i.bf16 %v317_v53, %v317_v53  ;;  %v330_v58 = vmax.f32 %v328_v50, %v329_v54  ;;  %v355_v59 = vrot.slane %v354_v55, 1 }
  0x34   : > { %v343_v62 = vmax.f32 %v341_v52, %v342_v56 }
  0x35   : > { %v331_v63 = vpack.i.bf16 %v330_v58, %v330_v58  ;;  %v356_v0 = vmax.f32 %v354_v55, %v355_v59 }
  0x36   : > { %v344_v1 = vpack.i.bf16 %v343_v62, %v343_v62 }
  0x37   : > { %v357_v2 = vpack.i.bf16 %v356_v0, %v356_v0  ;;  %v362_v3 = vcombine.low %v318_v57, %v331_v63 }
  0x39   : > { %v369_v7 = vrot.slane %v362_v3, %v721_v6  ;;  %v377_v8 = vcombine.low %v344_v1, %v357_v2 }
  0x3b   : > { %v376_v9 = vrot.slane %v369_v7, %v721_v6  ;;  %v384_v10 = vrot.slane %v377_v8, %v721_v6 }
  0x3d   : > { %v391_v12 = vrot.slane %v384_v10, %v721_v6  ;;  %v398_v13 = vrot.slane %v376_v9, %v397_v11 }
  0x3f   : > { %v405_v14 = vrot.slane %v398_v13, %v397_v11  ;;  %v412_v15 = vrot.slane %v391_v12, %v397_v11 }
  0x41   : > { %v419_v16 = vrot.slane %v412_v15, %v397_v11  ;;  %v420_v17 = vunpack.c.l.b16 %v405_v14  ;;  %v421_v18 = vunpack.c.h.b16 %v405_v14 }
  0x43   : > { %v422_v19 = vunpack.c.l.b16 %v419_v16  ;;  %v423_v20 = vunpack.c.h.b16 %v419_v16 }
  0x45   : > { %v424_v21 = vrot.slane %v422_v19, 7  ;;  %v427_v22 = vrot.slane %v423_v20, 7 }
  0x47   : > { %v426_v23 = vsel %vm425_vm1, %v424_v21, %v420_v17  ;;  %v428_v24 = vsel %vm425_vm1, %v427_v22, %v421_v18 }
  0x48   : > { %v429_v4 = vpack.c.b16 %v428_v24, %v426_v23 }
  0x4a   : > { %v436_v25 = vrot.slane %v429_v4, %v721_v6 }
  0x4c   : > { %573 = vst.sshfl [vmem:[%s232_s8] sm:$0x5 pattern:$0x73625140] %v436_v25 }
  0x4d PF: > { %s12_s13 = sadd.s32 1, %s657_s13   ;;  %s762_s9 = smov %s649_s11 }
  0x4e   : > { %p9_p9 = scmp.ge.s32.totalorder %s12_s13, 6   ;;  %s763_s10 = smov %s653_s12 }
  0x4f   : > { %s764_s11 = smov %s767_s14  ;;  %s765_s12 = smov %s771_s15 }
  0x50   :  { %11 = sbr.rel (!%p9_p9) target bundleno = 3 (0x3), region = 61 }

// kernel: forward.17
= control target key start
LH: loop header
LB: loop body
LE: loop exit
PB: predicated region body
PF: predicated region fallthrough
CT: control target
= control target key end

     0   :  { %s4769_s1 = inlined_call_operand.vmem [shape: bf16[1024,512], index: 1, kind: input, shape index: {}]   ;;  %s4770_s0 = inlined_call_operand.vmem [shape: bf16[16,1024], index: 0, kind: input, shape index: {}]   ;;  %s4771_s3 = inlined_call_operand.vmem [shape: bf16[512,256], index: 3, kind: input, shape index: {}]   ;;  %s4772_s2 = inlined_call_operand.vmem [shape: f32[1,512], index: 2, kind: input, shape index: {}]   ;;  %s4773_s5 = inlined_call_operand.vmem [shape: bf16[256,128], index: 5, kind: input, shape index: {}]   ;;  %s4774_s4 = inlined_call_operand.vmem [shape: f32[1,256], index: 4, kind: input, shape index: {}]   ;;  %s4775_s6 = inlined_call_operand.vmem [shape: f32[1,128], index: 6, kind: input, shape index: {}]   ;;  %s4776_s7 = inlined_call_operand.vmem [shape: f32[16,128], index: 7, kind: output, shape index: {}]  }
   0x1   :  { %v3102_v0 = vld [vmem:[%s4769_s1 + $0x4] ss:$16 sps:$4 sm:$0xff]   ;;  %v3106_v2 = vld [vmem:[%s4769_s1] ss:$16 sps:$4 sm:$0xff]   ;;  %v28_v50 = vld [vmem:[%s4770_s0 + $0x8] sm:$0xff] }
   0x2   :  { %v3104_v1 = vld [vmem:[%s4769_s1 + $0x204] ss:$16 sps:$4 sm:$0xff]   ;;  %1633 = vmatprep.subr.bf16.mxu1 %v3102_v0  ;;  %v3107_v3 = vld [vmem:[%s4769_s1 + $0x200] ss:$16 sps:$4 sm:$0xff]   ;;  %v32_v51 = vld [vmem:[%s4770_s0 + $0x28] sm:$0xff] }
   0x3   :  { %1676 = vmatprep.subr.bf16.mxu0 %v3104_v1  ;;  %v3108_v4 = vld [vmem:[%s4769_s1 + $0x24] ss:$16 sps:$4 sm:$0xff]   ;;  %1634 = vmatpush1.bf16.msra.mxu1 %v3106_v2  ;;  %v3112_v6 = vld [vmem:[%s4769_s1 + $0x20] ss:$16 sps:$4 sm:$0xff]   ;;  %v3808_v55 = vcombine.high %v28_v50, %v32_v51 }
   0x4   :  { %1677 = vmatpush1.bf16.msra.mxu0 %v3107_v3  ;;  %v3110_v5 = vld [vmem:[%s4769_s1 + $0x224] ss:$16 sps:$4 sm:$0xff]   ;;  %1635 = vmatprep.subr.bf16.mxu1 %v3108_v4  ;;  %v3113_v7 = vld [vmem:[%s4769_s1 + $0x220] ss:$16 sps:$4 sm:$0xff]  }
   0x5   :  { %1678 = vmatprep.subr.bf16.mxu0 %v3110_v5  ;;  %v3114_v8 = vld [vmem:[%s4769_s1 + $0x44] ss:$16 sps:$4 sm:$0xff]   ;;  %v3118_v10 = vld [vmem:[%s4769_s1 + $0x40] ss:$16 sps:$4 sm:$0xff]   ;;  %1708 = vmatprep.mubr.bf16.mxu0 %v3808_v55 }
   0x6   :  { %v3116_v9 = vld [vmem:[%s4769_s1 + $0x244] ss:$16 sps:$4 sm:$0xff]   ;;  %v3119_v11 = vld [vmem:[%s4769_s1 + $0x240] ss:$16 sps:$4 sm:$0xff]  }
   0x7   :  { %1636 = vmatpush1.bf16.msra.mxu1 %v3112_v6  ;;  %v3120_v12 = vld [vmem:[%s4769_s1 + $0x64] ss:$16 sps:$4 sm:$0xff]   ;;  %v3124_v14 = vld [vmem:[%s4769_s1 + $0x60] ss:$16 sps:$4 sm:$0xff]  }
   0x8   :  { %1679 = vmatpush1.bf16.msra.mxu0 %v3113_v7  ;;  %1637 = vmatprep.subr.bf16.mxu1 %v3114_v8  ;;  %v3122_v13 = vld [vmem:[%s4769_s1 + $0x264] ss:$16 sps:$4 sm:$0xff]   ;;  %v3125_v15 = vld [vmem:[%s4769_s1 + $0x260] ss:$16 sps:$4 sm:$0xff]   ;;  %v3203_v7 = vld [vmem:[%s4769_s1 + $0xc] ss:$16 sps:$4 sm:$0xff]  }
   0x9   :  { %1680 = vmatprep.subr.bf16.mxu0 %v3116_v9  ;;  %v3126_v16 = vld [vmem:[%s4769_s1 + $0x84] ss:$16 sps:$4 sm:$0xff]   ;;  %v3130_v18 = vld [vmem:[%s4769_s1 + $0x80] ss:$16 sps:$4 sm:$0xff]   ;;  %v3861_v9 = vcombine.low %v28_v50, %v32_v51  ;;  %v3255_v50 = vld [vmem:[%s4769_s1 + $0x128] ss:$16 sps:$4 sm:$0xff]  }
   0xa   :  { %v3128_v17 = vld [vmem:[%s4769_s1 + $0x284] ss:$16 sps:$4 sm:$0xff]   ;;  %v3131_v19 = vld [vmem:[%s4769_s1 + $0x280] ss:$16 sps:$4 sm:$0xff]  }
   0xb   :  { %1638 = vmatpush1.bf16.msra.mxu1 %v3118_v10  ;;  %v3132_v20 = vld [vmem:[%s4769_s1 + $0xa4] ss:$16 sps:$4 sm:$0xff]   ;;  %v3136_v22 = vld [vmem:[%s4769_s1 + $0xa0] ss:$16 sps:$4 sm:$0xff]  }
   0xc   :  { %1681 = vmatpush1.bf16.msra.mxu0 %v3119_v11  ;;  %1639 = vmatprep.subr.bf16.mxu1 %v3120_v12  ;;  %v3134_v21 = vld [vmem:[%s4769_s1 + $0x2a4] ss:$16 sps:$4 sm:$0xff]   ;;  %v3137_v23 = vld [vmem:[%s4769_s1 + $0x2a0] ss:$16 sps:$4 sm:$0xff]   ;;  %v3201_v11 = vld [vmem:[%s4769_s1 + $0x8] ss:$16 sps:$4 sm:$0xff]  }
   0xd   :  { %1682 = vmatprep.subr.bf16.mxu0 %v3122_v13  ;;  %v3138_v24 = vld [vmem:[%s4769_s1 + $0xc4] ss:$16 sps:$4 sm:$0xff]   ;;  %v3142_v26 = vld [vmem:[%s4769_s1 + $0xc0] ss:$16 sps:$4 sm:$0xff]   ;;  %v3209_v13 = vld [vmem:[%s4769_s1 + $0x2c] ss:$16 sps:$4 sm:$0xff]  }
   0xe   :  { %v3140_v25 = vld [vmem:[%s4769_s1 + $0x2c4] ss:$16 sps:$4 sm:$0xff]   ;;  %v3143_v27 = vld [vmem:[%s4769_s1 + $0x2c0] ss:$16 sps:$4 sm:$0xff]  }
   0xf   :  { %1640 = vmatpush1.bf16.msra.mxu1 %v3124_v14  ;;  %v3144_v28 = vld [vmem:[%s4769_s1 + $0xe4] ss:$16 sps:$4 sm:$0xff]   ;;  %v3148_v30 = vld [vmem:[%s4769_s1 + $0xe0] ss:$16 sps:$4 sm:$0xff]  }
  0x10   :  { %1683 = vmatpush1.bf16.msra.mxu0 %v3125_v15  ;;  %1641 = vmatprep.subr.bf16.mxu1 %v3126_v16  ;;  %v3146_v29 = vld [vmem:[%s4769_s1 + $0x2e4] ss:$16 sps:$4 sm:$0xff]   ;;  %v3149_v31 = vld [vmem:[%s4769_s1 + $0x2e0] ss:$16 sps:$4 sm:$0xff]   ;;  %v3207_v15 = vld [vmem:[%s4769_s1 + $0x28] ss:$16 sps:$4 sm:$0xff]  }
  0x11   :  { %1684 = vmatprep.subr.bf16.mxu0 %v3128_v17  ;;  %v3150_v32 = vld [vmem:[%s4769_s1 + $0x104] ss:$16 sps:$4 sm:$0xff]   ;;  %v3154_v34 = vld [vmem:[%s4769_s1 + $0x100] ss:$16 sps:$4 sm:$0xff]   ;;  %v3215_v17 = vld [vmem:[%s4769_s1 + $0x4c] ss:$16 sps:$4 sm:$0xff]  }
  0x12   :  { %v3152_v33 = vld [vmem:[%s4769_s1 + $0x304] ss:$16 sps:$4 sm:$0xff]   ;;  %v3155_v35 = vld [vmem:[%s4769_s1 + $0x300] ss:$16 sps:$4 sm:$0xff]  }
  0x13   :  { %1642 = vmatpush1.bf16.msra.mxu1 %v3130_v18  ;;  %v3156_v36 = vld [vmem:[%s4769_s1 + $0x124] ss:$16 sps:$4 sm:$0xff]   ;;  %v3160_v38 = vld [vmem:[%s4769_s1 + $0x120] ss:$16 sps:$4 sm:$0xff]  }
  0x14   :  { %1685 = vmatpush1.bf16.msra.mxu0 %v3131_v19  ;;  %1643 = vmatprep.subr.bf16.mxu1 %v3132_v20  ;;  %v3158_v37 = vld [vmem:[%s4769_s1 + $0x324] ss:$16 sps:$4 sm:$0xff]   ;;  %v3161_v39 = vld [vmem:[%s4769_s1 + $0x320] ss:$16 sps:$4 sm:$0xff]   ;;  %v3213_v19 = vld [vmem:[%s4769_s1 + $0x48] ss:$16 sps:$4 sm:$0xff]  }
  0x15   :  { %1686 = vmatprep.subr.bf16.mxu0 %v3134_v21  ;;  %v3162_v40 = vld [vmem:[%s4769_s1 + $0x144] ss:$16 sps:$4 sm:$0xff]   ;;  %v3166_v42 = vld [vmem:[%s4769_s1 + $0x140] ss:$16 sps:$4 sm:$0xff]   ;;  %v3221_v21 = vld [vmem:[%s4769_s1 + $0x6c] ss:$16 sps:$4 sm:$0xff]  }
  0x16   :  { %v3164_v41 = vld [vmem:[%s4769_s1 + $0x344] ss:$16 sps:$4 sm:$0xff]   ;;  %v3167_v43 = vld [vmem:[%s4769_s1 + $0x340] ss:$16 sps:$4 sm:$0xff]  }
  0x17   :  { %1644 = vmatpush1.bf16.msra.mxu1 %v3136_v22  ;;  %v3168_v44 = vld [vmem:[%s4769_s1 + $0x164] ss:$16 sps:$4 sm:$0xff]   ;;  %v3172_v46 = vld [vmem:[%s4769_s1 + $0x160] ss:$16 sps:$4 sm:$0xff]  }
  0x18   :  { %1687 = vmatpush1.bf16.msra.mxu0 %v3137_v23  ;;  %1645 = vmatprep.subr.bf16.mxu1 %v3138_v24  ;;  %v3170_v45 = vld [vmem:[%s4769_s1 + $0x364] ss:$16 sps:$4 sm:$0xff]   ;;  %v3173_v47 = vld [vmem:[%s4769_s1 + $0x360] ss:$16 sps:$4 sm:$0xff]   ;;  %v3219_v23 = vld [vmem:[%s4769_s1 + $0x68] ss:$16 sps:$4 sm:$0xff]  }
  0x19   :  { %1688 = vmatprep.subr.bf16.mxu0 %v3140_v25  ;;  %v27_v48 = vld [vmem:[%s4770_s0] sm:$0xff]  ;;  %v3227_v25 = vld [vmem:[%s4769_s1 + $0x8c] ss:$16 sps:$4 sm:$0xff]  }
  0x1a   :  { %v31_v49 = vld [vmem:[%s4770_s0 + $0x20] sm:$0xff] }
  0x1b   :  { %1646 = vmatpush1.bf16.msra.mxu1 %v3142_v26  ;;  %v3174_v52 = vld [vmem:[%s4769_s1 + $0x184] ss:$16 sps:$4 sm:$0xff]   ;;  %v2696_v53 = vcombine.high %v27_v48, %v31_v49  ;;  %v3178_v56 = vld [vmem:[%s4769_s1 + $0x180] ss:$16 sps:$4 sm:$0xff]   ;;  %v3859_v8 = vcombine.low %v27_v48, %v31_v49  ;;  %v3257_v48 = vld [vmem:[%s4769_s1 + $0x12c] ss:$16 sps:$4 sm:$0xff]  }
  0x1c   :  { %1689 = vmatpush1.bf16.msra.mxu0 %v3143_v27  ;;  %1647 = vmatprep.subr.bf16.mxu1 %v3144_v28  ;;  %v3176_v54 = vld [vmem:[%s4769_s1 + $0x384] ss:$16 sps:$4 sm:$0xff]   ;;  %v3179_v57 = vld [vmem:[%s4769_s1 + $0x380] ss:$16 sps:$4 sm:$0xff]   ;;  %v3225_v27 = vld [vmem:[%s4769_s1 + $0x88] ss:$16 sps:$4 sm:$0xff]  }
  0x1d   :  { %1690 = vmatprep.subr.bf16.mxu0 %v3146_v29  ;;  %1665 = vmatprep.mubr.bf16.mxu1 %v2696_v53  ;;  %v3180_v58 = vld [vmem:[%s4769_s1 + $0x1a4] ss:$16 sps:$4 sm:$0xff]   ;;  %v3184_v60 = vld [vmem:[%s4769_s1 + $0x1a0] ss:$16 sps:$4 sm:$0xff]   ;;  %v3233_v29 = vld [vmem:[%s4769_s1 + $0xac] ss:$16 sps:$4 sm:$0xff]  }
  0x1e   :  { %v3182_v59 = vld [vmem:[%s4769_s1 + $0x3a4] ss:$16 sps:$4 sm:$0xff]   ;;  %v3185_v61 = vld [vmem:[%s4769_s1 + $0x3a0] ss:$16 sps:$4 sm:$0xff]  }
  0x1f   :  { %1648 = vmatpush1.bf16.msra.mxu1 %v3148_v30  ;;  %v3186_v62 = vld [vmem:[%s4769_s1 + $0x1c4] ss:$16 sps:$4 sm:$0xff]   ;;  %v3190_v0 = vld [vmem:[%s4769_s1 + $0x1c0] ss:$16 sps:$4 sm:$0xff]  }
  0x20   :  { %1691 = vmatpush1.bf16.msra.mxu0 %v3149_v31  ;;  %1649 = vmatprep.subr.bf16.mxu1 %v3150_v32  ;;  %v3188_v63 = vld [vmem:[%s4769_s1 + $0x3c4] ss:$16 sps:$4 sm:$0xff]   ;;  %v3191_v1 = vld [vmem:[%s4769_s1 + $0x3c0] ss:$16 sps:$4 sm:$0xff]   ;;  %v3231_v31 = vld [vmem:[%s4769_s1 + $0xa8] ss:$16 sps:$4 sm:$0xff]  }
  0x21   :  { %1692 = vmatprep.subr.bf16.mxu0 %v3152_v33  ;;  %v3192_v2 = vld [vmem:[%s4769_s1 + $0x1e4] ss:$16 sps:$4 sm:$0xff]   ;;  %v3196_v4 = vld [vmem:[%s4769_s1 + $0x1e0] ss:$16 sps:$4 sm:$0xff]   ;;  %v3239_v33 = vld [vmem:[%s4769_s1 + $0xcc] ss:$16 sps:$4 sm:$0xff]  }
  0x22   :  { %v3194_v3 = vld [vmem:[%s4769_s1 + $0x3e4] ss:$16 sps:$4 sm:$0xff]   ;;  %v3197_v5 = vld [vmem:[%s4769_s1 + $0x3e0] ss:$16 sps:$4 sm:$0xff]  }
  0x23   :  { %1650 = vmatpush1.bf16.msra.mxu1 %v3154_v34  ;;  %v3200_v6 = vld [vmem:[%s4769_s1 + $0x404] ss:$16 sps:$4 sm:$0xff]   ;;  %v3198_v10 = vld [vmem:[%s4769_s1 + $0x400] ss:$16 sps:$4 sm:$0xff]  }
  0x24   :  { %1693 = vmatpush1.bf16.msra.mxu0 %v3155_v35  ;;  %1651 = vmatprep.subr.bf16.mxu1 %v3156_v36  ;;  %v3206_v12 = vld [vmem:[%s4769_s1 + $0x424] ss:$16 sps:$4 sm:$0xff]   ;;  %v3204_v14 = vld [vmem:[%s4769_s1 + $0x420] ss:$16 sps:$4 sm:$0xff]  }
  0x25   :  { %1694 = vmatprep.subr.bf16.mxu0 %v3158_v37  ;;  %v3212_v16 = vld [vmem:[%s4769_s1 + $0x444] ss:$16 sps:$4 sm:$0xff]   ;;  %v3210_v18 = vld [vmem:[%s4769_s1 + $0x440] ss:$16 sps:$4 sm:$0xff]   ;;  %v3237_v37 = vld [vmem:[%s4769_s1 + $0xc8] ss:$16 sps:$4 sm:$0xff]  }
  0x26   :  { %v3218_v20 = vld [vmem:[%s4769_s1 + $0x464] ss:$16 sps:$4 sm:$0xff]   ;;  %v3216_v22 = vld [vmem:[%s4769_s1 + $0x460] ss:$16 sps:$4 sm:$0xff]  }
  0x27   :  { %1652 = vmatpush1.bf16.msra.mxu1 %v3160_v38  ;;  %v3224_v24 = vld [vmem:[%s4769_s1 + $0x484] ss:$16 sps:$4 sm:$0xff]   ;;  %v3222_v26 = vld [vmem:[%s4769_s1 + $0x480] ss:$16 sps:$4 sm:$0xff]  }
  0x28   :  { %1695 = vmatpush1.bf16.msra.mxu0 %v3161_v39  ;;  %1653 = vmatprep.subr.bf16.mxu1 %v3162_v40  ;;  %v3230_v28 = vld [vmem:[%s4769_s1 + $0x4a4] ss:$16 sps:$4 sm:$0xff]   ;;  %v3228_v30 = vld [vmem:[%s4769_s1 + $0x4a0] ss:$16 sps:$4 sm:$0xff]   ;;  %v3245_v40 = vld [vmem:[%s4769_s1 + $0xec] ss:$16 sps:$4 sm:$0xff]  }
  0x29   :  { %1696 = vmatprep.subr.bf16.mxu0 %v3164_v41  ;;  %v3236_v32 = vld [vmem:[%s4769_s1 + $0x4c4] ss:$16 sps:$4 sm:$0xff]   ;;  %v3234_v36 = vld [vmem:[%s4769_s1 + $0x4c0] ss:$16 sps:$4 sm:$0xff]  }
  0x2a   :  { %v3940_v34 = vld [vmem:[%s4770_s0 + $0x10] sm:$0xff] }
  0x2b   :  { %1654 = vmatpush1.bf16.msra.mxu1 %v3166_v42  ;;  %v3945_v35 = vld [vmem:[%s4770_s0 + $0x30] sm:$0xff]  ;;  %v3243_v42 = vld [vmem:[%s4769_s1 + $0xe8] ss:$16 sps:$4 sm:$0xff]  }
  0x2c   :  { %1697 = vmatpush1.bf16.msra.mxu0 %v3167_v43  ;;  %1655 = vmatprep.subr.bf16.mxu1 %v3168_v44  ;;  %v3955_v38 = vcombine.high %v3940_v34, %v3945_v35  ;;  %v3242_v39 = vld [vmem:[%s4769_s1 + $0x4e4] ss:$16 sps:$4 sm:$0xff]   ;;  %v3240_v41 = vld [vmem:[%s4769_s1 + $0x4e0] ss:$16 sps:$4 sm:$0xff]   ;;  %v3251_v44 = vld [vmem:[%s4769_s1 + $0x10c] ss:$16 sps:$4 sm:$0xff]  }
  0x2d   :  { %1698 = vmatprep.subr.bf16.mxu0 %v3170_v45  ;;  %v3248_v43 = vld [vmem:[%s4769_s1 + $0x504] ss:$16 sps:$4 sm:$0xff]   ;;  %v3246_v45 = vld [vmem:[%s4769_s1 + $0x500] ss:$16 sps:$4 sm:$0xff]  }
  0x2e   :  { %v3252_v49 = vld [vmem:[%s4769_s1 + $0x520] ss:$16 sps:$4 sm:$0xff]   ;;  %v3260_v51 = vld [vmem:[%s4769_s1 + $0x544] ss:$16 sps:$4 sm:$0xff]  }
  0x2f   :  { %1656 = vmatpush1.bf16.msra.mxu1 %v3172_v46  ;;  %v3249_v46 = vld [vmem:[%s4769_s1 + $0x108] ss:$16 sps:$4 sm:$0xff]  }
  0x30   :  { %1699 = vmatpush1.bf16.msra.mxu0 %v3173_v47  ;;  %1657 = vmatprep.subr.bf16.mxu1 %v3174_v52  ;;  %v3254_v47 = vld [vmem:[%s4769_s1 + $0x524] ss:$16 sps:$4 sm:$0xff]   ;;  %v3263_v52 = vld [vmem:[%s4769_s1 + $0x14c] ss:$16 sps:$4 sm:$0xff]  }
  0x31   :  { %1700 = vmatprep.subr.bf16.mxu0 %v3176_v54  ;;  %v3261_v54 = vld [vmem:[%s4769_s1 + $0x148] ss:$16 sps:$4 sm:$0xff]  }
  0x33   :  { %1658 = vmatpush1.bf16.msra.mxu1 %v3178_v56  ;;  %v3266_v56 = vld [vmem:[%s4769_s1 + $0x564] ss:$16 sps:$4 sm:$0xff]  }
  0x34   :  { %1701 = vmatpush1.bf16.msra.mxu0 %v3179_v57  ;;  %1659 = vmatprep.subr.bf16.mxu1 %v3180_v58  ;;  %v3269_v57 = vld [vmem:[%s4769_s1 + $0x16c] ss:$16 sps:$4 sm:$0xff]   ;;  %v3264_v58 = vld [vmem:[%s4769_s1 + $0x560] ss:$16 sps:$4 sm:$0xff]  }
  0x35   :  { %1702 = vmatprep.subr.bf16.mxu0 %v3182_v59  ;;  %v3267_v59 = vld [vmem:[%s4769_s1 + $0x168] ss:$16 sps:$4 sm:$0xff]  }
  0x37   :  { %1660 = vmatpush1.bf16.msra.mxu1 %v3184_v60  ;;  %v3272_v60 = vld [vmem:[%s4769_s1 + $0x584] ss:$16 sps:$4 sm:$0xff]  }
  0x38   :  { %1703 = vmatpush1.bf16.msra.mxu0 %v3185_v61  ;;  %1661 = vmatprep.subr.bf16.mxu1 %v3186_v62  ;;  %v3275_v61 = vld [vmem:[%s4769_s1 + $0x18c] ss:$16 sps:$4 sm:$0xff]   ;;  %v3270_v62 = vld [vmem:[%s4769_s1 + $0x580] ss:$16 sps:$4 sm:$0xff]  }
  0x39   :  { %1704 = vmatprep.subr.bf16.mxu0 %v3188_v63  ;;  %v3273_v63 = vld [vmem:[%s4769_s1 + $0x188] ss:$16 sps:$4 sm:$0xff]  }
  0x3b   :  { %1662 = vmatpush1.bf16.msra.mxu1 %v3190_v0  ;;  %v3278_v0 = vld [vmem:[%s4769_s1 + $0x5a4] ss:$16 sps:$4 sm:$0xff]  }
  0x3c   :  { %1705 = vmatpush1.bf16.msra.mxu0 %v3191_v1  ;;  %1663 = vmatprep.subr.bf16.mxu1 %v3192_v2  ;;  %v3281_v1 = vld [vmem:[%s4769_s1 + $0x1ac] ss:$16 sps:$4 sm:$0xff]   ;;  %v3276_v2 = vld [vmem:[%s4769_s1 + $0x5a0] ss:$16 sps:$4 sm:$0xff]  }
  0x3d   :  { %1706 = vmatprep.subr.bf16.mxu0 %v3194_v3  ;;  %v3279_v3 = vld [vmem:[%s4769_s1 + $0x1a8] ss:$16 sps:$4 sm:$0xff]  }
  0x3f   :  { %1664 = vmatpush1.bf16.msra.mxu1 %v3196_v4  ;;  %v3284_v4 = vld [vmem:[%s4769_s1 + $0x5c4] ss:$16 sps:$4 sm:$0xff]  }
  0x40   :  { %1707 = vmatpush1.bf16.msra.mxu0 %v3197_v5  ;;  %1805 = vmatprep.subr.bf16.mxu1 %v3203_v7  ;;  %v3287_v5 = vld [vmem:[%s4769_s1 + $0x1cc] ss:$16 sps:$4 sm:$0xff]   ;;  %v3285_v7 = vld [vmem:[%s4769_s1 + $0x1c8] ss:$16 sps:$4 sm:$0xff]  }
  0x41   :  { %1719 = vmatprep.subr.bf16.mxu0 %v3200_v6  ;;  %v3282_v6 = vld [vmem:[%s4769_s1 + $0x5c0] ss:$16 sps:$4 sm:$0xff]  }
  0x42   :  { %1666 = vmatmul.mubr.bf16.vlgmr.msra.gmra.mrb[0].mxu1 %v3859_v8 }
  0x43   :  { %1709 = vmatmul.mubr.bf16.vlgmr.msra.gmra.mrb[0].mxu0 %v3861_v9  ;;  %1806 = vmatpush1.bf16.msra.mxu1 %v3201_v11  ;;  %v3293_v11 = vld [vmem:[%s4769_s1 + $0x1ec] ss:$16 sps:$4 sm:$0xff]  }
  0x44   :  { %1720 = vmatpush1.bf16.msra.mxu0 %v3198_v10  ;;  %1807 = vmatprep.subr.bf16.mxu1 %v3209_v13  ;;  %v3290_v10 = vld [vmem:[%s4769_s1 + $0x5e4] ss:$16 sps:$4 sm:$0xff]   ;;  %v3291_v13 = vld [vmem:[%s4769_s1 + $0x1e8] ss:$16 sps:$4 sm:$0xff]  }
  0x45   :  { %1721 = vmatprep.subr.bf16.mxu0 %v3206_v12  ;;  %1837 = vmatprep.mubr.bf16.mxu1 %v2696_v53  ;;  %v3258_v53 = vld [vmem:[%s4769_s1 + $0x540] ss:$16 sps:$4 sm:$0xff]  }
  0x46   :  { %1751 = vmatprep.mubr.bf16.mxu0 %v3955_v38  ;;  %v3288_v12 = vld [vmem:[%s4769_s1 + $0x5e0] ss:$16 sps:$4 sm:$0xff]  }
  0x47   :  { %1808 = vmatpush1.bf16.msra.mxu1 %v3207_v15  ;;  %v3299_v15 = vld [vmem:[%s4769_s1 + $0x20c] ss:$16 sps:$4 sm:$0xff]  }
  0x48   :  { %1722 = vmatpush1.bf16.msra.mxu0 %v3204_v14  ;;  %1809 = vmatprep.subr.bf16.mxu1 %v3215_v17  ;;  %v3296_v14 = vld [vmem:[%s4769_s1 + $0x604] ss:$16 sps:$4 sm:$0xff]   ;;  %v3294_v17 = vld [vmem:[%s4769_s1 + $0x600] ss:$16 sps:$4 sm:$0xff]  }
  0x49   :  { %1723 = vmatprep.subr.bf16.mxu0 %v3212_v16  ;;  %v4074_v16 = vcombine.low %v3940_v34, %v3945_v35  ;;  %v3318_v34 = vld [vmem:[%s4769_s1 + $0x680] ss:$16 sps:$4 sm:$0xff]   ;;  %v3321_v35 = vld [vmem:[%s4769_s1 + $0x288] ss:$16 sps:$4 sm:$0xff]  }
  0x4b   :  { %1810 = vmatpush1.bf16.msra.mxu1 %v3213_v19  ;;  %v3302_v19 = vld [vmem:[%s4769_s1 + $0x624] ss:$16 sps:$4 sm:$0xff]  }
  0x4c   :  { %1724 = vmatpush1.bf16.msra.mxu0 %v3210_v18  ;;  %1811 = vmatprep.subr.bf16.mxu1 %v3221_v21  ;;  %v3297_v18 = vld [vmem:[%s4769_s1 + $0x208] ss:$16 sps:$4 sm:$0xff]  }
  0x4d   :  { %1725 = vmatprep.subr.bf16.mxu0 %v3218_v20  ;;  %v3305_v20 = vld [vmem:[%s4769_s1 + $0x22c] ss:$16 sps:$4 sm:$0xff]  }
  0x4e   :  { %v4091_v21 = vld [vmem:[%s4770_s0 + $0x18] sm:$0xff] }
  0x4f   :  { %1812 = vmatpush1.bf16.msra.mxu1 %v3219_v23  ;;  %v3300_v23 = vld [vmem:[%s4769_s1 + $0x620] ss:$16 sps:$4 sm:$0xff]  }
  0x50   :  { %1726 = vmatpush1.bf16.msra.mxu0 %v3216_v22  ;;  %1813 = vmatprep.subr.bf16.mxu1 %v3227_v25  ;;  %v4096_v22 = vld [vmem:[%s4770_s0 + $0x38] sm:$0xff] }
  0x51   :  { %1727 = vmatprep.subr.bf16.mxu0 %v3224_v24  ;;  %v3303_v24 = vld [vmem:[%s4769_s1 + $0x228] ss:$16 sps:$4 sm:$0xff]   ;;  %v4108_v25 = vcombine.high %v4091_v21, %v4096_v22 }
  0x53   :  { %1814 = vmatpush1.bf16.msra.mxu1 %v3225_v27  ;;  %v3306_v27 = vld [vmem:[%s4769_s1 + $0x640] ss:$16 sps:$4 sm:$0xff]  }
  0x54   :  { %1728 = vmatpush1.bf16.msra.mxu0 %v3222_v26  ;;  %1815 = vmatprep.subr.bf16.mxu1 %v3233_v29  ;;  %v3308_v26 = vld [vmem:[%s4769_s1 + $0x644] ss:$16 sps:$4 sm:$0xff]  }
  0x55   :  { %1729 = vmatprep.subr.bf16.mxu0 %v3230_v28  ;;  %v3309_v28 = vld [vmem:[%s4769_s1 + $0x248] ss:$16 sps:$4 sm:$0xff]   ;;  %v3314_v29 = vld [vmem:[%s4769_s1 + $0x664] ss:$16 sps:$4 sm:$0xff]  }
  0x57   :  { %1816 = vmatpush1.bf16.msra.mxu1 %v3231_v31  ;;  %v3315_v31 = vld [vmem:[%s4769_s1 + $0x268] ss:$16 sps:$4 sm:$0xff]  }
  0x58   :  { %1730 = vmatpush1.bf16.msra.mxu0 %v3228_v30  ;;  %1817 = vmatprep.subr.bf16.mxu1 %v3239_v33  ;;  %v3312_v30 = vld [vmem:[%s4769_s1 + $0x660] ss:$16 sps:$4 sm:$0xff]   ;;  %v3323_v33 = vld [vmem:[%s4769_s1 + $0x28c] ss:$16 sps:$4 sm:$0xff]  }
  0x59   :  { %1731 = vmatprep.subr.bf16.mxu0 %v3236_v32  ;;  %v3320_v32 = vld [vmem:[%s4769_s1 + $0x684] ss:$16 sps:$4 sm:$0xff]  }
  0x5b   :  { %1818 = vmatpush1.bf16.msra.mxu1 %v3237_v37  ;;  %v3329_v37 = vld [vmem:[%s4769_s1 + $0x2ac] ss:$16 sps:$4 sm:$0xff]  }
  0x5c   :  { %1732 = vmatpush1.bf16.msra.mxu0 %v3234_v36  ;;  %1819 = vmatprep.subr.bf16.mxu1 %v3245_v40  ;;  %v3326_v36 = vld [vmem:[%s4769_s1 + $0x6a4] ss:$16 sps:$4 sm:$0xff]   ;;  %v3327_v40 = vld [vmem:[%s4769_s1 + $0x2a8] ss:$16 sps:$4 sm:$0xff]  }
  0x5d   :  { %1733 = vmatprep.subr.bf16.mxu0 %v3242_v39  ;;  %v3324_v39 = vld [vmem:[%s4769_s1 + $0x6a0] ss:$16 sps:$4 sm:$0xff]  }
  0x5f   :  { %1820 = vmatpush1.bf16.msra.mxu1 %v3243_v42  ;;  %v3335_v42 = vld [vmem:[%s4769_s1 + $0x2cc] ss:$16 sps:$4 sm:$0xff]  }
  0x60   :  { %1734 = vmatpush1.bf16.msra.mxu0 %v3240_v41  ;;  %1821 = vmatprep.subr.bf16.mxu1 %v3251_v44  ;;  %v3332_v41 = vld [vmem:[%s4769_s1 + $0x6c4] ss:$16 sps:$4 sm:$0xff]   ;;  %v3333_v44 = vld [vmem:[%s4769_s1 + $0x2c8] ss:$16 sps:$4 sm:$0xff]  }
  0x61   :  { %1735 = vmatprep.subr.bf16.mxu0 %v3248_v43  ;;  %v3330_v43 = vld [vmem:[%s4769_s1 + $0x6c0] ss:$16 sps:$4 sm:$0xff]  }
  0x63   :  { %1822 = vmatpush1.bf16.msra.mxu1 %v3249_v46  ;;  %v3341_v46 = vld [vmem:[%s4769_s1 + $0x2ec] ss:$16 sps:$4 sm:$0xff]  }
  0x64   :  { %1736 = vmatpush1.bf16.msra.mxu0 %v3246_v45  ;;  %1823 = vmatprep.subr.bf16.mxu1 %v3257_v48  ;;  %v3338_v45 = vld [vmem:[%s4769_s1 + $0x6e4] ss:$16 sps:$4 sm:$0xff]   ;;  %v3339_v48 = vld [vmem:[%s4769_s1 + $0x2e8] ss:$16 sps:$4 sm:$0xff]  }
  0x65   :  { %1737 = vmatprep.subr.bf16.mxu0 %v3254_v47  ;;  %v3336_v47 = vld [vmem:[%s4769_s1 + $0x6e0] ss:$16 sps:$4 sm:$0xff]  }
  0x67   :  { %1824 = vmatpush1.bf16.msra.mxu1 %v3255_v50  ;;  %v3347_v50 = vld [vmem:[%s4769_s1 + $0x30c] ss:$16 sps:$4 sm:$0xff]  }
  0x68   :  { %1738 = vmatpush1.bf16.msra.mxu0 %v3252_v49  ;;  %1825 = vmatprep.subr.bf16.mxu1 %v3263_v52  ;;  %v3344_v49 = vld [vmem:[%s4769_s1 + $0x704] ss:$16 sps:$4 sm:$0xff]   ;;  %v3345_v52 = vld [vmem:[%s4769_s1 + $0x308] ss:$16 sps:$4 sm:$0xff]  }
  0x69   :  { %1739 = vmatprep.subr.bf16.mxu0 %v3260_v51  ;;  %v3342_v51 = vld [vmem:[%s4769_s1 + $0x700] ss:$16 sps:$4 sm:$0xff]  }
  0x6b   :  { %1826 = vmatpush1.bf16.msra.mxu1 %v3261_v54  ;;  %v3353_v54 = vld [vmem:[%s4769_s1 + $0x32c] ss:$16 sps:$4 sm:$0xff]  }
  0x6c   :  { %1740 = vmatpush1.bf16.msra.mxu0 %v3258_v53  ;;  %1827 = vmatprep.subr.bf16.mxu1 %v3269_v57  ;;  %v3350_v53 = vld [vmem:[%s4769_s1 + $0x724] ss:$16 sps:$4 sm:$0xff]   ;;  %v3351_v57 = vld [vmem:[%s4769_s1 + $0x328] ss:$16 sps:$4 sm:$0xff]  }
  0x6d   :  { %1741 = vmatprep.subr.bf16.mxu0 %v3266_v56  ;;  %v3348_v56 = vld [vmem:[%s4769_s1 + $0x720] ss:$16 sps:$4 sm:$0xff]  }
  0x6f   :  { %1828 = vmatpush1.bf16.msra.mxu1 %v3267_v59  ;;  %v3359_v59 = vld [vmem:[%s4769_s1 + $0x34c] ss:$16 sps:$4 sm:$0xff]  }
  0x70   :  { %1742 = vmatpush1.bf16.msra.mxu0 %v3264_v58  ;;  %1829 = vmatprep.subr.bf16.mxu1 %v3275_v61  ;;  %v3356_v58 = vld [vmem:[%s4769_s1 + $0x744] ss:$16 sps:$4 sm:$0xff]   ;;  %v3357_v61 = vld [vmem:[%s4769_s1 + $0x348] ss:$16 sps:$4 sm:$0xff]  }
  0x71   :  { %1743 = vmatprep.subr.bf16.mxu0 %v3272_v60  ;;  %v3354_v60 = vld [vmem:[%s4769_s1 + $0x740] ss:$16 sps:$4 sm:$0xff]  }
  0x73   :  { %1830 = vmatpush1.bf16.msra.mxu1 %v3273_v63  ;;  %v3365_v63 = vld [vmem:[%s4769_s1 + $0x36c] ss:$16 sps:$4 sm:$0xff]  }
  0x74   :  { %1744 = vmatpush1.bf16.msra.mxu0 %v3270_v62  ;;  %1831 = vmatprep.subr.bf16.mxu1 %v3281_v1  ;;  %v3362_v62 = vld [vmem:[%s4769_s1 + $0x764] ss:$16 sps:$4 sm:$0xff]   ;;  %v3363_v1 = vld [vmem:[%s4769_s1 + $0x368] ss:$16 sps:$4 sm:$0xff]  }
  0x75   :  { %1745 = vmatprep.subr.bf16.mxu0 %v3278_v0  ;;  %v3360_v0 = vld [vmem:[%s4769_s1 + $0x760] ss:$16 sps:$4 sm:$0xff]  }
  0x77   :  { %1832 = vmatpush1.bf16.msra.mxu1 %v3279_v3  ;;  %v3371_v3 = vld [vmem:[%s4769_s1 + $0x38c] ss:$16 sps:$4 sm:$0xff]  }
  0x78   :  { %1746 = vmatpush1.bf16.msra.mxu0 %v3276_v2  ;;  %1833 = vmatprep.subr.bf16.mxu1 %v3287_v5  ;;  %v3368_v2 = vld [vmem:[%s4769_s1 + $0x784] ss:$16 sps:$4 sm:$0xff]   ;;  %v3369_v5 = vld [vmem:[%s4769_s1 + $0x388] ss:$16 sps:$4 sm:$0xff]  }
  0x79   :  { %1747 = vmatprep.subr.bf16.mxu0 %v3284_v4  ;;  %v3366_v4 = vld [vmem:[%s4769_s1 + $0x780] ss:$16 sps:$4 sm:$0xff]  }
  0x7b   :  { %1834 = vmatpush1.bf16.msra.mxu1 %v3285_v7  ;;  %v3377_v7 = vld [vmem:[%s4769_s1 + $0x3ac] ss:$16 sps:$4 sm:$0xff]  }
  0x7c   :  { %1748 = vmatpush1.bf16.msra.mxu0 %v3282_v6  ;;  %1835 = vmatprep.subr.bf16.mxu1 %v3293_v11  ;;  %v3374_v6 = vld [vmem:[%s4769_s1 + $0x7a4] ss:$16 sps:$4 sm:$0xff]   ;;  %v3375_v11 = vld [vmem:[%s4769_s1 + $0x3a8] ss:$16 sps:$4 sm:$0xff]  }
  0x7d   :  { %1749 = vmatprep.subr.bf16.mxu0 %v3290_v10  ;;  %v3372_v10 = vld [vmem:[%s4769_s1 + $0x7a0] ss:$16 sps:$4 sm:$0xff]  }
  0x7f   :  { %1836 = vmatpush1.bf16.msra.mxu1 %v3291_v13  ;;  %v3383_v13 = vld [vmem:[%s4769_s1 + $0x3cc] ss:$16 sps:$4 sm:$0xff]  }
  0x80   :  { %1750 = vmatpush1.bf16.msra.mxu0 %v3288_v12  ;;  %1848 = vmatprep.subr.bf16.mxu1 %v3299_v15  ;;  %v3380_v12 = vld [vmem:[%s4769_s1 + $0x7c4] ss:$16 sps:$4 sm:$0xff]   ;;  %v3381_v15 = vld [vmem:[%s4769_s1 + $0x3c8] ss:$16 sps:$4 sm:$0xff]  }
  0x81   :  { %1762 = vmatprep.subr.bf16.mxu0 %v3296_v14  ;;  %v3378_v14 = vld [vmem:[%s4769_s1 + $0x7c0] ss:$16 sps:$4 sm:$0xff]  }
  0x82   :  { %1838 = vmatmul.mubr.bf16.vlgmr.msra.gmra.mrb[4].mxu1 %v3859_v8  ;;  %v3311_v8 = vld [vmem:[%s4769_s1 + $0x24c] ss:$16 sps:$4 sm:$0xff]  }
  0x83   :  { %1752 = vmatmul.mubr.bf16.vlgmr.msra.gmra.mrb[0].mxu0 %v4074_v16  ;;  %1849 = vmatpush1.bf16.msra.mxu1 %v3297_v18  ;;  %v3389_v18 = vld [vmem:[%s4769_s1 + $0x3ec] ss:$16 sps:$4 sm:$0xff]  }
  0x84   :  { %1763 = vmatpush1.bf16.msra.mxu0 %v3294_v17  ;;  %1850 = vmatprep.subr.bf16.mxu1 %v3305_v20  ;;  %v3386_v17 = vld [vmem:[%s4769_s1 + $0x7e4] ss:$16 sps:$4 sm:$0xff]   ;;  %v3387_v20 = vld [vmem:[%s4769_s1 + $0x3e8] ss:$16 sps:$4 sm:$0xff]  }
  0x85   :  { %1764 = vmatprep.subr.bf16.mxu0 %v3302_v19  ;;  %1794 = vmatprep.mubr.bf16.mxu0 %v4108_v25  ;;  %v3384_v19 = vld [vmem:[%s4769_s1 + $0x7e0] ss:$16 sps:$4 sm:$0xff]  }
  0x86   :  { %1880 = vmatprep.mubr.bf16.mxu1 %v3808_v55  ;;  %v3317_v55 = vld [vmem:[%s4769_s1 + $0x26c] ss:$16 sps:$4 sm:$0xff]  }
  0x87   :  { %1851 = vmatpush1.bf16.msra.mxu1 %v3303_v24  ;;  %v4285_v24 = vcombine.low %v4091_v21, %v4096_v22  ;;  %v3393_v21 = vld [vmem:[%s4769_s1 + $0x428] ss:$16 sps:$4 sm:$0xff]   ;;  %v3398_v22 = vld [vmem:[%s4769_s1 + $0x44c] ss:$16 sps:$4 sm:$0xff]  }
  0x88   :  { %1765 = vmatpush1.bf16.msra.mxu0 %v3300_v23  ;;  %1852 = vmatprep.subr.bf16.mxu1 %v3311_v8  ;;  %v3392_v23 = vld [vmem:[%s4769_s1 + $0x40c] ss:$16 sps:$4 sm:$0xff]  }
  0x89   :  { %1766 = vmatprep.subr.bf16.mxu0 %v3308_v26  ;;  %v3390_v26 = vld [vmem:[%s4769_s1 + $0x408] ss:$16 sps:$4 sm:$0xff]   ;;  %v3395_v8 = vld [vmem:[%s4769_s1 + $0x42c] ss:$16 sps:$4 sm:$0xff]  }
  0x8b   :  { %1853 = vmatpush1.bf16.msra.mxu1 %v3309_v28  ;;  %v3491_v28 = vld [vmem:[%s4771_s3 + $0x14] ss:$8 sps:$4 sm:$0xff]  }
  0x8c   :  { %1767 = vmatpush1.bf16.msra.mxu0 %v3306_v27  ;;  %1854 = vmatprep.subr.bf16.mxu1 %v3317_v55  ;;  %v3486_v27 = vld [vmem:[%s4771_s3] ss:$8 sps:$4 sm:$0xff]   ;;  %v3489_v55 = vld [vmem:[%s4771_s3 + $0x10] ss:$8 sps:$4 sm:$0xff]  }
  0x8d   :  { %1768 = vmatprep.subr.bf16.mxu0 %v3314_v29  ;;  %v3396_v29 = vld [vmem:[%s4769_s1 + $0x448] ss:$16 sps:$4 sm:$0xff]  }
  0x8f   :  { %1855 = vmatpush1.bf16.msra.mxu1 %v3315_v31  ;;  %v3399_v31 = vld [vmem:[%s4769_s1 + $0x468] ss:$16 sps:$4 sm:$0xff]  }
  0x90   :  { %1769 = vmatpush1.bf16.msra.mxu0 %v3312_v30  ;;  %1856 = vmatprep.subr.bf16.mxu1 %v3323_v33  ;;  %v3494_v30 = vld [vmem:[%s4771_s3 + $0x24] ss:$8 sps:$4 sm:$0xff]   ;;  %v3492_v33 = vld [vmem:[%s4771_s3 + $0x20] ss:$8 sps:$4 sm:$0xff]  }
  0x91   :  { %1770 = vmatprep.subr.bf16.mxu0 %v3320_v32  ;;  %v3404_v32 = vld [vmem:[%s4769_s1 + $0x48c] ss:$16 sps:$4 sm:$0xff]  }
  0x93   :  { %1857 = vmatpush1.bf16.msra.mxu1 %v3321_v35  ;;  %v3402_v35 = vld [vmem:[%s4769_s1 + $0x488] ss:$16 sps:$4 sm:$0xff]  }
  0x94   :  { %1771 = vmatpush1.bf16.msra.mxu0 %v3318_v34  ;;  %1858 = vmatprep.subr.bf16.mxu1 %v3329_v37  ;;  %v3497_v34 = vld [vmem:[%s4771_s3 + $0x34] ss:$8 sps:$4 sm:$0xff]   ;;  %v3495_v37 = vld [vmem:[%s4771_s3 + $0x30] ss:$8 sps:$4 sm:$0xff]  }
  0x95   :  { %1772 = vmatprep.subr.bf16.mxu0 %v3326_v36  ;;  %v3407_v36 = vld [vmem:[%s4769_s1 + $0x4ac] ss:$16 sps:$4 sm:$0xff]  }
  0x97   :  { %1859 = vmatpush1.bf16.msra.mxu1 %v3327_v40  ;;  %v3405_v40 = vld [vmem:[%s4769_s1 + $0x4a8] ss:$16 sps:$4 sm:$0xff]  }
  0x98   :  { %1773 = vmatpush1.bf16.msra.mxu0 %v3324_v39  ;;  %1860 = vmatprep.subr.bf16.mxu1 %v3335_v42  ;;  %v3500_v39 = vld [vmem:[%s4771_s3 + $0x44] ss:$8 sps:$4 sm:$0xff]   ;;  %v3498_v42 = vld [vmem:[%s4771_s3 + $0x40] ss:$8 sps:$4 sm:$0xff]  }
  0x99   :  { %1774 = vmatprep.subr.bf16.mxu0 %v3332_v41  ;;  %v3410_v41 = vld [vmem:[%s4769_s1 + $0x4cc] ss:$16 sps:$4 sm:$0xff]  }
  0x9b   :  { %1861 = vmatpush1.bf16.msra.mxu1 %v3333_v44  ;;  %v3408_v44 = vld [vmem:[%s4769_s1 + $0x4c8] ss:$16 sps:$4 sm:$0xff]  }
  0x9c   :  { %1775 = vmatpush1.bf16.msra.mxu0 %v3330_v43  ;;  %1862 = vmatprep.subr.bf16.mxu1 %v3341_v46  ;;  %v3503_v43 = vld [vmem:[%s4771_s3 + $0x54] ss:$8 sps:$4 sm:$0xff]  }
  0x9d   :  { %1776 = vmatprep.subr.bf16.mxu0 %v3338_v45  ;;  %v3501_v45 = vld [vmem:[%s4771_s3 + $0x50] ss:$8 sps:$4 sm:$0xff]   ;;  %v3413_v46 = vld [vmem:[%s4769_s1 + $0x4ec] ss:$16 sps:$4 sm:$0xff]  }
  0x9f   :  { %1863 = vmatpush1.bf16.msra.mxu1 %v3339_v48  ;;  %v3411_v48 = vld [vmem:[%s4769_s1 + $0x4e8] ss:$16 sps:$4 sm:$0xff]  }
  0xa0   :  { %1777 = vmatpush1.bf16.msra.mxu0 %v3336_v47  ;;  %1864 = vmatprep.subr.bf16.mxu1 %v3347_v50  ;;  %v3506_v47 = vld [vmem:[%s4771_s3 + $0x64] ss:$8 sps:$4 sm:$0xff]  }
  0xa1   :  { %1778 = vmatprep.subr.bf16.mxu0 %v3344_v49  ;;  %v3504_v49 = vld [vmem:[%s4771_s3 + $0x60] ss:$8 sps:$4 sm:$0xff]   ;;  %v3416_v50 = vld [vmem:[%s4769_s1 + $0x50c] ss:$16 sps:$4 sm:$0xff]  }
  0xa3   :  { %1865 = vmatpush1.bf16.msra.mxu1 %v3345_v52  ;;  %v3414_v52 = vld [vmem:[%s4769_s1 + $0x508] ss:$16 sps:$4 sm:$0xff]  }
  0xa4   :  { %1779 = vmatpush1.bf16.msra.mxu0 %v3342_v51  ;;  %1866 = vmatprep.subr.bf16.mxu1 %v3353_v54  ;;  %v3509_v51 = vld [vmem:[%s4771_s3 + $0x74] ss:$8 sps:$4 sm:$0xff]  }
  0xa5   :  { %1780 = vmatprep.subr.bf16.mxu0 %v3350_v53  ;;  %v3507_v53 = vld [vmem:[%s4771_s3 + $0x70] ss:$8 sps:$4 sm:$0xff]   ;;  %v3419_v54 = vld [vmem:[%s4769_s1 + $0x52c] ss:$16 sps:$4 sm:$0xff]  }
  0xa7   :  { %1867 = vmatpush1.bf16.msra.mxu1 %v3351_v57  ;;  %v3417_v57 = vld [vmem:[%s4769_s1 + $0x528] ss:$16 sps:$4 sm:$0xff]  }
  0xa8   :  { %1781 = vmatpush1.bf16.msra.mxu0 %v3348_v56  ;;  %1868 = vmatprep.subr.bf16.mxu1 %v3359_v59  ;;  %v3512_v56 = vld [vmem:[%s4771_s3 + $0x84] ss:$8 sps:$4 sm:$0xff]  }
  0xa9   :  { %1782 = vmatprep.subr.bf16.mxu0 %v3356_v58  ;;  %v3510_v58 = vld [vmem:[%s4771_s3 + $0x80] ss:$8 sps:$4 sm:$0xff]   ;;  %v3422_v59 = vld [vmem:[%s4769_s1 + $0x54c] ss:$16 sps:$4 sm:$0xff]  }
  0xab   :  { %1869 = vmatpush1.bf16.msra.mxu1 %v3357_v61  ;;  %v3420_v61 = vld [vmem:[%s4769_s1 + $0x548] ss:$16 sps:$4 sm:$0xff]  }
  0xac   :  { %1783 = vmatpush1.bf16.msra.mxu0 %v3354_v60  ;;  %1870 = vmatprep.subr.bf16.mxu1 %v3365_v63  ;;  %v3515_v60 = vld [vmem:[%s4771_s3 + $0x94] ss:$8 sps:$4 sm:$0xff]  }
  0xad   :  { %1784 = vmatprep.subr.bf16.mxu0 %v3362_v62  ;;  %v3513_v62 = vld [vmem:[%s4771_s3 + $0x90] ss:$8 sps:$4 sm:$0xff]   ;;  %v3425_v63 = vld [vmem:[%s4769_s1 + $0x56c] ss:$16 sps:$4 sm:$0xff]  }
  0xaf   :  { %1871 = vmatpush1.bf16.msra.mxu1 %v3363_v1  ;;  %v3423_v1 = vld [vmem:[%s4769_s1 + $0x568] ss:$16 sps:$4 sm:$0xff]  }
  0xb0   :  { %1785 = vmatpush1.bf16.msra.mxu0 %v3360_v0  ;;  %1872 = vmatprep.subr.bf16.mxu1 %v3371_v3  ;;  %v3518_v0 = vld [vmem:[%s4771_s3 + $0xa4] ss:$8 sps:$4 sm:$0xff]  }
  0xb1   :  { %1786 = vmatprep.subr.bf16.mxu0 %v3368_v2  ;;  %v3516_v2 = vld [vmem:[%s4771_s3 + $0xa0] ss:$8 sps:$4 sm:$0xff]   ;;  %v3428_v3 = vld [vmem:[%s4769_s1 + $0x58c] ss:$16 sps:$4 sm:$0xff]  }
  0xb3   :  { %1873 = vmatpush1.bf16.msra.mxu1 %v3369_v5  ;;  %v3426_v5 = vld [vmem:[%s4769_s1 + $0x588] ss:$16 sps:$4 sm:$0xff]  }
  0xb4   :  { %1787 = vmatpush1.bf16.msra.mxu0 %v3366_v4  ;;  %1874 = vmatprep.subr.bf16.mxu1 %v3377_v7  ;;  %v3521_v4 = vld [vmem:[%s4771_s3 + $0xb4] ss:$8 sps:$4 sm:$0xff]  }
  0xb5   :  { %1788 = vmatprep.subr.bf16.mxu0 %v3374_v6  ;;  %v3519_v6 = vld [vmem:[%s4771_s3 + $0xb0] ss:$8 sps:$4 sm:$0xff]   ;;  %v3431_v7 = vld [vmem:[%s4769_s1 + $0x5ac] ss:$16 sps:$4 sm:$0xff]  }
  0xb7   :  { %1875 = vmatpush1.bf16.msra.mxu1 %v3375_v11  ;;  %v3429_v11 = vld [vmem:[%s4769_s1 + $0x5a8] ss:$16 sps:$4 sm:$0xff]  }
  0xb8   :  { %1789 = vmatpush1.bf16.msra.mxu0 %v3372_v10  ;;  %1876 = vmatprep.subr.bf16.mxu1 %v3383_v13  ;;  %v3524_v10 = vld [vmem:[%s4771_s3 + $0xc4] ss:$8 sps:$4 sm:$0xff]  }
  0xb9   :  { %1790 = vmatprep.subr.bf16.mxu0 %v3380_v12  ;;  %v3522_v12 = vld [vmem:[%s4771_s3 + $0xc0] ss:$8 sps:$4 sm:$0xff]   ;;  %v3434_v13 = vld [vmem:[%s4769_s1 + $0x5cc] ss:$16 sps:$4 sm:$0xff]  }
  0xbb   :  { %1877 = vmatpush1.bf16.msra.mxu1 %v3381_v15  ;;  %v3437_v15 = vld [vmem:[%s4769_s1 + $0x5ec] ss:$16 sps:$4 sm:$0xff]  }
  0xbc   :  { %1791 = vmatpush1.bf16.msra.mxu0 %v3378_v14  ;;  %1878 = vmatprep.subr.bf16.mxu1 %v3389_v18  ;;  %v3432_v14 = vld [vmem:[%s4769_s1 + $0x5c8] ss:$16 sps:$4 sm:$0xff]   ;;  %v3440_v18 = vld [vmem:[%s4769_s1 + $0x60c] ss:$16 sps:$4 sm:$0xff]  }
  0xbd   :  { %1792 = vmatprep.subr.bf16.mxu0 %v3386_v17  ;;  %v3435_v17 = vld [vmem:[%s4769_s1 + $0x5e8] ss:$16 sps:$4 sm:$0xff]  }
  0xbf   :  { %1879 = vmatpush1.bf16.msra.mxu1 %v3387_v20  ;;  %v3443_v20 = vld [vmem:[%s4769_s1 + $0x62c] ss:$16 sps:$4 sm:$0xff]  }
  0xc0   :  { %1793 = vmatpush1.bf16.msra.mxu0 %v3384_v19  ;;  %1891 = vmatprep.subr.bf16.mxu1 %v3392_v23  ;;  %v3438_v19 = vld [vmem:[%s4769_s1 + $0x608] ss:$16 sps:$4 sm:$0xff]  }
  0xc1   :  { %v3441_v23 = vld [vmem:[%s4769_s1 + $0x628] ss:$16 sps:$4 sm:$0xff]  }
  0xc2   :  { %1881 = vmatmul.mubr.bf16.vlgmr.msra.gmra.mrb[4].mxu1 %v3861_v9  ;;  %v3488_v9 = vld [vmem:[%s4771_s3 + $0x4] ss:$8 sps:$4 sm:$0xff]  }
  0xc3   :  { %1795 = vmatmul.mubr.bf16.vlgmr.msra.gmra.mrb[0].mxu0 %v4285_v24  ;;  %1892 = vmatpush1.bf16.msra.mxu1 %v3390_v26  ;;  %v3446_v26 = vld [vmem:[%s4769_s1 + $0x64c] ss:$16 sps:$4 sm:$0xff]  }
  0xc4   :  { %1923 = vmatprep.mubr.bf16.mxu1 %v3955_v38  ;;  %1893 = vmatprep.subr.bf16.mxu1 %v3395_v8  ;;  %v3401_v38 = vld [vmem:[%s4769_s1 + $0x46c] ss:$16 sps:$4 sm:$0xff]   ;;  %v3444_v8 = vld [vmem:[%s4769_s1 + $0x648] ss:$16 sps:$4 sm:$0xff]  }
  0xc5   :  { %2401 = vmatprep.subr.bf16.mxu0 %v3488_v9  ;;  %v3453_v9 = vld [vmem:[%s4769_s1 + $0x6a8] ss:$16 sps:$4 sm:$0xff]  }
  0xc6   :  { %2402 = vmatpush1.bf16.msra.mxu0 %v3486_v27  ;;  %v3455_v27 = vld [vmem:[%s4769_s1 + $0x6ac] ss:$16 sps:$4 sm:$0xff]  }
  0xc7   :  { %1894 = vmatpush1.bf16.msra.mxu1 %v3393_v21  ;;  %2403 = vmatprep.subr.bf16.mxu0 %v3491_v28  ;;  %v3452_v21 = vld [vmem:[%s4769_s1 + $0x68c] ss:$16 sps:$4 sm:$0xff]  }
  0xc8   :  { %1895 = vmatprep.subr.bf16.mxu1 %v3398_v22  ;;  %v3450_v22 = vld [vmem:[%s4769_s1 + $0x688] ss:$16 sps:$4 sm:$0xff]   ;;  %v3527_v28 = vld [vmem:[%s4771_s3 + $0xd4] ss:$8 sps:$4 sm:$0xff]  }
  0xca   :  { %2404 = vmatpush1.bf16.msra.mxu0 %v3489_v55 }
  0xcb   :  { %1896 = vmatpush1.bf16.msra.mxu1 %v3396_v29  ;;  %2405 = vmatprep.subr.bf16.mxu0 %v3494_v30  ;;  %v3458_v29 = vld [vmem:[%s4769_s1 + $0x6cc] ss:$16 sps:$4 sm:$0xff]  }
  0xcc   :  { %1897 = vmatprep.subr.bf16.mxu1 %v3401_v38  ;;  %v3525_v38 = vld [vmem:[%s4771_s3 + $0xd0] ss:$8 sps:$4 sm:$0xff]  }
  0xce   :  { %2406 = vmatpush1.bf16.msra.mxu0 %v3492_v33  ;;  %v3530_v33 = vld [vmem:[%s4771_s3 + $0xe4] ss:$8 sps:$4 sm:$0xff]  }
  0xcf   :  { %1898 = vmatpush1.bf16.msra.mxu1 %v3399_v31  ;;  %2407 = vmatprep.subr.bf16.mxu0 %v3497_v34 }
  0xd0   :  { %1899 = vmatprep.subr.bf16.mxu1 %v3404_v32  ;;  %v3456_v32 = vld [vmem:[%s4769_s1 + $0x6c8] ss:$16 sps:$4 sm:$0xff]  }
  0xd2   :  { %2408 = vmatpush1.bf16.msra.mxu0 %v3495_v37  ;;  %v3459_v37 = vld [vmem:[%s4769_s1 + $0x6e8] ss:$16 sps:$4 sm:$0xff]  }
  0xd3   :  { %1900 = vmatpush1.bf16.msra.mxu1 %v3402_v35  ;;  %2409 = vmatprep.subr.bf16.mxu0 %v3500_v39  ;;  %v3461_v35 = vld [vmem:[%s4769_s1 + $0x6ec] ss:$16 sps:$4 sm:$0xff]  }
  0xd4   :  { %1901 = vmatprep.subr.bf16.mxu1 %v3407_v36  ;;  %v3528_v36 = vld [vmem:[%s4771_s3 + $0xe0] ss:$8 sps:$4 sm:$0xff]   ;;  %v3533_v39 = vld [vmem:[%s4771_s3 + $0xf4] ss:$8 sps:$4 sm:$0xff]  }
  0xd6   :  { %2410 = vmatpush1.bf16.msra.mxu0 %v3498_v42  ;;  %v3462_v42 = vld [vmem:[%s4769_s1 + $0x708] ss:$16 sps:$4 sm:$0xff]  }
  0xd7   :  { %1902 = vmatpush1.bf16.msra.mxu1 %v3405_v40  ;;  %2411 = vmatprep.subr.bf16.mxu0 %v3503_v43  ;;  %v3464_v40 = vld [vmem:[%s4769_s1 + $0x70c] ss:$16 sps:$4 sm:$0xff]  }
  0xd8   :  { %1903 = vmatprep.subr.bf16.mxu1 %v3410_v41  ;;  %v3531_v41 = vld [vmem:[%s4771_s3 + $0xf0] ss:$8 sps:$4 sm:$0xff]   ;;  %v3467_v43 = vld [vmem:[%s4769_s1 + $0x72c] ss:$16 sps:$4 sm:$0xff]  }
  0xda   :  { %2412 = vmatpush1.bf16.msra.mxu0 %v3501_v45  ;;  %v3465_v45 = vld [vmem:[%s4769_s1 + $0x728] ss:$16 sps:$4 sm:$0xff]  }
  0xdb   :  { %1904 = vmatpush1.bf16.msra.mxu1 %v3408_v44  ;;  %2413 = vmatprep.subr.bf16.mxu0 %v3506_v47  ;;  %v3536_v44 = vld [vmem:[%s4771_s3 + $0x104] ss:$8 sps:$4 sm:$0xff]   ;;  %v3468_v47 = vld [vmem:[%s4769_s1 + $0x748] ss:$16 sps:$4 sm:$0xff]  }
  0xdc   :  { %1905 = vmatprep.subr.bf16.mxu1 %v3413_v46  ;;  %v3470_v46 = vld [vmem:[%s4769_s1 + $0x74c] ss:$16 sps:$4 sm:$0xff]  }
  0xde   :  { %2414 = vmatpush1.bf16.msra.mxu0 %v3504_v49  ;;  %v3471_v49 = vld [vmem:[%s4769_s1 + $0x768] ss:$16 sps:$4 sm:$0xff]  }
  0xdf   :  { %1906 = vmatpush1.bf16.msra.mxu1 %v3411_v48  ;;  %2415 = vmatprep.subr.bf16.mxu0 %v3509_v51  ;;  %v3473_v48 = vld [vmem:[%s4769_s1 + $0x76c] ss:$16 sps:$4 sm:$0xff]   ;;  %v3474_v51 = vld [vmem:[%s4769_s1 + $0x788] ss:$16 sps:$4 sm:$0xff]  }
  0xe0   :  { %1907 = vmatprep.subr.bf16.mxu1 %v3416_v50  ;;  %v3476_v50 = vld [vmem:[%s4769_s1 + $0x78c] ss:$16 sps:$4 sm:$0xff]  }
  0xe2   :  { %2416 = vmatpush1.bf16.msra.mxu0 %v3507_v53  ;;  %v3477_v53 = vld [vmem:[%s4769_s1 + $0x7a8] ss:$16 sps:$4 sm:$0xff]  }
  0xe3   :  { %1908 = vmatpush1.bf16.msra.mxu1 %v3414_v52  ;;  %2417 = vmatprep.subr.bf16.mxu0 %v3512_v56  ;;  %v3479_v52 = vld [vmem:[%s4769_s1 + $0x7ac] ss:$16 sps:$4 sm:$0xff]   ;;  %v3480_v56 = vld [vmem:[%s4769_s1 + $0x7c8] ss:$16 sps:$4 sm:$0xff]  }
  0xe4   :  { %1909 = vmatprep.subr.bf16.mxu1 %v3419_v54  ;;  %v3482_v54 = vld [vmem:[%s4769_s1 + $0x7cc] ss:$16 sps:$4 sm:$0xff]  }
  0xe6   :  { %2418 = vmatpush1.bf16.msra.mxu0 %v3510_v58  ;;  %v3483_v58 = vld [vmem:[%s4769_s1 + $0x7e8] ss:$16 sps:$4 sm:$0xff]  }
  0xe7   :  { %1910 = vmatpush1.bf16.msra.mxu1 %v3417_v57  ;;  %2419 = vmatprep.subr.bf16.mxu0 %v3515_v60  ;;  %v3485_v57 = vld [vmem:[%s4769_s1 + $0x7ec] ss:$16 sps:$4 sm:$0xff]  }
  0xe8   :  { %1911 = vmatprep.subr.bf16.mxu1 %v3422_v59  ;;  %v293_v59 = vlaneseq }
  0xea   :  { %2420 = vmatpush1.bf16.msra.mxu0 %v3513_v62  ;;  %v4589_v60 = vshrl.u32 %v293_v59, 7  ;;  %v4595_v62 = vld [vmem:[%s4772_s2] sm:$0xf]  ;;  %v3575_v59 = vld [vmem:[%s4771_s3 + $0x1d4] ss:$8 sps:$4 sm:$0xff]  }
  0xeb   :  { %1912 = vmatpush1.bf16.msra.mxu1 %v3420_v61  ;;  %2421 = vmatprep.subr.bf16.mxu0 %v3518_v0 }
  0xec   :  { %1913 = vmatprep.subr.bf16.mxu1 %v3425_v63  ;;  %v295_v61 = vsub.s32 0, %v4589_v60  ;;  %v299_v63 = vsub.s32 1, %v4589_v60 }
  0xee   :  { %2422 = vmatpush1.bf16.msra.mxu0 %v3516_v2  ;;  %v296_v0 = vrot.slane %v4595_v62, %v295_v61 }
  0xef   :  { %1914 = vmatpush1.bf16.msra.mxu1 %v3423_v1  ;;  %2423 = vmatprep.subr.bf16.mxu0 %v3521_v4 }
  0xf0   :  { %1915 = vmatprep.subr.bf16.mxu1 %v3428_v3 }
  0xf2   :  { %2424 = vmatpush1.bf16.msra.mxu0 %v3519_v6 }
  0xf3   :  { %1916 = vmatpush1.bf16.msra.mxu1 %v3426_v5  ;;  %2425 = vmatprep.subr.bf16.mxu0 %v3524_v10 }
  0xf4   :  { %1917 = vmatprep.subr.bf16.mxu1 %v3431_v7 }
  0xf6   :  { %2426 = vmatpush1.bf16.msra.mxu0 %v3522_v12 }
  0xf7   :  { %1918 = vmatpush1.bf16.msra.mxu1 %v3429_v11  ;;  %2427 = vmatprep.subr.bf16.mxu0 %v3527_v28  ;;  %v3582_v28 = vld [vmem:[%s4773_s5 + $0x40] sm:$0xff]  }
  0xf8   :  { %1919 = vmatprep.subr.bf16.mxu1 %v3434_v13 }
  0xfa   :  { %2428 = vmatpush1.bf16.msra.mxu0 %v3525_v38  ;;  %v3540_v38 = vld [vmem:[%s4771_s3 + $0x120] ss:$8 sps:$4 sm:$0xff]  }
  0xfb   :  { %1920 = vmatpush1.bf16.msra.mxu1 %v3432_v14  ;;  %2429 = vmatprep.subr.bf16.mxu0 %v3530_v33  ;;  %v3543_v33 = vld [vmem:[%s4771_s3 + $0x130] ss:$8 sps:$4 sm:$0xff]  }
  0xfc   :  { %1921 = vmatprep.subr.bf16.mxu1 %v3437_v15 }
  0xfe   :  { %2430 = vmatpush1.bf16.msra.mxu0 %v3528_v36  ;;  %v3588_v36 = vld [vmem:[%s4773_s5 + $0x58] sm:$0xff]  }
  0xff   :  { %1922 = vmatpush1.bf16.msra.mxu1 %v3435_v17  ;;  %2431 = vmatprep.subr.bf16.mxu0 %v3533_v39  ;;  %v3546_v39 = vld [vmem:[%s4771_s3 + $0x140] ss:$8 sps:$4 sm:$0xff]  }
 0x100   :  { %1934 = vmatprep.subr.bf16.mxu1 %v3440_v18 }
 0x102   :  { %1924 = vmatmul.mubr.bf16.vlgmr.msra.gmra.mrb[4].mxu1 %v4074_v16  ;;  %v3449_v16 = vld [vmem:[%s4769_s1 + $0x66c] ss:$16 sps:$4 sm:$0xff]   ;;  %2432 = vmatpush1.bf16.msra.mxu0 %v3531_v41 }
 0x103   :  { %1935 = vmatpush1.bf16.msra.mxu1 %v3438_v19  ;;  %1966 = vmatprep.mubr.bf16.mxu1 %v4108_v25  ;;  %v3447_v25 = vld [vmem:[%s4769_s1 + $0x668] ss:$16 sps:$4 sm:$0xff]   ;;  %v3551_v41 = vld [vmem:[%s4771_s3 + $0x154] ss:$8 sps:$4 sm:$0xff]  }
 0x104   :  { %1936 = vmatprep.subr.bf16.mxu1 %v3443_v20  ;;  %2444 = vmatprep.subr.bf16.mxu0 %v3536_v44  ;;  %v3554_v44 = vld [vmem:[%s4771_s3 + $0x164] ss:$8 sps:$4 sm:$0xff]  }
 0x107   :  { %1937 = vmatpush1.bf16.msra.mxu1 %v3441_v23 }
 0x108   :  { %1938 = vmatprep.subr.bf16.mxu1 %v3446_v26 }
 0x10b   :  { %1939 = vmatpush1.bf16.msra.mxu1 %v3444_v8 }
 0x10c   :  { %1940 = vmatprep.subr.bf16.mxu1 %v3449_v16 }
 0x10f   :  { %1941 = vmatpush1.bf16.msra.mxu1 %v3447_v25 }
 0x110   :  { %1942 = vmatprep.subr.bf16.mxu1 %v3452_v21  ;;  %v3534_v21 = vld [vmem:[%s4771_s3 + $0x100] ss:$8 sps:$4 sm:$0xff]  }
 0x113   :  { %1943 = vmatpush1.bf16.msra.mxu1 %v3450_v22  ;;  %v3539_v22 = vld [vmem:[%s4771_s3 + $0x114] ss:$8 sps:$4 sm:$0xff]  }
 0x114   :  { %1944 = vmatprep.subr.bf16.mxu1 %v3455_v27  ;;  %v3537_v27 = vld [vmem:[%s4771_s3 + $0x110] ss:$8 sps:$4 sm:$0xff]  }
 0x115   :  { %v4508_v55 = vpop.f32.mrb[0].mxu1 }
 0x116   :  { %v4510_v30 = vpop.f32.mrb[1].mxu1  ;;  %v1668_v1 = vadd.f32 %v4508_v55, %v296_v0  ;;  %v3584_v55 = vld [vmem:[%s4773_s5 + $0x48] sm:$0xff]  }
 0x117   :  { %v4512_v31 = vpop.f32.mrb[2].mxu1  ;;  %1945 = vmatpush1.bf16.msra.mxu1 %v3453_v9  ;;  %v3542_v9 = vld [vmem:[%s4771_s3 + $0x124] ss:$8 sps:$4 sm:$0xff]  }
 0x118   :  { %v4520_v34 = vpop.f32.mrb[3].mxu1  ;;  %1946 = vmatprep.subr.bf16.mxu1 %v3458_v29  ;;  %v1672_v4 = vadd.f32 %v4512_v31, %v296_v0  ;;  %v3583_v29 = vld [vmem:[%s4773_s5] sm:$0xff]   ;;  %v3586_v31 = vld [vmem:[%s4773_s5 + $0x50] sm:$0xff]  }
 0x119   :  { %v3573_v0 = vld [vmem:[%s4771_s3 + $0x1d0] ss:$8 sps:$4 sm:$0xff]  }
 0x11b   :  { %1947 = vmatpush1.bf16.msra.mxu1 %v3456_v32  ;;  %v3545_v32 = vld [vmem:[%s4771_s3 + $0x134] ss:$8 sps:$4 sm:$0xff]  }
 0x11c   :  { %1948 = vmatprep.subr.bf16.mxu1 %v3461_v35  ;;  %v3587_v35 = vld [vmem:[%s4773_s5 + $0x10] sm:$0xff]  }
 0x11f   :  { %1949 = vmatpush1.bf16.msra.mxu1 %v3459_v37  ;;  %v3589_v37 = vld [vmem:[%s4773_s5 + $0x18] sm:$0xff]  }
 0x120   :  { %1950 = vmatprep.subr.bf16.mxu1 %v3464_v40  ;;  %v3590_v40 = vld [vmem:[%s4773_s5 + $0x60] sm:$0xff]  }
 0x123   :  { %1951 = vmatpush1.bf16.msra.mxu1 %v3462_v42  ;;  %v3591_v42 = vld [vmem:[%s4773_s5 + $0x20] sm:$0xff]  }
 0x124   :  { %1952 = vmatprep.subr.bf16.mxu1 %v3467_v43  ;;  %v3549_v43 = vld [vmem:[%s4771_s3 + $0x150] ss:$8 sps:$4 sm:$0xff]  }
 0x127   :  { %1953 = vmatpush1.bf16.msra.mxu1 %v3465_v45  ;;  %v3552_v45 = vld [vmem:[%s4771_s3 + $0x160] ss:$8 sps:$4 sm:$0xff]  }
 0x128   :  { %1954 = vmatprep.subr.bf16.mxu1 %v3470_v46  ;;  %v3557_v46 = vld [vmem:[%s4771_s3 + $0x174] ss:$8 sps:$4 sm:$0xff]  }
 0x12b   :  { %1955 = vmatpush1.bf16.msra.mxu1 %v3468_v47  ;;  %v3555_v47 = vld [vmem:[%s4771_s3 + $0x170] ss:$8 sps:$4 sm:$0xff]  }
 0x12c   :  { %1956 = vmatprep.subr.bf16.mxu1 %v3473_v48  ;;  %v3560_v48 = vld [vmem:[%s4771_s3 + $0x184] ss:$8 sps:$4 sm:$0xff]  }
 0x12f   :  { %1957 = vmatpush1.bf16.msra.mxu1 %v3471_v49  ;;  %v3558_v49 = vld [vmem:[%s4771_s3 + $0x180] ss:$8 sps:$4 sm:$0xff]  }
 0x130   :  { %1958 = vmatprep.subr.bf16.mxu1 %v3476_v50  ;;  %v3563_v50 = vld [vmem:[%s4771_s3 + $0x194] ss:$8 sps:$4 sm:$0xff]  }
 0x133   :  { %1959 = vmatpush1.bf16.msra.mxu1 %v3474_v51  ;;  %v3561_v51 = vld [vmem:[%s4771_s3 + $0x190] ss:$8 sps:$4 sm:$0xff]  }
 0x134   :  { %1960 = vmatprep.subr.bf16.mxu1 %v3479_v52  ;;  %v3566_v52 = vld [vmem:[%s4771_s3 + $0x1a4] ss:$8 sps:$4 sm:$0xff]  }
 0x137   :  { %1961 = vmatpush1.bf16.msra.mxu1 %v3477_v53  ;;  %v3564_v53 = vld [vmem:[%s4771_s3 + $0x1a0] ss:$8 sps:$4 sm:$0xff]  }
 0x138   :  { %1962 = vmatprep.subr.bf16.mxu1 %v3482_v54  ;;  %v3569_v54 = vld [vmem:[%s4771_s3 + $0x1b4] ss:$8 sps:$4 sm:$0xff]  }
 0x13b   :  { %1963 = vmatpush1.bf16.msra.mxu1 %v3480_v56  ;;  %v3567_v56 = vld [vmem:[%s4771_s3 + $0x1b0] ss:$8 sps:$4 sm:$0xff]  }
 0x13c   :  { %1964 = vmatprep.subr.bf16.mxu1 %v3485_v57  ;;  %v3572_v57 = vld [vmem:[%s4771_s3 + $0x1c4] ss:$8 sps:$4 sm:$0xff]  }
 0x13f   :  { %1965 = vmatpush1.bf16.msra.mxu1 %v3483_v58  ;;  %v3570_v58 = vld [vmem:[%s4771_s3 + $0x1c0] ss:$8 sps:$4 sm:$0xff]  }
 0x140   :  { %3040 = vmatprep.subr.bf16.mxu1 %v3582_v28  ;;  %v3594_v28 = vld [vmem:[%s4773_s5 + $0x70] sm:$0xff]  }
 0x142   :  { %1967 = vmatmul.mubr.bf16.vlgmr.msra.gmra.mrb[4].mxu1 %v4285_v24  ;;  %v300_v24 = vrot.slane %v4595_v62, %v299_v63 }
 0x143   :  { %3041 = vmatpush3.bf16.msra.mxu1 %v3583_v29  ;;  %v3595_v29 = vld [vmem:[%s4773_s5 + $0x30] sm:$0xff]  }
 0x144   :  { %v1670_v2 = vadd.f32 %v4510_v30, %v300_v24  ;;  %v1674_v7 = vadd.f32 %v4520_v34, %v300_v24  ;;  %v3585_v30 = vld [vmem:[%s4773_s5 + $0x8] sm:$0xff]   ;;  %3042 = vmatprep.subr.bf16.mxu1 %v3584_v55  ;;  %v3597_v55 = vld [vmem:[%s4773_s5 + $0x38] sm:$0xff]  }
 0x145   :  { %v3548_v34 = vld [vmem:[%s4771_s3 + $0x144] ss:$8 sps:$4 sm:$0xff]  }
 0x146   :  { %v3578_v24 = vld [vmem:[%s4771_s3 + $0x1e4] ss:$8 sps:$4 sm:$0xff]  }
 0x147   :  { %3043 = vmatpush3.bf16.msra.mxu1 %v3585_v30  ;;  %v2069_v30 = vld [vmem:[%s4774_s4] sm:$0x3] }
 0x148   :  { %3044 = vmatprep.subr.bf16.mxu1 %v3586_v31  ;;  %v2074_v31 = vrot.slane %v2069_v30, %v295_v61 }
 0x14b   :  { %3045 = vmatpush3.bf16.msra.mxu1 %v3587_v35 }
 0x14c   :  { %3046 = vmatprep.subr.bf16.mxu1 %v3588_v36 }
 0x14f   :  { %3047 = vmatpush3.bf16.msra.mxu1 %v3589_v37 }
 0x150   :  { %3048 = vmatprep.subr.bf16.mxu1 %v3590_v40 }
 0x153   :  { %3049 = vmatpush3.bf16.msra.mxu1 %v3591_v42 }
 0x196   :  { %v1796_v3 = vpop.f32.mrb[0].mxu0 }
 0x197   :  { %v3063_v5 = vadd.f32 %v1796_v3, %v1668_v1  ;;  %v1798_v6 = vpop.f32.mrb[1].mxu0  ;;  %v3576_v1 = vld [vmem:[%s4771_s3 + $0x1e0] ss:$8 sps:$4 sm:$0xff]   ;;  %v3579_v3 = vld [vmem:[%s4771_s3 + $0x1f0] ss:$8 sps:$4 sm:$0xff]  }
 0x198   :  { %v3065_v10 = vadd.f32 %v1798_v6, %v1670_v2  ;;  %v1800_v11 = vpop.f32.mrb[2].mxu0  ;;  %v3581_v2 = vld [vmem:[%s4771_s3 + $0x1f4] ss:$8 sps:$4 sm:$0xff]  }
 0x199   :  { %v1985_v12 = vmul.f32 0.01, %v3063_v5  ;;  %v3067_v13 = vadd.f32 %v1800_v11, %v1672_v4  ;;  %v1802_v14 = vpop.f32.mrb[3].mxu0  ;;  %vm1977_vm0 = vcmp.ge.f32.partialorder %v3063_v5, 0.0  ;;  %v303_v4 = vsub.s32 2, %v4589_v60 }
 0x19a   :  { %v1986_v15 = vmul.f32 0.01, %v3065_v10  ;;  %v3069_v17 = vadd.f32 %v1802_v14, %v1674_v7  ;;  %vm1978_vm1 = vcmp.ge.f32.partialorder %v3065_v10, 0.0 }
 0x19b   :  { %vm1981_vm2 = vcmp.ge.f32.partialorder %v3067_v13, 0.0  ;;  %v1989_v18 = vmul.f32 0.01, %v3067_v13  ;;  %v1993_v20 = vsel %vm1977_vm0, %v3063_v5, %v1985_v12  ;;  %v307_v5 = vsub.s32 3, %v4589_v60 }
 0x19c   :  { %vm1982_vm3 = vcmp.ge.f32.partialorder %v3069_v17, 0.0  ;;  %v1990_v19 = vmul.f32 0.01, %v3069_v17  ;;  %v1994_v8 = vsel %vm1978_vm1, %v3065_v10, %v1986_v15  ;;  %v304_v6 = vrot.slane %v4595_v62, %v303_v4 }
 0x19d   :  { %v1997_v23 = vsel %vm1981_vm2, %v3067_v13, %v1989_v18  ;;  %v308_v7 = vrot.slane %v4595_v62, %v307_v5 }
 0x19e   :  { %v2001_v26 = vpack.c.bf16 %v1997_v23, %v1993_v20  ;;  %v1998_v16 = vsel %vm1982_vm3, %v3069_v17, %v1990_v19 }
 0x19f   :  { %v2002_v25 = vpack.c.bf16 %v1998_v16, %v1994_v8 }
 0x1a1   :  { %2433 = vmatprep.mubr.bf16.mxu0 %v2002_v25 }
 0x1a2   :  { %2434 = vmatmul.mubr.bf16.vlgmr.msra.gmra.mrb[4].mxu0 %v2001_v26 }
 0x1a3   :  { %2445 = vmatpush1.bf16.msra.mxu0 %v3534_v21 }
 0x1a4   :  { %2446 = vmatprep.subr.bf16.mxu0 %v3539_v22 }
 0x1a7   :  { %2447 = vmatpush1.bf16.msra.mxu0 %v3537_v27  ;;  %v3592_v27 = vld [vmem:[%s4773_s5 + $0x68] sm:$0xff]  }
 0x1a8   :  { %2448 = vmatprep.subr.bf16.mxu0 %v3542_v9  ;;  %v3593_v9 = vld [vmem:[%s4773_s5 + $0x28] sm:$0xff]   ;;  %3050 = vmatprep.subr.bf16.mxu1 %v3592_v27 }
 0x1a9   :  { %3051 = vmatpush3.bf16.msra.mxu1 %v3593_v9 }
 0x1aa   :  { %3052 = vmatprep.subr.bf16.mxu1 %v3594_v28 }
 0x1ab   :  { %2449 = vmatpush1.bf16.msra.mxu0 %v3540_v38  ;;  %v3596_v38 = vld [vmem:[%s4773_s5 + $0x78] sm:$0xff]  }
 0x1ac   :  { %2450 = vmatprep.subr.bf16.mxu0 %v3545_v32  ;;  %v2078_v32 = vrot.slane %v2069_v30, %v299_v63 }
 0x1ad   :  { %3053 = vmatpush3.bf16.msra.mxu1 %v3595_v29 }
 0x1ae   :  { %3054 = vmatprep.subr.bf16.mxu1 %v3596_v38 }
 0x1af   :  { %2451 = vmatpush1.bf16.msra.mxu0 %v3543_v33 }
 0x1b0   :  { %2452 = vmatprep.subr.bf16.mxu0 %v3548_v34 }
 0x1b1   :  { %3055 = vmatpush3.bf16.msra.mxu1 %v3597_v55 }
 0x1b3   :  { %2453 = vmatpush1.bf16.msra.mxu0 %v3546_v39 }
 0x1b4   :  { %2454 = vmatprep.subr.bf16.mxu0 %v3551_v41 }
 0x1b7   :  { %2455 = vmatpush1.bf16.msra.mxu0 %v3549_v43 }
 0x1b8   :  { %2456 = vmatprep.subr.bf16.mxu0 %v3554_v44 }
 0x1bb   :  { %2457 = vmatpush1.bf16.msra.mxu0 %v3552_v45 }
 0x1bc   :  { %2458 = vmatprep.subr.bf16.mxu0 %v3557_v46 }
 0x1bf   :  { %2459 = vmatpush1.bf16.msra.mxu0 %v3555_v47 }
 0x1c0   :  { %2460 = vmatprep.subr.bf16.mxu0 %v3560_v48 }
 0x1c3   :  { %2461 = vmatpush1.bf16.msra.mxu0 %v3558_v49 }
 0x1c4   :  { %2462 = vmatprep.subr.bf16.mxu0 %v3563_v50  ;;  %v3023_v50 = vld [vmem:[%s4775_s6] ss:$0 sm:$0xff] }
 0x1c7   :  { %2463 = vmatpush1.bf16.msra.mxu0 %v3561_v51 }
 0x1c8   :  { %2464 = vmatprep.subr.bf16.mxu0 %v3566_v52 }
 0x1cb   :  { %2465 = vmatpush1.bf16.msra.mxu0 %v3564_v53 }
 0x1cc   :  { %2466 = vmatprep.subr.bf16.mxu0 %v3569_v54 }
 0x1cf   :  { %2467 = vmatpush1.bf16.msra.mxu0 %v3567_v56 }
 0x1d0   :  { %2468 = vmatprep.subr.bf16.mxu0 %v3572_v57 }
 0x1d3   :  { %2469 = vmatpush1.bf16.msra.mxu0 %v3570_v58 }
 0x1d4   :  { %2470 = vmatprep.subr.bf16.mxu0 %v3575_v59 }
 0x1d7   :  { %2471 = vmatpush1.bf16.msra.mxu0 %v3573_v0 }
 0x1d8   :  { %2472 = vmatprep.subr.bf16.mxu0 %v3578_v24 }
 0x1db   :  { %2473 = vmatpush1.bf16.msra.mxu0 %v3576_v1 }
 0x1dc   :  { %2474 = vmatprep.subr.bf16.mxu0 %v3581_v2 }
 0x1df   :  { %2475 = vmatpush1.bf16.msra.mxu0 %v3579_v3 }
 0x215   :  { %v1968_v10 = vpop.f32.mrb[4].mxu1 }
 0x216   :  { %v3070_v11 = vadd.f32 %v1968_v10, %v304_v6  ;;  %v1970_v12 = vpop.f32.mrb[5].mxu1 }
 0x217   :  { %v3071_v13 = vadd.f32 %v1970_v12, %v308_v7  ;;  %v1972_v14 = vpop.f32.mrb[6].mxu1 }
 0x218   :  { %v1987_v15 = vmul.f32 0.01, %v3070_v11  ;;  %v3072_v17 = vadd.f32 %v1972_v14, %v304_v6  ;;  %v1974_v18 = vpop.f32.mrb[7].mxu1  ;;  %vm1979_vm4 = vcmp.ge.f32.partialorder %v3070_v11, 0.0 }
 0x219   :  { %v1988_v19 = vmul.f32 0.01, %v3071_v13  ;;  %v3073_v20 = vadd.f32 %v1974_v18, %v308_v7  ;;  %vm1980_vm5 = vcmp.ge.f32.partialorder %v3071_v13, 0.0 }
 0x21a   :  { %vm1983_vm6 = vcmp.ge.f32.partialorder %v3072_v17, 0.0  ;;  %v1991_v23 = vmul.f32 0.01, %v3072_v17  ;;  %v1995_v8 = vsel %vm1979_vm4, %v3070_v11, %v1987_v15 }
 0x21b   :  { %vm1984_vm7 = vcmp.ge.f32.partialorder %v3073_v20, 0.0  ;;  %v1992_v26 = vmul.f32 0.01, %v3073_v20  ;;  %v1996_v62 = vsel %vm1980_vm5, %v3071_v13, %v1988_v19 }
 0x21c   :  { %v1999_v16 = vsel %vm1983_vm6, %v3072_v17, %v1991_v23 }
 0x21d   :  { %v2003_v25 = vpack.c.bf16 %v1999_v16, %v1995_v8  ;;  %v2000_v21 = vsel %vm1984_vm7, %v3073_v20, %v1992_v26 }
 0x21e   :  { %v2004_v22 = vpack.c.bf16 %v2000_v21, %v1996_v62 }
 0x220   :  { %2476 = vmatprep.mubr.bf16.mxu0 %v2004_v22 }
 0x221   :  { %2477 = vmatmul.mubr.bf16.vlgmr.msra.gmra.mrb[4].mxu0 %v2003_v25 }
 0x2f4   :  { %v2478_v33 = vpop.f32.mrb[4].mxu0 }
 0x2f5   :  { %v3074_v34 = vadd.f32 %v2478_v33, %v2074_v31  ;;  %v2480_v35 = vpop.f32.mrb[5].mxu0 }
 0x2f6   :  { %v3075_v36 = vadd.f32 %v2480_v35, %v2078_v32  ;;  %v2482_v37 = vpop.f32.mrb[6].mxu0 }
 0x2f7   :  { %v2491_v39 = vmul.f32 0.01, %v3074_v34  ;;  %v3076_v40 = vadd.f32 %v2482_v37, %v2074_v31  ;;  %v2484_v41 = vpop.f32.mrb[7].mxu0  ;;  %vm2487_vm8 = vcmp.ge.f32.partialorder %v3074_v34, 0.0 }
 0x2f8   :  { %v2492_v42 = vmul.f32 0.01, %v3075_v36  ;;  %v3077_v43 = vadd.f32 %v2484_v41, %v2078_v32  ;;  %vm2488_vm9 = vcmp.ge.f32.partialorder %v3075_v36, 0.0 }
 0x2f9   :  { %vm2489_vm10 = vcmp.ge.f32.partialorder %v3076_v40, 0.0  ;;  %v2493_v44 = vmul.f32 0.01, %v3076_v40  ;;  %v2495_v61 = vsel %vm2487_vm8, %v3074_v34, %v2491_v39 }
 0x2fa   :  { %vm2490_vm11 = vcmp.ge.f32.partialorder %v3077_v43, 0.0  ;;  %v2494_v45 = vmul.f32 0.01, %v3077_v43  ;;  %v2496_v63 = vsel %vm2488_vm9, %v3075_v36, %v2492_v42 }
 0x2fb   :  { %v2497_v46 = vsel %vm2489_vm10, %v3076_v40, %v2493_v44 }
 0x2fc   :  { %v2499_v60 = vpack.c.bf16 %v2497_v46, %v2495_v61  ;;  %v2498_v47 = vsel %vm2490_vm11, %v3077_v43, %v2494_v45 }
 0x2fd   :  { %v2500_v48 = vpack.c.bf16 %v2498_v47, %v2496_v63 }
 0x2ff   :  { %2668 = vmatprep.mubr.bf16.mxu1 %v2500_v48 }
 0x300   :  { %2669 = vmatmul.mubr.bf16.vlgmr.msra.gmra.mrb[8].mxu1 %v2499_v60 }
 0x3d3   :  { %v3056_v49 = vpop.f32.mrb[8].mxu1 }
 0x3d4   :  { %v3057_v51 = vpop.f32.mrb[9].mxu1 }
 0x3d5   :  { %v3058_v52 = vadd.f32 %v3057_v51, %v3056_v49  ;;  %v3059_v53 = vpop.f32.mrb[10].mxu1 }
 0x3d6   :  { %v3060_v54 = vpop.f32.mrb[11].mxu1 }
 0x3d7   :  { %v2671_v56 = vadd.f32 %v3058_v52, %v3023_v50  ;;  %v3061_v57 = vadd.f32 %v3060_v54, %v3059_v53 }
 0x3d9   :  { %v2677_v58 = vsub.f32 0.0, %v2671_v56  ;;  %v2674_v59 = vadd.f32 %v3061_v57, %v3023_v50 }
 0x3db   :  { %v2679_v0 = vmul.f32 1.442695, %v2677_v58  ;;  %v2678_v24 = vsub.f32 0.0, %v2674_v59 }
 0x3dd   :  { %3598 = vpow2.f32 %v2679_v0  ;;  %v2681_v1 = vmul.f32 1.442695, %v2678_v24 }
 0x3df   :  { %3600 = vpow2.f32 %v2681_v1 }
 0x3e7   :  { %v3599_v2 = vpop.eup %3598 }
 0x3e8   :  { %v2683_v3 = vadd.f32 1.0, %v3599_v2 }
 0x3e9   :  { %v3601_v4 = vpop.eup %3600 }
 0x3ea   :  { %3602 = vrcp.f32 %v2683_v3  ;;  %v2684_v5 = vadd.f32 1.0, %v3601_v4 }
 0x3ec   :  { %3604 = vrcp.f32 %v2684_v5 }
 0x3f4   :  { %v3603_v6 = vpop.eup %3602 }
 0x3f5   :  { %2689 = vst [vmem:[%s4776_s7] sm:$0xff] %v3603_v6 }
 0x3f6   :  { %v3605_v7 = vpop.eup %3604 }
 0x3f7   :  { %2690 = vst [vmem:[%s4776_s7 + $0x8] sm:$0xff] %v3605_v7 }

</bundles_post_ra>
